<compile_context>
chip_gen: v7x
topology: tpu7x:2x2x1
jax: 0.10.0
libtpu: 0.0.40
codegen_flags: <defaults>
</compile_context>

<pallas_src>
import jax
import jax.numpy as jnp
from jax.experimental import pallas as pl
from jax.experimental.pallas import tpu as pltpu


# Flat-layout tap offsets: conv1 input rows are 32 wide (image at rows 2..29,
# cols 0..27 of a 32x32 zero-padded grid); conv2 input rows are 16 wide
# (pooled map at rows 2..15, cols 0..13 of the padded grid).
_TAP1_OFF = tuple((ky + 1) * 32 + kx - 1 for ky in range(3) for kx in range(3))
_TAP2_OFF = tuple((ky + 1) * 16 + kx - 1 for ky in range(3) for kx in range(3))


def _cnn_kernel(x_ref, w1_ref, b1_ref, w2_ref, b2_ref, w3_ref, b3_ref,
                w4_ref, b4_ref, o_ref,
                y1_ref, p1pad_ref, y2_ref, fcin_ref):
    f32 = jnp.float32
    bf16 = jnp.bfloat16

    # ---- conv1 (1->32, 3x3, pad 1) + ReLU: 9 shifted VPU multiply-adds ----
    xflat = x_ref[0]                       # (1024, 1): zero-padded flat image
    w1 = w1_ref[...]                       # (9, 32)
    acc1 = jnp.zeros((896, 32), f32)       # 28 rows x 32-wide (cols 28..31 unused)
    for t in range(9):
        off = _TAP1_OFF[t]
        acc1 = acc1 + xflat[off:off + 896, :] * w1[t:t + 1, :]
    y1_ref[...] = jnp.maximum(acc1 + b1_ref[...], 0.0)

    # ---- pool1 (2x2) written into zero-padded 16-wide-row layout ----
    p1pad_ref[...] = jnp.zeros_like(p1pad_ref)
    wp1 = jnp.maximum(y1_ref[pl.ds(0, 448, 2), :],
                      y1_ref[pl.ds(1, 448, 2), :])          # (448,32): 28 rows x 16
    for h in range(14):
        row = jnp.maximum(wp1[32 * h      : 32 * h + 14, :],
                          wp1[32 * h + 16 : 32 * h + 30, :])  # (14, 32)
        p1pad_ref[pl.ds((h + 2) * 16, 14), :] = row

    # ---- conv2 (32->64) + ReLU: 9 accumulating MXU GEMMs (in-VMEM im2col) ----
    acc2 = jnp.zeros((224, 64), f32)       # 14 rows x 16-wide (cols 14,15 unused)
    for t in range(9):
        a = p1pad_ref[pl.ds(_TAP2_OFF[t], 224), :].astype(bf16)   # (224, 32)
        acc2 = acc2 + jnp.dot(a, w2_ref[t], preferred_element_type=f32)
    y2_ref[...] = jnp.maximum(acc2 + b2_ref[...], 0.0)

    # ---- pool2 (2x2) + flatten in (H, W, C) order (w3 rows pre-permuted) ----
    wp2 = jnp.maximum(y2_ref[pl.ds(0, 112, 2), :],
                      y2_ref[pl.ds(1, 112, 2), :])          # (112,64): 14 rows x 8
    for h in range(7):
        row = jnp.maximum(wp2[16 * h     : 16 * h + 7, :],
                          wp2[16 * h + 8 : 16 * h + 15, :])   # (7, 64)
        for w in range(7):
            s = h * 7 + w
            fcin_ref[:, s * 64:(s + 1) * 64] = row[w:w + 1, :]

    # ---- fc1 + ReLU, fc2 (bf16 MXU operands, f32 accumulate / epilogue) ----
    xfc = fcin_ref[...].astype(bf16)                        # (1, 3136)
    h1 = jnp.dot(xfc, w3_ref[...], preferred_element_type=f32) + b3_ref[...]
    h1 = jnp.maximum(h1, 0.0)                               # (1, 128)
    logits = jnp.dot(h1.astype(bf16), w4_ref[...],
                     preferred_element_type=f32) + b4_ref[...]
    o_ref[0] = logits                                       # (1, 128) lane-dense


@jax.jit
def cnn_forward(x_nchw, prep):
    """x_nchw: (B, 1, 28, 28) float32 -> (B, 10) logits."""
    B = x_nchw.shape[0]
    # Tiny host glue: zero-pad the 28x28 image into a 32x32 grid (image at
    # rows 2..29, cols 0..27) and flatten to the kernel's (1024, 1) layout.
    img = x_nchw.reshape(B, 28, 28)
    xflat = jnp.pad(img, ((0, 0), (2, 2), (0, 4))).reshape(B, 1024, 1)

    out = pl.pallas_call(
        _cnn_kernel,
        out_shape=jax.ShapeDtypeStruct((B, 1, 128), jnp.float32),
        grid=(B,),
        in_specs=[
            pl.BlockSpec((1, 1024, 1), lambda b: (b, 0, 0)),   # padded image
            pl.BlockSpec((9, 32),      lambda b: (0, 0)),      # w1 taps
            pl.BlockSpec((1, 32),      lambda b: (0, 0)),      # b1
            pl.BlockSpec((9, 32, 64),  lambda b: (0, 0, 0)),   # w2 taps (bf16)
            pl.BlockSpec((1, 64),      lambda b: (0, 0)),      # b2
            pl.BlockSpec((3136, 128),  lambda b: (0, 0)),      # w3 (bf16, permuted)
            pl.BlockSpec((1, 128),     lambda b: (0, 0)),      # b3
            pl.BlockSpec((128, 128),   lambda b: (0, 0)),      # w4 (bf16, padded)
            pl.BlockSpec((1, 128),     lambda b: (0, 0)),      # b4 (padded)
        ],
        out_specs=pl.BlockSpec((1, 1, 128), lambda b: (b, 0, 0)),
        scratch_shapes=[
            pltpu.VMEM((896, 32), jnp.float32),   # conv1 output (flat rows x ch)
            pltpu.VMEM((280, 32), jnp.float32),   # zero-padded pooled conv1
            pltpu.VMEM((224, 64), jnp.float32),   # conv2 output (flat rows x ch)
            pltpu.VMEM((1, 3136), jnp.float32),   # flattened fc1 input
        ],
        compiler_params=pltpu.CompilerParams(
            dimension_semantics=("parallel",)),
    )(xflat, prep["w1"], prep["b1"], prep["w2"], prep["b2"],
      prep["w3"], prep["b3"], prep["w4"], prep["b4"])
    return out[:, 0, :10]


# ------------------------------ parameters -----------------------------------

def init_params(key):
    ks = jax.random.split(key, 8)

    def n(k, shape, scale):
        return (scale * jax.random.normal(k, shape)).astype(jnp.float32)

    return {
        "w1": n(ks[0], (3, 3, 1, 32), 0.10), "b1": n(ks[1], (32,), 0.05),
        "w2": n(ks[2], (3, 3, 32, 64), 0.05), "b2": n(ks[3], (64,), 0.05),
        "w3": n(ks[4], (64 * 7 * 7, 128), 0.02), "b3": n(ks[5], (128,), 0.05),
        "w4": n(ks[6], (128, 10), 0.05), "b4": n(ks[7], (10,), 0.05),
    }


def prepare_params(p):
    """One-time host-side weight repacking for the fused kernel."""
    w1 = p["w1"].reshape(9, 32).astype(jnp.float32)             # taps (ky,kx)
    b1 = p["b1"].reshape(1, 32).astype(jnp.float32)
    w2 = p["w2"].reshape(9, 32, 64).astype(jnp.bfloat16)        # taps x Cin x Cout
    b2 = p["b2"].reshape(1, 64).astype(jnp.float32)
    # Torch flattens pooled maps in (C, H, W) order; the kernel flattens in
    # (H, W, C) order, so permute w3's rows once here (numerics unchanged).
    w3 = (p["w3"].reshape(64, 7, 7, 128).transpose(1, 2, 0, 3)
          .reshape(3136, 128).astype(jnp.bfloat16))
    b3 = p["b3"].reshape(1, 128).astype(jnp.float32)
    w4 = (jnp.zeros((128, 128), jnp.float32).at[:, :10].set(p["w4"])
          .astype(jnp.bfloat16))                                # lane-dense fc2
    b4 = jnp.zeros((1, 128), jnp.float32).at[0, :10].set(p["b4"])
    return {"w1": w1, "b1": b1, "w2": w2, "b2": b2,
            "w3": w3, "b3": b3, "w4": w4, "b4": b4}


# ------------------------------ reference ------------------------------------

def reference_forward(x_nchw, p):
    """Pure-JAX f32 reference used only for a correctness check."""
    x = jnp.transpose(x_nchw, (0, 2, 3, 1))

    def conv(x, w, b):
        y = jax.lax.conv_general_dilated(
            x, w, window_strides=(1, 1), padding="SAME",
            dimension_numbers=("NHWC", "HWIO", "NHWC"))
        return jnp.maximum(y + b, 0.0)

    def pool(x):
        B, H, W, C = x.shape
        return jnp.max(x.reshape(B, H // 2, 2, W // 2, 2, C), axis=(2, 4))

    x = pool(conv(x, p["w1"], p["b1"]))
    x = pool(conv(x, p["w2"], p["b2"]))
    B = x.shape[0]
    x = jnp.transpose(x, (0, 3, 1, 2)).reshape(B, 64 * 7 * 7)
    x = jnp.maximum(x @ p["w3"] + p["b3"], 0.0)
    return x @ p["w4"] + p["b4"]


if __name__ == "__main__":
    key = jax.random.PRNGKey(0)
    kx, kp = jax.random.split(key)
    # fc1 (64 * 7 * 7) fixes the spatial size to 28x28 (MNIST); batch = 2.
    x = jax.random.normal(kx, (2, 1, 28, 28), dtype=jnp.float32)
    params = init_params(kp)
    prep = prepare_params(params)

    out = cnn_forward(x, prep)
    out = jax.block_until_ready(out)
    assert out.shape == (2, 10), out.shape

    ref = reference_forward(x, params)
    assert jnp.allclose(out, ref, rtol=2e-2, atol=2e-2), \
        float(jnp.max(jnp.abs(out - ref)))

    print("KERNEL_OK")
</pallas_src>

<mosaic_0001>
module attributes {stable_mosaic.version = 11 : i64} {
  func.func @_cnn_kernel(%arg0: i32, %arg1: memref<1x1024x1xf32, #tpu.memory_space<vmem>>, %arg2: memref<9x32xf32, #tpu.memory_space<vmem>>, %arg3: memref<1x32xf32, #tpu.memory_space<vmem>>, %arg4: memref<9x32x64xbf16, #tpu.memory_space<vmem>>, %arg5: memref<1x64xf32, #tpu.memory_space<vmem>>, %arg6: memref<3136x128xbf16, #tpu.memory_space<vmem>>, %arg7: memref<1x128xf32, #tpu.memory_space<vmem>>, %arg8: memref<128x128xbf16, #tpu.memory_space<vmem>>, %arg9: memref<1x128xf32, #tpu.memory_space<vmem>>, %arg10: memref<1x1x128xf32, #tpu.memory_space<vmem>>, %arg11: memref<896x32xf32, #tpu.memory_space<vmem>>, %arg12: memref<280x32xf32, #tpu.memory_space<vmem>>, %arg13: memref<224x64xf32, #tpu.memory_space<vmem>>, %arg14: memref<1x3136xf32, #tpu.memory_space<vmem>>) attributes {dimension_semantics = [#tpu.dimension_semantics<parallel>], iteration_bounds = array<i64: 2>, scalar_prefetch = 0 : i64, scratch_operands = 4 : i64, tpu.core_type = #tpu.core_type<tc>, window_params = [{transform_indices = @transform_0, window_bounds = array<i64: 1, 1024, 1>}, {pipeline_mode = #tpu.pipeline_mode<synchronous>, transform_indices = @transform_1, window_bounds = array<i64: 9, 32>}, {pipeline_mode = #tpu.pipeline_mode<synchronous>, transform_indices = @transform_2, window_bounds = array<i64: 1, 32>}, {pipeline_mode = #tpu.pipeline_mode<synchronous>, transform_indices = @transform_3, window_bounds = array<i64: 9, 32, 64>}, {pipeline_mode = #tpu.pipeline_mode<synchronous>, transform_indices = @transform_4, window_bounds = array<i64: 1, 64>}, {pipeline_mode = #tpu.pipeline_mode<synchronous>, transform_indices = @transform_5, window_bounds = array<i64: 3136, 128>}, {pipeline_mode = #tpu.pipeline_mode<synchronous>, transform_indices = @transform_6, window_bounds = array<i64: 1, 128>}, {pipeline_mode = #tpu.pipeline_mode<synchronous>, transform_indices = @transform_7, window_bounds = array<i64: 128, 128>}, {pipeline_mode = #tpu.pipeline_mode<synchronous>, transform_indices = @transform_8, window_bounds = array<i64: 1, 128>}, {transform_indices = @transform_9, window_bounds = array<i64: 1, 1, 128>}]} {
    %c0 = arith.constant 0 : index
    %c0_0 = arith.constant 0 : index
    %c0_1 = arith.constant 0 : index
    %0 = vector.load %arg1[%c0, %c0_0, %c0_1] : memref<1x1024x1xf32, #tpu.memory_space<vmem>>, vector<1x1024x1xf32>
    %1 = vector.shape_cast %0 : vector<1x1024x1xf32> to vector<1024x1xf32>
    %c0_2 = arith.constant 0 : index
    %c0_3 = arith.constant 0 : index
    %2 = vector.load %arg2[%c0_2, %c0_3] : memref<9x32xf32, #tpu.memory_space<vmem>>, vector<9x32xf32>
    %cst = arith.constant 0.000000e+00 : f32
    %3 = vector.broadcast %cst : f32 to vector<896x32xf32>
    %4 = vector.extract_strided_slice %1 {offsets = [31, 0], sizes = [896, 1], strides = [1, 1]} : vector<1024x1xf32> to vector<896x1xf32>
    %5 = vector.extract_strided_slice %2 {offsets = [0, 0], sizes = [1, 32], strides = [1, 1]} : vector<9x32xf32> to vector<1x32xf32>
    %6 = vector.broadcast %4 : vector<896x1xf32> to vector<896x32xf32>
    %7 = vector.broadcast %5 : vector<1x32xf32> to vector<896x32xf32>
    %8 = arith.mulf %6, %7 : vector<896x32xf32>
    %9 = arith.addf %3, %8 : vector<896x32xf32>
    %10 = vector.extract_strided_slice %1 {offsets = [32, 0], sizes = [896, 1], strides = [1, 1]} : vector<1024x1xf32> to vector<896x1xf32>
    %11 = vector.extract_strided_slice %2 {offsets = [1, 0], sizes = [1, 32], strides = [1, 1]} : vector<9x32xf32> to vector<1x32xf32>
    %12 = vector.broadcast %10 : vector<896x1xf32> to vector<896x32xf32>
    %13 = vector.broadcast %11 : vector<1x32xf32> to vector<896x32xf32>
    %14 = arith.mulf %12, %13 : vector<896x32xf32>
    %15 = arith.addf %9, %14 : vector<896x32xf32>
    %16 = vector.extract_strided_slice %1 {offsets = [33, 0], sizes = [896, 1], strides = [1, 1]} : vector<1024x1xf32> to vector<896x1xf32>
    %17 = vector.extract_strided_slice %2 {offsets = [2, 0], sizes = [1, 32], strides = [1, 1]} : vector<9x32xf32> to vector<1x32xf32>
    %18 = vector.broadcast %16 : vector<896x1xf32> to vector<896x32xf32>
    %19 = vector.broadcast %17 : vector<1x32xf32> to vector<896x32xf32>
    %20 = arith.mulf %18, %19 : vector<896x32xf32>
    %21 = arith.addf %15, %20 : vector<896x32xf32>
    %22 = vector.extract_strided_slice %1 {offsets = [63, 0], sizes = [896, 1], strides = [1, 1]} : vector<1024x1xf32> to vector<896x1xf32>
    %23 = vector.extract_strided_slice %2 {offsets = [3, 0], sizes = [1, 32], strides = [1, 1]} : vector<9x32xf32> to vector<1x32xf32>
    %24 = vector.broadcast %22 : vector<896x1xf32> to vector<896x32xf32>
    %25 = vector.broadcast %23 : vector<1x32xf32> to vector<896x32xf32>
    %26 = arith.mulf %24, %25 : vector<896x32xf32>
    %27 = arith.addf %21, %26 : vector<896x32xf32>
    %28 = vector.extract_strided_slice %1 {offsets = [64, 0], sizes = [896, 1], strides = [1, 1]} : vector<1024x1xf32> to vector<896x1xf32>
    %29 = vector.extract_strided_slice %2 {offsets = [4, 0], sizes = [1, 32], strides = [1, 1]} : vector<9x32xf32> to vector<1x32xf32>
    %30 = vector.broadcast %28 : vector<896x1xf32> to vector<896x32xf32>
    %31 = vector.broadcast %29 : vector<1x32xf32> to vector<896x32xf32>
    %32 = arith.mulf %30, %31 : vector<896x32xf32>
    %33 = arith.addf %27, %32 : vector<896x32xf32>
    %34 = vector.extract_strided_slice %1 {offsets = [65, 0], sizes = [896, 1], strides = [1, 1]} : vector<1024x1xf32> to vector<896x1xf32>
    %35 = vector.extract_strided_slice %2 {offsets = [5, 0], sizes = [1, 32], strides = [1, 1]} : vector<9x32xf32> to vector<1x32xf32>
    %36 = vector.broadcast %34 : vector<896x1xf32> to vector<896x32xf32>
    %37 = vector.broadcast %35 : vector<1x32xf32> to vector<896x32xf32>
    %38 = arith.mulf %36, %37 : vector<896x32xf32>
    %39 = arith.addf %33, %38 : vector<896x32xf32>
    %40 = vector.extract_strided_slice %1 {offsets = [95, 0], sizes = [896, 1], strides = [1, 1]} : vector<1024x1xf32> to vector<896x1xf32>
    %41 = vector.extract_strided_slice %2 {offsets = [6, 0], sizes = [1, 32], strides = [1, 1]} : vector<9x32xf32> to vector<1x32xf32>
    %42 = vector.broadcast %40 : vector<896x1xf32> to vector<896x32xf32>
    %43 = vector.broadcast %41 : vector<1x32xf32> to vector<896x32xf32>
    %44 = arith.mulf %42, %43 : vector<896x32xf32>
    %45 = arith.addf %39, %44 : vector<896x32xf32>
    %46 = vector.extract_strided_slice %1 {offsets = [96, 0], sizes = [896, 1], strides = [1, 1]} : vector<1024x1xf32> to vector<896x1xf32>
    %47 = vector.extract_strided_slice %2 {offsets = [7, 0], sizes = [1, 32], strides = [1, 1]} : vector<9x32xf32> to vector<1x32xf32>
    %48 = vector.broadcast %46 : vector<896x1xf32> to vector<896x32xf32>
    %49 = vector.broadcast %47 : vector<1x32xf32> to vector<896x32xf32>
    %50 = arith.mulf %48, %49 : vector<896x32xf32>
    %51 = arith.addf %45, %50 : vector<896x32xf32>
    %52 = vector.extract_strided_slice %1 {offsets = [97, 0], sizes = [896, 1], strides = [1, 1]} : vector<1024x1xf32> to vector<896x1xf32>
    %53 = vector.extract_strided_slice %2 {offsets = [8, 0], sizes = [1, 32], strides = [1, 1]} : vector<9x32xf32> to vector<1x32xf32>
    %54 = vector.broadcast %52 : vector<896x1xf32> to vector<896x32xf32>
    %55 = vector.broadcast %53 : vector<1x32xf32> to vector<896x32xf32>
    %56 = arith.mulf %54, %55 : vector<896x32xf32>
    %57 = arith.addf %51, %56 : vector<896x32xf32>
    %c0_4 = arith.constant 0 : index
    %c0_5 = arith.constant 0 : index
    %58 = vector.load %arg3[%c0_4, %c0_5] : memref<1x32xf32, #tpu.memory_space<vmem>>, vector<1x32xf32>
    %59 = vector.broadcast %58 : vector<1x32xf32> to vector<896x32xf32>
    %60 = arith.addf %57, %59 : vector<896x32xf32>
    %cst_6 = arith.constant 0.000000e+00 : f32
    %61 = vector.broadcast %cst_6 : f32 to vector<896x32xf32>
    %62 = arith.maximumf %60, %61 : vector<896x32xf32>
    %c0_7 = arith.constant 0 : index
    %c0_8 = arith.constant 0 : index
    %63 = vector.load %arg11[%c0_7, %c0_8] : memref<896x32xf32, #tpu.memory_space<vmem>>, vector<896x32xf32>
    tpu.vector_store %arg11[%c0_7, %c0_8], %62 {strides = array<i32>} : memref<896x32xf32, #tpu.memory_space<vmem>>, vector<896x32xf32>,
    %cst_9 = arith.constant 0.000000e+00 : f32
    %64 = vector.broadcast %cst_9 : f32 to vector<280x32xf32>
    %c0_10 = arith.constant 0 : index
    %c0_11 = arith.constant 0 : index
    %65 = vector.load %arg12[%c0_10, %c0_11] : memref<280x32xf32, #tpu.memory_space<vmem>>, vector<280x32xf32>
    tpu.vector_store %arg12[%c0_10, %c0_11], %64 {strides = array<i32>} : memref<280x32xf32, #tpu.memory_space<vmem>>, vector<280x32xf32>,
    %c0_12 = arith.constant 0 : index
    %c0_13 = arith.constant 0 : index
    %66 = tpu.strided_load %arg11[%c0_12, %c0_13] {strides = array<i32: 2, 1>} : memref<896x32xf32, #tpu.memory_space<vmem>>, vector<448x32xf32>
    %c1 = arith.constant 1 : index
    %c0_14 = arith.constant 0 : index
    %67 = tpu.strided_load %arg11[%c1, %c0_14] {strides = array<i32: 2, 1>} : memref<896x32xf32, #tpu.memory_space<vmem>>, vector<448x32xf32>
    %68 = arith.maximumf %66, %67 : vector<448x32xf32>
    %69 = vector.extract_strided_slice %68 {offsets = [0, 0], sizes = [14, 32], strides = [1, 1]} : vector<448x32xf32> to vector<14x32xf32>
    %70 = vector.extract_strided_slice %68 {offsets = [16, 0], sizes = [14, 32], strides = [1, 1]} : vector<448x32xf32> to vector<14x32xf32>
    %71 = arith.maximumf %69, %70 : vector<14x32xf32>
    %c32 = arith.constant 32 : index
    %c0_15 = arith.constant 0 : index
    %72 = vector.load %arg12[%c32, %c0_15] : memref<280x32xf32, #tpu.memory_space<vmem>>, vector<14x32xf32>
    tpu.vector_store %arg12[%c32, %c0_15], %71 {strides = array<i32>} : memref<280x32xf32, #tpu.memory_space<vmem>>, vector<14x32xf32>,
    %73 = vector.extract_strided_slice %68 {offsets = [32, 0], sizes = [14, 32], strides = [1, 1]} : vector<448x32xf32> to vector<14x32xf32>
    %74 = vector.extract_strided_slice %68 {offsets = [48, 0], sizes = [14, 32], strides = [1, 1]} : vector<448x32xf32> to vector<14x32xf32>
    %75 = arith.maximumf %73, %74 : vector<14x32xf32>
    %c48 = arith.constant 48 : index
    %c0_16 = arith.constant 0 : index
    %76 = vector.load %arg12[%c48, %c0_16] : memref<280x32xf32, #tpu.memory_space<vmem>>, vector<14x32xf32>
    tpu.vector_store %arg12[%c48, %c0_16], %75 {strides = array<i32>} : memref<280x32xf32, #tpu.memory_space<vmem>>, vector<14x32xf32>,
    %77 = vector.extract_strided_slice %68 {offsets = [64, 0], sizes = [14, 32], strides = [1, 1]} : vector<448x32xf32> to vector<14x32xf32>
    %78 = vector.extract_strided_slice %68 {offsets = [80, 0], sizes = [14, 32], strides = [1, 1]} : vector<448x32xf32> to vector<14x32xf32>
    %79 = arith.maximumf %77, %78 : vector<14x32xf32>
    %c64 = arith.constant 64 : index
    %c0_17 = arith.constant 0 : index
    %80 = vector.load %arg12[%c64, %c0_17] : memref<280x32xf32, #tpu.memory_space<vmem>>, vector<14x32xf32>
    tpu.vector_store %arg12[%c64, %c0_17], %79 {strides = array<i32>} : memref<280x32xf32, #tpu.memory_space<vmem>>, vector<14x32xf32>,
    %81 = vector.extract_strided_slice %68 {offsets = [96, 0], sizes = [14, 32], strides = [1, 1]} : vector<448x32xf32> to vector<14x32xf32>
    %82 = vector.extract_strided_slice %68 {offsets = [112, 0], sizes = [14, 32], strides = [1, 1]} : vector<448x32xf32> to vector<14x32xf32>
    %83 = arith.maximumf %81, %82 : vector<14x32xf32>
    %c80 = arith.constant 80 : index
    %c0_18 = arith.constant 0 : index
    %84 = vector.load %arg12[%c80, %c0_18] : memref<280x32xf32, #tpu.memory_space<vmem>>, vector<14x32xf32>
    tpu.vector_store %arg12[%c80, %c0_18], %83 {strides = array<i32>} : memref<280x32xf32, #tpu.memory_space<vmem>>, vector<14x32xf32>,
    %85 = vector.extract_strided_slice %68 {offsets = [128, 0], sizes = [14, 32], strides = [1, 1]} : vector<448x32xf32> to vector<14x32xf32>
    %86 = vector.extract_strided_slice %68 {offsets = [144, 0], sizes = [14, 32], strides = [1, 1]} : vector<448x32xf32> to vector<14x32xf32>
    %87 = arith.maximumf %85, %86 : vector<14x32xf32>
    %c96 = arith.constant 96 : index
    %c0_19 = arith.constant 0 : index
    %88 = vector.load %arg12[%c96, %c0_19] : memref<280x32xf32, #tpu.memory_space<vmem>>, vector<14x32xf32>
    tpu.vector_store %arg12[%c96, %c0_19], %87 {strides = array<i32>} : memref<280x32xf32, #tpu.memory_space<vmem>>, vector<14x32xf32>,
    %89 = vector.extract_strided_slice %68 {offsets = [160, 0], sizes = [14, 32], strides = [1, 1]} : vector<448x32xf32> to vector<14x32xf32>
    %90 = vector.extract_strided_slice %68 {offsets = [176, 0], sizes = [14, 32], strides = [1, 1]} : vector<448x32xf32> to vector<14x32xf32>
    %91 = arith.maximumf %89, %90 : vector<14x32xf32>
    %c112 = arith.constant 112 : index
    %c0_20 = arith.constant 0 : index
    %92 = vector.load %arg12[%c112, %c0_20] : memref<280x32xf32, #tpu.memory_space<vmem>>, vector<14x32xf32>
    tpu.vector_store %arg12[%c112, %c0_20], %91 {strides = array<i32>} : memref<280x32xf32, #tpu.memory_space<vmem>>, vector<14x32xf32>,
    %93 = vector.extract_strided_slice %68 {offsets = [192, 0], sizes = [14, 32], strides = [1, 1]} : vector<448x32xf32> to vector<14x32xf32>
    %94 = vector.extract_strided_slice %68 {offsets = [208, 0], sizes = [14, 32], strides = [1, 1]} : vector<448x32xf32> to vector<14x32xf32>
    %95 = arith.maximumf %93, %94 : vector<14x32xf32>
    %c128 = arith.constant 128 : index
    %c0_21 = arith.constant 0 : index
    %96 = vector.load %arg12[%c128, %c0_21] : memref<280x32xf32, #tpu.memory_space<vmem>>, vector<14x32xf32>
    tpu.vector_store %arg12[%c128, %c0_21], %95 {strides = array<i32>} : memref<280x32xf32, #tpu.memory_space<vmem>>, vector<14x32xf32>,
    %97 = vector.extract_strided_slice %68 {offsets = [224, 0], sizes = [14, 32], strides = [1, 1]} : vector<448x32xf32> to vector<14x32xf32>
    %98 = vector.extract_strided_slice %68 {offsets = [240, 0], sizes = [14, 32], strides = [1, 1]} : vector<448x32xf32> to vector<14x32xf32>
    %99 = arith.maximumf %97, %98 : vector<14x32xf32>
    %c144 = arith.constant 144 : index
    %c0_22 = arith.constant 0 : index
    %100 = vector.load %arg12[%c144, %c0_22] : memref<280x32xf32, #tpu.memory_space<vmem>>, vector<14x32xf32>
    tpu.vector_store %arg12[%c144, %c0_22], %99 {strides = array<i32>} : memref<280x32xf32, #tpu.memory_space<vmem>>, vector<14x32xf32>,
    %101 = vector.extract_strided_slice %68 {offsets = [256, 0], sizes = [14, 32], strides = [1, 1]} : vector<448x32xf32> to vector<14x32xf32>
    %102 = vector.extract_strided_slice %68 {offsets = [272, 0], sizes = [14, 32], strides = [1, 1]} : vector<448x32xf32> to vector<14x32xf32>
    %103 = arith.maximumf %101, %102 : vector<14x32xf32>
    %c160 = arith.constant 160 : index
    %c0_23 = arith.constant 0 : index
    %104 = vector.load %arg12[%c160, %c0_23] : memref<280x32xf32, #tpu.memory_space<vmem>>, vector<14x32xf32>
    tpu.vector_store %arg12[%c160, %c0_23], %103 {strides = array<i32>} : memref<280x32xf32, #tpu.memory_space<vmem>>, vector<14x32xf32>,
    %105 = vector.extract_strided_slice %68 {offsets = [288, 0], sizes = [14, 32], strides = [1, 1]} : vector<448x32xf32> to vector<14x32xf32>
    %106 = vector.extract_strided_slice %68 {offsets = [304, 0], sizes = [14, 32], strides = [1, 1]} : vector<448x32xf32> to vector<14x32xf32>
    %107 = arith.maximumf %105, %106 : vector<14x32xf32>
    %c176 = arith.constant 176 : index
    %c0_24 = arith.constant 0 : index
    %108 = vector.load %arg12[%c176, %c0_24] : memref<280x32xf32, #tpu.memory_space<vmem>>, vector<14x32xf32>
    tpu.vector_store %arg12[%c176, %c0_24], %107 {strides = array<i32>} : memref<280x32xf32, #tpu.memory_space<vmem>>, vector<14x32xf32>,
    %109 = vector.extract_strided_slice %68 {offsets = [320, 0], sizes = [14, 32], strides = [1, 1]} : vector<448x32xf32> to vector<14x32xf32>
    %110 = vector.extract_strided_slice %68 {offsets = [336, 0], sizes = [14, 32], strides = [1, 1]} : vector<448x32xf32> to vector<14x32xf32>
    %111 = arith.maximumf %109, %110 : vector<14x32xf32>
    %c192 = arith.constant 192 : index
    %c0_25 = arith.constant 0 : index
    %112 = vector.load %arg12[%c192, %c0_25] : memref<280x32xf32, #tpu.memory_space<vmem>>, vector<14x32xf32>
    tpu.vector_store %arg12[%c192, %c0_25], %111 {strides = array<i32>} : memref<280x32xf32, #tpu.memory_space<vmem>>, vector<14x32xf32>,
    %113 = vector.extract_strided_slice %68 {offsets = [352, 0], sizes = [14, 32], strides = [1, 1]} : vector<448x32xf32> to vector<14x32xf32>
    %114 = vector.extract_strided_slice %68 {offsets = [368, 0], sizes = [14, 32], strides = [1, 1]} : vector<448x32xf32> to vector<14x32xf32>
    %115 = arith.maximumf %113, %114 : vector<14x32xf32>
    %c208 = arith.constant 208 : index
    %c0_26 = arith.constant 0 : index
    %116 = vector.load %arg12[%c208, %c0_26] : memref<280x32xf32, #tpu.memory_space<vmem>>, vector<14x32xf32>
    tpu.vector_store %arg12[%c208, %c0_26], %115 {strides = array<i32>} : memref<280x32xf32, #tpu.memory_space<vmem>>, vector<14x32xf32>,
    %117 = vector.extract_strided_slice %68 {offsets = [384, 0], sizes = [14, 32], strides = [1, 1]} : vector<448x32xf32> to vector<14x32xf32>
    %118 = vector.extract_strided_slice %68 {offsets = [400, 0], sizes = [14, 32], strides = [1, 1]} : vector<448x32xf32> to vector<14x32xf32>
    %119 = arith.maximumf %117, %118 : vector<14x32xf32>
    %c224 = arith.constant 224 : index
    %c0_27 = arith.constant 0 : index
    %120 = vector.load %arg12[%c224, %c0_27] : memref<280x32xf32, #tpu.memory_space<vmem>>, vector<14x32xf32>
    tpu.vector_store %arg12[%c224, %c0_27], %119 {strides = array<i32>} : memref<280x32xf32, #tpu.memory_space<vmem>>, vector<14x32xf32>,
    %121 = vector.extract_strided_slice %68 {offsets = [416, 0], sizes = [14, 32], strides = [1, 1]} : vector<448x32xf32> to vector<14x32xf32>
    %122 = vector.extract_strided_slice %68 {offsets = [432, 0], sizes = [14, 32], strides = [1, 1]} : vector<448x32xf32> to vector<14x32xf32>
    %123 = arith.maximumf %121, %122 : vector<14x32xf32>
    %c240 = arith.constant 240 : index
    %c0_28 = arith.constant 0 : index
    %124 = vector.load %arg12[%c240, %c0_28] : memref<280x32xf32, #tpu.memory_space<vmem>>, vector<14x32xf32>
    tpu.vector_store %arg12[%c240, %c0_28], %123 {strides = array<i32>} : memref<280x32xf32, #tpu.memory_space<vmem>>, vector<14x32xf32>,
    %cst_29 = arith.constant 0.000000e+00 : f32
    %125 = vector.broadcast %cst_29 : f32 to vector<224x64xf32>
    %c15 = arith.constant 15 : index
    %c0_30 = arith.constant 0 : index
    %126 = vector.load %arg12[%c15, %c0_30] : memref<280x32xf32, #tpu.memory_space<vmem>>, vector<224x32xf32>
    %127 = arith.truncf %126 : vector<224x32xf32> to vector<224x32xbf16>
    %c0_31 = arith.constant 0 : index
    %c0_32 = arith.constant 0 : index
    %c0_33 = arith.constant 0 : index
    %128 = vector.load %arg4[%c0_31, %c0_32, %c0_33] : memref<9x32x64xbf16, #tpu.memory_space<vmem>>, vector<1x32x64xbf16>
    %129 = vector.shape_cast %128 : vector<1x32x64xbf16> to vector<32x64xbf16>
    %cst_34 = arith.constant dense<0.000000e+00> : vector<224x64xf32>
    %130 = tpu.matmul %127, %129, %cst_34 {dimension_numbers = #tpu.dot_dimension_numbers<[1], [0], [0], [1], [0, 0, 1, 1], [], []>} : vector<224x32xbf16>, vector<32x64xbf16>, vector<224x64xf32> -> vector<224x64xf32>
    %131 = arith.addf %125, %130 : vector<224x64xf32>
    %c16 = arith.constant 16 : index
    %c0_35 = arith.constant 0 : index
    %132 = vector.load %arg12[%c16, %c0_35] : memref<280x32xf32, #tpu.memory_space<vmem>>, vector<224x32xf32>
    %133 = arith.truncf %132 : vector<224x32xf32> to vector<224x32xbf16>
    %c1_36 = arith.constant 1 : index
    %c0_37 = arith.constant 0 : index
    %c0_38 = arith.constant 0 : index
    %134 = vector.load %arg4[%c1_36, %c0_37, %c0_38] : memref<9x32x64xbf16, #tpu.memory_space<vmem>>, vector<1x32x64xbf16>
    %135 = vector.shape_cast %134 : vector<1x32x64xbf16> to vector<32x64xbf16>
    %cst_39 = arith.constant dense<0.000000e+00> : vector<224x64xf32>
    %136 = tpu.matmul %133, %135, %cst_39 {dimension_numbers = #tpu.dot_dimension_numbers<[1], [0], [0], [1], [0, 0, 1, 1], [], []>} : vector<224x32xbf16>, vector<32x64xbf16>, vector<224x64xf32> -> vector<224x64xf32>
    %137 = arith.addf %131, %136 : vector<224x64xf32>
    %c17 = arith.constant 17 : index
    %c0_40 = arith.constant 0 : index
    %138 = vector.load %arg12[%c17, %c0_40] : memref<280x32xf32, #tpu.memory_space<vmem>>, vector<224x32xf32>
    %139 = arith.truncf %138 : vector<224x32xf32> to vector<224x32xbf16>
    %c2 = arith.constant 2 : index
    %c0_41 = arith.constant 0 : index
    %c0_42 = arith.constant 0 : index
    %140 = vector.load %arg4[%c2, %c0_41, %c0_42] : memref<9x32x64xbf16, #tpu.memory_space<vmem>>, vector<1x32x64xbf16>
    %141 = vector.shape_cast %140 : vector<1x32x64xbf16> to vector<32x64xbf16>
    %cst_43 = arith.constant dense<0.000000e+00> : vector<224x64xf32>
    %142 = tpu.matmul %139, %141, %cst_43 {dimension_numbers = #tpu.dot_dimension_numbers<[1], [0], [0], [1], [0, 0, 1, 1], [], []>} : vector<224x32xbf16>, vector<32x64xbf16>, vector<224x64xf32> -> vector<224x64xf32>
    %143 = arith.addf %137, %142 : vector<224x64xf32>
    %c31 = arith.constant 31 : index
    %c0_44 = arith.constant 0 : index
    %144 = vector.load %arg12[%c31, %c0_44] : memref<280x32xf32, #tpu.memory_space<vmem>>, vector<224x32xf32>
    %145 = arith.truncf %144 : vector<224x32xf32> to vector<224x32xbf16>
    %c3 = arith.constant 3 : index
    %c0_45 = arith.constant 0 : index
    %c0_46 = arith.constant 0 : index
    %146 = vector.load %arg4[%c3, %c0_45, %c0_46] : memref<9x32x64xbf16, #tpu.memory_space<vmem>>, vector<1x32x64xbf16>
    %147 = vector.shape_cast %146 : vector<1x32x64xbf16> to vector<32x64xbf16>
    %cst_47 = arith.constant dense<0.000000e+00> : vector<224x64xf32>
    %148 = tpu.matmul %145, %147, %cst_47 {dimension_numbers = #tpu.dot_dimension_numbers<[1], [0], [0], [1], [0, 0, 1, 1], [], []>} : vector<224x32xbf16>, vector<32x64xbf16>, vector<224x64xf32> -> vector<224x64xf32>
    %149 = arith.addf %143, %148 : vector<224x64xf32>
    %c32_48 = arith.constant 32 : index
    %c0_49 = arith.constant 0 : index
    %150 = vector.load %arg12[%c32_48, %c0_49] : memref<280x32xf32, #tpu.memory_space<vmem>>, vector<224x32xf32>
    %151 = arith.truncf %150 : vector<224x32xf32> to vector<224x32xbf16>
    %c4 = arith.constant 4 : index
    %c0_50 = arith.constant 0 : index
    %c0_51 = arith.constant 0 : index
    %152 = vector.load %arg4[%c4, %c0_50, %c0_51] : memref<9x32x64xbf16, #tpu.memory_space<vmem>>, vector<1x32x64xbf16>
    %153 = vector.shape_cast %152 : vector<1x32x64xbf16> to vector<32x64xbf16>
    %cst_52 = arith.constant dense<0.000000e+00> : vector<224x64xf32>
    %154 = tpu.matmul %151, %153, %cst_52 {dimension_numbers = #tpu.dot_dimension_numbers<[1], [0], [0], [1], [0, 0, 1, 1], [], []>} : vector<224x32xbf16>, vector<32x64xbf16>, vector<224x64xf32> -> vector<224x64xf32>
    %155 = arith.addf %149, %154 : vector<224x64xf32>
    %c33 = arith.constant 33 : index
    %c0_53 = arith.constant 0 : index
    %156 = vector.load %arg12[%c33, %c0_53] : memref<280x32xf32, #tpu.memory_space<vmem>>, vector<224x32xf32>
    %157 = arith.truncf %156 : vector<224x32xf32> to vector<224x32xbf16>
    %c5 = arith.constant 5 : index
    %c0_54 = arith.constant 0 : index
    %c0_55 = arith.constant 0 : index
    %158 = vector.load %arg4[%c5, %c0_54, %c0_55] : memref<9x32x64xbf16, #tpu.memory_space<vmem>>, vector<1x32x64xbf16>
    %159 = vector.shape_cast %158 : vector<1x32x64xbf16> to vector<32x64xbf16>
    %cst_56 = arith.constant dense<0.000000e+00> : vector<224x64xf32>
    %160 = tpu.matmul %157, %159, %cst_56 {dimension_numbers = #tpu.dot_dimension_numbers<[1], [0], [0], [1], [0, 0, 1, 1], [], []>} : vector<224x32xbf16>, vector<32x64xbf16>, vector<224x64xf32> -> vector<224x64xf32>
    %161 = arith.addf %155, %160 : vector<224x64xf32>
    %c47 = arith.constant 47 : index
    %c0_57 = arith.constant 0 : index
    %162 = vector.load %arg12[%c47, %c0_57] : memref<280x32xf32, #tpu.memory_space<vmem>>, vector<224x32xf32>
    %163 = arith.truncf %162 : vector<224x32xf32> to vector<224x32xbf16>
    %c6 = arith.constant 6 : index
    %c0_58 = arith.constant 0 : index
    %c0_59 = arith.constant 0 : index
    %164 = vector.load %arg4[%c6, %c0_58, %c0_59] : memref<9x32x64xbf16, #tpu.memory_space<vmem>>, vector<1x32x64xbf16>
    %165 = vector.shape_cast %164 : vector<1x32x64xbf16> to vector<32x64xbf16>
    %cst_60 = arith.constant dense<0.000000e+00> : vector<224x64xf32>
    %166 = tpu.matmul %163, %165, %cst_60 {dimension_numbers = #tpu.dot_dimension_numbers<[1], [0], [0], [1], [0, 0, 1, 1], [], []>} : vector<224x32xbf16>, vector<32x64xbf16>, vector<224x64xf32> -> vector<224x64xf32>
    %167 = arith.addf %161, %166 : vector<224x64xf32>
    %c48_61 = arith.constant 48 : index
    %c0_62 = arith.constant 0 : index
    %168 = vector.load %arg12[%c48_61, %c0_62] : memref<280x32xf32, #tpu.memory_space<vmem>>, vector<224x32xf32>
    %169 = arith.truncf %168 : vector<224x32xf32> to vector<224x32xbf16>
    %c7 = arith.constant 7 : index
    %c0_63 = arith.constant 0 : index
    %c0_64 = arith.constant 0 : index
    %170 = vector.load %arg4[%c7, %c0_63, %c0_64] : memref<9x32x64xbf16, #tpu.memory_space<vmem>>, vector<1x32x64xbf16>
    %171 = vector.shape_cast %170 : vector<1x32x64xbf16> to vector<32x64xbf16>
    %cst_65 = arith.constant dense<0.000000e+00> : vector<224x64xf32>
    %172 = tpu.matmul %169, %171, %cst_65 {dimension_numbers = #tpu.dot_dimension_numbers<[1], [0], [0], [1], [0, 0, 1, 1], [], []>} : vector<224x32xbf16>, vector<32x64xbf16>, vector<224x64xf32> -> vector<224x64xf32>
    %173 = arith.addf %167, %172 : vector<224x64xf32>
    %c49 = arith.constant 49 : index
    %c0_66 = arith.constant 0 : index
    %174 = vector.load %arg12[%c49, %c0_66] : memref<280x32xf32, #tpu.memory_space<vmem>>, vector<224x32xf32>
    %175 = arith.truncf %174 : vector<224x32xf32> to vector<224x32xbf16>
    %c8 = arith.constant 8 : index
    %c0_67 = arith.constant 0 : index
    %c0_68 = arith.constant 0 : index
    %176 = vector.load %arg4[%c8, %c0_67, %c0_68] : memref<9x32x64xbf16, #tpu.memory_space<vmem>>, vector<1x32x64xbf16>
    %177 = vector.shape_cast %176 : vector<1x32x64xbf16> to vector<32x64xbf16>
    %cst_69 = arith.constant dense<0.000000e+00> : vector<224x64xf32>
    %178 = tpu.matmul %175, %177, %cst_69 {dimension_numbers = #tpu.dot_dimension_numbers<[1], [0], [0], [1], [0, 0, 1, 1], [], []>} : vector<224x32xbf16>, vector<32x64xbf16>, vector<224x64xf32> -> vector<224x64xf32>
    %179 = arith.addf %173, %178 : vector<224x64xf32>
    %c0_70 = arith.constant 0 : index
    %c0_71 = arith.constant 0 : index
    %180 = vector.load %arg5[%c0_70, %c0_71] : memref<1x64xf32, #tpu.memory_space<vmem>>, vector<1x64xf32>
    %181 = vector.broadcast %180 : vector<1x64xf32> to vector<224x64xf32>
    %182 = arith.addf %179, %181 : vector<224x64xf32>
    %cst_72 = arith.constant 0.000000e+00 : f32
    %183 = vector.broadcast %cst_72 : f32 to vector<224x64xf32>
    %184 = arith.maximumf %182, %183 : vector<224x64xf32>
    %c0_73 = arith.constant 0 : index
    %c0_74 = arith.constant 0 : index
    %185 = vector.load %arg13[%c0_73, %c0_74] : memref<224x64xf32, #tpu.memory_space<vmem>>, vector<224x64xf32>
    tpu.vector_store %arg13[%c0_73, %c0_74], %184 {strides = array<i32>} : memref<224x64xf32, #tpu.memory_space<vmem>>, vector<224x64xf32>,
    %c0_75 = arith.constant 0 : index
    %c0_76 = arith.constant 0 : index
    %186 = tpu.strided_load %arg13[%c0_75, %c0_76] {strides = array<i32: 2, 1>} : memref<224x64xf32, #tpu.memory_space<vmem>>, vector<112x64xf32>
    %c1_77 = arith.constant 1 : index
    %c0_78 = arith.constant 0 : index
    %187 = tpu.strided_load %arg13[%c1_77, %c0_78] {strides = array<i32: 2, 1>} : memref<224x64xf32, #tpu.memory_space<vmem>>, vector<112x64xf32>
    %188 = arith.maximumf %186, %187 : vector<112x64xf32>
    %189 = vector.extract_strided_slice %188 {offsets = [0, 0], sizes = [7, 64], strides = [1, 1]} : vector<112x64xf32> to vector<7x64xf32>
    %190 = vector.extract_strided_slice %188 {offsets = [8, 0], sizes = [7, 64], strides = [1, 1]} : vector<112x64xf32> to vector<7x64xf32>
    %191 = arith.maximumf %189, %190 : vector<7x64xf32>
    %192 = vector.extract_strided_slice %191 {offsets = [0, 0], sizes = [1, 64], strides = [1, 1]} : vector<7x64xf32> to vector<1x64xf32>
    %c0_79 = arith.constant 0 : index
    %c0_80 = arith.constant 0 : index
    %193 = vector.load %arg14[%c0_79, %c0_80] : memref<1x3136xf32, #tpu.memory_space<vmem>>, vector<1x64xf32>
    tpu.vector_store %arg14[%c0_79, %c0_80], %192 {strides = array<i32>} : memref<1x3136xf32, #tpu.memory_space<vmem>>, vector<1x64xf32>,
    %194 = vector.extract_strided_slice %191 {offsets = [1, 0], sizes = [1, 64], strides = [1, 1]} : vector<7x64xf32> to vector<1x64xf32>
    %c0_81 = arith.constant 0 : index
    %c64_82 = arith.constant 64 : index
    %195 = vector.load %arg14[%c0_81, %c64_82] : memref<1x3136xf32, #tpu.memory_space<vmem>>, vector<1x64xf32>
    tpu.vector_store %arg14[%c0_81, %c64_82], %194 {strides = array<i32>} : memref<1x3136xf32, #tpu.memory_space<vmem>>, vector<1x64xf32>,
    %196 = vector.extract_strided_slice %191 {offsets = [2, 0], sizes = [1, 64], strides = [1, 1]} : vector<7x64xf32> to vector<1x64xf32>
    %c0_83 = arith.constant 0 : index
    %c128_84 = arith.constant 128 : index
    %197 = vector.load %arg14[%c0_83, %c128_84] : memref<1x3136xf32, #tpu.memory_space<vmem>>, vector<1x64xf32>
    tpu.vector_store %arg14[%c0_83, %c128_84], %196 {strides = array<i32>} : memref<1x3136xf32, #tpu.memory_space<vmem>>, vector<1x64xf32>,
    %198 = vector.extract_strided_slice %191 {offsets = [3, 0], sizes = [1, 64], strides = [1, 1]} : vector<7x64xf32> to vector<1x64xf32>
    %c0_85 = arith.constant 0 : index
    %c192_86 = arith.constant 192 : index
    %199 = vector.load %arg14[%c0_85, %c192_86] : memref<1x3136xf32, #tpu.memory_space<vmem>>, vector<1x64xf32>
    tpu.vector_store %arg14[%c0_85, %c192_86], %198 {strides = array<i32>} : memref<1x3136xf32, #tpu.memory_space<vmem>>, vector<1x64xf32>,
    %200 = vector.extract_strided_slice %191 {offsets = [4, 0], sizes = [1, 64], strides = [1, 1]} : vector<7x64xf32> to vector<1x64xf32>
    %c0_87 = arith.constant 0 : index
    %c256 = arith.constant 256 : index
    %201 = vector.load %arg14[%c0_87, %c256] : memref<1x3136xf32, #tpu.memory_space<vmem>>, vector<1x64xf32>
    tpu.vector_store %arg14[%c0_87, %c256], %200 {strides = array<i32>} : memref<1x3136xf32, #tpu.memory_space<vmem>>, vector<1x64xf32>,
    %202 = vector.extract_strided_slice %191 {offsets = [5, 0], sizes = [1, 64], strides = [1, 1]} : vector<7x64xf32> to vector<1x64xf32>
    %c0_88 = arith.constant 0 : index
    %c320 = arith.constant 320 : index
    %203 = vector.load %arg14[%c0_88, %c320] : memref<1x3136xf32, #tpu.memory_space<vmem>>, vector<1x64xf32>
    tpu.vector_store %arg14[%c0_88, %c320], %202 {strides = array<i32>} : memref<1x3136xf32, #tpu.memory_space<vmem>>, vector<1x64xf32>,
    %204 = vector.extract_strided_slice %191 {offsets = [6, 0], sizes = [1, 64], strides = [1, 1]} : vector<7x64xf32> to vector<1x64xf32>
    %c0_89 = arith.constant 0 : index
    %c384 = arith.constant 384 : index
    %205 = vector.load %arg14[%c0_89, %c384] : memref<1x3136xf32, #tpu.memory_space<vmem>>, vector<1x64xf32>
    tpu.vector_store %arg14[%c0_89, %c384], %204 {strides = array<i32>} : memref<1x3136xf32, #tpu.memory_space<vmem>>, vector<1x64xf32>,
    %206 = vector.extract_strided_slice %188 {offsets = [16, 0], sizes = [7, 64], strides = [1, 1]} : vector<112x64xf32> to vector<7x64xf32>
    %207 = vector.extract_strided_slice %188 {offsets = [24, 0], sizes = [7, 64], strides = [1, 1]} : vector<112x64xf32> to vector<7x64xf32>
    %208 = arith.maximumf %206, %207 : vector<7x64xf32>
    %209 = vector.extract_strided_slice %208 {offsets = [0, 0], sizes = [1, 64], strides = [1, 1]} : vector<7x64xf32> to vector<1x64xf32>
    %c0_90 = arith.constant 0 : index
    %c448 = arith.constant 448 : index
    %210 = vector.load %arg14[%c0_90, %c448] : memref<1x3136xf32, #tpu.memory_space<vmem>>, vector<1x64xf32>
    tpu.vector_store %arg14[%c0_90, %c448], %209 {strides = array<i32>} : memref<1x3136xf32, #tpu.memory_space<vmem>>, vector<1x64xf32>,
    %211 = vector.extract_strided_slice %208 {offsets = [1, 0], sizes = [1, 64], strides = [1, 1]} : vector<7x64xf32> to vector<1x64xf32>
    %c0_91 = arith.constant 0 : index
    %c512 = arith.constant 512 : index
    %212 = vector.load %arg14[%c0_91, %c512] : memref<1x3136xf32, #tpu.memory_space<vmem>>, vector<1x64xf32>
    tpu.vector_store %arg14[%c0_91, %c512], %211 {strides = array<i32>} : memref<1x3136xf32, #tpu.memory_space<vmem>>, vector<1x64xf32>,
    %213 = vector.extract_strided_slice %208 {offsets = [2, 0], sizes = [1, 64], strides = [1, 1]} : vector<7x64xf32> to vector<1x64xf32>
    %c0_92 = arith.constant 0 : index
    %c576 = arith.constant 576 : index
    %214 = vector.load %arg14[%c0_92, %c576] : memref<1x3136xf32, #tpu.memory_space<vmem>>, vector<1x64xf32>
    tpu.vector_store %arg14[%c0_92, %c576], %213 {strides = array<i32>} : memref<1x3136xf32, #tpu.memory_space<vmem>>, vector<1x64xf32>,
    %215 = vector.extract_strided_slice %208 {offsets = [3, 0], sizes = [1, 64], strides = [1, 1]} : vector<7x64xf32> to vector<1x64xf32>
    %c0_93 = arith.constant 0 : index
    %c640 = arith.constant 640 : index
    %216 = vector.load %arg14[%c0_93, %c640] : memref<1x3136xf32, #tpu.memory_space<vmem>>, vector<1x64xf32>
    tpu.vector_store %arg14[%c0_93, %c640], %215 {strides = array<i32>} : memref<1x3136xf32, #tpu.memory_space<vmem>>, vector<1x64xf32>,
    %217 = vector.extract_strided_slice %208 {offsets = [4, 0], sizes = [1, 64], strides = [1, 1]} : vector<7x64xf32> to vector<1x64xf32>
    %c0_94 = arith.constant 0 : index
    %c704 = arith.constant 704 : index
    %218 = vector.load %arg14[%c0_94, %c704] : memref<1x3136xf32, #tpu.memory_space<vmem>>, vector<1x64xf32>
    tpu.vector_store %arg14[%c0_94, %c704], %217 {strides = array<i32>} : memref<1x3136xf32, #tpu.memory_space<vmem>>, vector<1x64xf32>,
    %219 = vector.extract_strided_slice %208 {offsets = [5, 0], sizes = [1, 64], strides = [1, 1]} : vector<7x64xf32> to vector<1x64xf32>
    %c0_95 = arith.constant 0 : index
    %c768 = arith.constant 768 : index
    %220 = vector.load %arg14[%c0_95, %c768] : memref<1x3136xf32, #tpu.memory_space<vmem>>, vector<1x64xf32>
    tpu.vector_store %arg14[%c0_95, %c768], %219 {strides = array<i32>} : memref<1x3136xf32, #tpu.memory_space<vmem>>, vector<1x64xf32>,
    %221 = vector.extract_strided_slice %208 {offsets = [6, 0], sizes = [1, 64], strides = [1, 1]} : vector<7x64xf32> to vector<1x64xf32>
    %c0_96 = arith.constant 0 : index
    %c832 = arith.constant 832 : index
    %222 = vector.load %arg14[%c0_96, %c832] : memref<1x3136xf32, #tpu.memory_space<vmem>>, vector<1x64xf32>
    tpu.vector_store %arg14[%c0_96, %c832], %221 {strides = array<i32>} : memref<1x3136xf32, #tpu.memory_space<vmem>>, vector<1x64xf32>,
    %223 = vector.extract_strided_slice %188 {offsets = [32, 0], sizes = [7, 64], strides = [1, 1]} : vector<112x64xf32> to vector<7x64xf32>
    %224 = vector.extract_strided_slice %188 {offsets = [40, 0], sizes = [7, 64], strides = [1, 1]} : vector<112x64xf32> to vector<7x64xf32>
    %225 = arith.maximumf %223, %224 : vector<7x64xf32>
    %226 = vector.extract_strided_slice %225 {offsets = [0, 0], sizes = [1, 64], strides = [1, 1]} : vector<7x64xf32> to vector<1x64xf32>
    %c0_97 = arith.constant 0 : index
    %c896 = arith.constant 896 : index
    %227 = vector.load %arg14[%c0_97, %c896] : memref<1x3136xf32, #tpu.memory_space<vmem>>, vector<1x64xf32>
    tpu.vector_store %arg14[%c0_97, %c896], %226 {strides = array<i32>} : memref<1x3136xf32, #tpu.memory_space<vmem>>, vector<1x64xf32>,
    %228 = vector.extract_strided_slice %225 {offsets = [1, 0], sizes = [1, 64], strides = [1, 1]} : vector<7x64xf32> to vector<1x64xf32>
    %c0_98 = arith.constant 0 : index
    %c960 = arith.constant 960 : index
    %229 = vector.load %arg14[%c0_98, %c960] : memref<1x3136xf32, #tpu.memory_space<vmem>>, vector<1x64xf32>
    tpu.vector_store %arg14[%c0_98, %c960], %228 {strides = array<i32>} : memref<1x3136xf32, #tpu.memory_space<vmem>>, vector<1x64xf32>,
    %230 = vector.extract_strided_slice %225 {offsets = [2, 0], sizes = [1, 64], strides = [1, 1]} : vector<7x64xf32> to vector<1x64xf32>
    %c0_99 = arith.constant 0 : index
    %c1024 = arith.constant 1024 : index
    %231 = vector.load %arg14[%c0_99, %c1024] : memref<1x3136xf32, #tpu.memory_space<vmem>>, vector<1x64xf32>
    tpu.vector_store %arg14[%c0_99, %c1024], %230 {strides = array<i32>} : memref<1x3136xf32, #tpu.memory_space<vmem>>, vector<1x64xf32>,
    %232 = vector.extract_strided_slice %225 {offsets = [3, 0], sizes = [1, 64], strides = [1, 1]} : vector<7x64xf32> to vector<1x64xf32>
    %c0_100 = arith.constant 0 : index
    %c1088 = arith.constant 1088 : index
    %233 = vector.load %arg14[%c0_100, %c1088] : memref<1x3136xf32, #tpu.memory_space<vmem>>, vector<1x64xf32>
    tpu.vector_store %arg14[%c0_100, %c1088], %232 {strides = array<i32>} : memref<1x3136xf32, #tpu.memory_space<vmem>>, vector<1x64xf32>,
    %234 = vector.extract_strided_slice %225 {offsets = [4, 0], sizes = [1, 64], strides = [1, 1]} : vector<7x64xf32> to vector<1x64xf32>
    %c0_101 = arith.constant 0 : index
    %c1152 = arith.constant 1152 : index
    %235 = vector.load %arg14[%c0_101, %c1152] : memref<1x3136xf32, #tpu.memory_space<vmem>>, vector<1x64xf32>
    tpu.vector_store %arg14[%c0_101, %c1152], %234 {strides = array<i32>} : memref<1x3136xf32, #tpu.memory_space<vmem>>, vector<1x64xf32>,
    %236 = vector.extract_strided_slice %225 {offsets = [5, 0], sizes = [1, 64], strides = [1, 1]} : vector<7x64xf32> to vector<1x64xf32>
    %c0_102 = arith.constant 0 : index
    %c1216 = arith.constant 1216 : index
    %237 = vector.load %arg14[%c0_102, %c1216] : memref<1x3136xf32, #tpu.memory_space<vmem>>, vector<1x64xf32>
    tpu.vector_store %arg14[%c0_102, %c1216], %236 {strides = array<i32>} : memref<1x3136xf32, #tpu.memory_space<vmem>>, vector<1x64xf32>,
    %238 = vector.extract_strided_slice %225 {offsets = [6, 0], sizes = [1, 64], strides = [1, 1]} : vector<7x64xf32> to vector<1x64xf32>
    %c0_103 = arith.constant 0 : index
    %c1280 = arith.constant 1280 : index
    %239 = vector.load %arg14[%c0_103, %c1280] : memref<1x3136xf32, #tpu.memory_space<vmem>>, vector<1x64xf32>
    tpu.vector_store %arg14[%c0_103, %c1280], %238 {strides = array<i32>} : memref<1x3136xf32, #tpu.memory_space<vmem>>, vector<1x64xf32>,
    %240 = vector.extract_strided_slice %188 {offsets = [48, 0], sizes = [7, 64], strides = [1, 1]} : vector<112x64xf32> to vector<7x64xf32>
    %241 = vector.extract_strided_slice %188 {offsets = [56, 0], sizes = [7, 64], strides = [1, 1]} : vector<112x64xf32> to vector<7x64xf32>
    %242 = arith.maximumf %240, %241 : vector<7x64xf32>
    %243 = vector.extract_strided_slice %242 {offsets = [0, 0], sizes = [1, 64], strides = [1, 1]} : vector<7x64xf32> to vector<1x64xf32>
    %c0_104 = arith.constant 0 : index
    %c1344 = arith.constant 1344 : index
    %244 = vector.load %arg14[%c0_104, %c1344] : memref<1x3136xf32, #tpu.memory_space<vmem>>, vector<1x64xf32>
    tpu.vector_store %arg14[%c0_104, %c1344], %243 {strides = array<i32>} : memref<1x3136xf32, #tpu.memory_space<vmem>>, vector<1x64xf32>,
    %245 = vector.extract_strided_slice %242 {offsets = [1, 0], sizes = [1, 64], strides = [1, 1]} : vector<7x64xf32> to vector<1x64xf32>
    %c0_105 = arith.constant 0 : index
    %c1408 = arith.constant 1408 : index
    %246 = vector.load %arg14[%c0_105, %c1408] : memref<1x3136xf32, #tpu.memory_space<vmem>>, vector<1x64xf32>
    tpu.vector_store %arg14[%c0_105, %c1408], %245 {strides = array<i32>} : memref<1x3136xf32, #tpu.memory_space<vmem>>, vector<1x64xf32>,
    %247 = vector.extract_strided_slice %242 {offsets = [2, 0], sizes = [1, 64], strides = [1, 1]} : vector<7x64xf32> to vector<1x64xf32>
    %c0_106 = arith.constant 0 : index
    %c1472 = arith.constant 1472 : index
    %248 = vector.load %arg14[%c0_106, %c1472] : memref<1x3136xf32, #tpu.memory_space<vmem>>, vector<1x64xf32>
    tpu.vector_store %arg14[%c0_106, %c1472], %247 {strides = array<i32>} : memref<1x3136xf32, #tpu.memory_space<vmem>>, vector<1x64xf32>,
    %249 = vector.extract_strided_slice %242 {offsets = [3, 0], sizes = [1, 64], strides = [1, 1]} : vector<7x64xf32> to vector<1x64xf32>
    %c0_107 = arith.constant 0 : index
    %c1536 = arith.constant 1536 : index
    %250 = vector.load %arg14[%c0_107, %c1536] : memref<1x3136xf32, #tpu.memory_space<vmem>>, vector<1x64xf32>
    tpu.vector_store %arg14[%c0_107, %c1536], %249 {strides = array<i32>} : memref<1x3136xf32, #tpu.memory_space<vmem>>, vector<1x64xf32>,
    %251 = vector.extract_strided_slice %242 {offsets = [4, 0], sizes = [1, 64], strides = [1, 1]} : vector<7x64xf32> to vector<1x64xf32>
    %c0_108 = arith.constant 0 : index
    %c1600 = arith.constant 1600 : index
    %252 = vector.load %arg14[%c0_108, %c1600] : memref<1x3136xf32, #tpu.memory_space<vmem>>, vector<1x64xf32>
    tpu.vector_store %arg14[%c0_108, %c1600], %251 {strides = array<i32>} : memref<1x3136xf32, #tpu.memory_space<vmem>>, vector<1x64xf32>,
    %253 = vector.extract_strided_slice %242 {offsets = [5, 0], sizes = [1, 64], strides = [1, 1]} : vector<7x64xf32> to vector<1x64xf32>
    %c0_109 = arith.constant 0 : index
    %c1664 = arith.constant 1664 : index
    %254 = vector.load %arg14[%c0_109, %c1664] : memref<1x3136xf32, #tpu.memory_space<vmem>>, vector<1x64xf32>
    tpu.vector_store %arg14[%c0_109, %c1664], %253 {strides = array<i32>} : memref<1x3136xf32, #tpu.memory_space<vmem>>, vector<1x64xf32>,
    %255 = vector.extract_strided_slice %242 {offsets = [6, 0], sizes = [1, 64], strides = [1, 1]} : vector<7x64xf32> to vector<1x64xf32>
    %c0_110 = arith.constant 0 : index
    %c1728 = arith.constant 1728 : index
    %256 = vector.load %arg14[%c0_110, %c1728] : memref<1x3136xf32, #tpu.memory_space<vmem>>, vector<1x64xf32>
    tpu.vector_store %arg14[%c0_110, %c1728], %255 {strides = array<i32>} : memref<1x3136xf32, #tpu.memory_space<vmem>>, vector<1x64xf32>,
    %257 = vector.extract_strided_slice %188 {offsets = [64, 0], sizes = [7, 64], strides = [1, 1]} : vector<112x64xf32> to vector<7x64xf32>
    %258 = vector.extract_strided_slice %188 {offsets = [72, 0], sizes = [7, 64], strides = [1, 1]} : vector<112x64xf32> to vector<7x64xf32>
    %259 = arith.maximumf %257, %258 : vector<7x64xf32>
    %260 = vector.extract_strided_slice %259 {offsets = [0, 0], sizes = [1, 64], strides = [1, 1]} : vector<7x64xf32> to vector<1x64xf32>
    %c0_111 = arith.constant 0 : index
    %c1792 = arith.constant 1792 : index
    %261 = vector.load %arg14[%c0_111, %c1792] : memref<1x3136xf32, #tpu.memory_space<vmem>>, vector<1x64xf32>
    tpu.vector_store %arg14[%c0_111, %c1792], %260 {strides = array<i32>} : memref<1x3136xf32, #tpu.memory_space<vmem>>, vector<1x64xf32>,
    %262 = vector.extract_strided_slice %259 {offsets = [1, 0], sizes = [1, 64], strides = [1, 1]} : vector<7x64xf32> to vector<1x64xf32>
    %c0_112 = arith.constant 0 : index
    %c1856 = arith.constant 1856 : index
    %263 = vector.load %arg14[%c0_112, %c1856] : memref<1x3136xf32, #tpu.memory_space<vmem>>, vector<1x64xf32>
    tpu.vector_store %arg14[%c0_112, %c1856], %262 {strides = array<i32>} : memref<1x3136xf32, #tpu.memory_space<vmem>>, vector<1x64xf32>,
    %264 = vector.extract_strided_slice %259 {offsets = [2, 0], sizes = [1, 64], strides = [1, 1]} : vector<7x64xf32> to vector<1x64xf32>
    %c0_113 = arith.constant 0 : index
    %c1920 = arith.constant 1920 : index
    %265 = vector.load %arg14[%c0_113, %c1920] : memref<1x3136xf32, #tpu.memory_space<vmem>>, vector<1x64xf32>
    tpu.vector_store %arg14[%c0_113, %c1920], %264 {strides = array<i32>} : memref<1x3136xf32, #tpu.memory_space<vmem>>, vector<1x64xf32>,
    %266 = vector.extract_strided_slice %259 {offsets = [3, 0], sizes = [1, 64], strides = [1, 1]} : vector<7x64xf32> to vector<1x64xf32>
    %c0_114 = arith.constant 0 : index
    %c1984 = arith.constant 1984 : index
    %267 = vector.load %arg14[%c0_114, %c1984] : memref<1x3136xf32, #tpu.memory_space<vmem>>, vector<1x64xf32>
    tpu.vector_store %arg14[%c0_114, %c1984], %266 {strides = array<i32>} : memref<1x3136xf32, #tpu.memory_space<vmem>>, vector<1x64xf32>,
    %268 = vector.extract_strided_slice %259 {offsets = [4, 0], sizes = [1, 64], strides = [1, 1]} : vector<7x64xf32> to vector<1x64xf32>
    %c0_115 = arith.constant 0 : index
    %c2048 = arith.constant 2048 : index
    %269 = vector.load %arg14[%c0_115, %c2048] : memref<1x3136xf32, #tpu.memory_space<vmem>>, vector<1x64xf32>
    tpu.vector_store %arg14[%c0_115, %c2048], %268 {strides = array<i32>} : memref<1x3136xf32, #tpu.memory_space<vmem>>, vector<1x64xf32>,
    %270 = vector.extract_strided_slice %259 {offsets = [5, 0], sizes = [1, 64], strides = [1, 1]} : vector<7x64xf32> to vector<1x64xf32>
    %c0_116 = arith.constant 0 : index
    %c2112 = arith.constant 2112 : index
    %271 = vector.load %arg14[%c0_116, %c2112] : memref<1x3136xf32, #tpu.memory_space<vmem>>, vector<1x64xf32>
    tpu.vector_store %arg14[%c0_116, %c2112], %270 {strides = array<i32>} : memref<1x3136xf32, #tpu.memory_space<vmem>>, vector<1x64xf32>,
    %272 = vector.extract_strided_slice %259 {offsets = [6, 0], sizes = [1, 64], strides = [1, 1]} : vector<7x64xf32> to vector<1x64xf32>
    %c0_117 = arith.constant 0 : index
    %c2176 = arith.constant 2176 : index
    %273 = vector.load %arg14[%c0_117, %c2176] : memref<1x3136xf32, #tpu.memory_space<vmem>>, vector<1x64xf32>
    tpu.vector_store %arg14[%c0_117, %c2176], %272 {strides = array<i32>} : memref<1x3136xf32, #tpu.memory_space<vmem>>, vector<1x64xf32>,
    %274 = vector.extract_strided_slice %188 {offsets = [80, 0], sizes = [7, 64], strides = [1, 1]} : vector<112x64xf32> to vector<7x64xf32>
    %275 = vector.extract_strided_slice %188 {offsets = [88, 0], sizes = [7, 64], strides = [1, 1]} : vector<112x64xf32> to vector<7x64xf32>
    %276 = arith.maximumf %274, %275 : vector<7x64xf32>
    %277 = vector.extract_strided_slice %276 {offsets = [0, 0], sizes = [1, 64], strides = [1, 1]} : vector<7x64xf32> to vector<1x64xf32>
    %c0_118 = arith.constant 0 : index
    %c2240 = arith.constant 2240 : index
    %278 = vector.load %arg14[%c0_118, %c2240] : memref<1x3136xf32, #tpu.memory_space<vmem>>, vector<1x64xf32>
    tpu.vector_store %arg14[%c0_118, %c2240], %277 {strides = array<i32>} : memref<1x3136xf32, #tpu.memory_space<vmem>>, vector<1x64xf32>,
    %279 = vector.extract_strided_slice %276 {offsets = [1, 0], sizes = [1, 64], strides = [1, 1]} : vector<7x64xf32> to vector<1x64xf32>
    %c0_119 = arith.constant 0 : index
    %c2304 = arith.constant 2304 : index
    %280 = vector.load %arg14[%c0_119, %c2304] : memref<1x3136xf32, #tpu.memory_space<vmem>>, vector<1x64xf32>
    tpu.vector_store %arg14[%c0_119, %c2304], %279 {strides = array<i32>} : memref<1x3136xf32, #tpu.memory_space<vmem>>, vector<1x64xf32>,
    %281 = vector.extract_strided_slice %276 {offsets = [2, 0], sizes = [1, 64], strides = [1, 1]} : vector<7x64xf32> to vector<1x64xf32>
    %c0_120 = arith.constant 0 : index
    %c2368 = arith.constant 2368 : index
    %282 = vector.load %arg14[%c0_120, %c2368] : memref<1x3136xf32, #tpu.memory_space<vmem>>, vector<1x64xf32>
    tpu.vector_store %arg14[%c0_120, %c2368], %281 {strides = array<i32>} : memref<1x3136xf32, #tpu.memory_space<vmem>>, vector<1x64xf32>,
    %283 = vector.extract_strided_slice %276 {offsets = [3, 0], sizes = [1, 64], strides = [1, 1]} : vector<7x64xf32> to vector<1x64xf32>
    %c0_121 = arith.constant 0 : index
    %c2432 = arith.constant 2432 : index
    %284 = vector.load %arg14[%c0_121, %c2432] : memref<1x3136xf32, #tpu.memory_space<vmem>>, vector<1x64xf32>
    tpu.vector_store %arg14[%c0_121, %c2432], %283 {strides = array<i32>} : memref<1x3136xf32, #tpu.memory_space<vmem>>, vector<1x64xf32>,
    %285 = vector.extract_strided_slice %276 {offsets = [4, 0], sizes = [1, 64], strides = [1, 1]} : vector<7x64xf32> to vector<1x64xf32>
    %c0_122 = arith.constant 0 : index
    %c2496 = arith.constant 2496 : index
    %286 = vector.load %arg14[%c0_122, %c2496] : memref<1x3136xf32, #tpu.memory_space<vmem>>, vector<1x64xf32>
    tpu.vector_store %arg14[%c0_122, %c2496], %285 {strides = array<i32>} : memref<1x3136xf32, #tpu.memory_space<vmem>>, vector<1x64xf32>,
    %287 = vector.extract_strided_slice %276 {offsets = [5, 0], sizes = [1, 64], strides = [1, 1]} : vector<7x64xf32> to vector<1x64xf32>
    %c0_123 = arith.constant 0 : index
    %c2560 = arith.constant 2560 : index
    %288 = vector.load %arg14[%c0_123, %c2560] : memref<1x3136xf32, #tpu.memory_space<vmem>>, vector<1x64xf32>
    tpu.vector_store %arg14[%c0_123, %c2560], %287 {strides = array<i32>} : memref<1x3136xf32, #tpu.memory_space<vmem>>, vector<1x64xf32>,
    %289 = vector.extract_strided_slice %276 {offsets = [6, 0], sizes = [1, 64], strides = [1, 1]} : vector<7x64xf32> to vector<1x64xf32>
    %c0_124 = arith.constant 0 : index
    %c2624 = arith.constant 2624 : index
    %290 = vector.load %arg14[%c0_124, %c2624] : memref<1x3136xf32, #tpu.memory_space<vmem>>, vector<1x64xf32>
    tpu.vector_store %arg14[%c0_124, %c2624], %289 {strides = array<i32>} : memref<1x3136xf32, #tpu.memory_space<vmem>>, vector<1x64xf32>,
    %291 = vector.extract_strided_slice %188 {offsets = [96, 0], sizes = [7, 64], strides = [1, 1]} : vector<112x64xf32> to vector<7x64xf32>
    %292 = vector.extract_strided_slice %188 {offsets = [104, 0], sizes = [7, 64], strides = [1, 1]} : vector<112x64xf32> to vector<7x64xf32>
    %293 = arith.maximumf %291, %292 : vector<7x64xf32>
    %294 = vector.extract_strided_slice %293 {offsets = [0, 0], sizes = [1, 64], strides = [1, 1]} : vector<7x64xf32> to vector<1x64xf32>
    %c0_125 = arith.constant 0 : index
    %c2688 = arith.constant 2688 : index
    %295 = vector.load %arg14[%c0_125, %c2688] : memref<1x3136xf32, #tpu.memory_space<vmem>>, vector<1x64xf32>
    tpu.vector_store %arg14[%c0_125, %c2688], %294 {strides = array<i32>} : memref<1x3136xf32, #tpu.memory_space<vmem>>, vector<1x64xf32>,
    %296 = vector.extract_strided_slice %293 {offsets = [1, 0], sizes = [1, 64], strides = [1, 1]} : vector<7x64xf32> to vector<1x64xf32>
    %c0_126 = arith.constant 0 : index
    %c2752 = arith.constant 2752 : index
    %297 = vector.load %arg14[%c0_126, %c2752] : memref<1x3136xf32, #tpu.memory_space<vmem>>, vector<1x64xf32>
    tpu.vector_store %arg14[%c0_126, %c2752], %296 {strides = array<i32>} : memref<1x3136xf32, #tpu.memory_space<vmem>>, vector<1x64xf32>,
    %298 = vector.extract_strided_slice %293 {offsets = [2, 0], sizes = [1, 64], strides = [1, 1]} : vector<7x64xf32> to vector<1x64xf32>
    %c0_127 = arith.constant 0 : index
    %c2816 = arith.constant 2816 : index
    %299 = vector.load %arg14[%c0_127, %c2816] : memref<1x3136xf32, #tpu.memory_space<vmem>>, vector<1x64xf32>
    tpu.vector_store %arg14[%c0_127, %c2816], %298 {strides = array<i32>} : memref<1x3136xf32, #tpu.memory_space<vmem>>, vector<1x64xf32>,
    %300 = vector.extract_strided_slice %293 {offsets = [3, 0], sizes = [1, 64], strides = [1, 1]} : vector<7x64xf32> to vector<1x64xf32>
    %c0_128 = arith.constant 0 : index
    %c2880 = arith.constant 2880 : index
    %301 = vector.load %arg14[%c0_128, %c2880] : memref<1x3136xf32, #tpu.memory_space<vmem>>, vector<1x64xf32>
    tpu.vector_store %arg14[%c0_128, %c2880], %300 {strides = array<i32>} : memref<1x3136xf32, #tpu.memory_space<vmem>>, vector<1x64xf32>,
    %302 = vector.extract_strided_slice %293 {offsets = [4, 0], sizes = [1, 64], strides = [1, 1]} : vector<7x64xf32> to vector<1x64xf32>
    %c0_129 = arith.constant 0 : index
    %c2944 = arith.constant 2944 : index
    %303 = vector.load %arg14[%c0_129, %c2944] : memref<1x3136xf32, #tpu.memory_space<vmem>>, vector<1x64xf32>
    tpu.vector_store %arg14[%c0_129, %c2944], %302 {strides = array<i32>} : memref<1x3136xf32, #tpu.memory_space<vmem>>, vector<1x64xf32>,
    %304 = vector.extract_strided_slice %293 {offsets = [5, 0], sizes = [1, 64], strides = [1, 1]} : vector<7x64xf32> to vector<1x64xf32>
    %c0_130 = arith.constant 0 : index
    %c3008 = arith.constant 3008 : index
    %305 = vector.load %arg14[%c0_130, %c3008] : memref<1x3136xf32, #tpu.memory_space<vmem>>, vector<1x64xf32>
    tpu.vector_store %arg14[%c0_130, %c3008], %304 {strides = array<i32>} : memref<1x3136xf32, #tpu.memory_space<vmem>>, vector<1x64xf32>,
    %306 = vector.extract_strided_slice %293 {offsets = [6, 0], sizes = [1, 64], strides = [1, 1]} : vector<7x64xf32> to vector<1x64xf32>
    %c0_131 = arith.constant 0 : index
    %c3072 = arith.constant 3072 : index
    %307 = vector.load %arg14[%c0_131, %c3072] : memref<1x3136xf32, #tpu.memory_space<vmem>>, vector<1x64xf32>
    tpu.vector_store %arg14[%c0_131, %c3072], %306 {strides = array<i32>} : memref<1x3136xf32, #tpu.memory_space<vmem>>, vector<1x64xf32>,
    %c0_132 = arith.constant 0 : index
    %c0_133 = arith.constant 0 : index
    %308 = vector.load %arg14[%c0_132, %c0_133] : memref<1x3136xf32, #tpu.memory_space<vmem>>, vector<1x3136xf32>
    %309 = arith.truncf %308 : vector<1x3136xf32> to vector<1x3136xbf16>
    %c0_134 = arith.constant 0 : index
    %c0_135 = arith.constant 0 : index
    %310 = vector.load %arg6[%c0_134, %c0_135] : memref<3136x128xbf16, #tpu.memory_space<vmem>>, vector<3136x128xbf16>
    %cst_136 = arith.constant dense<0.000000e+00> : vector<1x128xf32>
    %311 = tpu.matmul %309, %310, %cst_136 {dimension_numbers = #tpu.dot_dimension_numbers<[1], [0], [0], [1], [0, 0, 1, 1], [], []>} : vector<1x3136xbf16>, vector<3136x128xbf16>, vector<1x128xf32> -> vector<1x128xf32>
    %c0_137 = arith.constant 0 : index
    %c0_138 = arith.constant 0 : index
    %312 = vector.load %arg7[%c0_137, %c0_138] : memref<1x128xf32, #tpu.memory_space<vmem>>, vector<1x128xf32>
    %313 = arith.addf %311, %312 : vector<1x128xf32>
    %cst_139 = arith.constant 0.000000e+00 : f32
    %314 = vector.broadcast %cst_139 : f32 to vector<1x128xf32>
    %315 = arith.maximumf %313, %314 : vector<1x128xf32>
    %316 = arith.truncf %315 : vector<1x128xf32> to vector<1x128xbf16>
    %c0_140 = arith.constant 0 : index
    %c0_141 = arith.constant 0 : index
    %317 = vector.load %arg8[%c0_140, %c0_141] : memref<128x128xbf16, #tpu.memory_space<vmem>>, vector<128x128xbf16>
    %cst_142 = arith.constant dense<0.000000e+00> : vector<1x128xf32>
    %318 = tpu.matmul %316, %317, %cst_142 {dimension_numbers = #tpu.dot_dimension_numbers<[1], [0], [0], [1], [0, 0, 1, 1], [], []>} : vector<1x128xbf16>, vector<128x128xbf16>, vector<1x128xf32> -> vector<1x128xf32>
    %c0_143 = arith.constant 0 : index
    %c0_144 = arith.constant 0 : index
    %319 = vector.load %arg9[%c0_143, %c0_144] : memref<1x128xf32, #tpu.memory_space<vmem>>, vector<1x128xf32>
    %320 = arith.addf %318, %319 : vector<1x128xf32>
    %c0_145 = arith.constant 0 : index
    %c0_146 = arith.constant 0 : index
    %c0_147 = arith.constant 0 : index
    %321 = vector.load %arg10[%c0_145, %c0_146, %c0_147] : memref<1x1x128xf32, #tpu.memory_space<vmem>>, vector<1x1x128xf32>
    %322 = vector.shape_cast %321 : vector<1x1x128xf32> to vector<1x128xf32>
    %323 = vector.shape_cast %320 : vector<1x128xf32> to vector<1x1x128xf32>
    tpu.vector_store %arg10[%c0_145, %c0_146, %c0_147], %323 {strides = array<i32>} : memref<1x1x128xf32, #tpu.memory_space<vmem>>, vector<1x1x128xf32>,
    return
  }
  func.func @transform_0(%arg0: i32) -> (i32, i32, i32) {
    %c0_i32 = arith.constant 0 : i32
    %c0_i32_0 = arith.constant 0 : i32
    %c0_i32_1 = arith.constant 0 : i32
    return %arg0, %c0_i32, %c0_i32_0 : i32, i32, i32
  }
  func.func @transform_1(%arg0: i32) -> (i32, i32) {
    %c0_i32 = arith.constant 0 : i32
    %c0_i32_0 = arith.constant 0 : i32
    %c0_i32_1 = arith.constant 0 : i32
    return %c0_i32, %c0_i32_0 : i32, i32
  }
  func.func @transform_2(%arg0: i32) -> (i32, i32) {
    %c0_i32 = arith.constant 0 : i32
    %c0_i32_0 = arith.constant 0 : i32
    %c0_i32_1 = arith.constant 0 : i32
    return %c0_i32, %c0_i32_0 : i32, i32
  }
  func.func @transform_3(%arg0: i32) -> (i32, i32, i32) {
    %c0_i32 = arith.constant 0 : i32
    %c0_i32_0 = arith.constant 0 : i32
    %c0_i32_1 = arith.constant 0 : i32
    %c0_i32_2 = arith.constant 0 : i32
    return %c0_i32, %c0_i32_0, %c0_i32_1 : i32, i32, i32
  }
  func.func @transform_4(%arg0: i32) -> (i32, i32) {
    %c0_i32 = arith.constant 0 : i32
    %c0_i32_0 = arith.constant 0 : i32
    %c0_i32_1 = arith.constant 0 : i32
    return %c0_i32, %c0_i32_0 : i32, i32
  }
  func.func @transform_5(%arg0: i32) -> (i32, i32) {
    %c0_i32 = arith.constant 0 : i32
    %c0_i32_0 = arith.constant 0 : i32
    %c0_i32_1 = arith.constant 0 : i32
    return %c0_i32, %c0_i32_0 : i32, i32
  }
  func.func @transform_6(%arg0: i32) -> (i32, i32) {
    %c0_i32 = arith.constant 0 : i32
    %c0_i32_0 = arith.constant 0 : i32
    %c0_i32_1 = arith.constant 0 : i32
    return %c0_i32, %c0_i32_0 : i32, i32
  }
  func.func @transform_7(%arg0: i32) -> (i32, i32) {
    %c0_i32 = arith.constant 0 : i32
    %c0_i32_0 = arith.constant 0 : i32
    %c0_i32_1 = arith.constant 0 : i32
    return %c0_i32, %c0_i32_0 : i32, i32
  }
  func.func @transform_8(%arg0: i32) -> (i32, i32) {
    %c0_i32 = arith.constant 0 : i32
    %c0_i32_0 = arith.constant 0 : i32
    %c0_i32_1 = arith.constant 0 : i32
    return %c0_i32, %c0_i32_0 : i32, i32
  }
  func.func @transform_9(%arg0: i32) -> (i32, i32, i32) {
    %c0_i32 = arith.constant 0 : i32
    %c0_i32_0 = arith.constant 0 : i32
    %c0_i32_1 = arith.constant 0 : i32
    return %arg0, %c0_i32, %c0_i32_0 : i32, i32, i32
  }
}

</mosaic_0001>

<bundles_post_ra>
// kernel: cnn_forward.1
= control target key start
LH: loop header
LB: loop body
LE: loop exit
PB: predicated region body
PF: predicated region fallthrough
CT: control target
= control target key end

     0   :  { %14 = vsyncpa [#allocation7], 0  ;;  %s21260_s0 = inlined_call_operand.vmem [shape: f32[2,1024,1], index: 0, kind: input, shape index: {}]   ;;  %s21261_s1 = inlined_call_operand.vmem [shape: f32[9,32], index: 1, kind: input, shape index: {}]   ;;  %s21262_s2 = inlined_call_operand.vmem [shape: f32[1,32], index: 2, kind: input, shape index: {}]   ;;  %s21263_s3 = inlined_call_operand.vmem [shape: bf16[9,32,64], index: 3, kind: input, shape index: {}]   ;;  %s21264_s4 = inlined_call_operand.vmem [shape: f32[1,64], index: 4, kind: input, shape index: {}]   ;;  %s21265_s5 = inlined_call_operand.vmem [shape: bf16[3136,128], index: 5, kind: input, shape index: {}]   ;;  %s21266_s6 = inlined_call_operand.vmem [shape: f32[1,128], index: 6, kind: input, shape index: {}]   ;;  %s21267_s7 = inlined_call_operand.vmem [shape: bf16[128,128], index: 7, kind: input, shape index: {}]   ;;  %s21268_s8 = inlined_call_operand.vmem [shape: f32[1,128], index: 8, kind: input, shape index: {}]   ;;  %s21269_s9 = inlined_call_operand.hbm [shape: f32[2,1,128], index: 9, kind: output, shape index: {}]  }
   0x1   :  { %16 = vsyncpa [#allocation7 + $0x1], 0  ;;  %s13815_s30 = smov 0   ;;  %s13817_s10 = smov 0  }
   0x2   :  { %s13819_s11 = smov 0   ;;  %s13821_s12 = smov 0  }
   0x3 LB: > { %s13836_s13 = sadd.s32 4294967295, %s13757_s12   ;;  %s12046_s14 = sadd.s32 4294967294, %s13757_s12   ;;  %s13757_s12 = sphi %s13821_s12, %s21621_s12   ;;  %s13753_s11 = sphi %s13819_s11, %s21620_s11   ;;  %s13749_s10 = sphi %s13817_s10, %s21619_s10   ;;  %s13745_s30 = sphi %s13815_s30, %s21618_s30  }
   0x4   : > { %s13840_s15 = sadd.s32 1, %s13757_s12   ;;  %s223_s16 = sadd.s32 1, %s13753_s11 }
   0x5   : > { %s220_s17 = ssub.s32 %s13757_s12, %s13840_s15  ;;  %p233_p0 = scmp.ne.s32.totalorder %s13753_s11, %s13749_s10 }
   0x6   : > { %p221_p1 = scmp.eq.s32.totalorder %s220_s17, 0  ;;  %p234_p2 = scmp.eq.s32.totalorder %s13836_s13, 1 }
   0x7   : > { %p239_p3 = scmp.ne.s32.totalorder %s13749_s10, %s13745_s30  ;;  %p240_p4 = scmp.eq.s32.totalorder %s12046_s14, 1 }
   0x8   : > { %s13851_s18 = scalar_select %p221_p1, %s13753_s11, %s223_s16  }
   0x9   : > { %p13853_p5 = por %p234_p2, %p233_p0  ;;  %p13857_p6 = por %p240_p4, %p239_p3 }
   0xa   : > { %p12049_p7 = scmp.ge.s32.totalorder %s13757_s12, 1  ;;  %p290_p8 = scmp.lt.s32.totalorder %s13757_s12, 3 }
   0xc   : > { %p291_p9 = pnand %p12049_p7, %p290_p8 }
   0xe   : > { %294 = sbr.rel (%p291_p9) target bundleno = 2657 (0xa61), region = 56 }
  0x15   : > { %p325_p10 = scmp.lt.s32.totalorder %s13836_s13, 1  ;;  %v13759_v0 = vmov 0   ;;  %v21270_v49 = vlaneseq  ;;  %vm1478_vm0 = vcmask 1046528   ;;  %vm2163_vm1 = vcmask 1045504   ;;  %s13762_s29 = smov 64  }
  0x16   : > { %13456 = vset.pattern.permute.xlu1 %v13759_v0  ;;  %13455 = vset.pattern.permute.xlu0 %v13759_v0  ;;  %vm6066_vm2 = vcmask 261120   ;;  %vm6064_vm3 = vcmask 261127   ;;  %vm6497_vm4 = vcmask 259072   ;;  %vm6178_vm5 = vcmask 260096   ;;  %s12437_s26 = sshll.u32 %s13836_s13, 4  ;;  %s13764_s17 = smov [#allocation6]  }
  0x17   : > { %s326_s21 = scalar_select %p325_p10, %s13836_s13, 1  ;;  %v13921_v52 = vshrl.u32 %v21270_v49, 7  ;;  %vm9023_vm6 = vcmask 523264   ;;  %vm13763_vm11 = vmmov 0  }
  0x19   : > { %s12440_s22 = sshll.u32 %s326_s21, 10  ;;  %21330 = vst [vmem:[#allocation9_spill] sm:$0xff] %v13921_v52  ;;  %v13930_v59 = vsub.s32 0, %v13921_v52  ;;  %v13933_v60 = vsub.s32 1, %v13921_v52  ;;  %v13936_v61 = vsub.s32 2, %v13921_v52  ;;  %v13939_v62 = vsub.s32 3, %v13921_v52 }
  0x1a   : > { %s13868_s25 = scalar_lea.vmem %s21260_s0, %s12440_s22  ;;  %s323_s22 = sand.u32 1, %s13749_s10  }
  0x1b   : > { %v334_v1 = vld [vmem:[%s13868_s25 + $0x30] sm:$0xff]  ;;  %v332_v2 = vld [vmem:[%s13868_s25 + $0x20] sm:$0xff]  ;;  %v335_v3 = vld [vmem:[%s13868_s25 + $0x38] sm:$0xff]  ;;  %21331 = vst [vmem:[#allocation10_spill] sm:$0xff] %v13930_v59  ;;  %s324_s27 = scalar_lea.vmem [#allocation6], %s323_s22  ;;  %s11979_s16 = scalar_lea.sflag [#allocation7], %s323_s22 }
  0x1c   : > { %472 = vperm.xlu1 %13456, %v334_v1   ;;  %462 = vperm.xlu0 %13455, %v332_v2   ;;  %v333_v4 = vld [vmem:[%s13868_s25 + $0x28] sm:$0xff]  ;;  %v336_v6 = vld [vmem:[%s13868_s25 + $0x40] sm:$0xff]  ;;  %v339_v7 = vld [vmem:[%s13868_s25 + $0x58] sm:$0xff]  ;;  %21332 = vst [vmem:[#allocation11_spill] sm:$0xff] %v13933_v60  ;;  %s13699_s21 = sshll.u32 %s13764_s17, 4  ;;  %s13700_s21 = int_to_ptr.vmem [resolvable:$false] %s13699_s21 }
  0x1d   : > { %v337_v5 = vld [vmem:[%s13868_s25 + $0x48] sm:$0xff]  ;;  %v338_v8 = vld [vmem:[%s13868_s25 + $0x50] sm:$0xff]  ;;  %v340_v9 = vld [vmem:[%s13868_s25 + $0x60] sm:$0xff]  ;;  %21333 = vst [vmem:[#allocation12_spill] sm:$0xff] %v13936_v61  ;;  %s13701_s23 = scalar_lea.vmem %s13700_s21, 32 }
  0x1e   : > { %v331_v10 = vld [vmem:[%s13868_s25 + $0x18] sm:$0xff]  ;;  %v341_v11 = vld [vmem:[%s13868_s25 + $0x68] sm:$0xff]  ;;  %v342_v12 = vld [vmem:[%s13868_s25 + $0x70] sm:$0xff]  ;;  %21334 = vst [vmem:[#allocation13_spill] sm:$0xff] %v13939_v62 }
  0x1f   : > { %v343_v13 = vld [vmem:[%s13868_s25 + $0x78] sm:$0xff]  ;;  %v344_v14 = vld [vmem:[%s13868_s25 + $0x80] sm:$0xff]  ;;  %v345_v15 = vld [vmem:[%s13868_s25 + $0x88] sm:$0xff] }
  0x20   : > { %477 = vperm.xlu1 %13456, %v335_v3   ;;  %467 = vperm.xlu0 %13455, %v333_v4   ;;  %v346_v16 = vld [vmem:[%s13868_s25 + $0x90] sm:$0xff]  ;;  %v347_v17 = vld [vmem:[%s13868_s25 + $0x98] sm:$0xff]  ;;  %v348_v18 = vld [vmem:[%s13868_s25 + $0xa0] sm:$0xff] }
  0x21   : > { %v349_v19 = vld [vmem:[%s13868_s25 + $0xa8] sm:$0xff]  ;;  %v350_v20 = vld [vmem:[%s13868_s25 + $0xb0] sm:$0xff]  ;;  %v351_v21 = vld [vmem:[%s13868_s25 + $0xb8] sm:$0xff] }
  0x22   : > { %v352_v22 = vld [vmem:[%s13868_s25 + $0xc0] sm:$0xff]  ;;  %v353_v23 = vld [vmem:[%s13868_s25 + $0xc8] sm:$0xff]  ;;  %v354_v24 = vld [vmem:[%s13868_s25 + $0xd0] sm:$0xff] }
  0x23   : > { %v355_v25 = vld [vmem:[%s13868_s25 + $0xd8] sm:$0xff]  ;;  %v356_v26 = vld [vmem:[%s13868_s25 + $0xe0] sm:$0xff]  ;;  %v357_v27 = vld [vmem:[%s13868_s25 + $0xe8] sm:$0xff] }
  0x24   : > { %487 = vperm.xlu1 %13456, %v337_v5   ;;  %482 = vperm.xlu0 %13455, %v336_v6   ;;  %v358_v28 = vld [vmem:[%s13868_s25 + $0xf0] sm:$0xff]  ;;  %v359_v29 = vld [vmem:[%s13868_s25 + $0xf8] sm:$0xff]  ;;  %v360_v30 = vld [vmem:[%s13868_s25 + $0x100] sm:$0xff] }
  0x25   : > { %v361_v31 = vld [vmem:[%s13868_s25 + $0x108] sm:$0xff]  ;;  %v362_v32 = vld [vmem:[%s13868_s25 + $0x110] sm:$0xff]  ;;  %v363_v33 = vld [vmem:[%s13868_s25 + $0x118] sm:$0xff] }
  0x26   : > { %v364_v34 = vld [vmem:[%s13868_s25 + $0x120] sm:$0xff]  ;;  %v365_v35 = vld [vmem:[%s13868_s25 + $0x128] sm:$0xff]  ;;  %v366_v36 = vld [vmem:[%s13868_s25 + $0x130] sm:$0xff] }
  0x27   : > { %v367_v37 = vld [vmem:[%s13868_s25 + $0x138] sm:$0xff]  ;;  %v368_v38 = vld [vmem:[%s13868_s25 + $0x140] sm:$0xff]  ;;  %v369_v39 = vld [vmem:[%s13868_s25 + $0x148] sm:$0xff] }
  0x28   : > { %497 = vperm.xlu1 %13456, %v339_v7   ;;  %492 = vperm.xlu0 %13455, %v338_v8   ;;  %v370_v40 = vld [vmem:[%s13868_s25 + $0x150] sm:$0xff]  ;;  %v371_v41 = vld [vmem:[%s13868_s25 + $0x158] sm:$0xff]  ;;  %v372_v42 = vld [vmem:[%s13868_s25 + $0x160] sm:$0xff]  ;;  %v13953_v8 = vsub.s32 4, %v13921_v52 }
  0x29   : > { %v373_v43 = vld [vmem:[%s13868_s25 + $0x168] sm:$0xff]  ;;  %v374_v44 = vld [vmem:[%s13868_s25 + $0x170] sm:$0xff]  ;;  %v375_v45 = vld [vmem:[%s13868_s25 + $0x178] sm:$0xff] }
  0x2a   : > { %v376_v46 = vld [vmem:[%s13868_s25 + $0x180] sm:$0xff]  ;;  %v377_v47 = vld [vmem:[%s13868_s25 + $0x188] sm:$0xff]  ;;  %v378_v48 = vld [vmem:[%s13868_s25 + $0x190] sm:$0xff]  ;;  %21335 = vst [vmem:[#allocation14_spill] sm:$0xff] %v13953_v8 }
  0x2b   : > { %v379_v50 = vld [vmem:[%s13868_s25 + $0x198] sm:$0xff]  ;;  %v380_v51 = vld [vmem:[%s13868_s25 + $0x1a0] sm:$0xff]  ;;  %v381_v53 = vld [vmem:[%s13868_s25 + $0x1a8] sm:$0xff] }
  0x2c   : > { %502 = vperm.xlu0 %13455, %v340_v9   ;;  %457 = vperm.xlu1 %13456, %v331_v10   ;;  %v382_v54 = vld [vmem:[%s13868_s25 + $0x1b0] sm:$0xff]  ;;  %v383_v55 = vld [vmem:[%s13868_s25 + $0x1b8] sm:$0xff]  ;;  %v384_v56 = vld [vmem:[%s13868_s25 + $0x1c0] sm:$0xff]  ;;  %v13956_v9 = vsub.s32 5, %v13921_v52  ;;  %v13959_v10 = vsub.s32 6, %v13921_v52 }
  0x2d   : > { %v385_v57 = vld [vmem:[%s13868_s25 + $0x1c8] sm:$0xff]  ;;  %v386_v58 = vld [vmem:[%s13868_s25 + $0x1d0] sm:$0xff]  ;;  %v387_v63 = vld [vmem:[%s13868_s25 + $0x1d8] sm:$0xff] }
  0x2e   : > { %v388_v0 = vld [vmem:[%s13868_s25 + $0x1e0] sm:$0xff]  ;;  %v389_v1 = vld [vmem:[%s13868_s25 + $0x1e8] sm:$0xff]  ;;  %v390_v2 = vld [vmem:[%s13868_s25 + $0x1f0] sm:$0xff]  ;;  %21336 = vst [vmem:[#allocation15_spill] sm:$0xff] %v13956_v9 }
  0x2f   : > { %v391_v3 = vld [vmem:[%s13868_s25 + $0x1f8] sm:$0xff]  ;;  %v392_v4 = vld [vmem:[%s13868_s25 + $0x200] sm:$0xff]  ;;  %v393_v5 = vld [vmem:[%s13868_s25 + $0x208] sm:$0xff]  ;;  %21337 = vst [vmem:[#allocation16_spill] sm:$0xff] %v13959_v10 }
  0x30   : > { %507 = vperm.xlu0 %13455, %v341_v11   ;;  %512 = vperm.xlu1 %13456, %v342_v12   ;;  %v394_v6 = vld [vmem:[%s13868_s25 + $0x210] sm:$0xff]  ;;  %v453_v7 = vld [vmem:[%s21261_s1] sm:$0xff]  ;;  %v13962_v11 = vsub.s32 7, %v13921_v52  ;;  %v395_v12 = vld [vmem:[%s13868_s25 + $0x218] sm:$0xff] }
  0x32   : > { %21338 = vst [vmem:[#allocation17_spill] sm:$0xff] %v13962_v11 }
  0x34   : > { %517 = vperm.xlu0 %13455, %v343_v13   ;;  %522 = vperm.xlu1 %13456, %v344_v14   ;;  %v13966_v13 = vrot.slane %v453_v7, %v13933_v60  ;;  %v13969_v14 = vrot.slane %v453_v7, %v13936_v61 }
  0x38   : > { %527 = vperm.xlu0 %13455, %v345_v15   ;;  %532 = vperm.xlu1 %13456, %v346_v16   ;;  %v396_v15 = vld [vmem:[%s13868_s25 + $0x220] sm:$0xff] }
  0x3c   : > { %537 = vperm.xlu0 %13455, %v347_v17   ;;  %542 = vperm.xlu1 %13456, %v348_v18   ;;  %v397_v18 = vld [vmem:[%s13868_s25 + $0x228] sm:$0xff] }
  0x40   : > { %547 = vperm.xlu0 %13455, %v349_v19   ;;  %552 = vperm.xlu1 %13456, %v350_v20  }
  0x44   : > { %557 = vperm.xlu0 %13455, %v351_v21   ;;  %562 = vperm.xlu1 %13456, %v352_v22   ;;  %v398_v21 = vld [vmem:[%s13868_s25 + $0x230] sm:$0xff] }
  0x48   : > { %567 = vperm.xlu0 %13455, %v353_v23   ;;  %572 = vperm.xlu1 %13456, %v354_v24  }
  0x4c   : > { %577 = vperm.xlu0 %13455, %v355_v25   ;;  %582 = vperm.xlu1 %13456, %v356_v26  }
  0x50   : > { %587 = vperm.xlu0 %13455, %v357_v27   ;;  %592 = vperm.xlu1 %13456, %v358_v28  }
  0x54   : > { %597 = vperm.xlu0 %13455, %v359_v29   ;;  %602 = vperm.xlu1 %13456, %v360_v30   ;;  %v399_v29 = vld [vmem:[%s13868_s25 + $0x238] sm:$0xff] }
  0x58   : > { %607 = vperm.xlu0 %13455, %v361_v31   ;;  %612 = vperm.xlu1 %13456, %v362_v32   ;;  %v13989_v31 = vrot.slane %v453_v7, %v13930_v59 }
  0x5c   : > { %617 = vperm.xlu0 %13455, %v363_v33   ;;  %622 = vperm.xlu1 %13456, %v364_v34   ;;  %v400_v34 = vld [vmem:[%s13868_s25 + $0x240] sm:$0xff] }
  0x60   : > { %627 = vperm.xlu0 %13455, %v365_v35   ;;  %632 = vperm.xlu1 %13456, %v366_v36   ;;  %v13999_v35 = vrot.slane %v453_v7, %v13939_v62 }
  0x64   : > { %637 = vperm.xlu0 %13455, %v367_v37   ;;  %642 = vperm.xlu1 %13456, %v368_v38  }
  0x68   : > { %647 = vperm.xlu0 %13455, %v369_v39   ;;  %652 = vperm.xlu1 %13456, %v370_v40   ;;  %v14008_v40 = vrot.slane %v453_v7, %v13953_v8  ;;  %v419_v8 = vld [vmem:[%s13868_s25 + $0x2d8] sm:$0xff] }
  0x6c   : > { %657 = vperm.xlu0 %13455, %v371_v41   ;;  %662 = vperm.xlu1 %13456, %v372_v42   ;;  %v14011_v41 = vrot.slane %v453_v7, %v13956_v9 }
  0x70   : > { %667 = vperm.xlu0 %13455, %v373_v43   ;;  %672 = vperm.xlu1 %13456, %v374_v44  }
  0x74   : > { %677 = vperm.xlu0 %13455, %v375_v45   ;;  %682 = vperm.xlu1 %13456, %v376_v46   ;;  %v14017_v46 = vrot.slane %v453_v7, %v13959_v10  ;;  %v417_v10 = vld [vmem:[%s13868_s25 + $0x2c8] sm:$0xff] }
  0x78   : > { %687 = vperm.xlu0 %13455, %v377_v47   ;;  %692 = vperm.xlu1 %13456, %v378_v48   ;;  %v14020_v47 = vrot.slane %v453_v7, %v13962_v11 }
  0x7c   : > { %697 = vperm.xlu0 %13455, %v379_v50   ;;  %702 = vperm.xlu1 %13456, %v380_v51  }
  0x80   : > { %707 = vperm.xlu0 %13455, %v381_v53   ;;  %712 = vperm.xlu1 %13456, %v382_v54  }
  0x84   : > { %717 = vperm.xlu0 %13455, %v383_v55   ;;  %722 = vperm.xlu1 %13456, %v384_v56  }
  0x88   : > { %727 = vperm.xlu0 %13455, %v385_v57   ;;  %732 = vperm.xlu1 %13456, %v386_v58   ;;  %v401_v58 = vld [vmem:[%s13868_s25 + $0x248] sm:$0xff] }
  0x8c   : > { %737 = vperm.xlu0 %13455, %v387_v63   ;;  %742 = vperm.xlu1 %13456, %v388_v0  }
  0x90   : > { %747 = vperm.xlu0 %13455, %v389_v1   ;;  %752 = vperm.xlu1 %13456, %v390_v2  }
  0x94   : > { %757 = vperm.xlu0 %13455, %v391_v3   ;;  %762 = vperm.xlu1 %13456, %v392_v4   ;;  %v402_v3 = vld [vmem:[%s13868_s25 + $0x250] sm:$0xff] }
  0x98   : > { %767 = vperm.xlu0 %13455, %v393_v5   ;;  %772 = vperm.xlu1 %13456, %v394_v6  }
  0x9b   : > { %v473_v16 = vpop.permute.xlu1 %472  ;;  %v463_v17 = vpop.permute.xlu0 %462 }
  0x9c   : > { %v1256_v19 = vmul.f32 %v13966_v13, %v473_v16  ;;  %v13975_v20 = vmul.f32 %v13969_v14, %v473_v16  ;;  %777 = vperm.xlu0 %13455, %v395_v12   ;;  %v13979_v22 = vmul.f32 %v13966_v13, %v463_v17  ;;  %v13982_v23 = vmul.f32 %v13969_v14, %v463_v17 }
  0x9d   : > { %782 = vperm.xlu1 %13456, %v396_v15   ;;  %v1027_v48 = vmul.f32 %v13989_v31, %v473_v16  ;;  %v14024_v50 = vmul.f32 %v13989_v31, %v463_v17  ;;  %v403_v15 = vld [vmem:[%s13868_s25 + $0x258] sm:$0xff] }
  0x9e   : > { %v1482_v24 = vrot.slane %v1256_v19, 1  ;;  %v2167_v25 = vrot.slane %v13975_v20, 2  ;;  %v21272_v26 = vrot.slane %v13982_v23, 2 }
  0x9f   : > { %v478_v27 = vpop.permute.xlu1 %477  ;;  %v468_v28 = vpop.permute.xlu0 %467 }
  0xa0   : > { %v13992_v32 = vmul.f32 %v13966_v13, %v478_v27  ;;  %v13995_v33 = vmul.f32 %v13969_v14, %v478_v27  ;;  %787 = vperm.xlu0 %13455, %v397_v18   ;;  %v14002_v36 = vmul.f32 %v13966_v13, %v468_v28  ;;  %v1938_v37 = vmul.f32 %v13969_v14, %v468_v28 }
  0xa1   : > { %792 = vperm.xlu1 %13456, %v398_v21   ;;  %v1028_v54 = vmul.f32 %v13989_v31, %v478_v27  ;;  %v14032_v55 = vmul.f32 %v13999_v35, %v478_v27  ;;  %v1026_v56 = vmul.f32 %v13989_v31, %v468_v28  ;;  %v404_v21 = vld [vmem:[%s13868_s25 + $0x260] sm:$0xff] }
  0xa2   : > { %v1484_v38 = vrot.slane %v13992_v32, 1  ;;  %v2169_v39 = vrot.slane %v13995_v33, 2  ;;  %v21273_v42 = vrot.slane %v14002_v36, 1  ;;  %v2165_v43 = vrot.slane %v1938_v37, 2 }
  0xa3   : > { %v488_v44 = vpop.permute.xlu1 %487  ;;  %v14014_v45 = vpop.permute.xlu0 %482 }
  0xa4   : > { %v1485_v51 = vsel %vm1478_vm0, %v1482_v24, %v1484_v38  ;;  %v14028_v53 = vmul.f32 %v13966_v13, %v488_v44  ;;  %797 = vperm.xlu0 %13455, %v399_v29   ;;  %v1483_v57 = vsel %vm1478_vm0, %v21273_v42, %v1482_v24  ;;  %v2170_v0 = vsel %vm2163_vm1, %v2167_v25, %v2169_v39  ;;  %v407_v42 = vld [vmem:[%s13868_s25 + $0x278] sm:$0xff] }
  0xa5   : > { %802 = vperm.xlu1 %13456, %v400_v34   ;;  %v1818_v63 = vadd.f32 %v1485_v51, %v1027_v48  ;;  %v14043_v1 = vmul.f32 %v13989_v31, %v488_v44  ;;  %v14046_v2 = vmul.f32 %v13969_v14, %v488_v44  ;;  %v1817_v4 = vadd.f32 %v1483_v57, %v1026_v56 }
  0xa6   : > { %v14052_v5 = vsel %vm2163_vm1, %v21272_v26, %v2165_v43  ;;  %v14055_v6 = vmul.f32 %v14008_v40, %v488_v44  ;;  %v14058_v7 = vmul.f32 %v14011_v41, %v488_v44  ;;  %v1488_v16 = vrot.slane %v14028_v53, 1  ;;  %v405_v53 = vld [vmem:[%s13868_s25 + $0x268] sm:$0xff] }
  0xa7   : > { %v14060_v12 = vpop.permute.xlu1 %497  ;;  %v21274_v17 = vrot.slane %v14046_v2, 2  ;;  %v1258_v18 = vmul.f32 %v13966_v13, %v14014_v45  ;;  %v1941_v19 = vmul.f32 %v13969_v14, %v14014_v45  ;;  %v493_v20 = vpop.permute.xlu0 %492  ;;  %v2168_v24 = vsel %vm2163_vm1, %v2165_v43, %v2167_v25 }
  0xa8   : > { %807 = vperm.xlu0 %13455, %v401_v58   ;;  %v2636_v27 = vmul.f32 %v13999_v35, %v488_v44  ;;  %v2505_v32 = vadd.f32 %v2170_v0, %v1818_v63  ;;  %v14076_v48 = vmul.f32 %v13966_v13, %v14060_v12  ;;  %v1029_v51 = vmul.f32 %v13989_v31, %v14014_v45  ;;  %v406_v0 = vld [vmem:[%s13868_s25 + $0x270] sm:$0xff] }
  0xa9   : > { %812 = vperm.xlu1 %13456, %v402_v3   ;;  %v1486_v34 = vrot.slane %v1258_v18, 1  ;;  %v2171_v37 = vrot.slane %v1941_v19, 2  ;;  %v14082_v25 = vmul.f32 %v13969_v14, %v14060_v12  ;;  %v14086_v43 = vmul.f32 %v14008_v40, %v14060_v12 }
  0xaa   : > { %v14090_v44 = vmul.f32 %v14011_v41, %v14060_v12  ;;  %v2504_v56 = vadd.f32 %v2168_v24, %v1817_v4  ;;  %v14097_v63 = vmul.f32 %v13999_v35, %v14014_v45  ;;  %v14102_v18 = vmul.f32 %v13989_v31, %v14060_v12 }
  0xab   : > { %v1487_v57 = vsel %vm1478_vm0, %v1484_v38, %v1486_v34  ;;  %v1489_v58 = vsel %vm1478_vm0, %v1486_v34, %v1488_v16  ;;  %v21275_v19 = vrot.slane %v14076_v48, 1  ;;  %v2172_v38 = vsel %vm2163_vm1, %v2169_v39, %v2171_v37  ;;  %v14112_v24 = vpop.permute.xlu0 %502 }
  0xac   : > { %817 = vperm.xlu0 %13455, %v403_v15   ;;  %v1819_v3 = vadd.f32 %v1487_v57, %v1028_v54  ;;  %v1260_v54 = vmul.f32 %v13966_v13, %v493_v20  ;;  %v1820_v34 = vadd.f32 %v1489_v58, %v1029_v51  ;;  %v2174_v57 = vsel %vm2163_vm1, %v2171_v37, %v21274_v17  ;;  %v408_v37 = vld [vmem:[%s13868_s25 + $0x280] sm:$0xff] }
  0xad   : > { %822 = vperm.xlu1 %13456, %v404_v21   ;;  %v1943_v21 = vmul.f32 %v13969_v14, %v493_v20  ;;  %v2637_v33 = vmul.f32 %v13999_v35, %v493_v20  ;;  %v1031_v39 = vmul.f32 %v13989_v31, %v493_v20  ;;  %v2866_v30 = vmul.f32 %v14008_v40, %v493_v20 }
  0xae   : > { %v1490_v26 = vrot.slane %v1260_v54, 1  ;;  %v3548_v15 = vmul.f32 %v14011_v41, %v493_v20  ;;  %v2506_v29 = vadd.f32 %v2172_v38, %v1819_v3  ;;  %v14125_v58 = vmul.f32 %v13966_v13, %v14112_v24 }
  0xaf   : > { %v2175_v49 = vrot.slane %v1943_v21, 2  ;;  %v2750_v51 = vadd.f32 %v2637_v33, %v2505_v32  ;;  %v3091_v4 = vrot.slane %v2866_v30, 1  ;;  %v2507_v28 = vadd.f32 %v2174_v57, %v1820_v34  ;;  %v409_v21 = vld [vmem:[%s13868_s25 + $0x288] sm:$0xff] }
  0xb0   : > { %827 = vperm.xlu0 %13455, %v405_v53   ;;  %v1491_v17 = vsel %vm1478_vm0, %v1488_v16, %v1490_v26  ;;  %v1493_v54 = vsel %vm1478_vm0, %v1490_v26, %v21275_v19  ;;  %v3775_v20 = vrot.slane %v3548_v15, 2  ;;  %v2749_v53 = vadd.f32 %v2636_v27, %v2504_v56 }
  0xb1   : > { %832 = vperm.xlu1 %13456, %v406_v0   ;;  %v2638_v32 = vmul.f32 %v13999_v35, %v14060_v12  ;;  %v14136_v3 = vmul.f32 %v13989_v31, %v14112_v24  ;;  %v1821_v0 = vadd.f32 %v1491_v17, %v14043_v1  ;;  %v1822_v16 = vadd.f32 %v1493_v54, %v1031_v39  ;;  %v14176_v54 = vld [vmem:[%s21261_s1 + $0x8] ss:$0 sm:$0xff] }
  0xb2   : > { %v21339_v38 = vrot.slane %v14055_v6, 1  ;;  %v21340_v30 = vrot.slane %v14086_v43, 1  ;;  %v21341_v15 = vrot.slane %v14046_v2, 2  ;;  %v21342_v57 = vrot.slane %v14082_v25, 2 }
  0xb3   : > { %v14145_v56 = vadd.f32 %v2638_v32, %v2506_v29  ;;  %v14161_v2 = vmul.f32 %v14008_v40, %v14112_v24  ;;  %v410_v29 = vld [vmem:[%s13868_s25 + $0x290] sm:$0xff]  ;;  %v21345_v32 = vrot.slane %v13979_v22, 1  ;;  %v2864_v39 = vmul.f32 %v14008_v40, %v14014_v45 }
  0xb4   : > { %v3092_v26 = vsel %vm1478_vm0, %v21339_v38, %v3091_v4  ;;  %v3094_v27 = vsel %vm1478_vm0, %v3091_v4, %v21340_v30  ;;  %837 = vperm.xlu0 %13455, %v407_v42   ;;  %v2176_v34 = vsel %vm2163_vm1, %v21341_v15, %v2175_v49  ;;  %v2178_v1 = vsel %vm2163_vm1, %v2175_v49, %v21342_v57 }
  0xb5   : > { %v3426_v17 = vadd.f32 %v3092_v26, %v2749_v53  ;;  %842 = vperm.xlu1 %13456, %v408_v37   ;;  %v3427_v33 = vadd.f32 %v3094_v27, %v2750_v51  ;;  %v14157_v42 = vmul.f32 %v13969_v14, %v14112_v24  ;;  %v21343_v4 = vrot.slane %v14058_v7, 2 }
  0xb6   : > { %v2639_v37 = vmul.f32 %v13999_v35, %v14112_v24  ;;  %v14171_v51 = vmul.f32 %v14011_v41, %v14112_v24  ;;  %v21344_v53 = vrot.slane %v14002_v36, 1  ;;  %v14183_v26 = vadd.f32 %v2176_v34, %v1821_v0  ;;  %v508_v34 = vpop.permute.xlu0 %507 }
  0xb7   : > { %v3776_v49 = vsel %vm2163_vm1, %v21343_v4, %v3775_v20  ;;  %v14185_v30 = vadd.f32 %v2178_v1, %v1822_v16  ;;  %v21346_v27 = vrot.slane %v14090_v44, 2  ;;  %v411_v4 = vld [vmem:[%s13868_s25 + $0x298] sm:$0xff]  ;;  %v21276_v19 = vrot.slane %v14161_v2, 1  ;;  %v458_v16 = vpop.permute.xlu1 %457  ;;  %v412_v1 = vld [vmem:[%s13868_s25 + $0x2a0] sm:$0xff] }
  0xb8   : > { %v1481_v38 = vsel %vm1478_vm0, %v21345_v32, %v21344_v53  ;;  %847 = vperm.xlu0 %13455, %v409_v21   ;;  %v14198_v0 = vmul.f32 %v14011_v41, %v14014_v45  ;;  %v21347_v21 = vrot.slane %v14125_v58, 1  ;;  %v21348_v32 = vrot.slane %v14076_v48, 1 }
  0xb9   : > { %v3778_v15 = vsel %vm2163_vm1, %v3775_v20, %v21346_v27  ;;  %v1816_v36 = vadd.f32 %v1481_v38, %v14024_v50  ;;  %852 = vperm.xlu1 %13456, %v410_v29   ;;  %v14201_v20 = vadd.f32 %v3776_v49, %v3426_v17  ;;  %v14214_v45 = vmul.f32 %v14020_v47, %v14112_v24 }
  0xba   : > { %v14203_v53 = vadd.f32 %v3778_v15, %v3427_v33  ;;  %v14210_v50 = vsel %vm1478_vm0, %v21348_v32, %v21347_v21  ;;  %v14216_v38 = vadd.f32 %v2639_v37, %v2507_v28  ;;  %v3088_v33 = vrot.slane %v2864_v39, 1 }
  0xbb   : > { %v2503_v17 = vadd.f32 %v14052_v5, %v1816_v36  ;;  %v3772_v49 = vrot.slane %v14198_v0, 2  ;;  %v14223_v48 = vmul.f32 %v14176_v54, %v14112_v24  ;;  %v1024_v27 = vmul.f32 %v13989_v31, %v458_v16  ;;  %v413_v0 = vld [vmem:[%s13868_s25 + $0x2a8] sm:$0xff] }
  0xbc   : > { %v14227_v15 = vmul.f32 %v13966_v13, %v508_v34  ;;  %857 = vperm.xlu0 %13455, %v411_v4   ;;  %v21349_v28 = vrot.slane %v14086_v43, 1  ;;  %v4242_v37 = vmul.f32 %v14017_v46, %v14060_v12  ;;  %v21350_v16 = vrot.slane %v14055_v6, 1 }
  0xbd   : > { %v2748_v39 = vadd.f32 %v14097_v63, %v2503_v17  ;;  %862 = vperm.xlu1 %13456, %v412_v1   ;;  %v21351_v21 = vrot.slane %v13979_v22, 1  ;;  %v414_v63 = vld [vmem:[%s13868_s25 + $0x2b0] sm:$0xff]  ;;  %v4243_v12 = vmul.f32 %v14017_v46, %v14112_v24  ;;  %v14254_v1 = vmul.f32 %v14008_v40, %v508_v34  ;;  %v416_v24 = vld [vmem:[%s13868_s25 + $0x2c0] sm:$0xff] }
  0xbe   : > { %v14234_v5 = vsel %vm1478_vm0, %v21349_v28, %v21276_v19  ;;  %v3090_v4 = vsel %vm1478_vm0, %v3088_v33, %v21350_v16  ;;  %v14248_v28 = vmul.f32 %v13969_v14, %v508_v34  ;;  %v14257_v6 = vmul.f32 %v14011_v41, %v508_v34  ;;  %v415_v16 = vld [vmem:[%s13868_s25 + $0x2b8] sm:$0xff] }
  0xbf   : > { %v1815_v43 = vadd.f32 %v21351_v21, %v1024_v27  ;;  %v3425_v17 = vadd.f32 %v3090_v4, %v2748_v39  ;;  %v21352_v22 = vrot.slane %v14058_v7, 2  ;;  %v21353_v29 = vrot.slane %v13982_v23, 2  ;;  %v513_v4 = vpop.permute.xlu1 %512 }
  0xc0   : > { %867 = vperm.xlu0 %13455, %v413_v0   ;;  %v14269_v36 = vmul.f32 %v13989_v31, %v508_v34  ;;  %v2640_v23 = vmul.f32 %v13999_v35, %v508_v34  ;;  %v14277_v0 = vmul.f32 %v14176_v54, %v508_v34  ;;  %v4244_v7 = vmul.f32 %v14017_v46, %v508_v34 }
  0xc1   : > { %v3774_v27 = vsel %vm2163_vm1, %v3772_v49, %v21352_v22  ;;  %v2502_v57 = vadd.f32 %v21353_v29, %v1815_v43  ;;  %872 = vperm.xlu1 %13456, %v414_v63   ;;  %v4473_v29 = vmul.f32 %v14020_v47, %v508_v34  ;;  %v21354_v43 = vrot.slane %v14227_v15, 1 }
  0xc2   : > { %v4111_v19 = vadd.f32 %v3774_v27, %v3425_v17  ;;  %v21355_v17 = vrot.slane %v14125_v58, 1  ;;  %v14288_v63 = vmul.f32 %v13966_v13, %v513_v4  ;;  %v5381_v21 = vrot.slane %v14277_v0, 2  ;;  %v418_v58 = vld [vmem:[%s13868_s25 + $0x2d0] sm:$0xff] }
  0xc3   : > { %v2747_v22 = vadd.f32 %v14032_v55, %v2502_v57  ;;  %v14291_v55 = vmul.f32 %v13969_v14, %v513_v4  ;;  %v4697_v32 = vrot.slane %v4473_v29, 1  ;;  %v14302_v11 = vmul.f32 %v14011_v41, %v513_v4 }
  0xc4   : > { %v14284_v27 = vsel %vm1478_vm0, %v21355_v17, %v21354_v43  ;;  %v4356_v57 = vadd.f32 %v4243_v12, %v4111_v19  ;;  %877 = vperm.xlu0 %13455, %v415_v16   ;;  %v14299_v17 = vmul.f32 %v14008_v40, %v513_v4  ;;  %v14307_v19 = vld [vmem:[%s21262_s2] ss:$0 sm:$0xff]  ;;  %v14310_v12 = vadd.f32 %v2640_v23, %v14183_v26 }
  0xc5   : > { %v3424_v39 = vadd.f32 %v3088_v33, %v2747_v22  ;;  %882 = vperm.xlu1 %13456, %v416_v24   ;;  %v21356_v16 = vrot.slane %v14214_v45, 1  ;;  %v2641_v29 = vmul.f32 %v13999_v35, %v513_v4  ;;  %v4357_v0 = vadd.f32 %v4244_v7, %v14201_v20  ;;  %v420_v20 = vld [vmem:[%s13868_s25 + $0x2e0] sm:$0xff] }
  0xc6   : > { %v14327_v23 = vmul.f32 %v14176_v54, %v513_v4  ;;  %v21358_v7 = vrot.slane %v14254_v1, 1 }
  0xc7   : > { %v4110_v33 = vadd.f32 %v3772_v49, %v3424_v39  ;;  %v4698_v22 = vsel %vm1478_vm0, %v21356_v16, %v4697_v32  ;;  %v21357_v49 = vrot.slane %v14223_v48, 2  ;;  %v14324_v39 = vmul.f32 %v14020_v47, %v513_v4 }
  0xc8   : > { %v5033_v24 = vadd.f32 %v4698_v22, %v4356_v57  ;;  %887 = vperm.xlu0 %13455, %v417_v10   ;;  %v21359_v57 = vrot.slane %v14161_v2, 1  ;;  %v1823_v22 = vadd.f32 %v14210_v50, %v14102_v18  ;;  %v14345_v43 = vadd.f32 %v2641_v29, %v14185_v30 }
  0xc9   : > { %v4355_v9 = vadd.f32 %v4242_v37, %v4110_v33  ;;  %v5382_v26 = vsel %vm2163_vm1, %v21357_v49, %v5381_v21  ;;  %v14338_v33 = vmul.f32 %v13989_v31, %v513_v4  ;;  %892 = vperm.xlu1 %13456, %v418_v58   ;;  %v21360_v49 = vrot.slane %v14214_v45, 1  ;;  %v421_v58 = vld [vmem:[%s13868_s25 + $0x2e8] sm:$0xff] }
  0xca   : > { %v14335_v16 = vsel %vm1478_vm0, %v21359_v57, %v21358_v7  ;;  %v5719_v37 = vadd.f32 %v5382_v26, %v5033_v24  ;;  %v4699_v34 = vrot.slane %v14324_v39, 1  ;;  %v518_v7 = vpop.permute.xlu0 %517  ;;  %v21361_v26 = vrot.slane %v14288_v63, 1 }
  0xcb   : > { %v5032_v10 = vadd.f32 %v21360_v49, %v4355_v9  ;;  %v21362_v57 = vrot.slane %v14227_v15, 1  ;;  %v4245_v9 = vmul.f32 %v14017_v46, %v513_v4  ;;  %v21363_v30 = vrot.slane %v14157_v42, 2 }
  0xcc   : > { %v5839_v24 = vadd.f32 %v14307_v19, %v5719_v37  ;;  %v21364_v50 = vrot.slane %v14082_v25, 2  ;;  %v21365_v29 = vrot.slane %v14223_v48, 2  ;;  %v4700_v37 = vsel %vm1478_vm0, %v4697_v32, %v4699_v34  ;;  %897 = vperm.xlu0 %13455, %v419_v8   ;;  %v422_v48 = vld [vmem:[%s13868_s25 + $0x2f0] sm:$0xff] }
  0xcd   : > { %v14355_v18 = vsel %vm1478_vm0, %v21362_v57, %v21361_v26  ;;  %v3428_v15 = vadd.f32 %v14234_v5, %v14145_v56  ;;  %v5034_v57 = vadd.f32 %v4700_v37, %v4357_v0  ;;  %v21366_v4 = vrot.slane %v14171_v51, 2  ;;  %902 = vperm.xlu1 %13456, %v420_v20  }
  0xce   : > { %v2180_v45 = vsel %vm2163_vm1, %v21364_v50, %v21363_v30  ;;  %v5718_v39 = vadd.f32 %v21365_v29, %v5032_v10  ;;  %v5952_v26 = vmax.f32 %v5839_v24, 0.0  ;;  %v21367_v2 = vrot.slane %v14090_v44, 2 }
  0xcf   : > { %v2510_v49 = vadd.f32 %v2180_v45, %v1823_v22  ;;  %v14375_v30 = vmul.f32 %v13966_v13, %v518_v7  ;;  %v21368_v22 = vrot.slane %v14327_v23, 2  ;;  %v14383_v8 = vmul.f32 %v13969_v14, %v518_v7 }
  0xd0   : > { %v3780_v25 = vsel %vm2163_vm1, %v21367_v2, %v21366_v4  ;;  %v5838_v32 = vadd.f32 %v14307_v19, %v5718_v39  ;;  %v14386_v5 = vmul.f32 %v14008_v40, %v518_v7  ;;  %6067 = vst.msk [vmem:[#allocation2 + $0x1] sm:$0xff] %vm6066_vm2, %v5952_v26  ;;  %v2642_v20 = vmul.f32 %v13999_v35, %v518_v7 }
  0xd1   : > { %v5384_v56 = vsel %vm2163_vm1, %v5381_v21, %v21368_v22  ;;  %v1500_v0 = vrot.slane %v14375_v30, 1  ;;  %v14392_v10 = vmul.f32 %v14011_v41, %v518_v7  ;;  %v4114_v24 = vadd.f32 %v3780_v25, %v3428_v15  ;;  %907 = vperm.xlu0 %13455, %v421_v58   ;;  %912 = vperm.xlu1 %13456, %v422_v48  }
  0xd2   : > { %v5720_v44 = vadd.f32 %v5384_v56, %v5034_v57  ;;  %v5951_v2 = vmax.f32 %v5838_v32, 0.0  ;;  %v3101_v21 = vrot.slane %v14386_v5, 1  ;;  %v4246_v50 = vmul.f32 %v14017_v46, %v518_v7 }
  0xd3   : > { %v21369_v45 = vrot.slane %v14299_v17, 1  ;;  %v21370_v29 = vrot.slane %v14254_v1, 1  ;;  %v4358_v37 = vadd.f32 %v4245_v9, %v14203_v53  ;;  %v2185_v57 = vrot.slane %v14383_v8, 2  ;;  %v523_v53 = vpop.permute.xlu1 %522 }
  0xd4   : > { %v5840_v26 = vadd.f32 %v14307_v19, %v5720_v44  ;;  %6065 = vst.msk [vmem:[#allocation2 - $0x7] sm:$0x80] %vm6064_vm3, %v5951_v2  ;;  %v14408_v58 = vmul.f32 %v13989_v31, %v518_v7  ;;  %v4475_v15 = vmul.f32 %v14020_v47, %v518_v7  ;;  %v5157_v1 = vmul.f32 %v14176_v54, %v518_v7  ;;  %v423_v2 = vld [vmem:[%s13868_s25 + $0x2f8] sm:$0xff] }
  0xd5   : > { %v14401_v39 = vsel %vm1478_vm0, %v21370_v29, %v21369_v45  ;;  %v1824_v4 = vadd.f32 %v14284_v27, %v14136_v3  ;;  %v21371_v25 = vrot.slane %v14288_v63, 1  ;;  %v14421_v32 = vadd.f32 %v2642_v20, %v2510_v49  ;;  %917 = vperm.xlu0 %13455, %v423_v2  }
  0xd6   : > { %v5953_v9 = vmax.f32 %v5840_v26, 0.0  ;;  %v21372_v7 = vmov %v21369_v45  ;;  %v4359_v3 = vadd.f32 %v4246_v50, %v4114_v24  ;;  %v4701_v27 = vrot.slane %v4475_v15, 1  ;;  %v424_v45 = vld [vmem:[%s13868_s25 + $0x300] sm:$0xff] }
  0xd7   : > { %v14419_v48 = vsel %vm1478_vm0, %v21371_v25, %v1500_v0  ;;  %v14429_v56 = vsel %vm1478_vm0, %v21372_v7, %v3101_v21  ;;  %v5385_v44 = vrot.slane %v5157_v1, 2  ;;  %v21373_v63 = vrot.slane %v14248_v28, 2  ;;  %922 = vperm.xlu1 %13456, %v424_v45   ;;  %v528_v7 = vpop.permute.xlu0 %527 }
  0xd8   : > { %6068 = vst.msk [vmem:[#allocation2 + $0x9] sm:$0xff] %vm6066_vm2, %v5953_v9  ;;  %v21374_v49 = vrot.slane %v14157_v42, 2  ;;  %v3429_v29 = vadd.f32 %v14335_v16, %v14216_v38  ;;  %v1266_v17 = vmul.f32 %v13966_v13, %v523_v53  ;;  %v14443_v26 = vmul.f32 %v13969_v14, %v523_v53  ;;  %v13457_v42 = vld [vmem:[%s21263_s3 + $0x10] sm:$0xff]  }
  0xd9   : > { %v4702_v24 = vsel %vm1478_vm0, %v4699_v34, %v4701_v27  ;;  %v14447_v15 = vmul.f32 %v14008_v40, %v523_v53  ;;  %v14450_v1 = vmul.f32 %v14011_v41, %v523_v53  ;;  %v21375_v16 = vrot.slane %v14257_v6, 2  ;;  %12863 = vmatprep.subr.bf16.mxu0 %v13457_v42  ;;  %13183 = vmatprep.subr.bf16.mxu1 %v13457_v42 }
  0xda   : > { %v2182_v20 = vsel %vm2163_vm1, %v21374_v49, %v21373_v63  ;;  %v5035_v38 = vadd.f32 %v4702_v24, %v4358_v37  ;;  %v21376_v9 = vrot.slane %v14171_v51, 2  ;;  %v14461_v34 = vmul.f32 %v13989_v31, %v523_v53  ;;  %12864 = vmatpush3.bf16.msra.mxu0 %v13457_v42  ;;  %13185 = vmatpush3.bf16.msra.mxu1 %v13457_v42 }
  0xdb   : > { %v2511_v50 = vadd.f32 %v2182_v20, %v1824_v4  ;;  %v2643_v4 = vmul.f32 %v13999_v35, %v523_v53  ;;  %v21377_v2 = vmov %v21368_v22  ;;  %v1502_v63 = vrot.slane %v1266_v17, 1 }
  0xdc   : > { %v3782_v25 = vsel %vm2163_vm1, %v21376_v9, %v21375_v16  ;;  %v5386_v45 = vsel %vm2163_vm1, %v21377_v2, %v5385_v44  ;;  %v3103_v49 = vrot.slane %v14447_v15, 1  ;;  %v4476_v37 = vmul.f32 %v14020_v47, %v523_v53 }
  0xdd   : > { %v5721_v51 = vadd.f32 %v5386_v45, %v5035_v38  ;;  %v4115_v20 = vadd.f32 %v3782_v25, %v3429_v29  ;;  %v2187_v24 = vrot.slane %v14443_v26, 2  ;;  %v5158_v16 = vmul.f32 %v14176_v54, %v523_v53 }
  0xde   : > { %v14471_v9 = vadd.f32 %v2643_v4, %v2511_v50  ;;  %v3787_v23 = vrot.slane %v14450_v1, 2  ;;  %v4703_v22 = vrot.slane %v4476_v37, 1  ;;  %v14475_v17 = vmul.f32 %v13966_v13, %v528_v7 }
  0xdf   : > { %v5841_v15 = vadd.f32 %v14307_v19, %v5721_v51  ;;  %v4247_v2 = vmul.f32 %v14017_v46, %v523_v53  ;;  %v5387_v38 = vrot.slane %v5158_v16, 2  ;;  %v1825_v29 = vadd.f32 %v14355_v18, %v14269_v36 }
  0xe0   : > { %v14484_v50 = vsel %vm1478_vm0, %v1500_v0, %v1502_v63  ;;  %v14489_v25 = vsel %vm1478_vm0, %v3101_v21, %v3103_v49  ;;  %v4704_v42 = vsel %vm1478_vm0, %v4701_v27, %v4703_v22  ;;  %v14493_v4 = vmul.f32 %v13989_v31, %v528_v7 }
  0xe1   : > { %v5954_v53 = vmax.f32 %v5841_v15, 0.0  ;;  %v5036_v45 = vadd.f32 %v4704_v42, %v4359_v3  ;;  %v1504_v37 = vrot.slane %v14475_v17, 1  ;;  %v14497_v36 = vmul.f32 %v13969_v14, %v528_v7 }
  0xe2   : > { %v5388_v18 = vsel %vm2163_vm1, %v5385_v44, %v5387_v38  ;;  %v21378_v30 = vrot.slane %v14291_v55, 2  ;;  %v21379_v5 = vrot.slane %v14248_v28, 2  ;;  %v14506_v21 = vmul.f32 %v14008_v40, %v528_v7 }
  0xe3   : > { %v3430_v27 = vadd.f32 %v14401_v39, %v14310_v12  ;;  %6069 = vst.msk [vmem:[#allocation2 + $0x11] sm:$0xff] %vm6066_vm2, %v5954_v53  ;;  %v4360_v3 = vadd.f32 %v4247_v2, %v4115_v20  ;;  %v5722_v51 = vadd.f32 %v5388_v18, %v5036_v45  ;;  %v2644_v15 = vmul.f32 %v13999_v35, %v528_v7  ;;  %v533_v53 = vpop.permute.xlu1 %532 }
  0xe4   : > { %v2184_v0 = vsel %vm2163_vm1, %v21379_v5, %v21378_v30  ;;  %v3105_v44 = vrot.slane %v14506_v21, 1  ;;  %v21380_v42 = vrot.slane %v14302_v11, 2  ;;  %v21381_v28 = vrot.slane %v14257_v6, 2 }
  0xe5   : > { %v2512_v16 = vadd.f32 %v2184_v0, %v1825_v29  ;;  %v4248_v5 = vmul.f32 %v14017_v46, %v528_v7  ;;  %v4477_v12 = vmul.f32 %v14020_v47, %v528_v7  ;;  %v5842_v39 = vadd.f32 %v14307_v19, %v5722_v51 }
  0xe6   : > { %v3784_v30 = vsel %vm2163_vm1, %v21381_v28, %v21380_v42  ;;  %v5159_v2 = vmul.f32 %v14176_v54, %v528_v7  ;;  %v1826_v29 = vadd.f32 %v14419_v48, %v14338_v33  ;;  %v14527_v6 = vsel %vm1478_vm0, %v1502_v63, %v1504_v37  ;;  %v425_v48 = vld [vmem:[%s13868_s25 + $0x308] sm:$0xff]  ;;  %v426_v28 = vld [vmem:[%s13868_s25 + $0x310] sm:$0xff] }
  0xe7   : > { %v4116_v20 = vadd.f32 %v3784_v30, %v3430_v27  ;;  %v14531_v18 = vmul.f32 %v14011_v41, %v528_v7  ;;  %v4705_v0 = vrot.slane %v4477_v12, 1  ;;  %v5955_v42 = vmax.f32 %v5842_v39, 0.0  ;;  %927 = vperm.xlu0 %13455, %v425_v48   ;;  %932 = vperm.xlu1 %13456, %v426_v28  }
  0xe8   : > { %v14533_v51 = vadd.f32 %v2644_v15, %v2512_v16  ;;  %v14538_v27 = vsel %vm1478_vm0, %v3103_v49, %v3105_v44  ;;  %v5389_v33 = vrot.slane %v5159_v2, 2  ;;  %v21382_v30 = vrot.slane %v14291_v55, 2  ;;  %v13458_v55 = vld [vmem:[%s21263_s3 + $0x18] sm:$0xff]  }
  0xe9   : > { %v4706_v63 = vsel %vm1478_vm0, %v4703_v22, %v4705_v0  ;;  %v3431_v16 = vadd.f32 %v14429_v56, %v14345_v43  ;;  %v14551_v15 = vmul.f32 %v13966_v13, %v533_v53  ;;  %6070 = vst.msk [vmem:[#allocation2 + $0x19] sm:$0xff] %vm6066_vm2, %v5955_v42  ;;  %v4361_v49 = vadd.f32 %v4248_v5, %v4116_v20 }
  0xea   : > { %v2186_v7 = vsel %vm2163_vm1, %v21382_v30, %v2185_v57  ;;  %v5037_v12 = vadd.f32 %v4706_v63, %v4360_v3  ;;  %v14555_v22 = vmul.f32 %v13969_v14, %v533_v53  ;;  %v5390_v2 = vsel %vm2163_vm1, %v5387_v38, %v5389_v33  ;;  %v538_v63 = vpop.permute.xlu0 %537  ;;  %12865 = vmatprep.subr.bf16.mxu0 %v13458_v55 }
  0xeb   : > { %v2513_v39 = vadd.f32 %v2186_v7, %v1826_v29  ;;  %v21383_v43 = vrot.slane %v14392_v10, 2  ;;  %v21384_v56 = vrot.slane %v14302_v11, 2  ;;  %v14567_v5 = vmul.f32 %v13989_v31, %v533_v53  ;;  %13184 = vmatprep.subr.bf16.mxu1 %v13458_v55  ;;  %12866 = vmatpush3.bf16.msra.mxu0 %v13458_v55 }
  0xec   : > { %v1506_v3 = vrot.slane %v14551_v15, 1  ;;  %v5723_v29 = vadd.f32 %v5390_v2, %v5037_v12  ;;  %v2874_v42 = vmul.f32 %v14008_v40, %v533_v53  ;;  %v4478_v28 = vmul.f32 %v14020_v47, %v533_v53  ;;  %13186 = vmatpush3.bf16.msra.mxu1 %v13458_v55 }
  0xed   : > { %v3786_v48 = vsel %vm2163_vm1, %v21384_v56, %v21383_v43  ;;  %v2645_v30 = vmul.f32 %v13999_v35, %v533_v53  ;;  %v14576_v7 = vmul.f32 %v14011_v41, %v533_v53  ;;  %v4249_v12 = vmul.f32 %v14017_v46, %v533_v53 }
  0xee   : > { %v4117_v38 = vadd.f32 %v3786_v48, %v3431_v16  ;;  %v5843_v15 = vadd.f32 %v14307_v19, %v5723_v29  ;;  %v4707_v2 = vrot.slane %v4478_v28, 1  ;;  %v5160_v43 = vmul.f32 %v14176_v54, %v533_v53 }
  0xef   : > { %v14584_v16 = vsel %vm1478_vm0, %v1504_v37, %v1506_v3  ;;  %v14586_v56 = vadd.f32 %v2645_v30, %v2513_v39  ;;  %v14589_v48 = vmul.f32 %v13966_v13, %v538_v63  ;;  %v1827_v55 = vadd.f32 %v14484_v50, %v14408_v58 }
  0xf0   : > { %v5956_v11 = vmax.f32 %v5843_v15, 0.0  ;;  %v3107_v29 = vrot.slane %v2874_v42, 1  ;;  %v4708_v20 = vsel %vm1478_vm0, %v4705_v0, %v4707_v2  ;;  %v5391_v28 = vrot.slane %v5160_v43, 2 }
  0xf1   : > { %v3791_v53 = vrot.slane %v14576_v7, 2  ;;  %v4362_v45 = vadd.f32 %v4249_v12, %v4117_v38  ;;  %v5038_v17 = vadd.f32 %v4708_v20, %v4361_v49  ;;  %v14596_v37 = vmul.f32 %v13969_v14, %v538_v63 }
  0xf2   : > { %6071 = vst.msk [vmem:[#allocation2 + $0x21] sm:$0xff] %vm6066_vm2, %v5956_v11  ;;  %v5392_v39 = vsel %vm2163_vm1, %v5389_v33, %v5391_v28  ;;  %v1508_v30 = vrot.slane %v14589_v48, 1  ;;  %v2188_v58 = vsel %vm2163_vm1, %v2185_v57, %v2187_v24  ;;  %v14607_v50 = vmul.f32 %v14008_v40, %v538_v63 }
  0xf3   : > { %v5724_v0 = vadd.f32 %v5392_v39, %v5038_v17  ;;  %v2514_v49 = vadd.f32 %v2188_v58, %v1827_v55  ;;  %v2646_v20 = vmul.f32 %v13999_v35, %v538_v63  ;;  %v3432_v42 = vadd.f32 %v14489_v25, %v14421_v32  ;;  %v543_v55 = vpop.permute.xlu1 %542 }
  0xf4   : > { %v14615_v33 = vsel %vm1478_vm0, %v3105_v44, %v3107_v29  ;;  %v14618_v38 = vmul.f32 %v13989_v31, %v538_v63  ;;  %v3109_v8 = vrot.slane %v14607_v50, 1  ;;  %v14622_v57 = vmul.f32 %v14011_v41, %v538_v63 }
  0xf5   : > { %v5844_v11 = vadd.f32 %v14307_v19, %v5724_v0  ;;  %v2193_v15 = vrot.slane %v14596_v37, 2  ;;  %v21385_v32 = vrot.slane %v14392_v10, 2  ;;  %v4479_v21 = vmul.f32 %v14020_v47, %v538_v63 }
  0xf6   : > { %v4250_v12 = vmul.f32 %v14017_v46, %v538_v63  ;;  %v5161_v43 = vmul.f32 %v14176_v54, %v538_v63  ;;  %v1828_v48 = vadd.f32 %v14527_v6, %v14461_v34  ;;  %v14637_v39 = vsel %vm1478_vm0, %v1506_v3, %v1508_v30  ;;  %v427_v6 = vld [vmem:[%s13868_s25 + $0x318] sm:$0xff]  ;;  %v428_v3 = vld [vmem:[%s13868_s25 + $0x320] sm:$0xff] }
  0xf7   : > { %v3788_v25 = vsel %vm2163_vm1, %v21385_v32, %v3787_v23  ;;  %v5957_v17 = vmax.f32 %v5844_v11, 0.0  ;;  %v14639_v10 = vadd.f32 %v2646_v20, %v2514_v49  ;;  %v4709_v58 = vrot.slane %v4479_v21, 1  ;;  %937 = vperm.xlu0 %13455, %v427_v6   ;;  %942 = vperm.xlu1 %13456, %v428_v3  }
  0xf8   : > { %v4118_v44 = vadd.f32 %v3788_v25, %v3432_v42  ;;  %v14644_v0 = vsel %vm1478_vm0, %v3107_v29, %v3109_v8  ;;  %v3793_v42 = vrot.slane %v14622_v57, 2  ;;  %v5393_v32 = vrot.slane %v5161_v43, 2 }
  0xf9   : > { %v21386_v63 = vrot.slane %v14497_v36, 2  ;;  %6072 = vst.msk [vmem:[#allocation2 + $0x29] sm:$0xff] %vm6066_vm2, %v5957_v17  ;;  %v4710_v49 = vsel %vm1478_vm0, %v4707_v2, %v4709_v58  ;;  %v3433_v20 = vadd.f32 %v14538_v27, %v14471_v9  ;;  %v1270_v29 = vmul.f32 %v13966_v13, %v543_v55 }
  0xfa   : > { %v14660_v11 = vmul.f32 %v13969_v14, %v543_v55  ;;  %v4363_v25 = vadd.f32 %v4250_v12, %v4118_v44  ;;  %v5039_v21 = vadd.f32 %v4710_v49, %v4362_v45  ;;  %v5394_v43 = vsel %vm2163_vm1, %v5391_v28, %v5393_v32 }
  0xfb   : > { %v2190_v34 = vsel %vm2163_vm1, %v2187_v24, %v21386_v63  ;;  %v2876_v24 = vmul.f32 %v14008_v40, %v543_v55  ;;  %v21387_v17 = vrot.slane %v14531_v18, 2  ;;  %v14670_v27 = vmul.f32 %v13989_v31, %v543_v55 }
  0xfc   : > { %v2515_v26 = vadd.f32 %v2190_v34, %v1828_v48  ;;  %v1510_v2 = vrot.slane %v1270_v29, 1  ;;  %v5725_v63 = vadd.f32 %v5394_v43, %v5039_v21  ;;  %v2647_v44 = vmul.f32 %v13999_v35, %v543_v55  ;;  %v548_v48 = vpop.permute.xlu0 %547 }
  0xfd   : > { %v3790_v9 = vsel %vm2163_vm1, %v3787_v23, %v21387_v17  ;;  %v14674_v45 = vmul.f32 %v14011_v41, %v543_v55  ;;  %v4480_v12 = vmul.f32 %v14020_v47, %v543_v55  ;;  %v4251_v1 = vmul.f32 %v14017_v46, %v543_v55 }
  0xfe   : > { %v4119_v28 = vadd.f32 %v3790_v9, %v3433_v20  ;;  %v5162_v23 = vmul.f32 %v14176_v54, %v543_v55  ;;  %v5845_v6 = vadd.f32 %v14307_v19, %v5725_v63  ;;  %v14681_v3 = vadd.f32 %v2647_v44, %v2515_v26 }
  0xff   : > { %v3111_v49 = vrot.slane %v2876_v24, 1  ;;  %v4711_v29 = vrot.slane %v4480_v12, 1  ;;  %v14684_v21 = vsel %vm1478_vm0, %v1508_v30, %v1510_v2  ;;  %v14687_v17 = vmul.f32 %v13966_v13, %v548_v48 }
 0x100   : > { %v5395_v43 = vrot.slane %v5162_v23, 2  ;;  %v1829_v20 = vadd.f32 %v14584_v16, %v14493_v4  ;;  %v5958_v9 = vmax.f32 %v5845_v6, 0.0  ;;  %v3795_v34 = vrot.slane %v14674_v45, 2 }
 0x101   : > { %v4712_v55 = vsel %vm1478_vm0, %v4709_v58, %v4711_v29  ;;  %v14694_v26 = vmul.f32 %v13969_v14, %v548_v48  ;;  %v21388_v30 = vrot.slane %v14555_v22, 2  ;;  %v21389_v44 = vrot.slane %v14497_v36, 2 }
 0x102   : > { %v5040_v24 = vadd.f32 %v4712_v55, %v4363_v25  ;;  %v5396_v63 = vsel %vm2163_vm1, %v5393_v32, %v5395_v43  ;;  %v2648_v23 = vmul.f32 %v13999_v35, %v548_v48  ;;  %6073 = vst.msk [vmem:[#allocation2 + $0x31] sm:$0xff] %vm6066_vm2, %v5958_v9  ;;  %v1512_v4 = vrot.slane %v14687_v17, 1 }
 0x103   : > { %v2192_v12 = vsel %vm2163_vm1, %v21389_v44, %v21388_v30  ;;  %v14706_v58 = vmul.f32 %v14008_v40, %v548_v48  ;;  %v3434_v25 = vadd.f32 %v14615_v33, %v14533_v51  ;;  %v4364_v32 = vadd.f32 %v4251_v1, %v4119_v28 }
 0x104   : > { %v2516_v16 = vadd.f32 %v2192_v12, %v1829_v20  ;;  %v5726_v6 = vadd.f32 %v5396_v63, %v5040_v24  ;;  %v14711_v55 = vmul.f32 %v14011_v41, %v548_v48  ;;  %v21390_v36 = vrot.slane %v14531_v18, 2  ;;  %v553_v24 = vpop.permute.xlu1 %552 }
 0x105   : > { %v14721_v17 = vsel %vm1478_vm0, %v3109_v8, %v3111_v49  ;;  %v3113_v20 = vrot.slane %v14706_v58, 1  ;;  %v4252_v51 = vmul.f32 %v14017_v46, %v548_v48  ;;  %v4481_v28 = vmul.f32 %v14020_v47, %v548_v48 }
 0x106   : > { %v3792_v9 = vsel %vm2163_vm1, %v21390_v36, %v3791_v53  ;;  %v5846_v33 = vadd.f32 %v14307_v19, %v5726_v6  ;;  %v5163_v1 = vmul.f32 %v14176_v54, %v548_v48  ;;  %v1830_v18 = vadd.f32 %v14637_v39, %v14567_v5 }
 0x107   : > { %v4120_v30 = vadd.f32 %v3792_v9, %v3434_v25  ;;  %v14731_v50 = vmul.f32 %v13989_v31, %v548_v48  ;;  %v14734_v8 = vsel %vm1478_vm0, %v1510_v2, %v1512_v4  ;;  %v14737_v44 = vadd.f32 %v2648_v23, %v2516_v16 }
 0x108   : > { %v5959_v12 = vmax.f32 %v5846_v33, 0.0  ;;  %v4713_v6 = vrot.slane %v4481_v28, 1  ;;  %v5397_v36 = vrot.slane %v5163_v1, 2  ;;  %v14743_v5 = vsel %vm1478_vm0, %v3111_v49, %v3113_v20 }
 0x109   : > { %v21391_v39 = vrot.slane %v14555_v22, 2  ;;  %v3435_v48 = vadd.f32 %v14644_v0, %v14586_v56  ;;  %v1272_v23 = vmul.f32 %v13966_v13, %v553_v24  ;;  %v4365_v16 = vadd.f32 %v4252_v51, %v4120_v30 }
 0x10a   : > { %6074 = vst.msk [vmem:[#allocation2 + $0x39] sm:$0xff] %vm6066_vm2, %v5959_v12  ;;  %v4714_v9 = vsel %vm1478_vm0, %v4711_v29, %v4713_v6  ;;  %v14756_v49 = vmul.f32 %v13969_v14, %v553_v24  ;;  %v5398_v1 = vsel %vm2163_vm1, %v5395_v43, %v5397_v36  ;;  %v3794_v22 = vsel %vm2163_vm1, %v3791_v53, %v3793_v42 }
 0x10b   : > { %v2194_v2 = vsel %vm2163_vm1, %v21391_v39, %v2193_v15  ;;  %v5041_v28 = vadd.f32 %v4714_v9, %v4364_v32  ;;  %v1514_v56 = vrot.slane %v1272_v23, 1  ;;  %v2649_v0 = vmul.f32 %v13999_v35, %v553_v24 }
 0x10c   : > { %v2517_v33 = vadd.f32 %v2194_v2, %v1830_v18  ;;  %v2878_v30 = vmul.f32 %v14008_v40, %v553_v24  ;;  %v14767_v29 = vmul.f32 %v14011_v41, %v553_v24  ;;  %v4482_v51 = vmul.f32 %v14020_v47, %v553_v24  ;;  %v558_v18 = vpop.permute.xlu0 %557 }
 0x10d   : > { %v5727_v32 = vadd.f32 %v5398_v1, %v5041_v28  ;;  %v4121_v12 = vadd.f32 %v3794_v22, %v3435_v48  ;;  %v14771_v43 = vmul.f32 %v13989_v31, %v553_v24  ;;  %v14774_v7 = vmul.f32 %v14176_v54, %v553_v24 }
 0x10e   : > { %v14777_v39 = vadd.f32 %v2649_v0, %v2517_v33  ;;  %v4253_v2 = vmul.f32 %v14017_v46, %v553_v24  ;;  %v4715_v23 = vrot.slane %v4482_v51, 1  ;;  %v14782_v25 = vsel %vm1478_vm0, %v1512_v4, %v1514_v56 }
 0x10f   : > { %v5847_v9 = vadd.f32 %v14307_v19, %v5727_v32  ;;  %v5399_v48 = vrot.slane %v14774_v7, 2  ;;  %v14786_v28 = vmul.f32 %v13966_v13, %v558_v18  ;;  %v3115_v1 = vrot.slane %v2878_v30, 1 }
 0x110   : > { %v3799_v22 = vrot.slane %v14767_v29, 2  ;;  %v4716_v53 = vsel %vm1478_vm0, %v4713_v6, %v4715_v23  ;;  %v1831_v33 = vadd.f32 %v14684_v21, %v14618_v38  ;;  %v4366_v0 = vadd.f32 %v4253_v2, %v4121_v12 }
 0x111   : > { %v5960_v24 = vmax.f32 %v5847_v9, 0.0  ;;  %v5042_v51 = vadd.f32 %v4716_v53, %v4365_v16  ;;  %v14793_v32 = vmul.f32 %v13969_v14, %v558_v18  ;;  %v5400_v4 = vsel %vm2163_vm1, %v5397_v36, %v5399_v48 }
 0x112   : > { %v1516_v7 = vrot.slane %v14786_v28, 1  ;;  %v21392_v63 = vrot.slane %v14660_v11, 2  ;;  %v14803_v6 = vmul.f32 %v14008_v40, %v558_v18  ;;  %v2650_v16 = vmul.f32 %v13999_v35, %v558_v18 }
 0x113   : > { %6075 = vst.msk [vmem:[#allocation2 + $0x41] sm:$0xff] %vm6066_vm2, %v5960_v24  ;;  %v5728_v38 = vadd.f32 %v5400_v4, %v5042_v51  ;;  %v3436_v36 = vadd.f32 %v14721_v17, %v14639_v10  ;;  %v14812_v12 = vsel %vm1478_vm0, %v3113_v20, %v3115_v1  ;;  %v14815_v37 = vmul.f32 %v13989_v31, %v558_v18  ;;  %v563_v24 = vpop.permute.xlu1 %562 }
 0x114   : > { %v2196_v30 = vsel %vm2163_vm1, %v2193_v15, %v21392_v63  ;;  %v3117_v15 = vrot.slane %v14803_v6, 1  ;;  %v14819_v63 = vmul.f32 %v14011_v41, %v558_v18  ;;  %v2201_v2 = vrot.slane %v14793_v32, 2 }
 0x115   : > { %v2518_v21 = vadd.f32 %v2196_v30, %v1831_v33  ;;  %v5848_v53 = vadd.f32 %v14307_v19, %v5728_v38  ;;  %v3796_v10 = vsel %vm2163_vm1, %v3793_v42, %v3795_v34  ;;  %v4483_v58 = vmul.f32 %v14020_v47, %v558_v18 }
 0x116   : > { %v4122_v17 = vadd.f32 %v3796_v10, %v3436_v36  ;;  %v4254_v20 = vmul.f32 %v14017_v46, %v558_v18  ;;  %v5165_v9 = vmul.f32 %v14176_v54, %v558_v18  ;;  %v1832_v33 = vadd.f32 %v14734_v8, %v14670_v27  ;;  %v429_v36 = vld [vmem:[%s13868_s25 + $0x328] sm:$0xff] }
 0x117   : > { %v5961_v51 = vmax.f32 %v5848_v53, 0.0  ;;  %v14836_v57 = vsel %vm1478_vm0, %v1514_v56, %v1516_v7  ;;  %v14838_v4 = vadd.f32 %v2650_v16, %v2518_v21  ;;  %v4717_v42 = vrot.slane %v4483_v58, 1  ;;  %v430_v56 = vld [vmem:[%s13868_s25 + $0x330] sm:$0xff]  ;;  %v13459_v21 = vld [vmem:[%s21263_s3] sm:$0xff]   ;;  %947 = vperm.xlu0 %13455, %v429_v36   ;;  %v14889_v36 = vld [vmem:[%s21261_s1 + $0x8] ss:$0 sm:$0xff] }
 0x118   : > { %v14843_v30 = vsel %vm1478_vm0, %v3115_v1, %v3117_v15  ;;  %v21285_v54 = vrot.slane %v14819_v63, 2  ;;  %v5401_v18 = vrot.slane %v5165_v9, 2  ;;  %v21393_v27 = vrot.slane %v14694_v26, 2  ;;  %952 = vperm.xlu1 %13456, %v430_v56   ;;  %12895 = vmatprep.subr.bf16.mxu0 %v13459_v21  ;;  %v431_v21 = vld [vmem:[%s13868_s25 + $0x338] sm:$0xff] }
 0x119   : > { %v21394_v8 = vrot.slane %v14660_v11, 2  ;;  %6076 = vst.msk [vmem:[#allocation2 + $0x49] sm:$0xff] %vm6066_vm2, %v5961_v51  ;;  %v4718_v1 = vsel %vm1478_vm0, %v4715_v23, %v4717_v42  ;;  %v3437_v16 = vadd.f32 %v14743_v5, %v14681_v3  ;;  %v14861_v53 = vmul.f32 %v13966_v13, %v563_v24 }
 0x11a   : > { %v14864_v11 = vmul.f32 %v13969_v14, %v563_v24  ;;  %v4367_v10 = vadd.f32 %v4254_v20, %v4122_v17  ;;  %v5043_v58 = vadd.f32 %v4718_v1, %v4366_v0  ;;  %v5402_v23 = vsel %vm2163_vm1, %v5399_v48, %v5401_v18  ;;  %v432_v1 = vld [vmem:[%s13868_s25 + $0x340] sm:$0xff] }
 0x11b   : > { %v2198_v38 = vsel %vm2163_vm1, %v21394_v8, %v21393_v27  ;;  %v14867_v27 = vmul.f32 %v14008_v40, %v563_v24  ;;  %v21395_v51 = vrot.slane %v14711_v55, 2  ;;  %v14876_v5 = vmul.f32 %v13989_v31, %v563_v24  ;;  %v568_v8 = vpop.permute.xlu0 %567  ;;  %957 = vperm.xlu0 %13455, %v431_v21  }
 0x11c   : > { %v2519_v9 = vadd.f32 %v2198_v38, %v1832_v33  ;;  %v1518_v0 = vrot.slane %v14861_v53, 1  ;;  %v5729_v17 = vadd.f32 %v5402_v23, %v5043_v58  ;;  %v2651_v20 = vmul.f32 %v13999_v35, %v563_v24  ;;  %962 = vperm.xlu1 %13456, %v432_v1  }
 0x11d   : > { %v3798_v3 = vsel %vm2163_vm1, %v3795_v34, %v21395_v51  ;;  %v14881_v33 = vmul.f32 %v14011_v41, %v563_v24  ;;  %v4484_v48 = vmul.f32 %v14020_v47, %v563_v24  ;;  %v4255_v34 = vmul.f32 %v14017_v46, %v563_v24 }
 0x11e   : > { %v4123_v38 = vadd.f32 %v3798_v3, %v3437_v16  ;;  %v5166_v56 = vmul.f32 %v14889_v36, %v563_v24  ;;  %v5849_v53 = vadd.f32 %v14307_v19, %v5729_v17  ;;  %v14895_v58 = vadd.f32 %v2651_v20, %v2519_v9 }
 0x11f   : > { %v3119_v23 = vrot.slane %v14867_v27, 1  ;;  %v4719_v16 = vrot.slane %v4484_v48, 1  ;;  %v14901_v51 = vsel %vm1478_vm0, %v1516_v7, %v1518_v0  ;;  %v14904_v45 = vmul.f32 %v13966_v13, %v568_v8 }
 0x120   : > { %v5403_v3 = vrot.slane %v5166_v56, 2  ;;  %v1833_v24 = vadd.f32 %v14782_v25, %v14731_v50  ;;  %v5962_v17 = vmax.f32 %v5849_v53, 0.0  ;;  %v3803_v9 = vrot.slane %v14881_v33, 2 }
 0x121   : > { %v4720_v27 = vsel %vm1478_vm0, %v4717_v42, %v4719_v16  ;;  %v14911_v20 = vmul.f32 %v13969_v14, %v568_v8  ;;  %v21396_v7 = vrot.slane %v14756_v49, 2  ;;  %v21397_v56 = vrot.slane %v14694_v26, 2 }
 0x122   : > { %v5044_v48 = vadd.f32 %v4720_v27, %v4367_v10  ;;  %v5404_v28 = vsel %vm2163_vm1, %v5401_v18, %v5403_v3  ;;  %v2652_v1 = vmul.f32 %v13999_v35, %v568_v8  ;;  %6077 = vst.msk [vmem:[#allocation2 + $0x51] sm:$0xff] %vm6066_vm2, %v5962_v17  ;;  %v1520_v50 = vrot.slane %v14904_v45, 1 }
 0x123   : > { %v2200_v21 = vsel %vm2163_vm1, %v21397_v56, %v21396_v7  ;;  %v14923_v42 = vmul.f32 %v14008_v40, %v568_v8  ;;  %v3438_v10 = vadd.f32 %v14812_v12, %v14737_v44  ;;  %v4368_v18 = vadd.f32 %v4255_v34, %v4123_v38 }
 0x124   : > { %v2520_v25 = vadd.f32 %v2200_v21, %v1833_v24  ;;  %v5730_v53 = vadd.f32 %v5404_v28, %v5044_v48  ;;  %v14928_v27 = vmul.f32 %v14011_v41, %v568_v8  ;;  %v21398_v26 = vrot.slane %v14711_v55, 2  ;;  %v573_v48 = vpop.permute.xlu1 %572 }
 0x125   : > { %v14938_v45 = vsel %vm1478_vm0, %v3117_v15, %v3119_v23  ;;  %v3121_v24 = vrot.slane %v14923_v42, 1  ;;  %v4256_v44 = vmul.f32 %v14017_v46, %v568_v8  ;;  %v4485_v38 = vmul.f32 %v14020_v47, %v568_v8 }
 0x126   : > { %v3800_v17 = vsel %vm2163_vm1, %v21398_v26, %v3799_v22  ;;  %v5850_v12 = vadd.f32 %v14307_v19, %v5730_v53  ;;  %v5167_v34 = vmul.f32 %v14889_v36, %v568_v8  ;;  %v1834_v55 = vadd.f32 %v14836_v57, %v14771_v43 }
 0x127   : > { %v4124_v7 = vadd.f32 %v3800_v17, %v3438_v10  ;;  %v14948_v6 = vmul.f32 %v13989_v31, %v568_v8  ;;  %v14951_v15 = vsel %vm1478_vm0, %v1518_v0, %v1520_v50  ;;  %v14954_v56 = vadd.f32 %v2652_v1, %v2520_v25 }
 0x128   : > { %v5963_v21 = vmax.f32 %v5850_v12, 0.0  ;;  %v4721_v53 = vrot.slane %v4485_v38, 1  ;;  %v5405_v26 = vrot.slane %v5167_v34, 2  ;;  %v14960_v43 = vsel %vm1478_vm0, %v3119_v23, %v3121_v24  ;;  %v433_v34 = vld [vmem:[%s13868_s25 + $0x348] sm:$0xff] }
 0x129   : > { %v21399_v57 = vrot.slane %v14756_v49, 2  ;;  %v3439_v8 = vadd.f32 %v14843_v30, %v14777_v39  ;;  %v14970_v1 = vmul.f32 %v13966_v13, %v573_v48  ;;  %v4369_v25 = vadd.f32 %v4256_v44, %v4124_v7  ;;  %967 = vperm.xlu0 %13455, %v433_v34  }
 0x12a   : > { %6078 = vst.msk [vmem:[#allocation2 + $0x59] sm:$0xff] %vm6066_vm2, %v5963_v21  ;;  %v4722_v17 = vsel %vm1478_vm0, %v4719_v16, %v4721_v53  ;;  %v14975_v23 = vmul.f32 %v13969_v14, %v573_v48  ;;  %v5406_v49 = vsel %vm2163_vm1, %v5403_v3, %v5405_v26  ;;  %v3802_v39 = vsel %vm2163_vm1, %v3799_v22, %v21285_v54  ;;  %v434_v21 = vld [vmem:[%s13868_s25 + $0x350] sm:$0xff]  ;;  %v578_v3 = vpop.permute.xlu0 %577 }
 0x12b   : > { %v2202_v0 = vsel %vm2163_vm1, %v21399_v57, %v2201_v2  ;;  %v5045_v38 = vadd.f32 %v4722_v17, %v4368_v18  ;;  %v1522_v30 = vrot.slane %v14970_v1, 1  ;;  %v2653_v7 = vmul.f32 %v13999_v35, %v573_v48  ;;  %972 = vperm.xlu1 %13456, %v434_v21  }
 0x12c   : > { %v2521_v12 = vadd.f32 %v2202_v0, %v1834_v55  ;;  %v2882_v16 = vmul.f32 %v14008_v40, %v573_v48  ;;  %v14989_v44 = vmul.f32 %v14011_v41, %v573_v48  ;;  %v4486_v18 = vmul.f32 %v14020_v47, %v573_v48 }
 0x12d   : > { %v5731_v55 = vadd.f32 %v5406_v49, %v5045_v38  ;;  %v4125_v57 = vadd.f32 %v3802_v39, %v3439_v8  ;;  %v14993_v29 = vmul.f32 %v13989_v31, %v573_v48  ;;  %v5168_v22 = vmul.f32 %v14889_v36, %v573_v48 }
 0x12e   : > { %v2207_v0 = vrot.slane %v14975_v23, 2  ;;  %v14997_v1 = vadd.f32 %v2653_v7, %v2521_v12  ;;  %v4257_v17 = vmul.f32 %v14017_v46, %v573_v48  ;;  %v4723_v10 = vrot.slane %v4486_v18, 1 }
 0x12f   : > { %v5851_v28 = vadd.f32 %v14307_v19, %v5731_v55  ;;  %v15002_v54 = vsel %vm1478_vm0, %v1520_v50, %v1522_v30  ;;  %v5407_v38 = vrot.slane %v5168_v22, 2  ;;  %v15005_v8 = vmul.f32 %v13966_v13, %v578_v3  ;;  %v15043_v22 = vld [vmem:[%s21262_s2] ss:$0 sm:$0xff] }
 0x130   : > { %v3123_v49 = vrot.slane %v2882_v16, 1  ;;  %v3807_v39 = vrot.slane %v14989_v44, 2  ;;  %v4724_v34 = vsel %vm1478_vm0, %v4721_v53, %v4723_v10  ;;  %v1835_v12 = vadd.f32 %v14901_v51, %v14815_v37 }
 0x131   : > { %v5964_v21 = vmax.f32 %v5851_v28, 0.0  ;;  %v4370_v48 = vadd.f32 %v4257_v17, %v4125_v57  ;;  %v5046_v7 = vadd.f32 %v4724_v34, %v4369_v25  ;;  %v15012_v19 = vmul.f32 %v13969_v14, %v578_v3 }
 0x132   : > { %v5408_v50 = vsel %vm2163_vm1, %v5405_v26, %v5407_v38  ;;  %v1524_v18 = vrot.slane %v15005_v8, 1  ;;  %v21400_v55 = vrot.slane %v14864_v11, 2  ;;  %v15022_v53 = vmul.f32 %v14008_v40, %v578_v3 }
 0x133   : > { %6079 = vst.msk [vmem:[#allocation2 + $0x61] sm:$0xff] %vm6066_vm2, %v5964_v21  ;;  %v5732_v37 = vadd.f32 %v5408_v50, %v5046_v7  ;;  %v2654_v28 = vmul.f32 %v13999_v35, %v578_v3  ;;  %v3440_v26 = vadd.f32 %v14938_v45, %v14838_v4  ;;  %v15031_v25 = vsel %vm1478_vm0, %v3121_v24, %v3123_v49  ;;  %v583_v7 = vpop.permute.xlu1 %582 }
 0x134   : > { %v2204_v16 = vsel %vm2163_vm1, %v2201_v2, %v21400_v55  ;;  %v15034_v32 = vmul.f32 %v13989_v31, %v578_v3  ;;  %v3125_v2 = vrot.slane %v15022_v53, 1  ;;  %v15038_v57 = vmul.f32 %v14011_v41, %v578_v3 }
 0x135   : > { %v2522_v51 = vadd.f32 %v2204_v16, %v1835_v12  ;;  %v5852_v4 = vadd.f32 %v15043_v22, %v5732_v37  ;;  %v2209_v42 = vrot.slane %v15012_v19, 2  ;;  %v21401_v45 = vrot.slane %v14819_v63, 2 }
 0x136   : > { %v4487_v17 = vmul.f32 %v14020_v47, %v578_v3  ;;  %v4258_v34 = vmul.f32 %v14017_v46, %v578_v3  ;;  %v5169_v12 = vmul.f32 %v14889_v36, %v578_v3  ;;  %v1836_v21 = vadd.f32 %v14951_v15, %v14876_v5 }
 0x137   : > { %v3804_v24 = vsel %vm2163_vm1, %v21401_v45, %v3803_v9  ;;  %v5965_v50 = vmax.f32 %v5852_v4, 0.0  ;;  %v15058_v55 = vsel %vm1478_vm0, %v1522_v30, %v1524_v18  ;;  %v15060_v16 = vadd.f32 %v2654_v28, %v2522_v51  ;;  %v593_v53 = vpop.permute.xlu1 %592 }
 0x138   : > { %v4126_v8 = vadd.f32 %v3804_v24, %v3440_v26  ;;  %v4725_v63 = vrot.slane %v4487_v17, 1  ;;  %v15065_v37 = vsel %vm1478_vm0, %v3123_v49, %v3125_v2  ;;  %v5409_v45 = vrot.slane %v5169_v12, 2 }
 0x139   : > { %v21402_v3 = vrot.slane %v14911_v20, 2  ;;  %v21403_v5 = vrot.slane %v14864_v11, 2  ;;  %6080 = vst.msk [vmem:[#allocation2 + $0x69] sm:$0xff] %vm6066_vm2, %v5965_v50  ;;  %v3441_v51 = vadd.f32 %v14960_v43, %v14895_v58  ;;  %v1278_v28 = vmul.f32 %v13966_v13, %v583_v7 }
 0x13a   : > { %v4726_v30 = vsel %vm1478_vm0, %v4723_v10, %v4725_v63  ;;  %v15079_v49 = vmul.f32 %v13969_v14, %v583_v7  ;;  %v4371_v4 = vadd.f32 %v4258_v34, %v4126_v8  ;;  %v2884_v12 = vmul.f32 %v14008_v40, %v583_v7  ;;  %v588_v34 = vpop.permute.xlu0 %587 }
 0x13b   : > { %v2206_v15 = vsel %vm2163_vm1, %v21403_v5, %v21402_v3  ;;  %v5047_v24 = vadd.f32 %v4726_v30, %v4370_v48  ;;  %v5410_v11 = vsel %vm2163_vm1, %v5407_v38, %v5409_v45  ;;  %v21404_v3 = vrot.slane %v14928_v27, 2 }
 0x13c   : > { %v2523_v17 = vadd.f32 %v2206_v15, %v1836_v21  ;;  %v15089_v58 = vmul.f32 %v13989_v31, %v583_v7  ;;  %v1526_v43 = vrot.slane %v1278_v28, 1  ;;  %v2655_v5 = vmul.f32 %v13999_v35, %v583_v7 }
 0x13d   : > { %v3806_v10 = vsel %vm2163_vm1, %v3803_v9, %v21404_v3  ;;  %v5733_v50 = vadd.f32 %v5410_v11, %v5047_v24  ;;  %v15093_v48 = vmul.f32 %v14011_v41, %v583_v7  ;;  %v4488_v8 = vmul.f32 %v14020_v47, %v583_v7 }
 0x13e   : > { %v4127_v38 = vadd.f32 %v3806_v10, %v3441_v51  ;;  %v4259_v33 = vmul.f32 %v14017_v46, %v583_v7  ;;  %v5170_v9 = vmul.f32 %v14889_v36, %v583_v7  ;;  %v15100_v30 = vadd.f32 %v2655_v5, %v2523_v17 }
 0x13f   : > { %v5853_v15 = vadd.f32 %v15043_v22, %v5733_v50  ;;  %v3127_v28 = vrot.slane %v2884_v12, 1  ;;  %v4727_v24 = vrot.slane %v4488_v8, 1  ;;  %v15103_v11 = vsel %vm1478_vm0, %v1524_v18, %v1526_v43 }
 0x140   : > { %v5411_v3 = vrot.slane %v5170_v9, 2  ;;  %v15106_v26 = vmul.f32 %v13966_v13, %v588_v34  ;;  %v1837_v51 = vadd.f32 %v15002_v54, %v14948_v6  ;;  %v3811_v21 = vrot.slane %v15093_v48, 2 }
 0x141   : > { %v5966_v10 = vmax.f32 %v5853_v15, 0.0  ;;  %v4728_v7 = vsel %vm1478_vm0, %v4725_v63, %v4727_v24  ;;  %v15113_v17 = vmul.f32 %v13969_v14, %v588_v34  ;;  %v21405_v50 = vrot.slane %v14911_v20, 2 }
 0x142   : > { %v5048_v12 = vadd.f32 %v4728_v7, %v4371_v4  ;;  %v5412_v18 = vsel %vm2163_vm1, %v5409_v45, %v5411_v3  ;;  %v2656_v54 = vmul.f32 %v13999_v35, %v588_v34  ;;  %v1528_v6 = vrot.slane %v15106_v26, 1  ;;  %v435_v7 = vld [vmem:[%s13868_s25 + $0x358] sm:$0xff]  ;;  %v436_v26 = vld [vmem:[%s13868_s25 + $0x360] sm:$0xff] }
 0x143   : > { %v2208_v5 = vsel %vm2163_vm1, %v21405_v50, %v2207_v0  ;;  %6081 = vst.msk [vmem:[#allocation2 + $0x71] sm:$0xff] %vm6066_vm2, %v5966_v10  ;;  %v15125_v8 = vmul.f32 %v14008_v40, %v588_v34  ;;  %v3442_v4 = vadd.f32 %v15031_v25, %v14954_v56  ;;  %v4372_v45 = vadd.f32 %v4259_v33, %v4127_v38 }
 0x144   : > { %v2524_v63 = vadd.f32 %v2208_v5, %v1837_v51  ;;  %v5734_v9 = vadd.f32 %v5412_v18, %v5048_v12  ;;  %v15130_v15 = vmul.f32 %v14011_v41, %v588_v34  ;;  %v21406_v20 = vrot.slane %v14928_v27, 2  ;;  %977 = vperm.xlu0 %13455, %v435_v7   ;;  %982 = vperm.xlu1 %13456, %v436_v26  }
 0x145   : > { %v15142_v51 = vsel %vm1478_vm0, %v3125_v2, %v3127_v28  ;;  %v3129_v56 = vrot.slane %v15125_v8, 1  ;;  %v4260_v38 = vmul.f32 %v14017_v46, %v588_v34  ;;  %v4489_v27 = vmul.f32 %v14020_v47, %v588_v34 }
 0x146   : > { %v3808_v10 = vsel %vm2163_vm1, %v21406_v20, %v3807_v39  ;;  %v5854_v33 = vadd.f32 %v15043_v22, %v5734_v9  ;;  %v5171_v12 = vmul.f32 %v14889_v36, %v588_v34  ;;  %v1838_v18 = vadd.f32 %v15058_v55, %v14993_v29 }
 0x147   : > { %v4128_v25 = vadd.f32 %v3808_v10, %v3442_v4  ;;  %v15152_v2 = vmul.f32 %v13989_v31, %v588_v34  ;;  %v15155_v50 = vsel %vm1478_vm0, %v1526_v43, %v1528_v6  ;;  %v2213_v5 = vrot.slane %v15113_v17, 2 }
 0x148   : > { %v15158_v4 = vadd.f32 %v2656_v54, %v2524_v63  ;;  %v5967_v20 = vmax.f32 %v5854_v33, 0.0  ;;  %v4729_v10 = vrot.slane %v4489_v27, 1  ;;  %v5413_v7 = vrot.slane %v5171_v12, 2  ;;  %v598_v12 = vpop.permute.xlu0 %597 }
 0x149   : > { %v15164_v29 = vsel %vm1478_vm0, %v3127_v28, %v3129_v56  ;;  %v2210_v55 = vsel %vm2163_vm1, %v2207_v0, %v2209_v42  ;;  %v3443_v43 = vadd.f32 %v15065_v37, %v14997_v1  ;;  %v1280_v34 = vmul.f32 %v13966_v13, %v593_v53 }
 0x14a   : > { %6082 = vst.msk [vmem:[#allocation2 + $0x79] sm:$0xff] %vm6066_vm2, %v5967_v20  ;;  %v4373_v54 = vadd.f32 %v4260_v38, %v4128_v25  ;;  %v4730_v63 = vsel %vm1478_vm0, %v4727_v24, %v4729_v10  ;;  %v2525_v26 = vadd.f32 %v2210_v55, %v1838_v18  ;;  %v15177_v28 = vmul.f32 %v13969_v14, %v593_v53 }
 0x14b   : > { %v5049_v33 = vadd.f32 %v4730_v63, %v4372_v45  ;;  %v5414_v27 = vsel %vm2163_vm1, %v5411_v3, %v5413_v7  ;;  %v21407_v23 = vrot.slane %v15038_v57, 2  ;;  %v1530_v1 = vrot.slane %v1280_v34, 1 }
 0x14c   : > { %v2657_v37 = vmul.f32 %v13999_v35, %v593_v53  ;;  %v2886_v25 = vmul.f32 %v14008_v40, %v593_v53  ;;  %v15188_v24 = vmul.f32 %v14011_v41, %v593_v53  ;;  %v4490_v38 = vmul.f32 %v14020_v47, %v593_v53 }
 0x14d   : > { %v3810_v0 = vsel %vm2163_vm1, %v3807_v39, %v21407_v23  ;;  %v5735_v45 = vadd.f32 %v5414_v27, %v5049_v33  ;;  %v15192_v3 = vmul.f32 %v13989_v31, %v593_v53  ;;  %v5172_v44 = vmul.f32 %v14889_v36, %v593_v53 }
 0x14e   : > { %v4129_v18 = vadd.f32 %v3810_v0, %v3443_v43  ;;  %v15196_v20 = vadd.f32 %v2657_v37, %v2525_v26  ;;  %v4261_v55 = vmul.f32 %v14017_v46, %v593_v53  ;;  %v4731_v34 = vrot.slane %v4490_v38, 1 }
 0x14f   : > { %v5855_v63 = vadd.f32 %v15043_v22, %v5735_v45  ;;  %v15201_v23 = vsel %vm1478_vm0, %v1528_v6, %v1530_v1  ;;  %v5415_v9 = vrot.slane %v5172_v44, 2  ;;  %v15204_v43 = vmul.f32 %v13966_v13, %v598_v12 }
 0x150   : > { %v3131_v33 = vrot.slane %v2886_v25, 1  ;;  %v3815_v27 = vrot.slane %v15188_v24, 2  ;;  %v4732_v0 = vsel %vm1478_vm0, %v4729_v10, %v4731_v34  ;;  %v1839_v26 = vadd.f32 %v15103_v11, %v15034_v32 }
 0x151   : > { %v5968_v37 = vmax.f32 %v5855_v63, 0.0  ;;  %v4374_v53 = vadd.f32 %v4261_v55, %v4129_v18  ;;  %v5050_v38 = vadd.f32 %v4732_v0, %v4373_v54  ;;  %v15211_v45 = vmul.f32 %v13969_v14, %v598_v12 }
 0x152   : > { %v5416_v6 = vsel %vm2163_vm1, %v5413_v7, %v5415_v9  ;;  %v1532_v44 = vrot.slane %v15204_v43, 1  ;;  %v21408_v39 = vrot.slane %v15079_v49, 2  ;;  %v15221_v10 = vmul.f32 %v14008_v40, %v598_v12 }
 0x153   : > { %6083 = vst.msk [vmem:[#allocation2 + $0x81] sm:$0xff] %vm6066_vm2, %v5968_v37  ;;  %v5736_v32 = vadd.f32 %v5416_v6, %v5050_v38  ;;  %v2658_v54 = vmul.f32 %v13999_v35, %v598_v12  ;;  %v3444_v7 = vadd.f32 %v15142_v51, %v15060_v16  ;;  %v15230_v18 = vsel %vm1478_vm0, %v3129_v56, %v3131_v33  ;;  %v603_v37 = vpop.permute.xlu1 %602 }
 0x154   : > { %v2212_v25 = vsel %vm2163_vm1, %v2209_v42, %v21408_v39  ;;  %v15233_v19 = vmul.f32 %v13989_v31, %v598_v12  ;;  %v3133_v42 = vrot.slane %v15221_v10, 1  ;;  %v15237_v39 = vmul.f32 %v14011_v41, %v598_v12 }
 0x155   : > { %v2526_v11 = vadd.f32 %v2212_v25, %v1839_v26  ;;  %v5856_v55 = vadd.f32 %v15043_v22, %v5736_v32  ;;  %v2217_v63 = vrot.slane %v15211_v45, 2  ;;  %v21409_v16 = vrot.slane %v15038_v57, 2 }
 0x156   : > { %v4491_v51 = vmul.f32 %v14020_v47, %v598_v12  ;;  %v4262_v43 = vmul.f32 %v14017_v46, %v598_v12  ;;  %v5173_v0 = vmul.f32 %v14889_v36, %v598_v12  ;;  %v1840_v26 = vadd.f32 %v15155_v50, %v15089_v58 }
 0x157   : > { %v3812_v8 = vsel %vm2163_vm1, %v21409_v16, %v3811_v21  ;;  %v5969_v38 = vmax.f32 %v5856_v55, 0.0  ;;  %v15252_v6 = vsel %vm1478_vm0, %v1530_v1, %v1532_v44  ;;  %v15254_v25 = vadd.f32 %v2658_v54, %v2526_v11  ;;  %v613_v10 = vpop.permute.xlu1 %612 }
 0x158   : > { %v4130_v56 = vadd.f32 %v3812_v8, %v3444_v7  ;;  %v4733_v57 = vrot.slane %v4491_v51, 1  ;;  %v15259_v32 = vsel %vm1478_vm0, %v3131_v33, %v3133_v42  ;;  %v5417_v7 = vrot.slane %v5173_v0, 2  ;;  %v437_v51 = vld [vmem:[%s13868_s25 + $0x368] sm:$0xff]  ;;  %v438_v0 = vld [vmem:[%s13868_s25 + $0x370] sm:$0xff] }
 0x159   : > { %v21410_v58 = vrot.slane %v15079_v49, 2  ;;  %6084 = vst.msk [vmem:[#allocation2 + $0x89] sm:$0xff] %vm6066_vm2, %v5969_v38  ;;  %v3445_v11 = vadd.f32 %v15164_v29, %v15100_v30  ;;  %v15272_v54 = vmul.f32 %v13966_v13, %v603_v37  ;;  %v15275_v33 = vmul.f32 %v13969_v14, %v603_v37  ;;  %987 = vperm.xlu0 %13455, %v437_v51  }
 0x15a   : > { %v4734_v1 = vsel %vm1478_vm0, %v4731_v34, %v4733_v57  ;;  %v4375_v55 = vadd.f32 %v4262_v43, %v4130_v56  ;;  %v15278_v49 = vmul.f32 %v14008_v40, %v603_v37  ;;  %v5418_v38 = vsel %vm2163_vm1, %v5415_v9, %v5417_v7  ;;  %992 = vperm.xlu1 %13456, %v438_v0  }
 0x15b   : > { %v2214_v50 = vsel %vm2163_vm1, %v21410_v58, %v2213_v5  ;;  %v5051_v16 = vadd.f32 %v4734_v1, %v4374_v53  ;;  %v21411_v34 = vrot.slane %v15130_v15, 2  ;;  %v15289_v29 = vmul.f32 %v13989_v31, %v603_v37  ;;  %v608_v58 = vpop.permute.xlu0 %607 }
 0x15c   : > { %v2527_v8 = vadd.f32 %v2214_v50, %v1840_v26  ;;  %v1534_v56 = vrot.slane %v15272_v54, 1  ;;  %v2659_v43 = vmul.f32 %v13999_v35, %v603_v37  ;;  %v15294_v26 = vmul.f32 %v14011_v41, %v603_v37 }
 0x15d   : > { %v3814_v30 = vsel %vm2163_vm1, %v3811_v21, %v21411_v34  ;;  %v5737_v53 = vadd.f32 %v5418_v38, %v5051_v16  ;;  %v4492_v9 = vmul.f32 %v14020_v47, %v603_v37  ;;  %v2219_v48 = vrot.slane %v15275_v33, 2 }
 0x15e   : > { %v4131_v50 = vadd.f32 %v3814_v30, %v3445_v11  ;;  %v4263_v21 = vmul.f32 %v14017_v46, %v603_v37  ;;  %v5174_v1 = vmul.f32 %v14889_v36, %v603_v37  ;;  %v15301_v51 = vadd.f32 %v2659_v43, %v2527_v8 }
 0x15f   : > { %v5857_v54 = vadd.f32 %v15043_v22, %v5737_v53  ;;  %v3135_v16 = vrot.slane %v15278_v49, 1  ;;  %v4735_v0 = vrot.slane %v4492_v9, 1  ;;  %v15305_v38 = vsel %vm1478_vm0, %v1532_v44, %v1534_v56 }
 0x160   : > { %v5419_v34 = vrot.slane %v5174_v1, 2  ;;  %v15308_v12 = vmul.f32 %v13966_v13, %v608_v58  ;;  %v1841_v11 = vadd.f32 %v15201_v23, %v15152_v2  ;;  %v3819_v37 = vrot.slane %v15294_v26, 2 }
 0x161   : > { %v5970_v30 = vmax.f32 %v5857_v54, 0.0  ;;  %v4736_v8 = vsel %vm1478_vm0, %v4733_v57, %v4735_v0  ;;  %v15315_v49 = vmul.f32 %v13969_v14, %v608_v58  ;;  %v21412_v43 = vrot.slane %v15177_v28, 2 }
 0x162   : > { %v5052_v53 = vadd.f32 %v4736_v8, %v4375_v55  ;;  %v5420_v44 = vsel %vm2163_vm1, %v5417_v7, %v5419_v34  ;;  %v2660_v2 = vmul.f32 %v13999_v35, %v608_v58  ;;  %v1536_v23 = vrot.slane %v15308_v12, 1 }
 0x163   : > { %v2216_v9 = vsel %vm2163_vm1, %v2213_v5, %v21412_v43  ;;  %6085 = vst.msk [vmem:[#allocation2 + $0x91] sm:$0xff] %vm6066_vm2, %v5970_v30  ;;  %v15327_v1 = vmul.f32 %v14008_v40, %v608_v58  ;;  %v3446_v55 = vadd.f32 %v15230_v18, %v15158_v4  ;;  %v4376_v7 = vadd.f32 %v4263_v21, %v4131_v50  ;;  %v439_v30 = vld [vmem:[%s13868_s25 + $0x378] sm:$0xff]  ;;  %v440_v43 = vld [vmem:[%s13868_s25 + $0x380] sm:$0xff] }
 0x164   : > { %v2528_v57 = vadd.f32 %v2216_v9, %v1841_v11  ;;  %v5738_v54 = vadd.f32 %v5420_v44, %v5052_v53  ;;  %v15332_v8 = vmul.f32 %v14011_v41, %v608_v58  ;;  %v21413_v17 = vrot.slane %v15130_v15, 2  ;;  %997 = vperm.xlu0 %13455, %v439_v30   ;;  %1002 = vperm.xlu1 %13456, %v440_v43  }
 0x165   : > { %v15344_v11 = vsel %vm1478_vm0, %v3133_v42, %v3135_v16  ;;  %v3137_v4 = vrot.slane %v15327_v1, 1  ;;  %v4264_v50 = vmul.f32 %v14017_v46, %v608_v58  ;;  %v4493_v15 = vmul.f32 %v14020_v47, %v608_v58 }
 0x166   : > { %v3816_v5 = vsel %vm2163_vm1, %v21413_v17, %v3815_v27  ;;  %v5858_v21 = vadd.f32 %v15043_v22, %v5738_v54  ;;  %v5175_v53 = vmul.f32 %v14889_v36, %v608_v58  ;;  %v1842_v44 = vadd.f32 %v15252_v6, %v15192_v3 }
 0x167   : > { %v4132_v18 = vadd.f32 %v3816_v5, %v3446_v55  ;;  %v15354_v42 = vmul.f32 %v13989_v31, %v608_v58  ;;  %v15359_v9 = vsel %vm1478_vm0, %v1534_v56, %v1536_v23  ;;  %v15362_v55 = vadd.f32 %v2660_v2, %v2528_v57 }
 0x168   : > { %v5971_v54 = vmax.f32 %v5858_v21, 0.0  ;;  %v4737_v5 = vrot.slane %v4493_v15, 1  ;;  %v5421_v30 = vrot.slane %v5175_v53, 2  ;;  %v15366_v3 = vsel %vm1478_vm0, %v3135_v16, %v3137_v4 }
 0x169   : > { %v21414_v6 = vrot.slane %v15177_v28, 2  ;;  %v3447_v56 = vadd.f32 %v15259_v32, %v15196_v20  ;;  %v15376_v2 = vmul.f32 %v13966_v13, %v613_v10  ;;  %v4377_v57 = vadd.f32 %v4264_v50, %v4132_v18 }
 0x16a   : > { %6086 = vst.msk [vmem:[#allocation2 + $0x99] sm:$0xff] %vm6066_vm2, %v5971_v54  ;;  %v4738_v43 = vsel %vm1478_vm0, %v4735_v0, %v4737_v5  ;;  %v15381_v21 = vmul.f32 %v13969_v14, %v613_v10  ;;  %v5422_v15 = vsel %vm2163_vm1, %v5419_v34, %v5421_v30  ;;  %v21415_v53 = vrot.slane %v15237_v39, 2 }
 0x16b   : > { %v2218_v58 = vsel %vm2163_vm1, %v21414_v6, %v2217_v63  ;;  %v5053_v28 = vadd.f32 %v4738_v43, %v4376_v7  ;;  %v2890_v32 = vmul.f32 %v14008_v40, %v613_v10  ;;  %v1538_v18 = vrot.slane %v15376_v2, 1  ;;  %v618_v7 = vpop.permute.xlu0 %617 }
 0x16c   : > { %v2529_v16 = vadd.f32 %v2218_v58, %v1842_v44  ;;  %v3818_v20 = vsel %vm2163_vm1, %v3815_v27, %v21415_v53  ;;  %v2661_v0 = vmul.f32 %v13999_v35, %v613_v10  ;;  %v15393_v50 = vmul.f32 %v14011_v41, %v613_v10  ;;  %v441_v27 = vld [vmem:[%s13868_s25 + $0x388] sm:$0xff]  ;;  %v442_v58 = vld [vmem:[%s13868_s25 + $0x390] sm:$0xff] }
 0x16d   : > { %v4494_v44 = vmul.f32 %v14020_v47, %v613_v10  ;;  %v5739_v54 = vadd.f32 %v5422_v15, %v5053_v28  ;;  %v4133_v34 = vadd.f32 %v3818_v20, %v3447_v56  ;;  %v15397_v6 = vmul.f32 %v13989_v31, %v613_v10  ;;  %1007 = vperm.xlu0 %13455, %v441_v27  }
 0x16e   : > { %v5176_v24 = vmul.f32 %v14889_v36, %v613_v10  ;;  %v21290_v43 = vrot.slane %v15381_v21, 2  ;;  %v15403_v2 = vadd.f32 %v2661_v0, %v2529_v16  ;;  %v3139_v53 = vrot.slane %v2890_v32, 1  ;;  %1012 = vperm.xlu1 %13456, %v442_v58  }
 0x16f   : > { %v4739_v17 = vrot.slane %v4494_v44, 1  ;;  %v5859_v1 = vadd.f32 %v15043_v22, %v5739_v54  ;;  %v4265_v28 = vmul.f32 %v14017_v46, %v613_v10  ;;  %v15408_v15 = vmul.f32 %v13966_v13, %v618_v7 }
 0x170   : > { %v5423_v56 = vrot.slane %v5176_v24, 2  ;;  %v15413_v20 = vsel %vm1478_vm0, %v1536_v23, %v1538_v18  ;;  %v1843_v0 = vadd.f32 %v15305_v38, %v15233_v19  ;;  %v15420_v10 = vmul.f32 %v13969_v14, %v618_v7 }
 0x171   : > { %v4740_v32 = vsel %vm1478_vm0, %v4737_v5, %v4739_v17  ;;  %v5972_v44 = vmax.f32 %v5859_v1, 0.0  ;;  %v4378_v54 = vadd.f32 %v4265_v28, %v4133_v34  ;;  %v15423_v24 = vsel %vm1478_vm0, %v3137_v4, %v3139_v53 }
 0x172   : > { %v5054_v27 = vadd.f32 %v4740_v32, %v4377_v57  ;;  %v5424_v12 = vsel %vm2163_vm1, %v5421_v30, %v5423_v56  ;;  %v15427_v23 = vmul.f32 %v13989_v31, %v618_v7  ;;  %v15430_v58 = vmul.f32 %v14008_v40, %v618_v7 }
 0x173   : > { %6087 = vst.msk [vmem:[#allocation2 + $0xa1] sm:$0xff] %vm6066_vm2, %v5972_v44  ;;  %v1540_v38 = vrot.slane %v15408_v15, 1  ;;  %v2220_v4 = vsel %vm2163_vm1, %v2217_v63, %v2219_v48  ;;  %v3448_v1 = vadd.f32 %v15344_v11, %v15254_v25  ;;  %v2662_v30 = vmul.f32 %v13999_v35, %v618_v7 }
 0x174   : > { %v5740_v19 = vadd.f32 %v5424_v12, %v5054_v27  ;;  %v2530_v5 = vadd.f32 %v2220_v4, %v1843_v0  ;;  %v3141_v57 = vrot.slane %v15430_v58, 1  ;;  %v15444_v34 = vmul.f32 %v14011_v41, %v618_v7  ;;  %v623_v12 = vpop.permute.xlu1 %622 }
 0x175   : > { %v21416_v45 = vrot.slane %v15237_v39, 2  ;;  %v15454_v25 = vmul.f32 %v14020_v47, %v618_v7  ;;  %v4266_v0 = vmul.f32 %v14017_v46, %v618_v7  ;;  %v15458_v44 = vmul.f32 %v14889_v36, %v618_v7 }
 0x176   : > { %v5860_v28 = vadd.f32 %v15043_v22, %v5740_v19  ;;  %v1844_v27 = vadd.f32 %v15359_v9, %v15289_v29  ;;  %v15465_v39 = vsel %vm1478_vm0, %v1538_v18, %v1540_v38  ;;  %v15475_v7 = vsel %vm1478_vm0, %v3139_v53, %v3141_v57 }
 0x177   : > { %v3820_v63 = vsel %vm2163_vm1, %v21416_v45, %v3819_v37  ;;  %v4741_v4 = vrot.slane %v15454_v25, 1  ;;  %v15470_v45 = vadd.f32 %v2662_v30, %v2530_v5  ;;  %v5425_v9 = vrot.slane %v15458_v44, 2 }
 0x178   : > { %v4134_v11 = vadd.f32 %v3820_v63, %v3448_v1  ;;  %v5973_v19 = vmax.f32 %v5860_v28, 0.0  ;;  %v3449_v1 = vadd.f32 %v15366_v3, %v15301_v51  ;;  %v21417_v28 = vrot.slane %v15315_v49, 2 }
 0x179   : > { %v4742_v18 = vsel %vm1478_vm0, %v4739_v17, %v4741_v4  ;;  %v15489_v3 = vmul.f32 %v13966_v13, %v623_v12  ;;  %v15492_v53 = vmul.f32 %v13969_v14, %v623_v12  ;;  %v2663_v26 = vmul.f32 %v13999_v35, %v623_v12 }
 0x17a   : > { %6088 = vst.msk [vmem:[#allocation2 + $0xa9] sm:$0xff] %vm6066_vm2, %v5973_v19  ;;  %v2222_v51 = vsel %vm2163_vm1, %v2219_v48, %v21417_v28  ;;  %v15494_v5 = vadd.f32 %v4266_v0, %v4134_v11  ;;  %v5055_v30 = vadd.f32 %v4742_v18, %v4378_v54  ;;  %v21418_v19 = vrot.slane %v15332_v8, 2 }
 0x17b   : > { %v2531_v63 = vadd.f32 %v2222_v51, %v1844_v27  ;;  %v5426_v48 = vsel %vm2163_vm1, %v5423_v56, %v5425_v9  ;;  %v15507_v28 = vmul.f32 %v13989_v31, %v623_v12  ;;  %v15510_v54 = vmul.f32 %v14008_v40, %v623_v12 }
 0x17c   : > { %v3822_v33 = vsel %vm2163_vm1, %v3819_v37, %v21418_v19  ;;  %v5741_v11 = vadd.f32 %v5426_v48, %v5055_v30  ;;  %v1542_v0 = vrot.slane %v15489_v3, 1  ;;  %v15515_v27 = vmul.f32 %v14020_v47, %v623_v12  ;;  %v15517_v37 = vpop.permute.xlu0 %627  ;;  %v443_v30 = vld [vmem:[%s13868_s25 + $0x398] sm:$0xff]  ;;  %v444_v19 = vld [vmem:[%s13868_s25 + $0x3a0] sm:$0xff] }
 0x17d   : > { %v15504_v17 = vadd.f32 %v3822_v33, %v3449_v1  ;;  %v15521_v1 = vmul.f32 %v14011_v41, %v623_v12  ;;  %v15524_v18 = vmul.f32 %v14017_v46, %v623_v12  ;;  %v15527_v51 = vmul.f32 %v14889_v36, %v623_v12  ;;  %1017 = vperm.xlu0 %13455, %v443_v30  }
 0x17e   : > { %v5861_v33 = vadd.f32 %v15043_v22, %v5741_v11  ;;  %v15532_v48 = vadd.f32 %v2663_v26, %v2531_v63  ;;  %v21292_v29 = vrot.slane %v15515_v27, 1  ;;  %1930 = vperm.xlu1 %13456, %v444_v19   ;;  %v21289_v56 = vrot.slane %v15510_v54, 1 }
 0x17f   : > { %v21291_v32 = vrot.slane %v15527_v51, 2  ;;  %v21286_v16 = vmov 0.0   ;;  %v15607_v12 = vmul.f32 %v13966_v13, %v15517_v37  ;;  %v1845_v63 = vadd.f32 %v15413_v20, %v15354_v42 }
 0x180   : > { %21419 = vst [vmem:[#allocation18_spill] sm:$0xff] %v15532_v48  ;;  %6182 = vst.msk [vmem:[#allocation3 + $0x10] sm:$0xff] %vm6066_vm2, %v21286_v16  ;;  %v5974_v11 = vmax.f32 %v5861_v33, 0.0  ;;  %v15616_v26 = vsel %vm1478_vm0, %v1540_v38, %v1542_v0  ;;  %v4744_v30 = vsel %vm1478_vm0, %v4741_v4, %v21292_v29  ;;  %v15625_v19 = vmul.f32 %v13969_v14, %v15517_v37  ;;  %v633_v48 = vpop.permute.xlu1 %632 }
 0x181   : > { %6183 = vst.msk [vmem:[#allocation3 + $0x18] sm:$0xff] %vm6066_vm2, %v21286_v16  ;;  %6181 = vst.msk [vmem:[#allocation3 + $0x8] sm:$0xff] %vm6066_vm2, %v21286_v16  ;;  %v5056_v42 = vadd.f32 %v4744_v30, %v15494_v5  ;;  %v5428_v15 = vsel %vm2163_vm1, %v5425_v9, %v21291_v32  ;;  %v21288_v20 = vrot.slane %v15607_v12, 1  ;;  %v21420_v38 = vrot.slane %v15315_v49, 2  ;;  %v6215_v30 = vld [vmem:[#allocation2] ss:$2 sm:$0xff] }
 0x182   : > { %6184 = vst.msk [vmem:[#allocation3 + $0x20] sm:$0xff] %vm6066_vm2, %v21286_v16  ;;  %6185 = vst.msk [vmem:[#allocation3 + $0x28] sm:$0xff] %vm6066_vm2, %v21286_v16  ;;  %v2664_v5 = vmul.f32 %v13999_v35, %v15517_v37  ;;  %v15644_v33 = vmul.f32 %v14008_v40, %v15517_v37  ;;  %v3450_v44 = vadd.f32 %v15423_v24, %v15362_v55  ;;  %v6221_v24 = vld [vmem:[#allocation2 + $0x30] ss:$2 sm:$0xff] }
 0x183   : > { %6186 = vst.msk [vmem:[#allocation3 + $0x30] sm:$0xff] %vm6066_vm2, %v21286_v16  ;;  %6187 = vst.msk [vmem:[#allocation3 + $0x38] sm:$0xff] %vm6066_vm2, %v21286_v16  ;;  %v2224_v25 = vsel %vm2163_vm1, %v21420_v38, %v21290_v43  ;;  %v15653_v49 = vsel %vm1478_vm0, %v3141_v57, %v21289_v56  ;;  %v6217_v38 = vld [vmem:[#allocation2 + $0x10] ss:$2 sm:$0xff]  ;;  %v15667_v55 = vsel %vm1478_vm0, %v1542_v0, %v21288_v20  ;;  %v6219_v57 = vld [vmem:[#allocation2 + $0x20] ss:$2 sm:$0xff] }
 0x184   : > { %6188 = vst.msk [vmem:[#allocation3 + $0x40] sm:$0xff] %vm6066_vm2, %v21286_v16  ;;  %6189 = vst.msk [vmem:[#allocation3 + $0x48] sm:$0xff] %vm6066_vm2, %v21286_v16  ;;  %v2532_v4 = vadd.f32 %v2224_v25, %v1845_v63  ;;  %v4380_v63 = vadd.f32 %v15524_v18, %v15504_v17  ;;  %v6327_v25 = vld [vmem:[#allocation2 + $0x1] ss:$2 sm:$0xff]  ;;  %v15672_v58 = vmul.f32 %v14011_v41, %v15517_v37  ;;  %v6329_v17 = vld [vmem:[#allocation2 + $0x11] ss:$2 sm:$0xff] }
 0x185   : > { %6190 = vst.msk [vmem:[#allocation3 + $0x50] sm:$0xff] %vm6066_vm2, %v21286_v16  ;;  %6191 = vst.msk [vmem:[#allocation3 + $0x58] sm:$0xff] %vm6066_vm2, %v21286_v16  ;;  %v15682_v3 = vmul.f32 %v14020_v47, %v15517_v37  ;;  %v15686_v0 = vmul.f32 %v14889_v36, %v15517_v37  ;;  %v6331_v20 = vld [vmem:[#allocation2 + $0x21] ss:$2 sm:$0xff]  ;;  %v6333_v56 = vld [vmem:[#allocation2 + $0x31] ss:$2 sm:$0xff]  ;;  %v6438_v61 = vmax.f32 %v6215_v30, %v6327_v25 }
 0x186   : > { %6192 = vst.msk [vmem:[#allocation3 + $0x60] sm:$0xff] %vm6066_vm2, %v21286_v16  ;;  %6193 = vst.msk [vmem:[#allocation3 + $0x68] sm:$0xff] %vm6066_vm2, %v21286_v16  ;;  %v3145_v29 = vrot.slane %v15644_v33, 1  ;;  %v6439_v60 = vmax.f32 %v6217_v38, %v6329_v17  ;;  %v6440_v36 = vmax.f32 %v6219_v57, %v6331_v20  ;;  %v6441_v52 = vmax.f32 %v6221_v24, %v6333_v56 }
 0x187   : > { %6194 = vst.msk [vmem:[#allocation3 + $0x70] sm:$0xff] %vm6066_vm2, %v21286_v16  ;;  %6195 = vst.msk [vmem:[#allocation3 + $0x78] sm:$0xff] %vm6066_vm2, %v21286_v16  ;;  %v6597_v43 = vld [vmem:[#allocation3 + $0x10] sm:$0xff]  ;;  %v4745_v62 = vrot.slane %v15682_v3, 1  ;;  %v5429_v59 = vrot.slane %v15686_v0, 2  ;;  %v21425_v56 = vrot.slane %v15527_v51, 2  ;;  %v15746_v3 = vmul.f32 %v14020_v47, %v633_v48  ;;  %v638_v0 = vpop.permute.xlu0 %637 }
 0x188   : > { %6196 = vst.msk [vmem:[#allocation3 + $0x80] sm:$0xff] %vm6066_vm2, %v21286_v16  ;;  %6197 = vst.msk [vmem:[#allocation3 + $0x88] sm:$0xff] %vm6066_vm2, %v21286_v16  ;;  %v6598_v32 = vld [vmem:[#allocation3 + $0x18] sm:$0xff]  ;;  %v21427_v30 = vrot.slane %v15381_v21, 2  ;;  %v21429_v51 = vrot.slane %v15444_v34, 2  ;;  %v21430_v25 = vrot.slane %v15393_v50, 2 }
 0x189   : > { %6198 = vst.msk [vmem:[#allocation3 + $0x90] sm:$0xff] %vm6066_vm2, %v21286_v16  ;;  %6199 = vst.msk [vmem:[#allocation3 + $0x98] sm:$0xff] %vm6066_vm2, %v21286_v16 }
 0x18a   : > { %6200 = vst.msk [vmem:[#allocation3 + $0xa0] sm:$0xff] %vm6066_vm2, %v21286_v16  ;;  %6201 = vst.msk [vmem:[#allocation3 + $0xa8] sm:$0xff] %vm6066_vm2, %v21286_v16  ;;  %v3826_v24 = vsel %vm2163_vm1, %v21430_v25, %v21429_v51 }
 0x18b   : > { %6202 = vst.msk [vmem:[#allocation3 + $0xb0] sm:$0xff] %vm6066_vm2, %v21286_v16  ;;  %6203 = vst.msk [vmem:[#allocation3 + $0xb8] sm:$0xff] %vm6066_vm2, %v21286_v16 }
 0x18c   : > { %6204 = vst.msk [vmem:[#allocation3 + $0xc0] sm:$0xff] %vm6066_vm2, %v21286_v16  ;;  %6205 = vst.msk [vmem:[#allocation3 + $0xc8] sm:$0xff] %vm6066_vm2, %v21286_v16 }
 0x18d   : > { %6206 = vst.msk [vmem:[#allocation3 + $0xd0] sm:$0xff] %vm6066_vm2, %v21286_v16  ;;  %6207 = vst.msk [vmem:[#allocation3 + $0xd8] sm:$0xff] %vm6066_vm2, %v21286_v16 }
 0x18e   : > { %6208 = vst.msk [vmem:[#allocation3 + $0xe0] sm:$0xff] %vm6066_vm2, %v21286_v16  ;;  %6209 = vst.msk [vmem:[#allocation3 + $0xe8] sm:$0xff] %vm6066_vm2, %v21286_v16 }
 0x18f   : > { %6210 = vst.msk [vmem:[#allocation3 + $0xf0] sm:$0xff] %vm6066_vm2, %v21286_v16  ;;  %6211 = vst.msk [vmem:[#allocation3 + $0xf8] sm:$0xff] %vm6066_vm2, %v21286_v16 }
 0x190   : > { %6212 = vst.msk [vmem:[#allocation3 + $0x100] sm:$0xff] %vm6066_vm2, %v21286_v16  ;;  %6213 = vst.msk [vmem:[#allocation3 + $0x108] sm:$0xff] %vm6066_vm2, %v21286_v16 }
 0x191   : > { %6214 = vst.msk [vmem:[#allocation3 + $0x110] sm:$0xff] %vm6066_vm2, %v21286_v16  ;;  %6089 = vst.msk [vmem:[#allocation2 + $0xb1] sm:$0xff] %vm6066_vm2, %v5974_v11  ;;  %v5742_v11 = vadd.f32 %v5428_v15, %v5056_v42  ;;  %v15660_v16 = vmul.f32 %v13989_v31, %v15517_v37  ;;  %v21422_v42 = vrot.slane %v15393_v50, 2  ;;  %v21423_v15 = vrot.slane %v15332_v8, 2 }
 0x193   : > { %21421 = vst [vmem:[#allocation19_spill] sm:$0xff] %v15660_v16  ;;  %v5862_v18 = vadd.f32 %v15043_v22, %v5742_v11  ;;  %v3824_v9 = vsel %vm2163_vm1, %v21423_v15, %v21422_v42  ;;  %v15688_v11 = vadd.f32 %v2664_v5, %v2532_v4  ;;  %v6625_v15 = vpack.c.bf16 %v6598_v32, %v6597_v43 }
 0x194   : > { %v4136_v8 = vadd.f32 %v3824_v9, %v3450_v44  ;;  %v1846_v16 = vadd.f32 %v15465_v39, %v15397_v6  ;;  %v3829_v4 = vrot.slane %v15672_v58, 2  ;;  %v4268_v43 = vmul.f32 %v14017_v46, %v15517_v37 }
 0x195   : > { %v5975_v42 = vmax.f32 %v5862_v18, 0.0  ;;  %12867 = vmatprep.mubr.msk.bf16.mxu0 %vm6066_vm2, %v6625_v15  ;;  %v21424_v32 = vrot.slane %v15515_v27, 1  ;;  %v5430_v6 = vsel %vm2163_vm1, %v21425_v56, %v5429_v59  ;;  %v6494_v39 = vmax.f32 %v6438_v61, %v6440_v36  ;;  %v15753_v15 = vld [vmem:[%s21261_s1 + $0x8] ss:$0 sm:$0xff] }
 0x196   : > { %v6495_v44 = vmax.f32 %v6439_v60, %v6441_v52  ;;  %v21426_v9 = vrot.slane %v15420_v10, 2  ;;  %v3451_v37 = vadd.f32 %v15475_v7, %v15403_v2  ;;  %v15714_v27 = vmul.f32 %v13966_v13, %v633_v48 }
 0x197   : > { %6090 = vst.msk [vmem:[#allocation2 + $0xb9] sm:$0xff] %vm6066_vm2, %v5975_v42  ;;  %v4746_v5 = vsel %vm1478_vm0, %v21424_v32, %v4745_v62  ;;  %v21428_v61 = vrot.slane %v15510_v54, 1  ;;  %6496 = vst.msk [vmem:[#allocation3 + $0x20] sm:$0xff] %vm6066_vm2, %v6494_v39  ;;  %v15729_v2 = vmul.f32 %v14008_v40, %v633_v48  ;;  %v4381_v7 = vadd.f32 %v4268_v43, %v4136_v8 }
 0x198   : > { %v5057_v20 = vadd.f32 %v4746_v5, %v4380_v63  ;;  %v2226_v38 = vsel %vm2163_vm1, %v21427_v30, %v21426_v9  ;;  %v15717_v63 = vmul.f32 %v13969_v14, %v633_v48  ;;  %6498 = vst.msk [vmem:[#allocation3 + $0x28] sm:$0x3f] %vm6497_vm4, %v6495_v44  ;;  %v15737_v54 = vmul.f32 %v13989_v31, %v633_v48 }
 0x199   : > { %v15724_v52 = vsel %vm1478_vm0, %v21428_v61, %v3145_v29  ;;  %v2533_v21 = vadd.f32 %v2226_v38, %v1846_v16  ;;  %v1546_v57 = vrot.slane %v15714_v27, 1  ;;  %v2665_v18 = vmul.f32 %v13999_v35, %v633_v48 }
 0x19a   : > { %v5743_v60 = vadd.f32 %v5430_v6, %v5057_v20  ;;  %v15743_v16 = vmul.f32 %v14011_v41, %v633_v48  ;;  %v4137_v8 = vadd.f32 %v3826_v24, %v3451_v37  ;;  %v2231_v50 = vrot.slane %v15717_v63, 2 }
 0x19b   : > { %v4269_v42 = vmul.f32 %v14017_v46, %v633_v48  ;;  %v15756_v36 = vmul.f32 %v15753_v15, %v633_v48  ;;  %v15758_v32 = vadd.f32 %v2665_v18, %v2533_v21  ;;  %v3147_v5 = vrot.slane %v15729_v2, 1 }
 0x19c   : > { %v5863_v17 = vadd.f32 %v15043_v22, %v5743_v60  ;;  %v4747_v20 = vrot.slane %v15746_v3, 1  ;;  %v21431_v56 = vrot.slane %v15607_v12, 1  ;;  %v15769_v44 = vmul.f32 %v13966_v13, %v638_v0 }
 0x19d   : > { %v5431_v39 = vrot.slane %v15756_v36, 2  ;;  %v1847_v48 = vadd.f32 %v15616_v26, %v15427_v23  ;;  %v3831_v9 = vrot.slane %v15743_v16, 2  ;;  %v15777_v38 = vmul.f32 %v13969_v14, %v638_v0 }
 0x19e   : > { %v5976_v43 = vmax.f32 %v5863_v17, 0.0  ;;  %v15765_v6 = vsel %vm1478_vm0, %v21431_v56, %v1546_v57  ;;  %v4748_v30 = vsel %vm1478_vm0, %v4745_v62, %v4747_v20  ;;  %v15780_v12 = vmul.f32 %v14008_v40, %v638_v0  ;;  %v6599_v37 = vld [vmem:[#allocation3 + $0x20] sm:$0xff] }
 0x19f   : > { %v6600_v27 = vld [vmem:[#allocation3 + $0x28] sm:$0xff]  ;;  %v5058_v61 = vadd.f32 %v4748_v30, %v4381_v7  ;;  %v5432_v60 = vsel %vm2163_vm1, %v5429_v59, %v5431_v39  ;;  %v21432_v23 = vrot.slane %v15492_v53, 2  ;;  %v21433_v26 = vrot.slane %v15420_v10, 2 }
 0x1a0   : > { %6091 = vst.msk [vmem:[#allocation2 + $0xc1] sm:$0xff] %vm6066_vm2, %v5976_v43  ;;  %v2666_v62 = vmul.f32 %v13999_v35, %v638_v0  ;;  %v6626_v2 = vpack.c.bf16 %v6600_v27, %v6599_v37  ;;  %v1548_v51 = vrot.slane %v15769_v44, 1  ;;  %v3452_v24 = vadd.f32 %v15653_v49, %v15470_v45  ;;  %v13460_v7 = vld [vmem:[%s21263_s3 + $0x8] sm:$0xff]   ;;  %v643_v37 = vpop.permute.xlu1 %642 }
 0x1a1   : > { %v2228_v21 = vsel %vm2163_vm1, %v21433_v26, %v21432_v23  ;;  %v4382_v59 = vadd.f32 %v4269_v42, %v4137_v8  ;;  %v5744_v17 = vadd.f32 %v5432_v60, %v5058_v61  ;;  %v3149_v18 = vrot.slane %v15780_v12, 1 }
 0x1a2   : > { %v2534_v25 = vadd.f32 %v2228_v21, %v1847_v48  ;;  %v21434_v10 = vrot.slane %v15521_v1, 2  ;;  %v21435_v3 = vrot.slane %v15444_v34, 2  ;;  %12868 = vmatmul.mubr.msk.bf16.vlgmr.msra.gmra.mrb[0].mxu0 %vm6066_vm2, %v6626_v2  ;;  %v15807_v45 = vsel %vm1478_vm0, %v3145_v29, %v3147_v5  ;;  %v13682_v29 = vld [vmem:[%s21263_s3] sm:$0xff]  }
 0x1a3   : > { %v15810_v49 = vmul.f32 %v13989_v31, %v638_v0  ;;  %v15813_v8 = vmul.f32 %v14011_v41, %v638_v0  ;;  %v5864_v56 = vadd.f32 %v15043_v22, %v5744_v17  ;;  %v4270_v34 = vmul.f32 %v14017_v46, %v638_v0  ;;  %12896 = vmatpush3.bf16.msra.mxu0 %v13682_v29 }
 0x1a4   : > { %v3828_v43 = vsel %vm2163_vm1, %v21435_v3, %v21434_v10  ;;  %v4499_v48 = vmul.f32 %v14020_v47, %v638_v0  ;;  %v5181_v30 = vmul.f32 %v15753_v15, %v638_v0  ;;  %v15825_v33 = vsel %vm1478_vm0, %v1546_v57, %v1548_v51  ;;  %12897 = vmatprep.subr.bf16.mxu0 %v13460_v7  ;;  %v445_v3 = vld [vmem:[%s13868_s25 + $0x3a8] sm:$0xff] }
 0x1a5   : > { %v4138_v42 = vadd.f32 %v3828_v43, %v3452_v24  ;;  %v2233_v27 = vrot.slane %v15777_v38, 2  ;;  %v15828_v22 = vadd.f32 %v2666_v62, %v2534_v25  ;;  %v1848_v61 = vadd.f32 %v15667_v55, %v15507_v28  ;;  %v21438_v28 = vld [vmem:[#allocation18_spill] sm:$0xff]  ;;  %2617 = vperm.xlu0 %13455, %v445_v3  }
 0x1a6   : > { %v5977_v0 = vmax.f32 %v5864_v56, 0.0  ;;  %v15835_v60 = vsel %vm1478_vm0, %v3147_v5, %v3149_v18  ;;  %v4749_v23 = vrot.slane %v4499_v48, 1  ;;  %v5433_v26 = vrot.slane %v5181_v30, 2 }
 0x1a7   : > { %v3833_v57 = vrot.slane %v15813_v8, 2  ;;  %v21436_v21 = vrot.slane %v15625_v19, 2  ;;  %v21437_v62 = vrot.slane %v15492_v53, 2  ;;  %v3453_v55 = vadd.f32 %v15724_v52, %v21438_v28  ;;  %12898 = vmatpush3.bf16.msra.mxu0 %v13460_v7  ;;  %v446_v53 = vld [vmem:[%s13868_s25 + $0x3b0] sm:$0xff] }
 0x1a8   : > { %v15846_v25 = vmul.f32 %v13966_v13, %v643_v37  ;;  %6092 = vst.msk [vmem:[#allocation2 + $0xc9] sm:$0xff] %vm6066_vm2, %v5977_v0  ;;  %v4383_v5 = vadd.f32 %v4270_v34, %v4138_v42  ;;  %v4750_v24 = vsel %vm1478_vm0, %v4747_v20, %v4749_v23  ;;  %v15851_v10 = vmul.f32 %v13969_v14, %v643_v37 }
 0x1a9   : > { %v2230_v2 = vsel %vm2163_vm1, %v21437_v62, %v21436_v21  ;;  %v5059_v43 = vadd.f32 %v4750_v24, %v4382_v59  ;;  %v21439_v52 = vrot.slane %v15521_v1, 2  ;;  %v2896_v42 = vmul.f32 %v14008_v40, %v643_v37  ;;  %2622 = vperm.xlu1 %13456, %v446_v53   ;;  %v648_v1 = vpop.permute.xlu0 %647  ;;  %v21440_v53 = vld [vmem:[#allocation19_spill] sm:$0xff] }
 0x1aa   : > { %v2535_v17 = vadd.f32 %v2230_v2, %v1848_v61  ;;  %v1550_v48 = vrot.slane %v15846_v25, 1  ;;  %v5434_v20 = vsel %vm2163_vm1, %v5431_v39, %v5433_v26  ;;  %v2667_v7 = vmul.f32 %v13999_v35, %v643_v37  ;;  %v15881_v2 = vld [vmem:[%s21262_s2] ss:$0 sm:$0xff] }
 0x1ab   : > { %v3830_v56 = vsel %vm2163_vm1, %v21439_v52, %v3829_v4  ;;  %v15867_v59 = vmul.f32 %v14011_v41, %v643_v37  ;;  %v4500_v34 = vmul.f32 %v14020_v47, %v643_v37  ;;  %v5745_v30 = vadd.f32 %v5434_v20, %v5059_v43 }
 0x1ac   : > { %v4139_v29 = vadd.f32 %v3830_v56, %v3453_v55  ;;  %v15871_v61 = vmul.f32 %v13989_v31, %v643_v37  ;;  %v2235_v0 = vrot.slane %v15851_v10, 2  ;;  %v15874_v21 = vadd.f32 %v2667_v7, %v2535_v17 }
 0x1ad   : > { %v4271_v36 = vmul.f32 %v14017_v46, %v643_v37  ;;  %v4751_v39 = vrot.slane %v4500_v34, 1  ;;  %v5182_v62 = vmul.f32 %v15753_v15, %v643_v37  ;;  %v5865_v28 = vadd.f32 %v15881_v2, %v5745_v30 }
 0x1ae   : > { %v15887_v55 = vsel %vm1478_vm0, %v1548_v51, %v1550_v48  ;;  %v3151_v25 = vrot.slane %v2896_v42, 1  ;;  %v15890_v24 = vmul.f32 %v13966_v13, %v648_v1  ;;  %v3835_v17 = vrot.slane %v15867_v59, 2 }
 0x1af   : > { %v4752_v37 = vsel %vm1478_vm0, %v4749_v23, %v4751_v39  ;;  %v5435_v3 = vrot.slane %v5182_v62, 2  ;;  %v1849_v43 = vadd.f32 %v15765_v6, %v21440_v53  ;;  %v5978_v52 = vmax.f32 %v5865_v28, 0.0  ;;  %v448_v28 = vld [vmem:[%s13868_s25 + $0x3c0] sm:$0xff] }
 0x1b0   : > { %v4384_v56 = vadd.f32 %v4271_v36, %v4139_v29  ;;  %v5060_v20 = vadd.f32 %v4752_v37, %v4383_v5  ;;  %v15897_v44 = vmul.f32 %v13969_v14, %v648_v1  ;;  %v15901_v42 = vmul.f32 %v13989_v31, %v648_v1  ;;  %3539 = vperm.xlu1 %13456, %v448_v28  }
 0x1b1   : > { %v5436_v51 = vsel %vm2163_vm1, %v5433_v26, %v5435_v3  ;;  %v1552_v7 = vrot.slane %v15890_v24, 1  ;;  %v15905_v23 = vmul.f32 %v14008_v40, %v648_v1  ;;  %6093 = vst.msk [vmem:[#allocation2 + $0xd1] sm:$0xff] %vm6066_vm2, %v5978_v52  ;;  %v15911_v6 = vsel %vm1478_vm0, %v3149_v18, %v3151_v25  ;;  %v447_v18 = vld [vmem:[%s13868_s25 + $0x3b8] sm:$0xff] }
 0x1b2   : > { %v5746_v5 = vadd.f32 %v5436_v51, %v5060_v20  ;;  %v21441_v26 = vrot.slane %v15625_v19, 2  ;;  %v3454_v30 = vadd.f32 %v15807_v45, %v15688_v11  ;;  %v2668_v36 = vmul.f32 %v13999_v35, %v648_v1  ;;  %2627 = vperm.xlu0 %13455, %v447_v18   ;;  %v653_v51 = vpop.permute.xlu1 %652 }
 0x1b3   : > { %v3153_v62 = vrot.slane %v15905_v23, 1  ;;  %v15923_v12 = vmul.f32 %v14011_v41, %v648_v1  ;;  %v2237_v53 = vrot.slane %v15897_v44, 2  ;;  %v3832_v19 = vsel %vm2163_vm1, %v3829_v4, %v3831_v9 }
 0x1b4   : > { %v2232_v34 = vsel %vm2163_vm1, %v21441_v26, %v2231_v50  ;;  %v5866_v37 = vadd.f32 %v15881_v2, %v5746_v5  ;;  %v4501_v11 = vmul.f32 %v14020_v47, %v648_v1  ;;  %v15938_v45 = vsel %vm1478_vm0, %v1550_v48, %v1552_v7 }
 0x1b5   : > { %v2536_v29 = vadd.f32 %v2232_v34, %v1849_v43  ;;  %v4140_v43 = vadd.f32 %v3832_v19, %v3454_v30  ;;  %v4272_v52 = vmul.f32 %v14017_v46, %v648_v1  ;;  %v5183_v20 = vmul.f32 %v15753_v15, %v648_v1 }
 0x1b6   : > { %v5979_v5 = vmax.f32 %v5866_v37, 0.0  ;;  %v4753_v26 = vrot.slane %v4501_v11, 1  ;;  %v1850_v58 = vadd.f32 %v15825_v33, %v15737_v54  ;;  %v3455_v4 = vadd.f32 %v15835_v60, %v15758_v32  ;;  %v6551_v37 = vld [vmem:[#allocation3 + $0xf] sm:$0xff] }
 0x1b7   : > { %v15946_v34 = vadd.f32 %v2668_v36, %v2536_v29  ;;  %v15951_v48 = vsel %vm1478_vm0, %v3151_v25, %v3153_v62  ;;  %v5437_v18 = vrot.slane %v5183_v20, 2  ;;  %v2234_v54 = vsel %vm2163_vm1, %v2231_v50, %v2233_v27 }
 0x1b8   : > { %6094 = vst.msk [vmem:[#allocation2 + $0xd9] sm:$0xff] %vm6066_vm2, %v5979_v5  ;;  %v4754_v1 = vsel %vm1478_vm0, %v4751_v39, %v4753_v26  ;;  %v15962_v32 = vmul.f32 %v13966_v13, %v653_v51  ;;  %v15965_v33 = vmul.f32 %v13969_v14, %v653_v51  ;;  %v4385_v60 = vadd.f32 %v4272_v52, %v4140_v43  ;;  %v658_v43 = vpop.permute.xlu0 %657 }
 0x1b9   : > { %v5061_v25 = vadd.f32 %v4754_v1, %v4384_v56  ;;  %v3834_v39 = vsel %vm2163_vm1, %v3831_v9, %v3833_v57  ;;  %v15973_v29 = vmul.f32 %v14008_v40, %v653_v51  ;;  %v5438_v63 = vsel %vm2163_vm1, %v5435_v3, %v5437_v18  ;;  %v6552_v56 = vld [vmem:[#allocation3 + $0x17] sm:$0xff] }
 0x1ba   : > { %v2537_v50 = vadd.f32 %v2234_v54, %v1850_v58  ;;  %v4141_v36 = vadd.f32 %v3834_v39, %v3455_v4  ;;  %v15977_v28 = vmul.f32 %v13989_v31, %v653_v51  ;;  %v1554_v11 = vrot.slane %v15962_v32, 1  ;;  %v449_v58 = vld [vmem:[%s13868_s25 + $0x3c8] sm:$0xff]  ;;  %v450_v4 = vld [vmem:[%s13868_s25 + $0x3d0] sm:$0xff] }
 0x1bb   : > { %v5747_v19 = vadd.f32 %v5438_v63, %v5061_v25  ;;  %v2669_v16 = vmul.f32 %v13999_v35, %v653_v51  ;;  %v15982_v9 = vmul.f32 %v14020_v47, %v653_v51  ;;  %v3155_v3 = vrot.slane %v15973_v29, 1  ;;  %4225 = vperm.xlu0 %13455, %v449_v58   ;;  %4230 = vperm.xlu1 %13456, %v450_v4   ;;  %v6553_v58 = vld [vmem:[#allocation3 + $0x1f] sm:$0xff] }
 0x1bc   : > { %v15987_v20 = vmul.f32 %v14011_v41, %v653_v51  ;;  %v15990_v5 = vmul.f32 %v15753_v15, %v653_v51  ;;  %v4273_v54 = vmul.f32 %v14017_v46, %v653_v51  ;;  %v6579_v25 = vpack.c.bf16 %v6552_v56, %v6551_v37 }
 0x1bd   : > { %v5867_v1 = vadd.f32 %v15881_v2, %v5747_v19  ;;  %v4755_v32 = vrot.slane %v15982_v9, 1  ;;  %v15997_v39 = vadd.f32 %v2669_v16, %v2537_v50  ;;  %v16001_v63 = vmul.f32 %v13966_v13, %v658_v43 }
 0x1be   : > { %v5439_v29 = vrot.slane %v15990_v5, 2  ;;  %v1851_v52 = vadd.f32 %v15887_v55, %v15810_v49  ;;  %v16008_v51 = vsel %vm1478_vm0, %v1552_v7, %v1554_v11  ;;  %12899 = vmatprep.mubr.msk.bf16.mxu0 %vm6066_vm2, %v6579_v25  ;;  %v16013_v50 = vmul.f32 %v13969_v14, %v658_v43 }
 0x1bf   : > { %v5980_v30 = vmax.f32 %v5867_v1, 0.0  ;;  %v4756_v37 = vsel %vm1478_vm0, %v4753_v26, %v4755_v32  ;;  %v16018_v56 = vsel %vm1478_vm0, %v3153_v62, %v3155_v3  ;;  %v21303_v49 = vrot.slane %v15987_v20, 2 }
 0x1c0   : > { %v4386_v55 = vadd.f32 %v4273_v54, %v4141_v36  ;;  %v5062_v19 = vadd.f32 %v4756_v37, %v4385_v60  ;;  %v5440_v24 = vsel %vm2163_vm1, %v5437_v18, %v5439_v29  ;;  %v2236_v7 = vsel %vm2163_vm1, %v2233_v27, %v2235_v0  ;;  %v6554_v18 = vld [vmem:[#allocation3 + $0x27] sm:$0xff] }
 0x1c1   : > { %6095 = vst.msk [vmem:[#allocation2 + $0xe1] sm:$0xff] %vm6066_vm2, %v5980_v30  ;;  %v16029_v26 = vmul.f32 %v14008_v40, %v658_v43  ;;  %v3456_v23 = vadd.f32 %v15911_v6, %v15828_v22  ;;  %v16034_v36 = vmul.f32 %v13989_v31, %v658_v43  ;;  %v1556_v30 = vrot.slane %v16001_v63, 1  ;;  %v663_v63 = vpop.permute.xlu1 %662 }
 0x1c2   : > { %v5748_v62 = vadd.f32 %v5440_v24, %v5062_v19  ;;  %v2538_v60 = vadd.f32 %v2236_v7, %v1851_v52  ;;  %v2670_v38 = vmul.f32 %v13999_v35, %v658_v43  ;;  %v16041_v9 = vmul.f32 %v14011_v41, %v658_v43 }
 0x1c3   : > { %v3157_v27 = vrot.slane %v16029_v26, 1  ;;  %v3836_v22 = vsel %vm2163_vm1, %v3833_v57, %v3835_v17  ;;  %v4503_v6 = vmul.f32 %v14020_v47, %v658_v43  ;;  %v5185_v52 = vmul.f32 %v15753_v15, %v658_v43 }
 0x1c4   : > { %v5868_v5 = vadd.f32 %v15881_v2, %v5748_v62  ;;  %v4142_v4 = vadd.f32 %v3836_v22, %v3456_v23  ;;  %v4274_v1 = vmul.f32 %v14017_v46, %v658_v43  ;;  %v6580_v54 = vpack.c.bf16 %v6554_v18, %v6553_v58 }
 0x1c5   : > { %v1852_v25 = vadd.f32 %v15938_v45, %v15871_v61  ;;  %v16055_v19 = vsel %vm1478_vm0, %v1554_v11, %v1556_v30  ;;  %v4757_v8 = vrot.slane %v4503_v6, 1  ;;  %v5441_v24 = vrot.slane %v5185_v52, 2  ;;  %v451_v6 = vld [vmem:[%s13868_s25 + $0x3d8] sm:$0xff]  ;;  %v452_v52 = vld [vmem:[%s13868_s25 + $0x3e0] sm:$0xff]  ;;  %s11991_s25 = sshll.u32 %s324_s27, 4  ;;  %s21220_s25 = int_to_ptr.vmem [resolvable:$true] %s11991_s25 }
 0x1c6   : > { %v5981_v37 = vmax.f32 %v5868_v5, 0.0  ;;  %v16057_v57 = vadd.f32 %v2670_v38, %v2538_v60  ;;  %v16060_v7 = vsel %vm1478_vm0, %v3155_v3, %v3157_v27  ;;  %12900 = vmatmul.mubr.msk.bf16.vlgmr.msra.gmra.mrb[0].mxu0 %vm6066_vm2, %v6580_v54  ;;  %v2238_v61 = vsel %vm2163_vm1, %v2235_v0, %v2237_v53  ;;  %4235 = vperm.xlu0 %13455, %v451_v6   ;;  %v6335_v6 = vld [vmem:[#allocation2 + $0x41] ss:$2 sm:$0xff]  ;;  %s13695_s13 = scalar_lea.vmem %s21220_s25, 16  ;;  %p13702_p0 = scmp.lt.s32.totalorder %s21220_s25, %s13700_s21 }
 0x1c7   : > { %v4758_v45 = vsel %vm1478_vm0, %v4755_v32, %v4757_v8  ;;  %v3457_v11 = vadd.f32 %v15951_v48, %v15874_v21  ;;  %v1294_v43 = vmul.f32 %v13966_v13, %v663_v63  ;;  %v16075_v3 = vmul.f32 %v13969_v14, %v663_v63  ;;  %5147 = vperm.xlu1 %13456, %v452_v52   ;;  %v6337_v52 = vld [vmem:[#allocation2 + $0x51] ss:$2 sm:$0xff]  ;;  %p13696_p11 = scmp.ne.s32.totalorder %s21220_s25, %s13695_s13  ;;  %p13703_p1 = scmp.lt.s32.totalorder %s13701_s23, %s13695_s13 }
 0x1c8   : > { %6096 = vst.msk [vmem:[#allocation2 + $0xe9] sm:$0xff] %vm6066_vm2, %v5981_v37  ;;  %v4387_v23 = vadd.f32 %v4274_v1, %v4142_v4  ;;  %v5063_v62 = vadd.f32 %v4758_v45, %v4386_v55  ;;  %v2539_v60 = vadd.f32 %v2238_v61, %v1852_v25  ;;  %v16078_v10 = vmul.f32 %v14008_v40, %v663_v63 }
 0x1c9   : > { %v5442_v0 = vsel %vm2163_vm1, %v5439_v29, %v5441_v24  ;;  %v21442_v32 = vrot.slane %v15923_v12, 2  ;;  %v16087_v48 = vmul.f32 %v13989_v31, %v663_v63  ;;  %v2671_v18 = vmul.f32 %v13999_v35, %v663_v63  ;;  %v668_v29 = vpop.permute.xlu0 %667  ;;  %p13697_p12 = pnand %p13696_p11, %p13853_p5  ;;  %p13704_p2 = por %p13703_p1, %p13702_p0 }
 0x1ca   : > { %v5749_v38 = vadd.f32 %v5442_v0, %v5063_v62  ;;  %v1558_v5 = vrot.slane %v1294_v43, 1  ;;  %v16091_v55 = vmul.f32 %v14011_v41, %v663_v63  ;;  %v16094_v22 = vmul.f32 %v14020_v47, %v663_v63 }
 0x1cb   : > { %v3838_v21 = vsel %vm2163_vm1, %v3835_v17, %v21442_v32  ;;  %v21304_v17 = vrot.slane %v16078_v10, 1  ;;  %v16101_v4 = vmul.f32 %v15753_v15, %v663_v63  ;;  %v16104_v54 = vadd.f32 %v2671_v18, %v2539_v60  ;;  %p13698_p13 = pneg %p13697_p12 }
 0x1cc   : > { %v4143_v58 = vadd.f32 %v3838_v21, %v3457_v11  ;;  %v5869_v1 = vadd.f32 %v15881_v2, %v5749_v38  ;;  %v4275_v25 = vmul.f32 %v14017_v46, %v663_v63  ;;  %v4759_v37 = vrot.slane %v16094_v22, 1 }
 0x1cd   : > { %v5443_v61 = vrot.slane %v16101_v4, 2  ;;  %v16110_v45 = vmul.f32 %v13966_v13, %v668_v29  ;;  %v1853_v11 = vadd.f32 %v16008_v51, %v15901_v42  ;;  %v16115_v43 = vmul.f32 %v13969_v14, %v668_v29  ;;  %v6223_v51 = vld [vmem:[#allocation2 + $0x40] ss:$2 sm:$0xff]  ;;  %p13705_p3 = pnand %p13704_p2, %p13698_p13 }
 0x1ce   : > { %v5982_v62 = vmax.f32 %v5869_v1, 0.0  ;;  %v16118_v0 = vsel %vm1478_vm0, %v1556_v30, %v1558_v5  ;;  %v4760_v63 = vsel %vm1478_vm0, %v4757_v8, %v4759_v37  ;;  %v16125_v32 = vsel %vm1478_vm0, %v3157_v27, %v21304_v17 }
 0x1cf   : > { %21443 = vst [vmem:[#allocation18_spill] sm:$0xff] %v16115_v43  ;;  %v4388_v21 = vadd.f32 %v4275_v25, %v4143_v58  ;;  %v5064_v18 = vadd.f32 %v4760_v63, %v4387_v23  ;;  %v21302_v42 = vrot.slane %v16110_v45, 1  ;;  %v5444_v38 = vsel %vm2163_vm1, %v5441_v24, %v5443_v61  ;;  %v6225_v23 = vld [vmem:[#allocation2 + $0x50] ss:$2 sm:$0xff]  ;;  %v6227_v25 = vld [vmem:[#allocation2 + $0x60] ss:$2 sm:$0xff]  ;;  %v673_v43 = vpop.permute.xlu1 %672 }
 0x1d0   : > { %6097 = vst.msk [vmem:[#allocation2 + $0xf1] sm:$0xff] %vm6066_vm2, %v5982_v62  ;;  %v16131_v30 = vmul.f32 %v13989_v31, %v668_v29  ;;  %v21445_v22 = vrot.slane %v15965_v33, 2  ;;  %v16139_v27 = vmul.f32 %v14008_v40, %v668_v29  ;;  %v2672_v24 = vmul.f32 %v13999_v35, %v668_v29  ;;  %v6339_v62 = vld [vmem:[#allocation2 + $0x61] ss:$2 sm:$0xff] }
 0x1d1   : > { %v5750_v58 = vadd.f32 %v5444_v38, %v5064_v18  ;;  %v16146_v44 = vsel %vm1478_vm0, %v1558_v5, %v21302_v42  ;;  %v16151_v63 = vmul.f32 %v14011_v41, %v668_v29  ;;  %v21446_v18 = vrot.slane %v15923_v12, 2  ;;  %v6229_v38 = vld [vmem:[#allocation2 + $0x70] ss:$2 sm:$0xff] }
 0x1d2   : > { %21444 = vst [vmem:[#allocation19_spill] sm:$0xff] %v16131_v30  ;;  %v2240_v8 = vsel %vm2163_vm1, %v2237_v53, %v21445_v22  ;;  %v3458_v53 = vadd.f32 %v16018_v56, %v15946_v34  ;;  %v6341_v22 = vld [vmem:[#allocation2 + $0x71] ss:$2 sm:$0xff]  ;;  %v4276_v4 = vmul.f32 %v14017_v46, %v668_v29  ;;  %v4505_v5 = vmul.f32 %v14020_v47, %v668_v29 }
 0x1d3   : > { %v2540_v1 = vadd.f32 %v2240_v8, %v1853_v11  ;;  %v3840_v11 = vsel %vm2163_vm1, %v21446_v18, %v21303_v49  ;;  %v5870_v8 = vadd.f32 %v15881_v2, %v5750_v58  ;;  %v16162_v60 = vmul.f32 %v15753_v15, %v668_v29 }
 0x1d4   : > { %v3161_v34 = vrot.slane %v16139_v27, 1  ;;  %v6442_v56 = vmax.f32 %v6223_v51, %v6335_v6  ;;  %v6443_v59 = vmax.f32 %v6225_v23, %v6337_v52  ;;  %v6444_v42 = vmax.f32 %v6227_v25, %v6339_v62 }
 0x1d5   : > { %v5983_v26 = vmax.f32 %v5870_v8, 0.0  ;;  %v4761_v12 = vrot.slane %v4505_v5, 1  ;;  %v5445_v18 = vrot.slane %v16162_v60, 2  ;;  %v6445_v49 = vmax.f32 %v6229_v38, %v6341_v22 }
 0x1d6   : > { %v16166_v16 = vadd.f32 %v2672_v24, %v2540_v1  ;;  %v4144_v58 = vadd.f32 %v3840_v11, %v3458_v53  ;;  %v6499_v17 = vmax.f32 %v6442_v56, %v6444_v42  ;;  %v1854_v30 = vadd.f32 %v16055_v19, %v15977_v28 }
 0x1d7   : > { %6098 = vst.msk [vmem:[#allocation2 + $0xf9] sm:$0xff] %vm6066_vm2, %v5983_v26  ;;  %v3845_v29 = vrot.slane %v16151_v63, 2  ;;  %v4762_v51 = vsel %vm1478_vm0, %v4759_v37, %v4761_v12  ;;  %v6500_v27 = vmax.f32 %v6443_v59, %v6445_v49  ;;  %v3459_v23 = vadd.f32 %v16060_v7, %v15997_v39 }
 0x1d8   : > { %v21447_v60 = vrot.slane %v16078_v10, 1  ;;  %v5065_v42 = vadd.f32 %v4762_v51, %v4388_v21  ;;  %v5446_v52 = vsel %vm2163_vm1, %v5443_v61, %v5445_v18  ;;  %6501 = vst.msk [vmem:[#allocation3 + $0x30] sm:$0xff] %vm6066_vm2, %v6499_v17  ;;  %v21448_v28 = vrot.slane %v16013_v50, 2 }
 0x1d9   : > { %v21449_v19 = vrot.slane %v15965_v33, 2  ;;  %6502 = vst.msk [vmem:[#allocation3 + $0x38] sm:$0x3f] %vm6497_vm4, %v6500_v27  ;;  %v16189_v39 = vmul.f32 %v13966_v13, %v673_v43  ;;  %v16192_v7 = vmul.f32 %v13969_v14, %v673_v43  ;;  %v16195_v10 = vmul.f32 %v14008_v40, %v673_v43 }
 0x1da   : > { %v16178_v6 = vsel %vm1478_vm0, %v21447_v60, %v3161_v34  ;;  %v4389_v59 = vadd.f32 %v4276_v4, %v4144_v58  ;;  %v5751_v17 = vadd.f32 %v5446_v52, %v5065_v42  ;;  %v21450_v37 = vrot.slane %v16041_v9, 2  ;;  %v678_v4 = vpop.permute.xlu0 %677 }
 0x1db   : > { %v2242_v26 = vsel %vm2163_vm1, %v21449_v19, %v21448_v28  ;;  %v21451_v33 = vrot.slane %v15987_v20, 2  ;;  %v16203_v21 = vmul.f32 %v14020_v47, %v673_v43  ;;  %v16206_v1 = vmul.f32 %v13989_v31, %v673_v43 }
 0x1dc   : > { %v2541_v49 = vadd.f32 %v2242_v26, %v1854_v30  ;;  %v2673_v24 = vmul.f32 %v13999_v35, %v673_v43  ;;  %v16210_v25 = vmul.f32 %v14011_v41, %v673_v43  ;;  %v5871_v62 = vadd.f32 %v15881_v2, %v5751_v17 }
 0x1dd   : > { %v3842_v61 = vsel %vm2163_vm1, %v21451_v33, %v21450_v37  ;;  %v1562_v53 = vrot.slane %v16189_v39, 1  ;;  %v3163_v20 = vrot.slane %v16195_v10, 1  ;;  %v4763_v11 = vrot.slane %v16203_v21, 1 }
 0x1de   : > { %v4145_v30 = vadd.f32 %v3842_v61, %v3459_v23  ;;  %v2247_v38 = vrot.slane %v16192_v7, 2  ;;  %v16217_v22 = vadd.f32 %v2673_v24, %v2541_v49  ;;  %v4277_v8 = vmul.f32 %v14017_v46, %v673_v43 }
 0x1df   : > { %v5188_v5 = vmul.f32 %v15753_v15, %v673_v43  ;;  %v5984_v56 = vmax.f32 %v5871_v62, 0.0  ;;  %v4764_v58 = vsel %vm1478_vm0, %v4761_v12, %v4763_v11  ;;  %v16223_v51 = vmul.f32 %v13966_v13, %v678_v4  ;;  %v6601_v23 = vld [vmem:[#allocation3 + $0x30] sm:$0xff] }
 0x1e0   : > { %v1855_v27 = vadd.f32 %v16118_v0, %v16034_v36  ;;  %v3847_v60 = vrot.slane %v16210_v25, 2  ;;  %v4390_v42 = vadd.f32 %v4277_v8, %v4145_v30  ;;  %v5066_v52 = vadd.f32 %v4764_v58, %v4389_v59  ;;  %v6602_v19 = vld [vmem:[#allocation3 + $0x38] sm:$0xff]  ;;  %v6555_v26 = vld [vmem:[#allocation3 + $0x2f] sm:$0xff] }
 0x1e1   : > { %v5447_v28 = vrot.slane %v5188_v5, 2  ;;  %6099 = vst.msk [vmem:[#allocation2 + $0x101] sm:$0xff] %vm6066_vm2, %v5984_v56  ;;  %v6556_v43 = vld [vmem:[#allocation3 + $0x37] sm:$0xff]  ;;  %v21452_v49 = vrot.slane %v16110_v45, 1  ;;  %v16235_v39 = vsel %vm1478_vm0, %v3161_v34, %v3163_v20  ;;  %v16238_v36 = vmul.f32 %v13969_v14, %v678_v4 }
 0x1e2   : > { %v16241_v0 = vmul.f32 %v14008_v40, %v678_v4  ;;  %v6627_v10 = vpack.c.bf16 %v6602_v19, %v6601_v23  ;;  %v6581_v59 = vpack.c.bf16 %v6556_v43, %v6555_v26  ;;  %v21453_v37 = vrot.slane %v16075_v3, 2  ;;  %v683_v26 = vpop.permute.xlu1 %682 }
 0x1e3   : > { %v16232_v12 = vsel %vm1478_vm0, %v21452_v49, %v1562_v53  ;;  %v5448_v17 = vsel %vm2163_vm1, %v5445_v18, %v5447_v28  ;;  %v21454_v45 = vrot.slane %v16013_v50, 2  ;;  %v16250_v34 = vmul.f32 %v13989_v31, %v678_v4 }
 0x1e4   : > { %v5752_v61 = vadd.f32 %v5448_v17, %v5066_v52  ;;  %v1564_v21 = vrot.slane %v16223_v51, 1  ;;  %12871 = vmatprep.mubr.msk.bf16.mxu1 %vm6066_vm2, %v6627_v10  ;;  %12903 = vmatprep.mubr.msk.bf16.mxu0 %vm6066_vm2, %v6581_v59  ;;  %v2674_v24 = vmul.f32 %v13999_v35, %v678_v4  ;;  %v3165_v18 = vrot.slane %v16241_v0, 1 }
 0x1e5   : > { %v2244_v33 = vsel %vm2163_vm1, %v21454_v45, %v21453_v37  ;;  %v3460_v50 = vadd.f32 %v16125_v32, %v16057_v57  ;;  %v16260_v62 = vmul.f32 %v14011_v41, %v678_v4  ;;  %v21455_v5 = vrot.slane %v16091_v55, 2  ;;  %v21457_v45 = vld [vmem:[#allocation18_spill] sm:$0xff] }
 0x1e6   : > { %v2542_v30 = vadd.f32 %v2244_v33, %v1855_v27  ;;  %v5872_v8 = vadd.f32 %v15881_v2, %v5752_v61  ;;  %v21456_v56 = vrot.slane %v16041_v9, 2  ;;  %v4278_v27 = vmul.f32 %v14017_v46, %v678_v4 }
 0x1e7   : > { %v4507_v23 = vmul.f32 %v14020_v47, %v678_v4  ;;  %v2249_v52 = vrot.slane %v16238_v36, 2  ;;  %v5189_v57 = vmul.f32 %v15753_v15, %v678_v4  ;;  %v1856_v32 = vadd.f32 %v16146_v44, %v16087_v48 }
 0x1e8   : > { %v3844_v58 = vsel %vm2163_vm1, %v21456_v56, %v21455_v5  ;;  %v5985_v43 = vmax.f32 %v5872_v8, 0.0  ;;  %v1565_v9 = vsel %vm1478_vm0, %v1562_v53, %v1564_v21  ;;  %v3461_v10 = vadd.f32 %v16178_v6, %v16104_v54 }
 0x1e9   : > { %v4146_v19 = vadd.f32 %v3844_v58, %v3460_v50  ;;  %v4765_v49 = vrot.slane %v4507_v23, 1  ;;  %v16279_v59 = vadd.f32 %v2674_v24, %v2542_v30  ;;  %v3166_v17 = vsel %vm1478_vm0, %v3163_v20, %v3165_v18 }
 0x1ea   : > { %v3849_v4 = vrot.slane %v16260_v62, 2  ;;  %v5449_v37 = vrot.slane %v5189_v57, 2  ;;  %6100 = vst.msk [vmem:[#allocation2 + $0x109] sm:$0xff] %vm6066_vm2, %v5985_v43  ;;  %v21458_v53 = vrot.slane %v21457_v45, 2  ;;  %v21459_v33 = vrot.slane %v16075_v3, 2  ;;  %v688_v57 = vpop.permute.xlu0 %687 }
 0x1eb   : > { %v4391_v48 = vadd.f32 %v4278_v27, %v4146_v19  ;;  %v4766_v44 = vsel %vm1478_vm0, %v4763_v11, %v4765_v49  ;;  %v16293_v6 = vmul.f32 %v13966_v13, %v683_v26  ;;  %v21460_v20 = vmov %v21455_v5 }
 0x1ec   : > { %v2246_v54 = vsel %vm2163_vm1, %v21459_v33, %v21458_v53  ;;  %v5067_v61 = vadd.f32 %v4766_v44, %v4390_v42  ;;  %v3846_v24 = vsel %vm2163_vm1, %v21460_v20, %v3845_v29  ;;  %v16301_v50 = vmul.f32 %v13969_v14, %v683_v26 }
 0x1ed   : > { %v2543_v30 = vadd.f32 %v2246_v54, %v1856_v32  ;;  %v5450_v11 = vsel %vm2163_vm1, %v5447_v28, %v5449_v37  ;;  %v4147_v8 = vadd.f32 %v3846_v24, %v3461_v10  ;;  %v16305_v3 = vmul.f32 %v14008_v40, %v683_v26 }
 0x1ee   : > { %v16308_v5 = vmul.f32 %v14011_v41, %v683_v26  ;;  %v5753_v42 = vadd.f32 %v5450_v11, %v5067_v61  ;;  %v16311_v56 = vmul.f32 %v13989_v31, %v683_v26  ;;  %v2675_v55 = vmul.f32 %v13999_v35, %v683_v26  ;;  %v21461_v61 = vld [vmem:[#allocation19_spill] sm:$0xff] }
 0x1ef   : > { %v4508_v58 = vmul.f32 %v14020_v47, %v683_v26  ;;  %v1566_v27 = vrot.slane %v16293_v6, 1  ;;  %v2251_v23 = vrot.slane %v16301_v50, 2  ;;  %v4279_v28 = vmul.f32 %v14017_v46, %v683_v26 }
 0x1f0   : > { %v5190_v19 = vmul.f32 %v15753_v15, %v683_v26  ;;  %v5873_v32 = vadd.f32 %v15881_v2, %v5753_v42  ;;  %v16320_v43 = vadd.f32 %v2675_v55, %v2543_v30  ;;  %v3167_v10 = vrot.slane %v16305_v3, 1 }
 0x1f1   : > { %v4767_v44 = vrot.slane %v4508_v58, 1  ;;  %v4392_v33 = vadd.f32 %v4279_v28, %v4147_v8  ;;  %v1857_v20 = vadd.f32 %v16232_v12, %v21461_v61  ;;  %v16328_v26 = vmul.f32 %v13989_v31, %v688_v57 }
 0x1f2   : > { %v5451_v54 = vrot.slane %v5190_v19, 2  ;;  %v5986_v24 = vmax.f32 %v5873_v32, 0.0  ;;  %v16331_v42 = vmul.f32 %v13966_v13, %v688_v57  ;;  %v16334_v55 = vmul.f32 %v13969_v14, %v688_v57 }
 0x1f3   : > { %v4768_v11 = vsel %vm1478_vm0, %v4765_v49, %v4767_v44  ;;  %v21462_v8 = vmov %v21458_v53  ;;  %v2676_v12 = vmul.f32 %v13999_v35, %v688_v57  ;;  %v16345_v19 = vmul.f32 %v14008_v40, %v688_v57 }
 0x1f4   : > { %v5068_v30 = vadd.f32 %v4768_v11, %v4391_v48  ;;  %v2248_v58 = vsel %vm2163_vm1, %v21462_v8, %v2247_v38  ;;  %6101 = vst.msk [vmem:[#allocation2 + $0x111] sm:$0xff] %vm6066_vm2, %v5986_v24  ;;  %v5452_v49 = vsel %vm2163_vm1, %v5449_v37, %v5451_v54  ;;  %v3462_v48 = vadd.f32 %v16235_v39, %v16166_v16 }
 0x1f5   : > { %v2544_v28 = vadd.f32 %v2248_v58, %v1857_v20  ;;  %v16350_v61 = vmul.f32 %v14011_v41, %v688_v57  ;;  %v3848_v45 = vsel %vm2163_vm1, %v3845_v29, %v3847_v60  ;;  %v4509_v24 = vmul.f32 %v14020_v47, %v688_v57 }
 0x1f6   : > { %v5754_v32 = vadd.f32 %v5452_v49, %v5068_v30  ;;  %v4148_v20 = vadd.f32 %v3848_v45, %v3462_v48  ;;  %v4280_v11 = vmul.f32 %v14017_v46, %v688_v57  ;;  %v5191_v8 = vmul.f32 %v15753_v15, %v688_v57  ;;  %v693_v49 = vpop.permute.xlu1 %692 }
 0x1f7   : > { %v4769_v30 = vrot.slane %v4509_v24, 1  ;;  %v1858_v58 = vadd.f32 %v1565_v9, %v16206_v1  ;;  %v16364_v63 = vadd.f32 %v2676_v12, %v2544_v28  ;;  %v3169_v29 = vrot.slane %v16345_v19, 1  ;;  %v698_v24 = vpop.permute.xlu0 %697 }
 0x1f8   : > { %v5874_v16 = vadd.f32 %v15881_v2, %v5754_v32  ;;  %v5453_v53 = vrot.slane %v5191_v8, 2  ;;  %v3463_v37 = vadd.f32 %v3166_v17, %v16217_v22  ;;  %v2250_v32 = vsel %vm2163_vm1, %v2247_v38, %v2249_v52 }
 0x1f9   : > { %v4770_v57 = vsel %vm1478_vm0, %v4767_v44, %v4769_v30  ;;  %v4393_v1 = vadd.f32 %v4280_v11, %v4148_v20  ;;  %v3850_v12 = vsel %vm2163_vm1, %v3847_v60, %v3849_v4  ;;  %v16381_v22 = vmul.f32 %v13966_v13, %v693_v49 }
 0x1fa   : > { %v5987_v48 = vmax.f32 %v5874_v16, 0.0  ;;  %v5069_v9 = vadd.f32 %v4770_v57, %v4392_v33  ;;  %v5454_v17 = vsel %vm2163_vm1, %v5451_v54, %v5453_v53  ;;  %v2545_v44 = vadd.f32 %v2250_v32, %v1858_v58 }
 0x1fb   : > { %v16386_v7 = vmul.f32 %v13989_v31, %v693_v49  ;;  %v16389_v38 = vmul.f32 %v13969_v14, %v693_v49  ;;  %v4149_v28 = vadd.f32 %v3850_v12, %v3463_v37  ;;  %v2677_v25 = vmul.f32 %v13999_v35, %v693_v49 }
 0x1fc   : > { %6102 = vst.msk [vmem:[#allocation2 + $0x119] sm:$0xff] %vm6066_vm2, %v5987_v48  ;;  %v5755_v33 = vadd.f32 %v5454_v17, %v5069_v9  ;;  %v4510_v60 = vmul.f32 %v14020_v47, %v693_v49  ;;  %v21307_v20 = vrot.slane %v16381_v22, 1  ;;  %v16395_v11 = vmul.f32 %v14008_v40, %v693_v49 }
 0x1fd   : > { %v16398_v54 = vmul.f32 %v14011_v41, %v693_v49  ;;  %v4281_v8 = vmul.f32 %v14017_v46, %v693_v49  ;;  %v5192_v48 = vmul.f32 %v15753_v15, %v693_v49  ;;  %v16404_v57 = vadd.f32 %v2677_v25, %v2545_v44  ;;  %v703_v25 = vpop.permute.xlu1 %702 }
 0x1fe   : > { %v5875_v16 = vadd.f32 %v15881_v2, %v5755_v33  ;;  %v4771_v37 = vrot.slane %v4510_v60, 1  ;;  %v16407_v32 = vmul.f32 %v13966_v13, %v698_v24  ;;  %v1567_v9 = vsel %vm1478_vm0, %v1564_v21, %v1566_v27 }
 0x1ff   : > { %v16415_v12 = vmul.f32 %v13969_v14, %v698_v24  ;;  %v5455_v60 = vrot.slane %v5192_v48, 2  ;;  %v1859_v49 = vadd.f32 %v1567_v9, %v16250_v34  ;;  %v3171_v44 = vrot.slane %v16395_v11, 1  ;;  %v6233_v11 = vld [vmem:[#allocation2 + $0x90] ss:$2 sm:$0xff] }
 0x200   : > { %v5988_v17 = vmax.f32 %v5875_v16, 0.0  ;;  %v4772_v33 = vsel %vm1478_vm0, %v4769_v30, %v4771_v37  ;;  %v1572_v45 = vrot.slane %v16407_v32, 1  ;;  %v4394_v51 = vadd.f32 %v4281_v8, %v4149_v28 }
 0x201   : > { %v5070_v58 = vadd.f32 %v4772_v33, %v4393_v1  ;;  %v5456_v21 = vsel %vm2163_vm1, %v5453_v53, %v5455_v60  ;;  %v16425_v39 = vmul.f32 %v13989_v31, %v698_v24  ;;  %v16428_v30 = vmul.f32 %v14008_v40, %v698_v24  ;;  %v713_v62 = vpop.permute.xlu1 %712 }
 0x202   : > { %6103 = vst.msk [vmem:[#allocation2 + $0x121] sm:$0xff] %vm6066_vm2, %v5988_v17  ;;  %v2252_v34 = vsel %vm2163_vm1, %v2249_v52, %v2251_v23  ;;  %v3168_v53 = vsel %vm1478_vm0, %v3165_v18, %v3167_v10  ;;  %v2678_v8 = vmul.f32 %v13999_v35, %v698_v24  ;;  %v16452_v52 = vsel %vm1478_vm0, %v21307_v20, %v1572_v45 }
 0x203   : > { %v5756_v16 = vadd.f32 %v5456_v21, %v5070_v58  ;;  %v2546_v28 = vadd.f32 %v2252_v34, %v1859_v49  ;;  %v3464_v48 = vadd.f32 %v3168_v53, %v16279_v59  ;;  %v16444_v58 = vmul.f32 %v14011_v41, %v698_v24 }
 0x204   : > { %v3173_v0 = vrot.slane %v16428_v30, 1  ;;  %v4511_v18 = vmul.f32 %v14020_v47, %v698_v24  ;;  %v21463_v9 = vrot.slane %v16308_v5, 2  ;;  %v4282_v17 = vmul.f32 %v14017_v46, %v698_v24 }
 0x205   : > { %v5876_v36 = vadd.f32 %v15881_v2, %v5756_v16  ;;  %v5193_v33 = vmul.f32 %v15753_v15, %v698_v24  ;;  %v21464_v49 = vrot.slane %v16331_v42, 1  ;;  %v16469_v20 = vadd.f32 %v2678_v8, %v2546_v28 }
 0x206   : > { %v3852_v59 = vsel %vm2163_vm1, %v3849_v4, %v21463_v9  ;;  %v4773_v53 = vrot.slane %v4511_v18, 1  ;;  %v3170_v15 = vsel %vm1478_vm0, %v3167_v10, %v3169_v29  ;;  %v16483_v6 = vsel %vm1478_vm0, %v3171_v44, %v3173_v0 }
 0x207   : > { %v1569_v21 = vsel %vm1478_vm0, %v1566_v27, %v21464_v49  ;;  %v5989_v16 = vmax.f32 %v5876_v36, 0.0  ;;  %v4150_v34 = vadd.f32 %v3852_v59, %v3464_v48  ;;  %v5457_v4 = vrot.slane %v5193_v33, 2  ;;  %v708_v33 = vpop.permute.xlu0 %707 }
 0x208   : > { %v1860_v1 = vadd.f32 %v1569_v21, %v16311_v56  ;;  %v4774_v56 = vsel %vm1478_vm0, %v4771_v37, %v4773_v53  ;;  %v21465_v27 = vrot.slane %v16334_v55, 2  ;;  %v3465_v3 = vadd.f32 %v3170_v15, %v16320_v43  ;;  %v16521_v15 = vld [vmem:[%s21261_s1 + $0x8] ss:$0 sm:$0xff] }
 0x209   : > { %6104 = vst.msk [vmem:[#allocation2 + $0x129] sm:$0xff] %vm6066_vm2, %v5989_v16  ;;  %v5071_v10 = vadd.f32 %v4774_v56, %v4394_v51  ;;  %v1302_v8 = vmul.f32 %v13966_v13, %v703_v25  ;;  %v16494_v48 = vmul.f32 %v13969_v14, %v703_v25  ;;  %v4395_v36 = vadd.f32 %v4282_v17, %v4150_v34 }
 0x20a   : > { %v2254_v24 = vsel %vm2163_vm1, %v2251_v23, %v21465_v27  ;;  %v5458_v18 = vsel %vm2163_vm1, %v5455_v60, %v5457_v4  ;;  %v16498_v37 = vmul.f32 %v14008_v40, %v703_v25  ;;  %v16501_v9 = vmul.f32 %v14011_v41, %v703_v25 }
 0x20b   : > { %v2547_v28 = vadd.f32 %v2254_v24, %v1860_v1  ;;  %v5757_v50 = vadd.f32 %v5458_v18, %v5071_v10  ;;  %v21466_v23 = vrot.slane %v16350_v61, 2  ;;  %v21467_v43 = vrot.slane %v16308_v5, 2 }
 0x20c   : > { %v1574_v1 = vrot.slane %v1302_v8, 1  ;;  %v2679_v59 = vmul.f32 %v13999_v35, %v703_v25  ;;  %v16510_v60 = vmul.f32 %v13989_v31, %v703_v25  ;;  %v4512_v21 = vmul.f32 %v14020_v47, %v703_v25 }
 0x20d   : > { %v3854_v51 = vsel %vm2163_vm1, %v21467_v43, %v21466_v23  ;;  %v5877_v16 = vadd.f32 %v15881_v2, %v5757_v50  ;;  %v4283_v5 = vmul.f32 %v14017_v46, %v703_v25  ;;  %v16524_v56 = vmul.f32 %v16521_v15, %v703_v25 }
 0x20e   : > { %v4151_v17 = vadd.f32 %v3854_v51, %v3465_v3  ;;  %v16515_v34 = vadd.f32 %v2679_v59, %v2547_v28  ;;  %v21309_v27 = vrot.slane %v16498_v37, 1  ;;  %v4775_v3 = vrot.slane %v4512_v21, 1 }
 0x20f   : > { %v16529_v10 = vmul.f32 %v13966_v13, %v708_v33  ;;  %v5990_v28 = vmax.f32 %v5877_v16, 0.0  ;;  %v16534_v8 = vsel %vm1478_vm0, %v1572_v45, %v1574_v1  ;;  %v5459_v18 = vrot.slane %v16524_v56, 2 }
 0x210   : > { %v21468_v50 = vrot.slane %v16381_v22, 1  ;;  %v21469_v25 = vmov %v21464_v49  ;;  %v4776_v43 = vsel %vm1478_vm0, %v4773_v53, %v4775_v3  ;;  %v16546_v21 = vmul.f32 %v13969_v14, %v708_v33 }
 0x211   : > { %v21308_v51 = vrot.slane %v16529_v10, 1  ;;  %6105 = vst.msk [vmem:[#allocation2 + $0x131] sm:$0xff] %vm6066_vm2, %v5990_v28  ;;  %v4396_v45 = vadd.f32 %v4283_v5, %v4151_v17  ;;  %v5072_v32 = vadd.f32 %v4776_v43, %v4395_v36  ;;  %v21470_v16 = vrot.slane %v16389_v38, 2  ;;  %v6231_v28 = vld [vmem:[#allocation2 + $0x80] ss:$2 sm:$0xff] }
 0x212   : > { %v1571_v23 = vsel %vm1478_vm0, %v21469_v25, %v21468_v50  ;;  %v21471_v22 = vrot.slane %v16334_v55, 2  ;;  %v2680_v56 = vmul.f32 %v13999_v35, %v708_v33  ;;  %v5460_v53 = vsel %vm2163_vm1, %v5457_v4, %v5459_v18  ;;  %v6343_v25 = vld [vmem:[#allocation2 + $0x81] ss:$2 sm:$0xff] }
 0x213   : > { %v1861_v59 = vadd.f32 %v1571_v23, %v16328_v26  ;;  %v16557_v26 = vmul.f32 %v14008_v40, %v708_v33  ;;  %v3172_v36 = vsel %vm1478_vm0, %v3169_v29, %v3171_v44  ;;  %v16569_v55 = vsel %vm1478_vm0, %v3173_v0, %v21309_v27  ;;  %v6235_v0 = vld [vmem:[#allocation2 + $0xa0] ss:$2 sm:$0xff]  ;;  %v6347_v23 = vld [vmem:[#allocation2 + $0xa1] ss:$2 sm:$0xff] }
 0x214   : > { %v2256_v42 = vsel %vm2163_vm1, %v21471_v22, %v21470_v16  ;;  %v5758_v17 = vadd.f32 %v5460_v53, %v5072_v32  ;;  %v16572_v4 = vmul.f32 %v13989_v31, %v708_v33  ;;  %v16575_v5 = vmul.f32 %v14011_v41, %v708_v33  ;;  %v6349_v53 = vld [vmem:[#allocation2 + $0xb1] ss:$2 sm:$0xff] }
 0x215   : > { %v2548_v50 = vadd.f32 %v2256_v42, %v1861_v59  ;;  %v16580_v19 = vsel %vm1478_vm0, %v1574_v1, %v21308_v51  ;;  %v3466_v44 = vadd.f32 %v3172_v36, %v16364_v63  ;;  %v16585_v30 = vmul.f32 %v14020_v47, %v708_v33  ;;  %v6237_v42 = vld [vmem:[#allocation2 + $0xb0] ss:$2 sm:$0xff]  ;;  %v6345_v63 = vld [vmem:[#allocation2 + $0x91] ss:$2 sm:$0xff] }
 0x216   : > { %v5878_v43 = vadd.f32 %v15881_v2, %v5758_v17  ;;  %v21472_v32 = vrot.slane %v16398_v54, 2  ;;  %v21473_v16 = vrot.slane %v16350_v61, 2  ;;  %v16596_v22 = vmul.f32 %v16521_v15, %v708_v33 }
 0x217   : > { %v16588_v59 = vadd.f32 %v2680_v56, %v2548_v50  ;;  %v4284_v17 = vmul.f32 %v14017_v46, %v708_v33  ;;  %v4777_v56 = vrot.slane %v16585_v30, 1  ;;  %v6446_v61 = vmax.f32 %v6231_v28, %v6343_v25 }
 0x218   : > { %v3856_v1 = vsel %vm2163_vm1, %v21473_v16, %v21472_v32  ;;  %v5991_v50 = vmax.f32 %v5878_v43, 0.0  ;;  %v5461_v24 = vrot.slane %v16596_v22, 2  ;;  %v6448_v49 = vmax.f32 %v6235_v0, %v6347_v23 }
 0x219   : > { %v4778_v32 = vsel %vm1478_vm0, %v4775_v3, %v4777_v56  ;;  %v6447_v16 = vmax.f32 %v6233_v11, %v6345_v63  ;;  %v6449_v51 = vmax.f32 %v6237_v42, %v6349_v53  ;;  %v1862_v27 = vadd.f32 %v16452_v52, %v16386_v7 }
 0x21a   : > { %6106 = vst.msk [vmem:[#allocation2 + $0x139] sm:$0xff] %vm6066_vm2, %v5991_v50  ;;  %v5073_v29 = vadd.f32 %v4778_v32, %v4396_v45  ;;  %v6503_v36 = vmax.f32 %v6446_v61, %v6448_v49  ;;  %v21474_v33 = vrot.slane %v16415_v12, 2  ;;  %v21475_v30 = vrot.slane %v16389_v38, 2 }
 0x21b   : > { %v3467_v28 = vadd.f32 %v16483_v6, %v16404_v57  ;;  %v4152_v3 = vadd.f32 %v3856_v1, %v3466_v44  ;;  %v5462_v11 = vsel %vm2163_vm1, %v5459_v18, %v5461_v24  ;;  %v6504_v25 = vmax.f32 %v6447_v16, %v6449_v51 }
 0x21c   : > { %v2258_v43 = vsel %vm2163_vm1, %v21475_v30, %v21474_v33  ;;  %v5759_v7 = vadd.f32 %v5462_v11, %v5073_v29  ;;  %6505 = vst.msk [vmem:[#allocation3 + $0x40] sm:$0xff] %vm6066_vm2, %v6503_v36  ;;  %v21476_v52 = vrot.slane %v16444_v58, 2  ;;  %v21477_v49 = vrot.slane %v16398_v54, 2 }
 0x21d   : > { %v2549_v0 = vadd.f32 %v2258_v43, %v1862_v27  ;;  %v1304_v38 = vmul.f32 %v13966_v13, %v713_v62  ;;  %v16623_v23 = vmul.f32 %v13969_v14, %v713_v62  ;;  %v21478_v57 = vrot.slane %v16557_v26, 1  ;;  %6506 = vst.msk [vmem:[#allocation3 + $0x48] sm:$0x3f] %vm6497_vm4, %v6504_v25 }
 0x21e   : > { %v3858_v45 = vsel %vm2163_vm1, %v21477_v49, %v21476_v52  ;;  %v21479_v6 = vrot.slane %v16498_v37, 1  ;;  %v2910_v51 = vmul.f32 %v14008_v40, %v713_v62  ;;  %v16635_v54 = vmul.f32 %v14011_v41, %v713_v62  ;;  %v718_v37 = vpop.permute.xlu0 %717 }
 0x21f   : > { %v4153_v18 = vadd.f32 %v3858_v45, %v3467_v28  ;;  %v5879_v29 = vadd.f32 %v15881_v2, %v5759_v7  ;;  %v1578_v44 = vrot.slane %v1304_v38, 1  ;;  %v2681_v1 = vmul.f32 %v13999_v35, %v713_v62 }
 0x220   : > { %v16630_v27 = vsel %vm1478_vm0, %v21479_v6, %v21478_v57  ;;  %v16640_v22 = vmul.f32 %v14020_v47, %v713_v62  ;;  %v4397_v42 = vadd.f32 %v4284_v17, %v4152_v3  ;;  %v16643_v63 = vmul.f32 %v13989_v31, %v713_v62 }
 0x221   : > { %v2263_v53 = vrot.slane %v16623_v23, 2  ;;  %v4285_v36 = vmul.f32 %v14017_v46, %v713_v62  ;;  %v5992_v50 = vmax.f32 %v5879_v29, 0.0  ;;  %v16647_v61 = vadd.f32 %v2681_v1, %v2549_v0 }
 0x222   : > { %v4779_v2 = vrot.slane %v16640_v22, 1  ;;  %v16651_v32 = vmul.f32 %v16521_v15, %v713_v62  ;;  %v3179_v16 = vrot.slane %v2910_v51, 1  ;;  %v3863_v33 = vrot.slane %v16635_v54, 2 }
 0x223   : > { %v16655_v17 = vmul.f32 %v13966_v13, %v718_v37  ;;  %v1863_v30 = vadd.f32 %v16534_v8, %v16425_v39  ;;  %6107 = vst.msk [vmem:[#allocation2 + $0x141] sm:$0xff] %vm6066_vm2, %v5992_v50  ;;  %v21480_v43 = vrot.slane %v16529_v10, 1  ;;  %v4398_v3 = vadd.f32 %v4285_v36, %v4153_v18  ;;  %v6603_v25 = vld [vmem:[#allocation3 + $0x40] sm:$0xff] }
 0x224   : > { %v4780_v62 = vsel %vm1478_vm0, %v4777_v56, %v4779_v2  ;;  %v5463_v11 = vrot.slane %v16651_v32, 2  ;;  %v16669_v52 = vmul.f32 %v13969_v14, %v718_v37  ;;  %v21481_v39 = vrot.slane %v16494_v48, 2  ;;  %v6604_v49 = vld [vmem:[#allocation3 + $0x48] sm:$0xff]  ;;  %v6557_v45 = vld [vmem:[#allocation3 + $0x3f] sm:$0xff] }
 0x225   : > { %v16663_v28 = vsel %vm1478_vm0, %v21480_v43, %v1578_v44  ;;  %v5074_v0 = vadd.f32 %v4780_v62, %v4397_v42  ;;  %v1580_v7 = vrot.slane %v16655_v17, 1  ;;  %v21482_v8 = vrot.slane %v16415_v12, 2  ;;  %v6558_v38 = vld [vmem:[#allocation3 + $0x47] sm:$0xff] }
 0x226   : > { %v5464_v56 = vsel %vm2163_vm1, %v5461_v24, %v5463_v11  ;;  %v16678_v6 = vmul.f32 %v14008_v40, %v718_v37  ;;  %v3468_v18 = vadd.f32 %v16569_v55, %v16469_v20  ;;  %v6628_v51 = vpack.c.bf16 %v6604_v49, %v6603_v25  ;;  %v16700_v20 = vld [vmem:[%s21262_s2] ss:$0 sm:$0xff] }
 0x227   : > { %v2260_v10 = vsel %vm2163_vm1, %v21482_v8, %v21481_v39  ;;  %v6582_v29 = vpack.c.bf16 %v6558_v38, %v6557_v45  ;;  %v5760_v1 = vadd.f32 %v5464_v56, %v5074_v0  ;;  %v2682_v22 = vmul.f32 %v13999_v35, %v718_v37  ;;  %v723_v39 = vpop.permute.xlu1 %722 }
 0x228   : > { %v2550_v57 = vadd.f32 %v2260_v10, %v1863_v30  ;;  %v21483_v12 = vrot.slane %v16557_v26, 1  ;;  %v16689_v36 = vmul.f32 %v13989_v31, %v718_v37  ;;  %v16692_v24 = vsel %vm1478_vm0, %v1578_v44, %v1580_v7  ;;  %12872 = vmatmul.mubr.msk.bf16.vlgmr.msra.gmra.mrb[0].mxu1 %vm6066_vm2, %v6628_v51 }
 0x229   : > { %v3181_v50 = vrot.slane %v16678_v6, 1  ;;  %12904 = vmatmul.mubr.msk.bf16.gmra.mrb[4].mxu0 %vm6066_vm2, %v6582_v29  ;;  %v5880_v26 = vadd.f32 %v16700_v20, %v5760_v1  ;;  %v2265_v55 = vrot.slane %v16669_v52, 2  ;;  %v16705_v32 = vmul.f32 %v14011_v41, %v718_v37 }
 0x22a   : > { %v16686_v42 = vsel %vm1478_vm0, %v21483_v12, %v3179_v16  ;;  %v21484_v44 = vrot.slane %v16501_v9, 2  ;;  %v21485_v17 = vrot.slane %v16444_v58, 2  ;;  %v4286_v62 = vmul.f32 %v14017_v46, %v718_v37  ;;  %v728_v9 = vpop.permute.xlu0 %727 }
 0x22b   : > { %v4515_v25 = vmul.f32 %v14020_v47, %v718_v37  ;;  %v5197_v0 = vmul.f32 %v16521_v15, %v718_v37  ;;  %v5993_v8 = vmax.f32 %v5880_v26, 0.0  ;;  %v16715_v10 = vadd.f32 %v2682_v22, %v2550_v57 }
 0x22c   : > { %v3860_v30 = vsel %vm2163_vm1, %v21485_v17, %v21484_v44  ;;  %v16720_v49 = vsel %vm1478_vm0, %v3179_v16, %v3181_v50  ;;  %v1864_v58 = vadd.f32 %v16580_v19, %v16510_v60  ;;  %v21486_v56 = vrot.slane %v16546_v21, 2 }
 0x22d   : > { %v4154_v43 = vadd.f32 %v3860_v30, %v3468_v18  ;;  %v4781_v45 = vrot.slane %v4515_v25, 1  ;;  %v5465_v38 = vrot.slane %v5197_v0, 2  ;;  %v21487_v18 = vrot.slane %v16494_v48, 2  ;;  %6108 = vst.msk [vmem:[#allocation2 + $0x149] sm:$0xff] %vm6066_vm2, %v5993_v8 }
 0x22e   : > { %v3469_v57 = vadd.f32 %v16630_v27, %v16515_v34  ;;  %v3865_v51 = vrot.slane %v16705_v32, 2  ;;  %v1306_v29 = vmul.f32 %v13966_v13, %v723_v39  ;;  %v16735_v60 = vmul.f32 %v13969_v14, %v723_v39 }
 0x22f   : > { %v2262_v37 = vsel %vm2163_vm1, %v21487_v18, %v21486_v56  ;;  %v4399_v19 = vadd.f32 %v4286_v62, %v4154_v43  ;;  %v4782_v1 = vsel %vm1478_vm0, %v4779_v2, %v4781_v45  ;;  %v21488_v48 = vrot.slane %v16575_v5, 2 }
 0x230   : > { %v2551_v16 = vadd.f32 %v2262_v37, %v1864_v58  ;;  %v21489_v22 = vmov %v21484_v44  ;;  %v16744_v34 = vmul.f32 %v13989_v31, %v723_v39  ;;  %v5075_v27 = vadd.f32 %v4782_v1, %v4398_v3 }
 0x231   : > { %v3862_v12 = vsel %vm2163_vm1, %v21489_v22, %v21488_v48  ;;  %v1582_v26 = vrot.slane %v1306_v29, 1  ;;  %v2683_v44 = vmul.f32 %v13999_v35, %v723_v39  ;;  %v2912_v17 = vmul.f32 %v14008_v40, %v723_v39 }
 0x232   : > { %v5466_v30 = vsel %vm2163_vm1, %v5463_v11, %v5465_v38  ;;  %v4155_v43 = vadd.f32 %v3862_v12, %v3469_v57  ;;  %v16750_v2 = vmul.f32 %v14011_v41, %v723_v39  ;;  %v4516_v62 = vmul.f32 %v14020_v47, %v723_v39 }
 0x233   : > { %v5761_v25 = vadd.f32 %v5466_v30, %v5075_v27  ;;  %v2267_v0 = vrot.slane %v16735_v60, 2  ;;  %v16754_v8 = vadd.f32 %v2683_v44, %v2551_v16  ;;  %v5198_v3 = vmul.f32 %v16521_v15, %v723_v39 }
 0x234   : > { %v16758_v58 = vsel %vm1478_vm0, %v1580_v7, %v1582_v26  ;;  %v3183_v56 = vrot.slane %v2912_v17, 1  ;;  %v4287_v11 = vmul.f32 %v14017_v46, %v723_v39  ;;  %v4783_v18 = vrot.slane %v4516_v62, 1 }
 0x235   : > { %v5881_v37 = vadd.f32 %v16700_v20, %v5761_v25  ;;  %v3867_v57 = vrot.slane %v16750_v2, 2  ;;  %v5467_v29 = vrot.slane %v5198_v3, 2  ;;  %v16764_v1 = vmul.f32 %v13966_v13, %v728_v9 }
 0x236   : > { %v4400_v48 = vadd.f32 %v4287_v11, %v4155_v43  ;;  %v4784_v16 = vsel %vm1478_vm0, %v4781_v45, %v4783_v18  ;;  %v1865_v22 = vadd.f32 %v16663_v28, %v16572_v4  ;;  %v16770_v7 = vmul.f32 %v13969_v14, %v728_v9 }
 0x237   : > { %v5994_v12 = vmax.f32 %v5881_v37, 0.0  ;;  %v5076_v39 = vadd.f32 %v4784_v16, %v4399_v19  ;;  %v1584_v27 = vrot.slane %v16764_v1, 1  ;;  %v21490_v44 = vrot.slane %v16546_v21, 2 }
 0x238   : > { %v5468_v30 = vsel %vm2163_vm1, %v5465_v38, %v5467_v29  ;;  %v2684_v45 = vmul.f32 %v13999_v35, %v728_v9  ;;  %v16781_v4 = vmul.f32 %v14008_v40, %v728_v9  ;;  %v16787_v28 = vsel %vm1478_vm0, %v3181_v50, %v3183_v56 }
 0x239   : > { %v2264_v17 = vsel %vm2163_vm1, %v21490_v44, %v2263_v53  ;;  %6109 = vst.msk [vmem:[#allocation2 + $0x151] sm:$0xff] %vm6066_vm2, %v5994_v12  ;;  %v5762_v19 = vadd.f32 %v5468_v30, %v5076_v39  ;;  %v16790_v21 = vmul.f32 %v13989_v31, %v728_v9  ;;  %v3470_v38 = vadd.f32 %v16686_v42, %v16588_v59  ;;  %v733_v12 = vpop.permute.xlu1 %732 }
 0x23a   : > { %v2552_v43 = vadd.f32 %v2264_v17, %v1865_v22  ;;  %v16795_v62 = vsel %vm1478_vm0, %v1582_v26, %v1584_v27  ;;  %v2269_v25 = vrot.slane %v16770_v7, 2  ;;  %v3185_v3 = vrot.slane %v16781_v4, 1 }
 0x23b   : > { %v16800_v11 = vmul.f32 %v14011_v41, %v728_v9  ;;  %v5882_v6 = vadd.f32 %v16700_v20, %v5762_v19  ;;  %v21491_v37 = vrot.slane %v16575_v5, 2  ;;  %v4517_v42 = vmul.f32 %v14020_v47, %v728_v9 }
 0x23c   : > { %v16803_v50 = vadd.f32 %v2684_v45, %v2552_v43  ;;  %v4288_v1 = vmul.f32 %v14017_v46, %v728_v9  ;;  %v5199_v16 = vmul.f32 %v16521_v15, %v728_v9  ;;  %v1866_v22 = vadd.f32 %v16692_v24, %v16643_v63 }
 0x23d   : > { %v3864_v59 = vsel %vm2163_vm1, %v21491_v37, %v3863_v33  ;;  %v5995_v39 = vmax.f32 %v5882_v6, 0.0  ;;  %v4785_v44 = vrot.slane %v4517_v42, 1  ;;  %v2266_v5 = vsel %vm2163_vm1, %v2263_v53, %v2265_v55 }
 0x23e   : > { %v4156_v26 = vadd.f32 %v3864_v59, %v3470_v38  ;;  %v3471_v17 = vadd.f32 %v16720_v49, %v16647_v61  ;;  %v16825_v30 = vsel %vm1478_vm0, %v3183_v56, %v3185_v3  ;;  %v3869_v9 = vrot.slane %v16800_v11, 2 }
 0x23f   : > { %v5469_v63 = vrot.slane %v5199_v16, 2  ;;  %v2553_v24 = vadd.f32 %v2266_v5, %v1866_v22  ;;  %6110 = vst.msk [vmem:[#allocation2 + $0x159] sm:$0xff] %vm6066_vm2, %v5995_v39  ;;  %v4786_v43 = vsel %vm1478_vm0, %v4783_v18, %v4785_v44  ;;  %v3866_v23 = vsel %vm2163_vm1, %v3863_v33, %v3865_v51 }
 0x240   : > { %v1308_v53 = vmul.f32 %v13966_v13, %v733_v12  ;;  %v16837_v61 = vmul.f32 %v13969_v14, %v733_v12  ;;  %v4401_v49 = vadd.f32 %v4288_v1, %v4156_v26  ;;  %v5077_v56 = vadd.f32 %v4786_v43, %v4400_v48  ;;  %v738_v48 = vpop.permute.xlu0 %737 }
 0x241   : > { %v4157_v45 = vadd.f32 %v3866_v23, %v3471_v17  ;;  %v2914_v19 = vmul.f32 %v14008_v40, %v733_v12  ;;  %v5470_v38 = vsel %vm2163_vm1, %v5467_v29, %v5469_v63  ;;  %v2685_v18 = vmul.f32 %v13999_v35, %v733_v12 }
 0x242   : > { %v1586_v6 = vrot.slane %v1308_v53, 1  ;;  %v16843_v37 = vmul.f32 %v14011_v41, %v733_v12  ;;  %v5763_v54 = vadd.f32 %v5470_v38, %v5077_v56  ;;  %v16846_v33 = vmul.f32 %v13989_v31, %v733_v12 }
 0x243   : > { %v21311_v59 = vrot.slane %v16837_v61, 2  ;;  %v4518_v42 = vmul.f32 %v14020_v47, %v733_v12  ;;  %v16850_v26 = vadd.f32 %v2685_v18, %v2553_v24  ;;  %v3187_v1 = vrot.slane %v2914_v19, 1 }
 0x244   : > { %v4289_v29 = vmul.f32 %v14017_v46, %v733_v12  ;;  %v5200_v16 = vmul.f32 %v16521_v15, %v733_v12  ;;  %v5883_v22 = vadd.f32 %v16700_v20, %v5763_v54  ;;  %v16856_v39 = vsel %vm1478_vm0, %v1584_v27, %v1586_v6 }
 0x245   : > { %v21312_v5 = vrot.slane %v16843_v37, 2  ;;  %v4787_v17 = vrot.slane %v4518_v42, 1  ;;  %v1309_v53 = vmul.f32 %v13966_v13, %v738_v48  ;;  %v1867_v24 = vadd.f32 %v16758_v58, %v16689_v36 }
 0x246   : > { %v4402_v43 = vadd.f32 %v4289_v29, %v4157_v45  ;;  %v5471_v23 = vrot.slane %v5200_v16, 2  ;;  %v5996_v56 = vmax.f32 %v5883_v22, 0.0  ;;  %v16864_v12 = vmul.f32 %v13969_v14, %v738_v48 }
 0x247   : > { %v4788_v19 = vsel %vm1478_vm0, %v4785_v44, %v4787_v17  ;;  %v2268_v27 = vsel %vm2163_vm1, %v2265_v55, %v2267_v0  ;;  %v1588_v18 = vrot.slane %v1309_v53, 1  ;;  %v2686_v54 = vmul.f32 %v13999_v35, %v738_v48 }
 0x248   : > { %v5078_v38 = vadd.f32 %v4788_v19, %v4401_v49  ;;  %v5472_v45 = vsel %vm2163_vm1, %v5469_v63, %v5471_v23  ;;  %6111 = vst.msk [vmem:[#allocation2 + $0x161] sm:$0xff] %vm6066_vm2, %v5996_v56  ;;  %v2554_v36 = vadd.f32 %v2268_v27, %v1867_v24  ;;  %v16875_v58 = vmul.f32 %v14008_v40, %v738_v48  ;;  %v743_v24 = vpop.permute.xlu1 %742 }
 0x249   : > { %v3472_v44 = vadd.f32 %v16787_v28, %v16715_v10  ;;  %v16880_v42 = vmul.f32 %v14011_v41, %v738_v48  ;;  %v16885_v52 = vsel %vm1478_vm0, %v3185_v3, %v3187_v1  ;;  %v16888_v63 = vmul.f32 %v13989_v31, %v738_v48 }
 0x24a   : > { %v5764_v55 = vadd.f32 %v5472_v45, %v5078_v38  ;;  %v3868_v49 = vsel %vm2163_vm1, %v3865_v51, %v3867_v57  ;;  %v3189_v28 = vrot.slane %v16875_v58, 1  ;;  %v4290_v4 = vmul.f32 %v14017_v46, %v738_v48 }
 0x24b   : > { %v4158_v29 = vadd.f32 %v3868_v49, %v3472_v44  ;;  %v4519_v16 = vmul.f32 %v14020_v47, %v738_v48  ;;  %v5201_v22 = vmul.f32 %v16521_v15, %v738_v48  ;;  %v1868_v53 = vadd.f32 %v16795_v62, %v16744_v34 }
 0x24c   : > { %v5884_v3 = vadd.f32 %v16700_v20, %v5764_v55  ;;  %v16904_v32 = vsel %vm1478_vm0, %v1586_v6, %v1588_v18  ;;  %v16906_v51 = vadd.f32 %v2686_v54, %v2554_v36  ;;  %v2270_v19 = vsel %vm2163_vm1, %v2267_v0, %v2269_v25 }
 0x24d   : > { %v4789_v38 = vrot.slane %v4519_v16, 1  ;;  %v5473_v48 = vrot.slane %v5201_v22, 2  ;;  %v3473_v34 = vadd.f32 %v16825_v30, %v16754_v8  ;;  %v16919_v62 = vsel %vm1478_vm0, %v3187_v1, %v3189_v28 }
 0x24e   : > { %v5997_v27 = vmax.f32 %v5884_v3, 0.0  ;;  %v2555_v6 = vadd.f32 %v2270_v19, %v1868_v53  ;;  %v1310_v45 = vmul.f32 %v13966_v13, %v743_v24  ;;  %v16923_v54 = vmul.f32 %v13969_v14, %v743_v24 }
 0x24f   : > { %v4403_v60 = vadd.f32 %v4290_v4, %v4158_v29  ;;  %v4790_v0 = vsel %vm1478_vm0, %v4787_v17, %v4789_v38  ;;  %v3870_v8 = vsel %vm2163_vm1, %v3867_v57, %v3869_v9  ;;  %v16933_v30 = vmul.f32 %v13989_v31, %v743_v24  ;;  %v748_v57 = vpop.permute.xlu0 %747 }
 0x250   : > { %6112 = vst.msk [vmem:[#allocation2 + $0x169] sm:$0xff] %vm6066_vm2, %v5997_v27  ;;  %v5079_v1 = vadd.f32 %v4790_v0, %v4402_v43  ;;  %v1590_v36 = vrot.slane %v1310_v45, 1  ;;  %v2687_v44 = vmul.f32 %v13999_v35, %v743_v24  ;;  %v16937_v55 = vmul.f32 %v14008_v40, %v743_v24 }
 0x251   : > { %v5474_v49 = vsel %vm2163_vm1, %v5471_v23, %v5473_v48  ;;  %v4159_v29 = vadd.f32 %v3870_v8, %v3473_v34  ;;  %v16941_v17 = vmul.f32 %v14011_v41, %v743_v24  ;;  %v16944_v2 = vmul.f32 %v14020_v47, %v743_v24 }
 0x252   : > { %v5765_v4 = vadd.f32 %v5474_v49, %v5079_v1  ;;  %v16947_v43 = vadd.f32 %v2687_v44, %v2555_v6  ;;  %v16950_v16 = vmul.f32 %v16521_v15, %v743_v24  ;;  %v16953_v22 = vsel %vm1478_vm0, %v1588_v18, %v1590_v36 }
 0x253   : > { %v3191_v23 = vrot.slane %v16937_v55, 1  ;;  %v4291_v53 = vmul.f32 %v14017_v46, %v743_v24  ;;  %v4791_v19 = vrot.slane %v16944_v2, 1  ;;  %v16962_v6 = vmul.f32 %v13966_v13, %v748_v57 }
 0x254   : > { %v5885_v27 = vadd.f32 %v16700_v20, %v5765_v4  ;;  %v5475_v45 = vrot.slane %v16950_v16, 2  ;;  %v1869_v18 = vadd.f32 %v16856_v39, %v16790_v21  ;;  %v16968_v1 = vmul.f32 %v13969_v14, %v748_v57  ;;  %v6239_v39 = vld [vmem:[#allocation2 + $0xc0] ss:$2 sm:$0xff]  ;;  %v6351_v16 = vld [vmem:[#allocation2 + $0xc1] ss:$2 sm:$0xff] }
 0x255   : > { %v4404_v0 = vadd.f32 %v4291_v53, %v4159_v29  ;;  %v4792_v8 = vsel %vm1478_vm0, %v4789_v38, %v4791_v19  ;;  %v21310_v55 = vrot.slane %v16962_v6, 1  ;;  %v2272_v49 = vsel %vm2163_vm1, %v2269_v25, %v21311_v59  ;;  %v6353_v53 = vld [vmem:[#allocation2 + $0xd1] ss:$2 sm:$0xff] }
 0x256   : > { %v5998_v24 = vmax.f32 %v5885_v27, 0.0  ;;  %v5080_v44 = vadd.f32 %v4792_v8, %v4403_v60  ;;  %v5476_v29 = vsel %vm2163_vm1, %v5473_v48, %v5475_v45  ;;  %v2556_v2 = vadd.f32 %v2272_v49, %v1869_v18  ;;  %v6241_v48 = vld [vmem:[#allocation2 + $0xd0] ss:$2 sm:$0xff] }
 0x257   : > { %v2688_v38 = vmul.f32 %v13999_v35, %v748_v57  ;;  %v16979_v21 = vmul.f32 %v14008_v40, %v748_v57  ;;  %v16983_v4 = vmul.f32 %v13989_v31, %v748_v57  ;;  %v3474_v7 = vadd.f32 %v16885_v52, %v16803_v50  ;;  %v6243_v50 = vld [vmem:[#allocation2 + $0xe0] ss:$2 sm:$0xff]  ;;  %v6355_v52 = vld [vmem:[#allocation2 + $0xe1] ss:$2 sm:$0xff] }
 0x258   : > { %6113 = vst.msk [vmem:[#allocation2 + $0x171] sm:$0xff] %vm6066_vm2, %v5998_v24  ;;  %v5766_v60 = vadd.f32 %v5476_v29, %v5080_v44  ;;  %v16988_v25 = vmul.f32 %v14011_v41, %v748_v57  ;;  %v16993_v27 = vsel %vm1478_vm0, %v3189_v28, %v3191_v23  ;;  %v16998_v8 = vsel %vm1478_vm0, %v1590_v36, %v21310_v55  ;;  %v6245_v36 = vld [vmem:[#allocation2 + $0xf0] ss:$2 sm:$0xff]  ;;  %v6357_v29 = vld [vmem:[#allocation2 + $0xf1] ss:$2 sm:$0xff] }
 0x259   : > { %v17001_v24 = vadd.f32 %v2688_v38, %v2556_v2  ;;  %v3193_v49 = vrot.slane %v16979_v21, 1  ;;  %v3872_v58 = vsel %vm2163_vm1, %v3869_v9, %v21312_v5  ;;  %v4521_v28 = vmul.f32 %v14020_v47, %v748_v57  ;;  %v753_v5 = vpop.permute.xlu1 %752 }
 0x25a   : > { %v5886_v44 = vadd.f32 %v16700_v20, %v5766_v60  ;;  %v3877_v18 = vrot.slane %v16988_v25, 2  ;;  %v4160_v2 = vadd.f32 %v3872_v58, %v3474_v7  ;;  %v4292_v38 = vmul.f32 %v14017_v46, %v748_v57 }
 0x25b   : > { %v5203_v34 = vmul.f32 %v16521_v15, %v748_v57  ;;  %v4793_v3 = vrot.slane %v4521_v28, 1  ;;  %v6450_v55 = vmax.f32 %v6239_v39, %v6351_v16  ;;  %v6452_v56 = vmax.f32 %v6243_v50, %v6355_v52 }
 0x25c   : > { %v5999_v60 = vmax.f32 %v5886_v44, 0.0  ;;  %v6451_v10 = vmax.f32 %v6241_v48, %v6353_v53  ;;  %v6453_v11 = vmax.f32 %v6245_v36, %v6357_v29  ;;  %v1870_v9 = vadd.f32 %v16904_v32, %v16846_v33  ;;  %v758_v36 = vpop.permute.xlu0 %757 }
 0x25d   : > { %v5477_v59 = vrot.slane %v5203_v34, 2  ;;  %v17020_v7 = vsel %vm1478_vm0, %v3191_v23, %v3193_v49  ;;  %v4794_v57 = vsel %vm1478_vm0, %v4791_v19, %v4793_v3  ;;  %v6507_v44 = vmax.f32 %v6450_v55, %v6452_v56 }
 0x25e   : > { %6114 = vst.msk [vmem:[#allocation2 + $0x179] sm:$0xff] %vm6066_vm2, %v5999_v60  ;;  %v3475_v39 = vadd.f32 %v16919_v62, %v16850_v26  ;;  %v4405_v34 = vadd.f32 %v4292_v38, %v4160_v2  ;;  %v5081_v48 = vadd.f32 %v4794_v57, %v4404_v0  ;;  %v6508_v16 = vmax.f32 %v6451_v10, %v6453_v11 }
 0x25f   : > { %v21492_v53 = vrot.slane %v16864_v12, 2  ;;  %v21493_v33 = vrot.slane %v16837_v61, 2  ;;  %v5478_v50 = vsel %vm2163_vm1, %v5475_v45, %v5477_v59  ;;  %6509 = vst.msk [vmem:[#allocation3 + $0x50] sm:$0xff] %vm6066_vm2, %v6507_v44  ;;  %v1312_v19 = vmul.f32 %v13966_v13, %v753_v5 }
 0x260   : > { %v17034_v56 = vmul.f32 %v13969_v14, %v753_v5  ;;  %v5767_v26 = vadd.f32 %v5478_v50, %v5081_v48  ;;  %6510 = vst.msk [vmem:[#allocation3 + $0x58] sm:$0x3f] %vm6497_vm4, %v6508_v16  ;;  %v21494_v10 = vrot.slane %v16880_v42, 2  ;;  %v21495_v62 = vrot.slane %v16843_v37, 2 }
 0x261   : > { %v2274_v32 = vsel %vm2163_vm1, %v21493_v33, %v21492_v53  ;;  %v2918_v0 = vmul.f32 %v14008_v40, %v753_v5  ;;  %v17044_v45 = vmul.f32 %v14011_v41, %v753_v5  ;;  %v1594_v52 = vrot.slane %v1312_v19, 1 }
 0x262   : > { %v2557_v23 = vadd.f32 %v2274_v32, %v1870_v9  ;;  %v3874_v61 = vsel %vm2163_vm1, %v21495_v62, %v21494_v10  ;;  %v2689_v58 = vmul.f32 %v13999_v35, %v753_v5  ;;  %v17048_v28 = vmul.f32 %v14020_v47, %v753_v5 }
 0x263   : > { %v4161_v55 = vadd.f32 %v3874_v61, %v3475_v39  ;;  %v5887_v29 = vadd.f32 %v16700_v20, %v5767_v26  ;;  %v17052_v2 = vmul.f32 %v13989_v31, %v753_v5  ;;  %v2279_v37 = vrot.slane %v17034_v56, 2 }
 0x264   : > { %v4293_v38 = vmul.f32 %v14017_v46, %v753_v5  ;;  %v17056_v60 = vadd.f32 %v2689_v58, %v2557_v23  ;;  %v3195_v11 = vrot.slane %v2918_v0, 1  ;;  %v4795_v9 = vrot.slane %v17048_v28, 1 }
 0x265   : > { %v17060_v57 = vmul.f32 %v16521_v15, %v753_v5  ;;  %v6000_v44 = vmax.f32 %v5887_v29, 0.0  ;;  %v21496_v39 = vrot.slane %v16962_v6, 1  ;;  %v3879_v16 = vrot.slane %v17044_v45, 2 }
 0x266   : > { %v17069_v53 = vmul.f32 %v13966_v13, %v758_v36  ;;  %v4406_v33 = vadd.f32 %v4293_v38, %v4161_v55  ;;  %v4796_v32 = vsel %vm1478_vm0, %v4793_v3, %v4795_v9  ;;  %v1871_v5 = vadd.f32 %v16953_v22, %v16888_v63  ;;  %v6605_v23 = vld [vmem:[#allocation3 + $0x50] sm:$0xff] }
 0x267   : > { %v17065_v48 = vsel %vm1478_vm0, %v21496_v39, %v1594_v52  ;;  %v5479_v50 = vrot.slane %v17060_v57, 2  ;;  %6115 = vst.msk [vmem:[#allocation2 + $0x181] sm:$0xff] %vm6066_vm2, %v6000_v44  ;;  %v5082_v6 = vadd.f32 %v4796_v32, %v4405_v34  ;;  %v17078_v26 = vmul.f32 %v13969_v14, %v758_v36  ;;  %v6606_v61 = vld [vmem:[#allocation3 + $0x58] sm:$0xff]  ;;  %v6559_v0 = vld [vmem:[#allocation3 + $0x4f] sm:$0xff] }
 0x268   : > { %v1596_v19 = vrot.slane %v17069_v53, 1  ;;  %v21497_v10 = vrot.slane %v16923_v54, 2  ;;  %v21498_v62 = vrot.slane %v16864_v12, 2  ;;  %v6560_v55 = vld [vmem:[#allocation3 + $0x57] sm:$0xff]  ;;  %v2690_v58 = vmul.f32 %v13999_v35, %v758_v36 }
 0x269   : > { %v5480_v63 = vsel %vm2163_vm1, %v5477_v59, %v5479_v50  ;;  %v17088_v34 = vmul.f32 %v14008_v40, %v758_v36  ;;  %v6629_v28 = vpack.c.bf16 %v6606_v61, %v6605_v23  ;;  %v6583_v29 = vpack.c.bf16 %v6560_v55, %v6559_v0 }
 0x26a   : > { %v2276_v3 = vsel %vm2163_vm1, %v21498_v62, %v21497_v10  ;;  %v17093_v38 = vsel %vm1478_vm0, %v3193_v49, %v3195_v11  ;;  %v5768_v12 = vadd.f32 %v5480_v63, %v5082_v6  ;;  %v17096_v57 = vmul.f32 %v13989_v31, %v758_v36  ;;  %v763_v62 = vpop.permute.xlu1 %762 }
 0x26b   : > { %v2558_v22 = vadd.f32 %v2276_v3, %v1871_v5  ;;  %v3197_v44 = vrot.slane %v17088_v34, 1  ;;  %v3476_v59 = vadd.f32 %v16993_v27, %v16906_v51  ;;  %v17102_v39 = vmul.f32 %v14011_v41, %v758_v36  ;;  %12875 = vmatprep.mubr.msk.bf16.mxu1 %vm6066_vm2, %v6629_v28  ;;  %12907 = vmatprep.mubr.msk.bf16.mxu0 %vm6066_vm2, %v6583_v29 }
 0x26c   : > { %v5888_v21 = vadd.f32 %v16700_v20, %v5768_v12  ;;  %v17108_v49 = vsel %vm1478_vm0, %v1594_v52, %v1596_v19  ;;  %v2281_v53 = vrot.slane %v17078_v26, 2  ;;  %v21499_v32 = vrot.slane %v16941_v17, 2 }
 0x26d   : > { %v21500_v5 = vrot.slane %v16880_v42, 2  ;;  %v17116_v27 = vadd.f32 %v2690_v58, %v2558_v22  ;;  %v4294_v6 = vmul.f32 %v14017_v46, %v758_v36  ;;  %v4523_v10 = vmul.f32 %v14020_v47, %v758_v36 }
 0x26e   : > { %v6001_v3 = vmax.f32 %v5888_v21, 0.0  ;;  %v17121_v52 = vsel %vm1478_vm0, %v3195_v11, %v3197_v44  ;;  %v5205_v61 = vmul.f32 %v16521_v15, %v758_v36  ;;  %v1872_v0 = vadd.f32 %v16998_v8, %v16933_v30 }
 0x26f   : > { %v3876_v51 = vsel %vm2163_vm1, %v21500_v5, %v21499_v32  ;;  %v3881_v42 = vrot.slane %v17102_v39, 2  ;;  %v4797_v55 = vrot.slane %v4523_v10, 1  ;;  %v21501_v63 = vrot.slane %v16968_v1, 2 }
 0x270   : > { %v4162_v23 = vadd.f32 %v3876_v51, %v3476_v59  ;;  %v21502_v22 = vrot.slane %v16923_v54, 2  ;;  %v3477_v34 = vadd.f32 %v17020_v7, %v16947_v43  ;;  %6116 = vst.msk [vmem:[#allocation2 + $0x189] sm:$0xff] %vm6066_vm2, %v6001_v3  ;;  %v5481_v11 = vrot.slane %v5205_v61, 2 }
 0x271   : > { %v21503_v30 = vmov %v21499_v32  ;;  %v1314_v36 = vmul.f32 %v13966_v13, %v763_v62  ;;  %v4798_v54 = vsel %vm1478_vm0, %v4795_v9, %v4797_v55  ;;  %v17143_v59 = vmul.f32 %v13969_v14, %v763_v62  ;;  %v768_v9 = vpop.permute.xlu0 %767 }
 0x272   : > { %v2278_v58 = vsel %vm2163_vm1, %v21502_v22, %v21501_v63  ;;  %v3878_v8 = vsel %vm2163_vm1, %v21503_v30, %v3877_v18  ;;  %v4407_v29 = vadd.f32 %v4294_v6, %v4162_v23  ;;  %v5083_v43 = vadd.f32 %v4798_v54, %v4406_v33 }
 0x273   : > { %v2559_v28 = vadd.f32 %v2278_v58, %v1872_v0  ;;  %v4163_v12 = vadd.f32 %v3878_v8, %v3477_v34  ;;  %v1598_v7 = vrot.slane %v1314_v36, 1  ;;  %v2691_v21 = vmul.f32 %v13999_v35, %v763_v62 }
 0x274   : > { %v2920_v32 = vmul.f32 %v14008_v40, %v763_v62  ;;  %v5482_v5 = vsel %vm2163_vm1, %v5479_v50, %v5481_v11  ;;  %v17149_v17 = vmul.f32 %v13989_v31, %v763_v62  ;;  %v2283_v51 = vrot.slane %v17143_v59, 2 }
 0x275   : > { %v17153_v23 = vmul.f32 %v14011_v41, %v763_v62  ;;  %v5769_v6 = vadd.f32 %v5482_v5, %v5083_v43  ;;  %v17155_v10 = vadd.f32 %v2691_v21, %v2559_v28  ;;  %v4295_v33 = vmul.f32 %v14017_v46, %v763_v62 }
 0x276   : > { %v4524_v3 = vmul.f32 %v14020_v47, %v763_v62  ;;  %v17160_v61 = vsel %vm1478_vm0, %v1596_v19, %v1598_v7  ;;  %v3199_v50 = vrot.slane %v2920_v32, 1  ;;  %v5206_v63 = vmul.f32 %v16521_v15, %v763_v62 }
 0x277   : > { %v3883_v0 = vrot.slane %v17153_v23, 2  ;;  %v5889_v22 = vadd.f32 %v16700_v20, %v5769_v6  ;;  %v4408_v58 = vadd.f32 %v4295_v33, %v4163_v12  ;;  %v1315_v30 = vmul.f32 %v13966_v13, %v768_v9 }
 0x278   : > { %v4799_v34 = vrot.slane %v4524_v3, 1  ;;  %v5483_v28 = vrot.slane %v5206_v63, 2  ;;  %v17167_v8 = vmul.f32 %v13989_v31, %v768_v9  ;;  %v1873_v36 = vadd.f32 %v17065_v48, %v16983_v4 }
 0x279   : > { %v17172_v19 = vmul.f32 %v13969_v14, %v768_v9  ;;  %v6002_v54 = vmax.f32 %v5889_v22, 0.0  ;;  %v1600_v62 = vrot.slane %v1315_v30, 1  ;;  %v21504_v12 = vrot.slane %v16968_v1, 2 }
 0x27a   : > { %v4800_v43 = vsel %vm1478_vm0, %v4797_v55, %v4799_v34  ;;  %v17181_v32 = vsel %vm1478_vm0, %v3197_v44, %v3199_v50  ;;  %v2692_v4 = vmul.f32 %v13999_v35, %v768_v9  ;;  %v5484_v48 = vsel %vm2163_vm1, %v5481_v11, %v5483_v28 }
 0x27b   : > { %v2280_v21 = vsel %vm2163_vm1, %v21504_v12, %v2279_v37  ;;  %v5084_v5 = vadd.f32 %v4800_v43, %v4407_v29  ;;  %6117 = vst.msk [vmem:[#allocation2 + $0x191] sm:$0xff] %vm6066_vm2, %v6002_v54  ;;  %v17187_v55 = vmul.f32 %v14008_v40, %v768_v9  ;;  %v3478_v33 = vadd.f32 %v17093_v38, %v17001_v24 }
 0x27c   : > { %v2560_v6 = vadd.f32 %v2280_v21, %v1873_v36  ;;  %v17192_v1 = vmul.f32 %v14011_v41, %v768_v9  ;;  %v2285_v44 = vrot.slane %v17172_v19, 2  ;;  %v3880_v29 = vsel %vm2163_vm1, %v3877_v18, %v3879_v16  ;;  %v773_v18 = vpop.permute.xlu1 %772 }
 0x27d   : > { %v5770_v3 = vadd.f32 %v5484_v48, %v5084_v5  ;;  %v4296_v11 = vmul.f32 %v14017_v46, %v768_v9  ;;  %v17202_v63 = vsel %vm1478_vm0, %v1598_v7, %v1600_v62  ;;  %v3201_v22 = vrot.slane %v17187_v55, 1 }
 0x27e   : > { %v4164_v24 = vadd.f32 %v3880_v29, %v3478_v33  ;;  %v4525_v38 = vmul.f32 %v14020_v47, %v768_v9  ;;  %v17207_v36 = vadd.f32 %v2692_v4, %v2560_v6  ;;  %v5207_v54 = vmul.f32 %v16521_v15, %v768_v9 }
 0x27f   : > { %v5890_v30 = vadd.f32 %v16700_v20, %v5770_v3  ;;  %v1874_v25 = vadd.f32 %v17108_v49, %v17052_v2  ;;  %v3885_v43 = vrot.slane %v17192_v1, 2  ;;  %v2282_v7 = vsel %vm2163_vm1, %v2279_v37, %v2281_v53  ;;  %v778_v3 = vpop.permute.xlu0 %777 }
 0x280   : > { %v4801_v12 = vrot.slane %v4525_v38, 1  ;;  %v3479_v21 = vadd.f32 %v17121_v52, %v17056_v60  ;;  %v17221_v6 = vsel %vm1478_vm0, %v3199_v50, %v3201_v22  ;;  %v4409_v15 = vadd.f32 %v4296_v11, %v4164_v24 }
 0x281   : > { %v6003_v5 = vmax.f32 %v5890_v30, 0.0  ;;  %v5485_v9 = vrot.slane %v5207_v54, 2  ;;  %v2561_v49 = vadd.f32 %v2282_v7, %v1874_v25  ;;  %v3882_v56 = vsel %vm2163_vm1, %v3879_v16, %v3881_v42  ;;  %v17256_v7 = vld [vmem:[%s21261_s1 + $0x8] ss:$0 sm:$0xff] }
 0x282   : > { %v4802_v2 = vsel %vm1478_vm0, %v4799_v34, %v4801_v12  ;;  %v1316_v37 = vmul.f32 %v13966_v13, %v773_v18  ;;  %v4165_v50 = vadd.f32 %v3882_v56, %v3479_v21  ;;  %v17233_v4 = vmul.f32 %v13969_v14, %v773_v18 }
 0x283   : > { %6118 = vst.msk [vmem:[#allocation2 + $0x199] sm:$0xff] %vm6066_vm2, %v6003_v5  ;;  %v5085_v60 = vadd.f32 %v4802_v2, %v4408_v58  ;;  %v5486_v52 = vsel %vm2163_vm1, %v5483_v28, %v5485_v9  ;;  %v2693_v34 = vmul.f32 %v13999_v35, %v773_v18  ;;  %v2922_v55 = vmul.f32 %v14008_v40, %v773_v18 }
 0x284   : > { %v1602_v48 = vrot.slane %v1316_v37, 1  ;;  %v17238_v45 = vmul.f32 %v14011_v41, %v773_v18  ;;  %v17241_v33 = vmul.f32 %v13989_v31, %v773_v18  ;;  %v4297_v58 = vmul.f32 %v14017_v46, %v773_v18 }
 0x285   : > { %v5771_v16 = vadd.f32 %v5486_v52, %v5085_v60  ;;  %v4526_v28 = vmul.f32 %v14020_v47, %v773_v18  ;;  %v21314_v11 = vrot.slane %v17233_v4, 2  ;;  %v17249_v24 = vadd.f32 %v2693_v34, %v2561_v49 }
 0x286   : > { %v17246_v29 = vsel %vm1478_vm0, %v1600_v62, %v1602_v48  ;;  %v3203_v38 = vrot.slane %v2922_v55, 1  ;;  %v21313_v54 = vrot.slane %v17238_v45, 2  ;;  %v5208_v21 = vmul.f32 %v17256_v7, %v773_v18 }
 0x287   : > { %v5891_v30 = vadd.f32 %v16700_v20, %v5771_v16  ;;  %v4803_v25 = vrot.slane %v4526_v28, 1  ;;  %v4410_v5 = vadd.f32 %v4297_v58, %v4165_v50  ;;  %v1317_v62 = vmul.f32 %v13966_v13, %v778_v3 }
 0x288   : > { %v1875_v2 = vadd.f32 %v17160_v61, %v17096_v57  ;;  %v17263_v49 = vmul.f32 %v13969_v14, %v778_v3  ;;  %v5487_v60 = vrot.slane %v5208_v21, 2  ;;  %v2284_v52 = vsel %vm2163_vm1, %v2281_v53, %v2283_v51 }
 0x289   : > { %v6004_v56 = vmax.f32 %v5891_v30, 0.0  ;;  %v4804_v37 = vsel %vm1478_vm0, %v4801_v12, %v4803_v25  ;;  %v17272_v50 = vmul.f32 %v13989_v31, %v778_v3  ;;  %v1604_v34 = vrot.slane %v1317_v62, 1 }
 0x28a   : > { %v5086_v18 = vadd.f32 %v4804_v37, %v4409_v15  ;;  %v2562_v55 = vadd.f32 %v2284_v52, %v1875_v2  ;;  %v5488_v57 = vsel %vm2163_vm1, %v5485_v9, %v5487_v60  ;;  %v2694_v61 = vmul.f32 %v13999_v35, %v778_v3  ;;  %v783_v2 = vpop.permute.xlu1 %782 }
 0x28b   : > { %6119 = vst.msk [vmem:[#allocation2 + $0x1a1] sm:$0xff] %vm6066_vm2, %v6004_v56  ;;  %v2923_v12 = vmul.f32 %v14008_v40, %v778_v3  ;;  %v3480_v16 = vadd.f32 %v17181_v32, %v17116_v27  ;;  %v17281_v26 = vsel %vm1478_vm0, %v3201_v22, %v3203_v38  ;;  %v17284_v15 = vmul.f32 %v14011_v41, %v778_v3 }
 0x28c   : > { %v5772_v53 = vadd.f32 %v5488_v57, %v5086_v18  ;;  %v3884_v9 = vsel %vm2163_vm1, %v3881_v42, %v3883_v0  ;;  %v2289_v58 = vrot.slane %v17263_v49, 2  ;;  %v4298_v21 = vmul.f32 %v14017_v46, %v778_v3 }
 0x28d   : > { %v3205_v28 = vrot.slane %v2923_v12, 1  ;;  %v4166_v30 = vadd.f32 %v3884_v9, %v3480_v16  ;;  %v17295_v32 = vsel %vm1478_vm0, %v1602_v48, %v1604_v34  ;;  %v4527_v22 = vmul.f32 %v14020_v47, %v778_v3  ;;  %v788_v9 = vpop.permute.xlu0 %787 }
 0x28e   : > { %v5892_v27 = vadd.f32 %v16700_v20, %v5772_v53  ;;  %v5209_v62 = vmul.f32 %v17256_v7, %v778_v3  ;;  %v17299_v56 = vadd.f32 %v2694_v61, %v2562_v55  ;;  %v1876_v42 = vadd.f32 %v17202_v63, %v17149_v17 }
 0x28f   : > { %v2286_v37 = vsel %vm2163_vm1, %v2283_v51, %v2285_v44  ;;  %v4805_v52 = vrot.slane %v4527_v22, 1  ;;  %v3481_v3 = vadd.f32 %v17221_v6, %v17155_v10  ;;  %v17312_v55 = vsel %vm1478_vm0, %v3203_v38, %v3205_v28 }
 0x290   : > { %v6005_v48 = vmax.f32 %v5892_v27, 0.0  ;;  %v5489_v18 = vrot.slane %v5209_v62, 2  ;;  %v4411_v57 = vadd.f32 %v4298_v21, %v4166_v30  ;;  %v2563_v61 = vadd.f32 %v2286_v37, %v1876_v42 }
 0x291   : > { %v1318_v12 = vmul.f32 %v13966_v13, %v783_v2  ;;  %v4806_v17 = vsel %vm1478_vm0, %v4803_v25, %v4805_v52  ;;  %v3886_v59 = vsel %vm2163_vm1, %v3883_v0, %v3885_v43  ;;  %v17323_v51 = vmul.f32 %v13989_v31, %v783_v2 }
 0x292   : > { %6120 = vst.msk [vmem:[#allocation2 + $0x1a9] sm:$0xff] %vm6066_vm2, %v6005_v48  ;;  %v17326_v10 = vmul.f32 %v13969_v14, %v783_v2  ;;  %v5087_v63 = vadd.f32 %v4806_v17, %v4410_v5  ;;  %v4167_v6 = vadd.f32 %v3886_v59, %v3481_v3  ;;  %v17329_v16 = vmul.f32 %v14008_v40, %v783_v2 }
 0x293   : > { %v1606_v38 = vrot.slane %v1318_v12, 1  ;;  %v5490_v25 = vsel %vm2163_vm1, %v5487_v60, %v5489_v18  ;;  %v2695_v53 = vmul.f32 %v13999_v35, %v783_v2  ;;  %v17334_v23 = vmul.f32 %v14011_v41, %v783_v2 }
 0x294   : > { %v17337_v0 = vmul.f32 %v14020_v47, %v783_v2  ;;  %v5773_v30 = vadd.f32 %v5490_v25, %v5087_v63  ;;  %v3207_v5 = vrot.slane %v17329_v16, 1  ;;  %v4299_v27 = vmul.f32 %v14017_v46, %v783_v2 }
 0x295   : > { %v17343_v22 = vsel %vm1478_vm0, %v1604_v34, %v1606_v38  ;;  %v17345_v60 = vadd.f32 %v2695_v53, %v2563_v61  ;;  %v5210_v42 = vmul.f32 %v17256_v7, %v783_v2  ;;  %v17352_v12 = vmul.f32 %v13966_v13, %v788_v9 }
 0x296   : > { %v4807_v62 = vrot.slane %v17337_v0, 1  ;;  %v5893_v37 = vadd.f32 %v16700_v20, %v5773_v30  ;;  %v4412_v3 = vadd.f32 %v4299_v27, %v4167_v6  ;;  %v1877_v34 = vadd.f32 %v17246_v29, %v17167_v8  ;;  %v6247_v29 = vld [vmem:[#allocation2 + $0x100] ss:$2 sm:$0xff]  ;;  %v6361_v30 = vld [vmem:[#allocation2 + $0x111] ss:$2 sm:$0xff] }
 0x297   : > { %v5491_v59 = vrot.slane %v5210_v42, 2  ;;  %v17358_v61 = vmul.f32 %v13969_v14, %v788_v9  ;;  %v17361_v2 = vsel %vm1478_vm0, %v3205_v28, %v3207_v5  ;;  %v2288_v6 = vsel %vm2163_vm1, %v2285_v44, %v21314_v11  ;;  %v6249_v44 = vld [vmem:[#allocation2 + $0x110] ss:$2 sm:$0xff]  ;;  %v6365_v27 = vld [vmem:[#allocation2 + $0x131] ss:$2 sm:$0xff] }
 0x298   : > { %v4808_v17 = vsel %vm1478_vm0, %v4805_v52, %v4807_v62  ;;  %v6006_v63 = vmax.f32 %v5893_v37, 0.0  ;;  %v1608_v25 = vrot.slane %v17352_v12, 1  ;;  %v2564_v53 = vadd.f32 %v2288_v6, %v1877_v34  ;;  %v6251_v34 = vld [vmem:[#allocation2 + $0x120] ss:$2 sm:$0xff] }
 0x299   : > { %v5088_v16 = vadd.f32 %v4808_v17, %v4411_v57  ;;  %v5492_v52 = vsel %vm2163_vm1, %v5489_v18, %v5491_v59  ;;  %v2696_v8 = vmul.f32 %v13999_v35, %v788_v9  ;;  %v17373_v28 = vmul.f32 %v13989_v31, %v788_v9  ;;  %v6359_v18 = vld [vmem:[#allocation2 + $0x101] ss:$2 sm:$0xff] }
 0x29a   : > { %6121 = vst.msk [vmem:[#allocation2 + $0x1b1] sm:$0xff] %vm6066_vm2, %v6006_v63  ;;  %v17376_v57 = vmul.f32 %v14008_v40, %v788_v9  ;;  %v3482_v19 = vadd.f32 %v17281_v26, %v17207_v36  ;;  %v17382_v42 = vmul.f32 %v14011_v41, %v788_v9  ;;  %v3888_v37 = vsel %vm2163_vm1, %v3885_v43, %v21313_v54  ;;  %v6363_v63 = vld [vmem:[#allocation2 + $0x121] ss:$2 sm:$0xff] }
 0x29b   : > { %v5774_v0 = vadd.f32 %v5492_v52, %v5088_v16  ;;  %v4300_v17 = vmul.f32 %v14017_v46, %v788_v9  ;;  %v4529_v6 = vmul.f32 %v14020_v47, %v788_v9  ;;  %v6253_v52 = vld [vmem:[#allocation2 + $0x130] ss:$2 sm:$0xff]  ;;  %v17396_v48 = vsel %vm1478_vm0, %v1606_v38, %v1608_v25  ;;  %v793_v38 = vpop.permute.xlu1 %792 }
 0x29c   : > { %v3209_v26 = vrot.slane %v17376_v57, 1  ;;  %v4168_v16 = vadd.f32 %v3888_v37, %v3482_v19  ;;  %v17398_v1 = vadd.f32 %v2696_v8, %v2564_v53  ;;  %v3893_v43 = vrot.slane %v17382_v42, 2 }
 0x29d   : > { %v5894_v36 = vadd.f32 %v16700_v20, %v5774_v0  ;;  %v17402_v21 = vmul.f32 %v17256_v7, %v788_v9  ;;  %v4809_v0 = vrot.slane %v4529_v6, 1  ;;  %v6454_v57 = vmax.f32 %v6247_v29, %v6359_v18 }
 0x29e   : > { %v6455_v19 = vmax.f32 %v6249_v44, %v6361_v30  ;;  %v6456_v54 = vmax.f32 %v6251_v34, %v6363_v63  ;;  %v6457_v39 = vmax.f32 %v6253_v52, %v6365_v27  ;;  %v1878_v11 = vadd.f32 %v17295_v32, %v17241_v33  ;;  %v17444_v34 = vld [vmem:[%s21262_s2] ss:$0 sm:$0xff]  ;;  %v798_v52 = vpop.permute.xlu0 %797 }
 0x29f   : > { %v6007_v20 = vmax.f32 %v5894_v36, 0.0  ;;  %v5493_v37 = vrot.slane %v17402_v21, 2  ;;  %v17409_v53 = vsel %vm1478_vm0, %v3207_v5, %v3209_v26  ;;  %v4413_v8 = vadd.f32 %v4300_v17, %v4168_v16 }
 0x2a0   : > { %v4810_v9 = vsel %vm1478_vm0, %v4807_v62, %v4809_v0  ;;  %v3483_v29 = vadd.f32 %v17312_v55, %v17249_v24  ;;  %v6511_v18 = vmax.f32 %v6454_v57, %v6456_v54  ;;  %v6512_v21 = vmax.f32 %v6455_v19, %v6457_v39 }
 0x2a1   : > { %6122 = vst.msk [vmem:[#allocation2 + $0x1b9] sm:$0xff] %vm6066_vm2, %v6007_v20  ;;  %v5089_v44 = vadd.f32 %v4810_v9, %v4412_v3  ;;  %v21505_v30 = vrot.slane %v17233_v4, 2  ;;  %v5494_v32 = vsel %vm2163_vm1, %v5491_v59, %v5493_v37  ;;  %v21506_v5 = vrot.slane %v17284_v15, 2 }
 0x2a2   : > { %v21507_v17 = vrot.slane %v17238_v45, 2  ;;  %v1320_v24 = vmul.f32 %v13966_v13, %v793_v38  ;;  %6513 = vst.msk [vmem:[#allocation3 + $0x60] sm:$0xff] %vm6066_vm2, %v6511_v18  ;;  %v17429_v4 = vmul.f32 %v13969_v14, %v793_v38  ;;  %v17432_v39 = vmul.f32 %v14008_v40, %v793_v38 }
 0x2a3   : > { %v2290_v33 = vsel %vm2163_vm1, %v21505_v30, %v2289_v58  ;;  %v5775_v55 = vadd.f32 %v5494_v32, %v5089_v44  ;;  %6514 = vst.msk [vmem:[#allocation3 + $0x68] sm:$0x3f] %vm6497_vm4, %v6512_v21  ;;  %v2697_v3 = vmul.f32 %v13999_v35, %v793_v38  ;;  %v17436_v45 = vmul.f32 %v14011_v41, %v793_v38 }
 0x2a4   : > { %v2565_v27 = vadd.f32 %v2290_v33, %v1878_v11  ;;  %v3890_v62 = vsel %vm2163_vm1, %v21507_v17, %v21506_v5  ;;  %v1610_v11 = vrot.slane %v1320_v24, 1  ;;  %v17439_v59 = vmul.f32 %v14020_v47, %v793_v38 }
 0x2a5   : > { %v4169_v54 = vadd.f32 %v3890_v62, %v3483_v29  ;;  %v5895_v63 = vadd.f32 %v17444_v34, %v5775_v55  ;;  %v17448_v36 = vmul.f32 %v13989_v31, %v793_v38  ;;  %v3211_v16 = vrot.slane %v17432_v39, 1 }
 0x2a6   : > { %v4301_v6 = vmul.f32 %v14017_v46, %v793_v38  ;;  %v17455_v20 = vsel %vm1478_vm0, %v1608_v25, %v1610_v11  ;;  %v2295_v57 = vrot.slane %v17429_v4, 2  ;;  %v17458_v19 = vadd.f32 %v2697_v3, %v2565_v27 }
 0x2a7   : > { %v4811_v9 = vrot.slane %v17439_v59, 1  ;;  %v6008_v29 = vmax.f32 %v5895_v63, 0.0  ;;  %v3895_v44 = vrot.slane %v17436_v45, 2  ;;  %v5212_v21 = vmul.f32 %v17256_v7, %v793_v38 }
 0x2a8   : > { %v4414_v18 = vadd.f32 %v4301_v6, %v4169_v54  ;;  %v17465_v33 = vmul.f32 %v13966_v13, %v798_v52  ;;  %v1879_v12 = vadd.f32 %v17343_v22, %v17272_v50  ;;  %v17470_v25 = vmul.f32 %v13969_v14, %v798_v52 }
 0x2a9   : > { %v4812_v30 = vsel %vm1478_vm0, %v4809_v0, %v4811_v9  ;;  %6123 = vst.msk [vmem:[#allocation2 + $0x1c1] sm:$0xff] %vm6066_vm2, %v6008_v29  ;;  %v17474_v32 = vsel %vm1478_vm0, %v3209_v26, %v3211_v16  ;;  %v5495_v5 = vrot.slane %v5212_v21, 2  ;;  %v21508_v38 = vrot.slane %v17326_v10, 2  ;;  %v6607_v17 = vld [vmem:[#allocation3 + $0x60] sm:$0xff] }
 0x2aa   : > { %v5090_v27 = vadd.f32 %v4812_v30, %v4413_v8  ;;  %v6608_v62 = vld [vmem:[#allocation3 + $0x68] sm:$0xff]  ;;  %v1612_v50 = vrot.slane %v17465_v33, 1  ;;  %v2698_v24 = vmul.f32 %v13999_v35, %v798_v52  ;;  %v17484_v55 = vmul.f32 %v14008_v40, %v798_v52  ;;  %v6561_v54 = vld [vmem:[#allocation3 + $0x5f] sm:$0xff] }
 0x2ab   : > { %v2292_v0 = vsel %vm2163_vm1, %v2289_v58, %v21508_v38  ;;  %v6630_v26 = vpack.c.bf16 %v6608_v62, %v6607_v17  ;;  %v6562_v8 = vld [vmem:[#allocation3 + $0x67] sm:$0xff]  ;;  %v5496_v39 = vsel %vm2163_vm1, %v5493_v37, %v5495_v5  ;;  %v3484_v49 = vadd.f32 %v17361_v2, %v17299_v56  ;;  %v803_v38 = vpop.permute.xlu1 %802 }
 0x2ac   : > { %v2566_v22 = vadd.f32 %v2292_v0, %v1879_v12  ;;  %v17490_v58 = vmul.f32 %v14011_v41, %v798_v52  ;;  %v6584_v3 = vpack.c.bf16 %v6562_v8, %v6561_v54  ;;  %v5776_v59 = vadd.f32 %v5496_v39, %v5090_v27 }
 0x2ad   : > { %v17493_v63 = vmul.f32 %v13989_v31, %v798_v52  ;;  %v2297_v6 = vrot.slane %v17470_v25, 2  ;;  %12876 = vmatmul.mubr.msk.bf16.gmra.mrb[4].mxu1 %vm6066_vm2, %v6630_v26  ;;  %v17498_v29 = vsel %vm1478_vm0, %v1610_v11, %v1612_v50  ;;  %v3213_v37 = vrot.slane %v17484_v55, 1 }
 0x2ae   : > { %v21509_v21 = vrot.slane %v17334_v23, 2  ;;  %v21510_v56 = vrot.slane %v17284_v15, 2  ;;  %v4302_v30 = vmul.f32 %v14017_v46, %v798_v52  ;;  %12908 = vmatmul.mubr.msk.bf16.gmra.mrb[8].mxu0 %vm6066_vm2, %v6584_v3  ;;  %v5896_v33 = vadd.f32 %v17444_v34, %v5776_v59 }
 0x2af   : > { %v4531_v27 = vmul.f32 %v14020_v47, %v798_v52  ;;  %v5213_v11 = vmul.f32 %v17256_v7, %v798_v52  ;;  %v17511_v0 = vadd.f32 %v2698_v24, %v2566_v22  ;;  %v3897_v17 = vrot.slane %v17490_v58, 2 }
 0x2b0   : > { %v3892_v2 = vsel %vm2163_vm1, %v21510_v56, %v21509_v21  ;;  %v1880_v15 = vadd.f32 %v17396_v48, %v17323_v51  ;;  %v3485_v62 = vadd.f32 %v17409_v53, %v17345_v60  ;;  %v6009_v55 = vmax.f32 %v5896_v33, 0.0  ;;  %v808_v33 = vpop.permute.xlu0 %807 }
 0x2b1   : > { %v4170_v12 = vadd.f32 %v3892_v2, %v3484_v49  ;;  %v4813_v26 = vrot.slane %v4531_v27, 1  ;;  %v5497_v54 = vrot.slane %v5213_v11, 2  ;;  %v21511_v8 = vrot.slane %v17358_v61, 2 }
 0x2b2   : > { %v21512_v39 = vrot.slane %v17326_v10, 2  ;;  %v17524_v22 = vsel %vm1478_vm0, %v3211_v16, %v3213_v37  ;;  %v1322_v3 = vmul.f32 %v13966_v13, %v803_v38  ;;  %6124 = vst.msk [vmem:[#allocation2 + $0x1c9] sm:$0xff] %vm6066_vm2, %v6009_v55  ;;  %v21513_v60 = vmov %v21509_v21 }
 0x2b3   : > { %v4415_v24 = vadd.f32 %v4302_v30, %v4170_v12  ;;  %v4814_v51 = vsel %vm1478_vm0, %v4811_v9, %v4813_v26  ;;  %v3894_v48 = vsel %vm2163_vm1, %v21513_v60, %v3893_v43  ;;  %v17535_v10 = vmul.f32 %v13989_v31, %v803_v38 }
 0x2b4   : > { %v2294_v52 = vsel %vm2163_vm1, %v21512_v39, %v21511_v8  ;;  %v17538_v53 = vmul.f32 %v13969_v14, %v803_v38  ;;  %v5091_v16 = vadd.f32 %v4814_v51, %v4414_v18  ;;  %v4171_v59 = vadd.f32 %v3894_v48, %v3485_v62 }
 0x2b5   : > { %v2567_v49 = vadd.f32 %v2294_v52, %v1880_v15  ;;  %v1614_v21 = vrot.slane %v1322_v3, 1  ;;  %v2928_v56 = vmul.f32 %v14008_v40, %v803_v38  ;;  %v5498_v2 = vsel %vm2163_vm1, %v5495_v5, %v5497_v54 }
 0x2b6   : > { %v2699_v9 = vmul.f32 %v13999_v35, %v803_v38  ;;  %v17544_v30 = vmul.f32 %v14011_v41, %v803_v38  ;;  %v4532_v23 = vmul.f32 %v14020_v47, %v803_v38  ;;  %v5777_v12 = vadd.f32 %v5498_v2, %v5091_v16 }
 0x2b7   : > { %v17548_v27 = vsel %vm1478_vm0, %v1612_v50, %v1614_v21  ;;  %v2299_v18 = vrot.slane %v17538_v53, 2  ;;  %v4303_v11 = vmul.f32 %v14017_v46, %v803_v38  ;;  %v3215_v62 = vrot.slane %v2928_v56, 1 }
 0x2b8   : > { %v17552_v15 = vadd.f32 %v2699_v9, %v2567_v49  ;;  %v4815_v5 = vrot.slane %v4532_v23, 1  ;;  %v5214_v55 = vmul.f32 %v17256_v7, %v803_v38  ;;  %v5897_v8 = vadd.f32 %v17444_v34, %v5777_v12 }
 0x2b9   : > { %v3899_v39 = vrot.slane %v17544_v30, 2  ;;  %v4416_v52 = vadd.f32 %v4303_v11, %v4171_v59  ;;  %v1323_v3 = vmul.f32 %v13966_v13, %v808_v33  ;;  %v1881_v60 = vadd.f32 %v17455_v20, %v17373_v28 }
 0x2ba   : > { %v4816_v50 = vsel %vm1478_vm0, %v4813_v26, %v4815_v5  ;;  %v5499_v51 = vrot.slane %v5214_v55, 2  ;;  %v17562_v49 = vmul.f32 %v13969_v14, %v808_v33  ;;  %v6010_v48 = vmax.f32 %v5897_v8, 0.0 }
 0x2bb   : > { %v5092_v16 = vadd.f32 %v4816_v50, %v4415_v24  ;;  %v1616_v56 = vrot.slane %v1323_v3, 1  ;;  %v21514_v38 = vrot.slane %v17358_v61, 2  ;;  %v17570_v2 = vsel %vm1478_vm0, %v3213_v37, %v3215_v62 }
 0x2bc   : > { %v5500_v26 = vsel %vm2163_vm1, %v5497_v54, %v5499_v51  ;;  %v2700_v28 = vmul.f32 %v13999_v35, %v808_v33  ;;  %6125 = vst.msk [vmem:[#allocation2 + $0x1d1] sm:$0xff] %vm6066_vm2, %v6010_v48  ;;  %v17576_v24 = vmul.f32 %v13989_v31, %v808_v33  ;;  %v17579_v23 = vmul.f32 %v14008_v40, %v808_v33  ;;  %v813_v48 = vpop.permute.xlu1 %812 }
 0x2bd   : > { %v2296_v59 = vsel %vm2163_vm1, %v21514_v38, %v2295_v57  ;;  %v5778_v20 = vadd.f32 %v5500_v26, %v5092_v16  ;;  %v3486_v61 = vadd.f32 %v17474_v32, %v17398_v1  ;;  %v17584_v37 = vsel %vm1478_vm0, %v1614_v21, %v1616_v56 }
 0x2be   : > { %v2568_v9 = vadd.f32 %v2296_v59, %v1881_v60  ;;  %v2301_v54 = vrot.slane %v17562_v49, 2  ;;  %v17590_v11 = vmul.f32 %v14011_v41, %v808_v33  ;;  %v3217_v8 = vrot.slane %v17579_v23, 1 }
 0x2bf   : > { %v5898_v55 = vadd.f32 %v17444_v34, %v5778_v20  ;;  %v3896_v1 = vsel %vm2163_vm1, %v3893_v43, %v3895_v44  ;;  %v4533_v32 = vmul.f32 %v14020_v47, %v808_v33  ;;  %v4304_v3 = vmul.f32 %v14017_v46, %v808_v33 }
 0x2c0   : > { %v17587_v12 = vadd.f32 %v2700_v28, %v2568_v9  ;;  %v4172_v21 = vadd.f32 %v3896_v1, %v3486_v61  ;;  %v5215_v50 = vmul.f32 %v17256_v7, %v808_v33  ;;  %v1882_v60 = vadd.f32 %v17498_v29, %v17448_v36 }
 0x2c1   : > { %v6011_v16 = vmax.f32 %v5898_v55, 0.0  ;;  %v3901_v38 = vrot.slane %v17590_v11, 2  ;;  %v4817_v59 = vrot.slane %v4533_v32, 1  ;;  %v2298_v42 = vsel %vm2163_vm1, %v2295_v57, %v2297_v6 }
 0x2c2   : > { %v17611_v43 = vsel %vm1478_vm0, %v3215_v62, %v3217_v8  ;;  %v5501_v26 = vrot.slane %v5215_v50, 2  ;;  %v2569_v9 = vadd.f32 %v2298_v42, %v1882_v60  ;;  %v3487_v33 = vadd.f32 %v17524_v22, %v17458_v19 }
 0x2c3   : > { %6126 = vst.msk [vmem:[#allocation2 + $0x1d9] sm:$0xff] %vm6066_vm2, %v6011_v16  ;;  %v4818_v36 = vsel %vm1478_vm0, %v4815_v5, %v4817_v59  ;;  %v3898_v4 = vsel %vm2163_vm1, %v3895_v44, %v3897_v17  ;;  %v1324_v57 = vmul.f32 %v13966_v13, %v813_v48  ;;  %v17624_v29 = vmul.f32 %v13969_v14, %v813_v48 }
 0x2c4   : > { %v4417_v62 = vadd.f32 %v4304_v3, %v4172_v21  ;;  %v5093_v28 = vadd.f32 %v4818_v36, %v4416_v52  ;;  %v5502_v20 = vsel %vm2163_vm1, %v5499_v51, %v5501_v26  ;;  %v4173_v19 = vadd.f32 %v3898_v4, %v3487_v33  ;;  %v818_v52 = vpop.permute.xlu0 %817 }
 0x2c5   : > { %v1618_v22 = vrot.slane %v1324_v57, 1  ;;  %v2701_v23 = vmul.f32 %v13999_v35, %v813_v48  ;;  %v2930_v5 = vmul.f32 %v14008_v40, %v813_v48  ;;  %v17630_v61 = vmul.f32 %v14011_v41, %v813_v48 }
 0x2c6   : > { %v5779_v45 = vadd.f32 %v5502_v20, %v5093_v28  ;;  %v17633_v44 = vmul.f32 %v13989_v31, %v813_v48  ;;  %v21316_v55 = vrot.slane %v17624_v29, 2  ;;  %v4534_v1 = vmul.f32 %v14020_v47, %v813_v48 }
 0x2c7   : > { %v17638_v51 = vsel %vm1478_vm0, %v1616_v56, %v1618_v22  ;;  %v17640_v32 = vadd.f32 %v2701_v23, %v2569_v9  ;;  %v4305_v21 = vmul.f32 %v14017_v46, %v813_v48  ;;  %v5216_v3 = vmul.f32 %v17256_v7, %v813_v48 }
 0x2c8   : > { %v5899_v50 = vadd.f32 %v17444_v34, %v5779_v45  ;;  %v3219_v60 = vrot.slane %v2930_v5, 1  ;;  %v21315_v16 = vrot.slane %v17630_v61, 2  ;;  %v4819_v42 = vrot.slane %v4534_v1, 1 }
 0x2c9   : > { %v4418_v33 = vadd.f32 %v4305_v21, %v4173_v19  ;;  %v5503_v36 = vrot.slane %v5216_v3, 2  ;;  %v1325_v4 = vmul.f32 %v13966_v13, %v818_v52  ;;  %v1883_v56 = vadd.f32 %v17548_v27, %v17493_v63 }
 0x2ca   : > { %v6012_v57 = vmax.f32 %v5899_v50, 0.0  ;;  %v4820_v9 = vsel %vm1478_vm0, %v4817_v59, %v4819_v42  ;;  %v17651_v28 = vmul.f32 %v13989_v31, %v818_v52  ;;  %v17654_v48 = vmul.f32 %v13969_v14, %v818_v52 }
 0x2cb   : > { %v5094_v20 = vadd.f32 %v4820_v9, %v4417_v62  ;;  %v5504_v23 = vsel %vm2163_vm1, %v5501_v26, %v5503_v36  ;;  %v1620_v5 = vrot.slane %v1325_v4, 1  ;;  %v2300_v19 = vsel %vm2163_vm1, %v2297_v6, %v2299_v18 }
 0x2cc   : > { %6127 = vst.msk [vmem:[#allocation2 + $0x1e1] sm:$0xff] %vm6066_vm2, %v6012_v57  ;;  %v2570_v63 = vadd.f32 %v2300_v19, %v1883_v56  ;;  %v2702_v27 = vmul.f32 %v13999_v35, %v818_v52  ;;  %v2931_v59 = vmul.f32 %v14008_v40, %v818_v52  ;;  %v3488_v45 = vadd.f32 %v17570_v2, %v17511_v0  ;;  %v823_v56 = vpop.permute.xlu1 %822 }
 0x2cd   : > { %v17668_v62 = vsel %vm1478_vm0, %v3217_v8, %v3219_v60  ;;  %v5780_v26 = vadd.f32 %v5504_v23, %v5094_v20  ;;  %v17671_v1 = vmul.f32 %v14011_v41, %v818_v52  ;;  %v3900_v25 = vsel %vm2163_vm1, %v3897_v17, %v3899_v39 }
 0x2ce   : > { %v3221_v21 = vrot.slane %v2931_v59, 1  ;;  %v4174_v3 = vadd.f32 %v3900_v25, %v3488_v45  ;;  %v4306_v50 = vmul.f32 %v14017_v46, %v818_v52  ;;  %v17682_v2 = vsel %vm1478_vm0, %v1618_v22, %v1620_v5  ;;  %v828_v25 = vpop.permute.xlu0 %827 }
 0x2cf   : > { %v5900_v0 = vadd.f32 %v17444_v34, %v5780_v26  ;;  %v4535_v8 = vmul.f32 %v14020_v47, %v818_v52  ;;  %v5217_v4 = vmul.f32 %v17256_v7, %v818_v52  ;;  %v17686_v57 = vadd.f32 %v2702_v27, %v2570_v63 }
 0x2d0   : > { %v1884_v17 = vadd.f32 %v17584_v37, %v17535_v10  ;;  %v2302_v9 = vsel %vm2163_vm1, %v2299_v18, %v2301_v54  ;;  %v3489_v52 = vadd.f32 %v17611_v43, %v17552_v15  ;;  %v17699_v19 = vsel %vm1478_vm0, %v3219_v60, %v3221_v21 }
 0x2d1   : > { %v6013_v22 = vmax.f32 %v5900_v0, 0.0  ;;  %v4821_v20 = vrot.slane %v4535_v8, 1  ;;  %v5505_v23 = vrot.slane %v5217_v4, 2  ;;  %v4419_v63 = vadd.f32 %v4306_v50, %v4174_v3 }
 0x2d2   : > { %v2571_v27 = vadd.f32 %v2302_v9, %v1884_v17  ;;  %v1326_v59 = vmul.f32 %v13966_v13, %v823_v56  ;;  %v3902_v53 = vsel %vm2163_vm1, %v3899_v39, %v3901_v38  ;;  %v17710_v18 = vmul.f32 %v13989_v31, %v823_v56 }
 0x2d3   : > { %6128 = vst.msk [vmem:[#allocation2 + $0x1e9] sm:$0xff] %vm6066_vm2, %v6013_v22  ;;  %v4822_v10 = vsel %vm1478_vm0, %v4819_v42, %v4821_v20  ;;  %v17713_v15 = vmul.f32 %v13969_v14, %v823_v56  ;;  %v4175_v43 = vadd.f32 %v3902_v53, %v3489_v52  ;;  %v17716_v45 = vmul.f32 %v14008_v40, %v823_v56 }
 0x2d4   : > { %v5095_v37 = vadd.f32 %v4822_v10, %v4418_v33  ;;  %v1622_v60 = vrot.slane %v1326_v59, 1  ;;  %v5506_v42 = vsel %vm2163_vm1, %v5503_v36, %v5505_v23  ;;  %v2703_v26 = vmul.f32 %v13999_v35, %v823_v56 }
 0x2d5   : > { %v17721_v30 = vmul.f32 %v14011_v41, %v823_v56  ;;  %v17724_v39 = vmul.f32 %v14020_v47, %v823_v56  ;;  %v3223_v33 = vrot.slane %v17716_v45, 1  ;;  %v4307_v0 = vmul.f32 %v14017_v46, %v823_v56 }
 0x2d6   : > { %v5781_v3 = vadd.f32 %v5506_v42, %v5095_v37  ;;  %v17730_v8 = vsel %vm1478_vm0, %v1620_v5, %v1622_v60  ;;  %v17732_v36 = vadd.f32 %v2703_v26, %v2571_v27  ;;  %v5218_v17 = vmul.f32 %v17256_v7, %v823_v56 }
 0x2d7   : > { %v4823_v4 = vrot.slane %v17724_v39, 1  ;;  %v4420_v52 = vadd.f32 %v4307_v0, %v4175_v43  ;;  %v17739_v59 = vmul.f32 %v13966_v13, %v828_v25  ;;  %v1885_v5 = vadd.f32 %v17638_v51, %v17576_v24  ;;  %v6255_v51 = vld [vmem:[#allocation2 + $0x140] ss:$2 sm:$0xff]  ;;  %v6373_v0 = vld [vmem:[#allocation2 + $0x171] ss:$2 sm:$0xff] }
 0x2d8   : > { %v5901_v9 = vadd.f32 %v17444_v34, %v5781_v3  ;;  %v5507_v53 = vrot.slane %v5218_v17, 2  ;;  %v17745_v27 = vmul.f32 %v13969_v14, %v828_v25  ;;  %v17748_v56 = vsel %vm1478_vm0, %v3221_v21, %v3223_v33  ;;  %v6369_v3 = vld [vmem:[#allocation2 + $0x151] ss:$2 sm:$0xff] }
 0x2d9   : > { %v4824_v10 = vsel %vm1478_vm0, %v4821_v20, %v4823_v4  ;;  %v2304_v43 = vsel %vm2163_vm1, %v2301_v54, %v21316_v55  ;;  %v1624_v42 = vrot.slane %v17739_v59, 1  ;;  %v2704_v24 = vmul.f32 %v13999_v35, %v828_v25  ;;  %v6257_v54 = vld [vmem:[#allocation2 + $0x150] ss:$2 sm:$0xff] }
 0x2da   : > { %v6014_v37 = vmax.f32 %v5901_v9, 0.0  ;;  %v5096_v45 = vadd.f32 %v4824_v10, %v4419_v63  ;;  %v5508_v20 = vsel %vm2163_vm1, %v5505_v23, %v5507_v53  ;;  %v2572_v26 = vadd.f32 %v2304_v43, %v1885_v5  ;;  %v6367_v23 = vld [vmem:[#allocation2 + $0x141] ss:$2 sm:$0xff]  ;;  %v6259_v5 = vld [vmem:[#allocation2 + $0x160] ss:$2 sm:$0xff] }
 0x2db   : > { %v17760_v21 = vmul.f32 %v13989_v31, %v828_v25  ;;  %v17763_v63 = vmul.f32 %v14008_v40, %v828_v25  ;;  %v3490_v49 = vadd.f32 %v17668_v62, %v17587_v12  ;;  %v17769_v17 = vmul.f32 %v14011_v41, %v828_v25 }
 0x2dc   : > { %6129 = vst.msk [vmem:[#allocation2 + $0x1f1] sm:$0xff] %vm6066_vm2, %v6014_v37  ;;  %v5782_v39 = vadd.f32 %v5508_v20, %v5096_v45  ;;  %v3904_v9 = vsel %vm2163_vm1, %v3901_v38, %v21315_v16  ;;  %v4308_v10 = vmul.f32 %v14017_v46, %v828_v25  ;;  %v6371_v37 = vld [vmem:[#allocation2 + $0x161] ss:$2 sm:$0xff]  ;;  %v4537_v43 = vmul.f32 %v14020_v47, %v828_v25  ;;  %v6261_v20 = vld [vmem:[#allocation2 + $0x170] ss:$2 sm:$0xff] }
 0x2dd   : > { %v3225_v62 = vrot.slane %v17763_v63, 1  ;;  %v4176_v45 = vadd.f32 %v3904_v9, %v3490_v49  ;;  %v17783_v22 = vsel %vm1478_vm0, %v1622_v60, %v1624_v42  ;;  %v17785_v11 = vadd.f32 %v2704_v24, %v2572_v26  ;;  %v833_v60 = vpop.permute.xlu1 %832 }
 0x2de   : > { %v5902_v12 = vadd.f32 %v17444_v34, %v5782_v39  ;;  %v3909_v38 = vrot.slane %v17769_v17, 2  ;;  %v17789_v50 = vmul.f32 %v17256_v7, %v828_v25  ;;  %v4825_v16 = vrot.slane %v4537_v43, 1 }
 0x2df   : > { %v6458_v63 = vmax.f32 %v6255_v51, %v6367_v23  ;;  %v6459_v49 = vmax.f32 %v6257_v54, %v6369_v3  ;;  %v6460_v58 = vmax.f32 %v6259_v5, %v6371_v37  ;;  %v6461_v55 = vmax.f32 %v6261_v20, %v6373_v0  ;;  %v838_v20 = vpop.permute.xlu0 %837 }
 0x2e0   : > { %v6015_v39 = vmax.f32 %v5902_v12, 0.0  ;;  %v5509_v9 = vrot.slane %v17789_v50, 2  ;;  %v1886_v6 = vadd.f32 %v17682_v2, %v17633_v44  ;;  %v17796_v26 = vsel %vm1478_vm0, %v3223_v33, %v3225_v62 }
 0x2e1   : > { %v4421_v24 = vadd.f32 %v4308_v10, %v4176_v45  ;;  %v4826_v25 = vsel %vm1478_vm0, %v4823_v4, %v4825_v16  ;;  %v3491_v51 = vadd.f32 %v17699_v19, %v17640_v32  ;;  %v6515_v23 = vmax.f32 %v6458_v63, %v6460_v58 }
 0x2e2   : > { %6130 = vst.msk [vmem:[#allocation2 + $0x1f9] sm:$0xff] %vm6066_vm2, %v6015_v39  ;;  %v5097_v54 = vadd.f32 %v4826_v25, %v4420_v52  ;;  %v6516_v50 = vmax.f32 %v6459_v49, %v6461_v55  ;;  %v21515_v3 = vrot.slane %v17654_v48, 2  ;;  %v21516_v0 = vrot.slane %v17624_v29, 2 }
 0x2e3   : > { %v5510_v2 = vsel %vm2163_vm1, %v5507_v53, %v5509_v9  ;;  %v21517_v33 = vrot.slane %v17671_v1, 2  ;;  %v21518_v10 = vrot.slane %v17630_v61, 2  ;;  %v1328_v32 = vmul.f32 %v13966_v13, %v833_v60  ;;  %6517 = vst.msk [vmem:[#allocation3 + $0x70] sm:$0xff] %vm6066_vm2, %v6515_v23 }
 0x2e4   : > { %v2306_v44 = vsel %vm2163_vm1, %v21516_v0, %v21515_v3  ;;  %v5783_v19 = vadd.f32 %v5510_v2, %v5097_v54  ;;  %6518 = vst.msk [vmem:[#allocation3 + $0x78] sm:$0x3f] %vm6497_vm4, %v6516_v50  ;;  %v17816_v29 = vmul.f32 %v13969_v14, %v833_v60  ;;  %v17819_v58 = vmul.f32 %v14008_v40, %v833_v60 }
 0x2e5   : > { %v2573_v5 = vadd.f32 %v2306_v44, %v1886_v6  ;;  %v3906_v4 = vsel %vm2163_vm1, %v21518_v10, %v21517_v33  ;;  %v1626_v6 = vrot.slane %v1328_v32, 1  ;;  %v2705_v52 = vmul.f32 %v13999_v35, %v833_v60 }
 0x2e6   : > { %v4177_v55 = vadd.f32 %v3906_v4, %v3491_v51  ;;  %v17823_v61 = vmul.f32 %v14011_v41, %v833_v60  ;;  %v17826_v53 = vmul.f32 %v14020_v47, %v833_v60  ;;  %v5903_v37 = vadd.f32 %v17444_v34, %v5783_v19 }
 0x2e7   : > { %v17830_v12 = vmul.f32 %v13989_v31, %v833_v60  ;;  %v3227_v45 = vrot.slane %v17819_v58, 1  ;;  %v4309_v43 = vmul.f32 %v14017_v46, %v833_v60  ;;  %v17837_v39 = vsel %vm1478_vm0, %v1624_v42, %v1626_v6 }
 0x2e8   : > { %v2311_v63 = vrot.slane %v17816_v29, 2  ;;  %v17840_v49 = vadd.f32 %v2705_v52, %v2573_v5  ;;  %v4827_v25 = vrot.slane %v17826_v53, 1  ;;  %v6016_v51 = vmax.f32 %v5903_v37, 0.0 }
 0x2e9   : > { %v3911_v54 = vrot.slane %v17823_v61, 2  ;;  %v4422_v23 = vadd.f32 %v4309_v43, %v4177_v55  ;;  %v5220_v50 = vmul.f32 %v17256_v7, %v833_v60  ;;  %v17847_v0 = vmul.f32 %v13966_v13, %v838_v20 }
 0x2ea   : > { %v4828_v3 = vsel %vm1478_vm0, %v4825_v16, %v4827_v25  ;;  %v1887_v59 = vadd.f32 %v17730_v8, %v17651_v28  ;;  %v17852_v42 = vmul.f32 %v13969_v14, %v838_v20  ;;  %6131 = vst.msk [vmem:[#allocation2 + $0x201] sm:$0xff] %vm6066_vm2, %v6016_v51  ;;  %v17856_v44 = vsel %vm1478_vm0, %v3225_v62, %v3227_v45  ;;  %v6609_v10 = vld [vmem:[#allocation3 + $0x70] sm:$0xff] }
 0x2eb   : > { %v5098_v2 = vadd.f32 %v4828_v3, %v4421_v24  ;;  %v5511_v5 = vrot.slane %v5220_v50, 2  ;;  %v21519_v60 = vrot.slane %v17713_v15, 2  ;;  %v21520_v16 = vrot.slane %v17654_v48, 2  ;;  %v6610_v4 = vld [vmem:[#allocation3 + $0x78] sm:$0xff]  ;;  %v6563_v55 = vld [vmem:[#allocation3 + $0x6f] sm:$0xff] }
 0x2ec   : > { %v1628_v28 = vrot.slane %v17847_v0, 1  ;;  %v2706_v32 = vmul.f32 %v13999_v35, %v838_v20  ;;  %v17866_v19 = vmul.f32 %v14008_v40, %v838_v20  ;;  %v6631_v62 = vpack.c.bf16 %v6610_v4, %v6609_v10  ;;  %v6564_v24 = vld [vmem:[#allocation3 + $0x77] sm:$0xff] }
 0x2ed   : > { %v2308_v33 = vsel %vm2163_vm1, %v21520_v16, %v21519_v60  ;;  %v5512_v58 = vsel %vm2163_vm1, %v5509_v9, %v5511_v5  ;;  %v3492_v48 = vadd.f32 %v17748_v56, %v17686_v57  ;;  %v17872_v52 = vmul.f32 %v14011_v41, %v838_v20  ;;  %v843_v16 = vpop.permute.xlu1 %842 }
 0x2ee   : > { %v2574_v8 = vadd.f32 %v2308_v33, %v1887_v59  ;;  %v6585_v53 = vpack.c.bf16 %v6564_v24, %v6563_v55  ;;  %v5784_v37 = vadd.f32 %v5512_v58, %v5098_v2  ;;  %v17875_v43 = vmul.f32 %v13989_v31, %v838_v20  ;;  %12879 = vmatprep.mubr.msk.bf16.mxu1 %vm6066_vm2, %v6631_v62 }
 0x2ef   : > { %v2313_v51 = vrot.slane %v17852_v42, 2  ;;  %v17880_v50 = vsel %vm1478_vm0, %v1626_v6, %v1628_v28  ;;  %v3229_v9 = vrot.slane %v17866_v19, 1  ;;  %v21521_v3 = vrot.slane %v17721_v30, 2 }
 0x2f0   : > { %v21522_v57 = vrot.slane %v17671_v1, 2  ;;  %v4310_v0 = vmul.f32 %v14017_v46, %v838_v20  ;;  %12911 = vmatprep.mubr.msk.bf16.mxu0 %vm6066_vm2, %v6585_v53  ;;  %v5904_v59 = vadd.f32 %v17444_v34, %v5784_v37  ;;  %v4539_v60 = vmul.f32 %v14020_v47, %v838_v20 }
 0x2f1   : > { %v5221_v6 = vmul.f32 %v17256_v7, %v838_v20  ;;  %v17893_v33 = vadd.f32 %v2706_v32, %v2574_v8  ;;  %v3913_v10 = vrot.slane %v17872_v52, 2  ;;  %v1888_v1 = vadd.f32 %v17783_v22, %v17710_v18 }
 0x2f2   : > { %v3908_v56 = vsel %vm2163_vm1, %v21522_v57, %v21521_v3  ;;  %v3493_v4 = vadd.f32 %v17796_v26, %v17732_v36  ;;  %v6017_v19 = vmax.f32 %v5904_v59, 0.0  ;;  %v4829_v62 = vrot.slane %v4539_v60, 1  ;;  %v848_v59 = vpop.permute.xlu0 %847 }
 0x2f3   : > { %v4178_v2 = vadd.f32 %v3908_v56, %v3492_v48  ;;  %v5513_v55 = vrot.slane %v5221_v6, 2  ;;  %v21523_v24 = vrot.slane %v17745_v27, 2  ;;  %v21524_v58 = vrot.slane %v17713_v15, 2 }
 0x2f4   : > { %v17906_v8 = vsel %vm1478_vm0, %v3227_v45, %v3229_v9  ;;  %v1330_v53 = vmul.f32 %v13966_v13, %v843_v16  ;;  %6132 = vst.msk [vmem:[#allocation2 + $0x209] sm:$0xff] %vm6066_vm2, %v6017_v19  ;;  %v4830_v18 = vsel %vm1478_vm0, %v4827_v25, %v4829_v62  ;;  %v21525_v36 = vmov %v21521_v3 }
 0x2f5   : > { %v2310_v20 = vsel %vm2163_vm1, %v21524_v58, %v21523_v24  ;;  %v4423_v32 = vadd.f32 %v4310_v0, %v4178_v2  ;;  %v3910_v22 = vsel %vm2163_vm1, %v21525_v36, %v3909_v38  ;;  %v17917_v15 = vmul.f32 %v13989_v31, %v843_v16 }
 0x2f6   : > { %v2575_v48 = vadd.f32 %v2310_v20, %v1888_v1  ;;  %v17920_v26 = vmul.f32 %v13969_v14, %v843_v16  ;;  %v5099_v45 = vadd.f32 %v4830_v18, %v4422_v23  ;;  %v4179_v37 = vadd.f32 %v3910_v22, %v3493_v4 }
 0x2f7   : > { %v1630_v3 = vrot.slane %v1330_v53, 1  ;;  %v2936_v57 = vmul.f32 %v14008_v40, %v843_v16  ;;  %v5514_v56 = vsel %vm2163_vm1, %v5511_v5, %v5513_v55  ;;  %v2707_v25 = vmul.f32 %v13999_v35, %v843_v16 }
 0x2f8   : > { %v17926_v0 = vmul.f32 %v14011_v41, %v843_v16  ;;  %v4540_v30 = vmul.f32 %v14020_v47, %v843_v16  ;;  %v5785_v2 = vadd.f32 %v5514_v56, %v5099_v45  ;;  %v2315_v23 = vrot.slane %v17920_v26, 2 }
 0x2f9   : > { %v17930_v60 = vsel %vm1478_vm0, %v1628_v28, %v1630_v3  ;;  %v4311_v6 = vmul.f32 %v14017_v46, %v843_v16  ;;  %v17934_v1 = vadd.f32 %v2707_v25, %v2575_v48  ;;  %v3231_v4 = vrot.slane %v2936_v57, 1 }
 0x2fa   : > { %v4831_v5 = vrot.slane %v4540_v30, 1  ;;  %v5222_v19 = vmul.f32 %v17256_v7, %v843_v16  ;;  %v5905_v24 = vadd.f32 %v17444_v34, %v5785_v2  ;;  %v3915_v58 = vrot.slane %v17926_v0, 2 }
 0x2fb   : > { %v4424_v20 = vadd.f32 %v4311_v6, %v4179_v37  ;;  %v1331_v53 = vmul.f32 %v13966_v13, %v848_v59  ;;  %v1889_v36 = vadd.f32 %v17837_v39, %v17760_v21  ;;  %v17944_v48 = vmul.f32 %v13969_v14, %v848_v59 }
 0x2fc   : > { %v4832_v28 = vsel %vm1478_vm0, %v4829_v62, %v4831_v5  ;;  %v5515_v18 = vrot.slane %v5222_v19, 2  ;;  %v6018_v22 = vmax.f32 %v5905_v24, 0.0  ;;  %v21526_v7 = vrot.slane %v17745_v27, 2 }
 0x2fd   : > { %v5100_v45 = vadd.f32 %v4832_v28, %v4423_v32  ;;  %v1632_v57 = vrot.slane %v1331_v53, 1  ;;  %v17952_v37 = vsel %vm1478_vm0, %v3229_v9, %v3231_v4  ;;  %v2708_v21 = vmul.f32 %v13999_v35, %v848_v59  ;;  %v17986_v53 = vld [vmem:[%s21261_s1 + $0x8] ss:$0 sm:$0xff] }
 0x2fe   : > { %v2312_v16 = vsel %vm2163_vm1, %v21526_v7, %v2311_v63  ;;  %v5516_v62 = vsel %vm2163_vm1, %v5513_v55, %v5515_v18  ;;  %6133 = vst.msk [vmem:[#allocation2 + $0x211] sm:$0xff] %vm6066_vm2, %v6018_v22  ;;  %v17958_v32 = vmul.f32 %v13989_v31, %v848_v59  ;;  %v17961_v25 = vmul.f32 %v14008_v40, %v848_v59  ;;  %v853_v22 = vpop.permute.xlu1 %852 }
 0x2ff   : > { %v2576_v56 = vadd.f32 %v2312_v16, %v1889_v36  ;;  %v5786_v39 = vadd.f32 %v5516_v62, %v5100_v45  ;;  %v3494_v27 = vadd.f32 %v17856_v44, %v17785_v11  ;;  %v17966_v9 = vsel %vm1478_vm0, %v1630_v3, %v1632_v57 }
 0x300   : > { %v2317_v55 = vrot.slane %v17944_v48, 2  ;;  %v17972_v2 = vmul.f32 %v14011_v41, %v848_v59  ;;  %v3233_v19 = vrot.slane %v17961_v25, 1  ;;  %v3912_v11 = vsel %vm2163_vm1, %v3909_v38, %v3911_v54 }
 0x301   : > { %v17969_v30 = vadd.f32 %v2708_v21, %v2576_v56  ;;  %v5906_v6 = vadd.f32 %v17444_v34, %v5786_v39  ;;  %v4541_v44 = vmul.f32 %v14020_v47, %v848_v59  ;;  %v4180_v3 = vadd.f32 %v3912_v11, %v3494_v27 }
 0x302   : > { %v4312_v24 = vmul.f32 %v14017_v46, %v848_v59  ;;  %v5223_v28 = vmul.f32 %v17986_v53, %v848_v59  ;;  %v1890_v36 = vadd.f32 %v17880_v50, %v17830_v12  ;;  %v3917_v17 = vrot.slane %v17972_v2, 2  ;;  %v6381_v2 = vld [vmem:[#allocation2 + $0x1b1] ss:$2 sm:$0xff] }
 0x303   : > { %v6019_v45 = vmax.f32 %v5906_v6, 0.0  ;;  %v4833_v38 = vrot.slane %v4541_v44, 1  ;;  %v2314_v7 = vsel %vm2163_vm1, %v2311_v63, %v2313_v51  ;;  %v17998_v16 = vsel %vm1478_vm0, %v3231_v4, %v3233_v19 }
 0x304   : > { %v5517_v62 = vrot.slane %v5223_v28, 2  ;;  %v2577_v56 = vadd.f32 %v2314_v7, %v1890_v36  ;;  %v3495_v59 = vadd.f32 %v17906_v8, %v17840_v49  ;;  %v3914_v29 = vsel %vm2163_vm1, %v3911_v54, %v3913_v10 }
 0x305   : > { %6134 = vst.msk [vmem:[#allocation2 + $0x219] sm:$0xff] %vm6066_vm2, %v6019_v45  ;;  %v4834_v12 = vsel %vm1478_vm0, %v4831_v5, %v4833_v38  ;;  %v1332_v63 = vmul.f32 %v13966_v13, %v853_v22  ;;  %v18011_v50 = vmul.f32 %v13969_v14, %v853_v22  ;;  %v4425_v4 = vadd.f32 %v4312_v24, %v4180_v3 }
 0x306   : > { %v5101_v21 = vadd.f32 %v4834_v12, %v4424_v20  ;;  %v5518_v39 = vsel %vm2163_vm1, %v5515_v18, %v5517_v62  ;;  %v4181_v49 = vadd.f32 %v3914_v29, %v3495_v59  ;;  %v2709_v25 = vmul.f32 %v13999_v35, %v853_v22  ;;  %v858_v20 = vpop.permute.xlu0 %857 }
 0x307   : > { %v1634_v8 = vrot.slane %v1332_v63, 1  ;;  %v2938_v5 = vmul.f32 %v14008_v40, %v853_v22  ;;  %v18017_v27 = vmul.f32 %v14011_v41, %v853_v22  ;;  %v18020_v54 = vmul.f32 %v13989_v31, %v853_v22 }
 0x308   : > { %v5787_v61 = vadd.f32 %v5518_v39, %v5101_v21  ;;  %v21318_v6 = vrot.slane %v18011_v50, 2  ;;  %v4542_v11 = vmul.f32 %v14020_v47, %v853_v22  ;;  %v18027_v44 = vadd.f32 %v2709_v25, %v2577_v56 }
 0x309   : > { %v18025_v18 = vsel %vm1478_vm0, %v1632_v57, %v1634_v8  ;;  %v4313_v3 = vmul.f32 %v14017_v46, %v853_v22  ;;  %v5224_v24 = vmul.f32 %v17986_v53, %v853_v22  ;;  %v3235_v36 = vrot.slane %v2938_v5, 1 }
 0x30a   : > { %v5907_v28 = vadd.f32 %v17444_v34, %v5787_v61  ;;  %v21317_v45 = vrot.slane %v18017_v27, 2  ;;  %v4835_v7 = vrot.slane %v4542_v11, 1  ;;  %v1333_v29 = vmul.f32 %v13966_v13, %v858_v20 }
 0x30b   : > { %v4426_v59 = vadd.f32 %v4313_v3, %v4181_v49  ;;  %v5519_v12 = vrot.slane %v5224_v24, 2  ;;  %v1891_v57 = vadd.f32 %v17930_v60, %v17875_v43  ;;  %v18038_v21 = vmul.f32 %v13989_v31, %v858_v20 }
 0x30c   : > { %v6020_v63 = vmax.f32 %v5907_v28, 0.0  ;;  %v4836_v56 = vsel %vm1478_vm0, %v4833_v38, %v4835_v7  ;;  %v18041_v22 = vmul.f32 %v13969_v14, %v858_v20  ;;  %v1636_v5 = vrot.slane %v1333_v29, 1 }
 0x30d   : > { %v5102_v39 = vadd.f32 %v4836_v56, %v4425_v4  ;;  %v5520_v25 = vsel %vm2163_vm1, %v5517_v62, %v5519_v12  ;;  %v2316_v49 = vsel %vm2163_vm1, %v2313_v51, %v2315_v23  ;;  %v2710_v60 = vmul.f32 %v13999_v35, %v858_v20 }
 0x30e   : > { %6135 = vst.msk [vmem:[#allocation2 + $0x221] sm:$0xff] %vm6066_vm2, %v6020_v63  ;;  %v2578_v43 = vadd.f32 %v2316_v49, %v1891_v57  ;;  %v2939_v38 = vmul.f32 %v14008_v40, %v858_v20  ;;  %v3496_v61 = vadd.f32 %v17952_v37, %v17893_v33  ;;  %v18055_v4 = vsel %vm1478_vm0, %v3233_v19, %v3235_v36  ;;  %v863_v57 = vpop.permute.xlu1 %862 }
 0x30f   : > { %v5788_v62 = vadd.f32 %v5520_v25, %v5102_v39  ;;  %v18058_v11 = vmul.f32 %v14011_v41, %v858_v20  ;;  %v3916_v42 = vsel %vm2163_vm1, %v3913_v10, %v3915_v58  ;;  %v4314_v28 = vmul.f32 %v14017_v46, %v858_v20 }
 0x310   : > { %v3237_v3 = vrot.slane %v2939_v38, 1  ;;  %v4182_v24 = vadd.f32 %v3916_v42, %v3496_v61  ;;  %v18069_v37 = vsel %vm1478_vm0, %v1634_v8, %v1636_v5  ;;  %v4543_v19 = vmul.f32 %v14020_v47, %v858_v20  ;;  %v868_v42 = vpop.permute.xlu0 %867 }
 0x311   : > { %v5908_v33 = vadd.f32 %v17444_v34, %v5788_v62  ;;  %v5225_v29 = vmul.f32 %v17986_v53, %v858_v20  ;;  %v18073_v63 = vadd.f32 %v2710_v60, %v2578_v43  ;;  %v1892_v10 = vadd.f32 %v17966_v9, %v17917_v15 }
 0x312   : > { %v2318_v56 = vsel %vm2163_vm1, %v2315_v23, %v2317_v55  ;;  %v4837_v39 = vrot.slane %v4543_v19, 1  ;;  %v3497_v20 = vadd.f32 %v17998_v16, %v17934_v1  ;;  %v18086_v49 = vsel %vm1478_vm0, %v3235_v36, %v3237_v3 }
 0x313   : > { %v6021_v8 = vmax.f32 %v5908_v33, 0.0  ;;  %v5521_v25 = vrot.slane %v5225_v29, 2  ;;  %v4427_v43 = vadd.f32 %v4314_v28, %v4182_v24  ;;  %v2579_v60 = vadd.f32 %v2318_v56, %v1892_v10 }
 0x314   : > { %v18089_v38 = vmul.f32 %v13966_v13, %v863_v57  ;;  %v4838_v15 = vsel %vm1478_vm0, %v4835_v7, %v4837_v39  ;;  %v3918_v26 = vsel %vm2163_vm1, %v3915_v58, %v3917_v17  ;;  %v18099_v23 = vmul.f32 %v13989_v31, %v863_v57 }
 0x315   : > { %6136 = vst.msk [vmem:[#allocation2 + $0x229] sm:$0xff] %vm6066_vm2, %v6021_v8  ;;  %v18102_v1 = vmul.f32 %v13969_v14, %v863_v57  ;;  %v5103_v9 = vadd.f32 %v4838_v15, %v4426_v59  ;;  %v4183_v16 = vadd.f32 %v3918_v26, %v3497_v20  ;;  %v18106_v61 = vmul.f32 %v14008_v40, %v863_v57 }
 0x316   : > { %v1638_v36 = vrot.slane %v18089_v38, 1  ;;  %v5522_v7 = vsel %vm2163_vm1, %v5519_v12, %v5521_v25  ;;  %v2711_v62 = vmul.f32 %v13999_v35, %v863_v57  ;;  %v18111_v0 = vmul.f32 %v14011_v41, %v863_v57 }
 0x317   : > { %v18114_v58 = vmul.f32 %v14020_v47, %v863_v57  ;;  %v5789_v24 = vadd.f32 %v5522_v7, %v5103_v9  ;;  %v3239_v28 = vrot.slane %v18106_v61, 1  ;;  %v4315_v33 = vmul.f32 %v14017_v46, %v863_v57 }
 0x318   : > { %v18120_v19 = vsel %vm1478_vm0, %v1636_v5, %v1638_v36  ;;  %v18122_v12 = vadd.f32 %v2711_v62, %v2579_v60  ;;  %v18126_v10 = vmul.f32 %v17986_v53, %v863_v57  ;;  %v18131_v38 = vmul.f32 %v13966_v13, %v868_v42 }
 0x319   : > { %v4839_v29 = vrot.slane %v18114_v58, 1  ;;  %v5909_v56 = vadd.f32 %v17444_v34, %v5789_v24  ;;  %v4428_v20 = vadd.f32 %v4315_v33, %v4183_v16  ;;  %v1893_v60 = vadd.f32 %v18025_v18, %v17958_v32  ;;  %v6263_v18 = vld [vmem:[#allocation2 + $0x180] ss:$2 sm:$0xff]  ;;  %v6377_v58 = vld [vmem:[#allocation2 + $0x191] ss:$2 sm:$0xff] }
 0x31a   : > { %v5523_v5 = vrot.slane %v18126_v10, 2  ;;  %v18138_v26 = vmul.f32 %v13969_v14, %v868_v42  ;;  %v18141_v9 = vsel %vm1478_vm0, %v3237_v3, %v3239_v28  ;;  %v2320_v16 = vsel %vm2163_vm1, %v2317_v55, %v21318_v6  ;;  %v6265_v55 = vld [vmem:[#allocation2 + $0x190] ss:$2 sm:$0xff] }
 0x31b   : > { %v4840_v15 = vsel %vm1478_vm0, %v4837_v39, %v4839_v29  ;;  %v6022_v57 = vmax.f32 %v5909_v56, 0.0  ;;  %v1640_v61 = vrot.slane %v18131_v38, 1  ;;  %v2580_v7 = vadd.f32 %v2320_v16, %v1893_v60  ;;  %v6379_v60 = vld [vmem:[#allocation2 + $0x1a1] ss:$2 sm:$0xff] }
 0x31c   : > { %v5104_v34 = vadd.f32 %v4840_v15, %v4427_v43  ;;  %v5524_v39 = vsel %vm2163_vm1, %v5521_v25, %v5523_v5  ;;  %v2712_v32 = vmul.f32 %v13999_v35, %v868_v42  ;;  %v18153_v3 = vmul.f32 %v13989_v31, %v868_v42  ;;  %v6375_v25 = vld [vmem:[#allocation2 + $0x181] ss:$2 sm:$0xff]  ;;  %v6267_v15 = vld [vmem:[#allocation2 + $0x1a0] ss:$2 sm:$0xff] }
 0x31d   : > { %6137 = vst.msk [vmem:[#allocation2 + $0x231] sm:$0xff] %vm6066_vm2, %v6022_v57  ;;  %v18156_v43 = vmul.f32 %v14008_v40, %v868_v42  ;;  %v3498_v48 = vadd.f32 %v18055_v4, %v17969_v30  ;;  %v18162_v33 = vmul.f32 %v14011_v41, %v868_v42  ;;  %v3920_v10 = vsel %vm2163_vm1, %v3917_v17, %v21317_v45  ;;  %v18173_v30 = vld [vmem:[%s21262_s2] ss:$0 sm:$0xff] }
 0x31e   : > { %v5790_v62 = vadd.f32 %v5524_v39, %v5104_v34  ;;  %v4316_v56 = vmul.f32 %v14017_v46, %v868_v42  ;;  %v4545_v16 = vmul.f32 %v14020_v47, %v868_v42  ;;  %v6269_v39 = vld [vmem:[#allocation2 + $0x1b0] ss:$2 sm:$0xff]  ;;  %v18181_v17 = vsel %vm1478_vm0, %v1638_v36, %v1640_v61  ;;  %v873_v36 = vpop.permute.xlu1 %872 }
 0x31f   : > { %v3241_v57 = vrot.slane %v18156_v43, 1  ;;  %v4184_v34 = vadd.f32 %v3920_v10, %v3498_v48  ;;  %v18183_v24 = vadd.f32 %v2712_v32, %v2580_v7  ;;  %v3925_v8 = vrot.slane %v18162_v33, 2 }
 0x320   : > { %v5910_v4 = vadd.f32 %v18173_v30, %v5790_v62  ;;  %v18187_v59 = vmul.f32 %v17986_v53, %v868_v42  ;;  %v4841_v45 = vrot.slane %v4545_v16, 1  ;;  %v6462_v43 = vmax.f32 %v6263_v18, %v6375_v25 }
 0x321   : > { %v6463_v48 = vmax.f32 %v6265_v55, %v6377_v58  ;;  %v6464_v52 = vmax.f32 %v6267_v15, %v6379_v60  ;;  %v6465_v6 = vmax.f32 %v6269_v39, %v6381_v2  ;;  %v1894_v51 = vadd.f32 %v18069_v37, %v18020_v54  ;;  %v878_v2 = vpop.permute.xlu0 %877 }
 0x322   : > { %v6023_v62 = vmax.f32 %v5910_v4, 0.0  ;;  %v5525_v10 = vrot.slane %v18187_v59, 2  ;;  %v18194_v7 = vsel %vm1478_vm0, %v3239_v28, %v3241_v57  ;;  %v4429_v32 = vadd.f32 %v4316_v56, %v4184_v34 }
 0x323   : > { %v4842_v42 = vsel %vm1478_vm0, %v4839_v29, %v4841_v45  ;;  %v3499_v18 = vadd.f32 %v18086_v49, %v18027_v44  ;;  %v6519_v25 = vmax.f32 %v6462_v43, %v6464_v52  ;;  %v6520_v59 = vmax.f32 %v6463_v48, %v6465_v6 }
 0x324   : > { %6138 = vst.msk [vmem:[#allocation2 + $0x239] sm:$0xff] %vm6066_vm2, %v6023_v62  ;;  %v5105_v55 = vadd.f32 %v4842_v42, %v4428_v20  ;;  %v21527_v58 = vrot.slane %v18041_v22, 2  ;;  %v21528_v15 = vrot.slane %v18011_v50, 2  ;;  %v5526_v37 = vsel %vm2163_vm1, %v5523_v5, %v5525_v10 }
 0x325   : > { %v21529_v28 = vrot.slane %v18058_v11, 2  ;;  %v21530_v56 = vrot.slane %v18017_v27, 2  ;;  %v1336_v44 = vmul.f32 %v13966_v13, %v873_v36  ;;  %6521 = vst.msk [vmem:[#allocation3 + $0x80] sm:$0xff] %vm6066_vm2, %v6519_v25  ;;  %v18214_v50 = vmul.f32 %v13969_v14, %v873_v36 }
 0x326   : > { %v2322_v54 = vsel %vm2163_vm1, %v21528_v15, %v21527_v58  ;;  %v5791_v49 = vadd.f32 %v5526_v37, %v5105_v55  ;;  %6522 = vst.msk [vmem:[#allocation3 + $0x88] sm:$0x3f] %vm6497_vm4, %v6520_v59  ;;  %v18217_v52 = vmul.f32 %v14008_v40, %v873_v36  ;;  %v2713_v20 = vmul.f32 %v13999_v35, %v873_v36 }
 0x327   : > { %v2581_v60 = vadd.f32 %v2322_v54, %v1894_v51  ;;  %v3922_v29 = vsel %vm2163_vm1, %v21530_v56, %v21529_v28  ;;  %v1642_v51 = vrot.slane %v1336_v44, 1  ;;  %v18221_v27 = vmul.f32 %v14011_v41, %v873_v36 }
 0x328   : > { %v4185_v6 = vadd.f32 %v3922_v29, %v3499_v18  ;;  %v18224_v5 = vmul.f32 %v14020_v47, %v873_v36  ;;  %v5911_v4 = vadd.f32 %v18173_v30, %v5791_v49  ;;  %v18228_v34 = vmul.f32 %v13989_v31, %v873_v36 }
 0x329   : > { %v3243_v16 = vrot.slane %v18217_v52, 1  ;;  %v4317_v39 = vmul.f32 %v14017_v46, %v873_v36  ;;  %v18235_v62 = vsel %vm1478_vm0, %v1640_v61, %v1642_v51  ;;  %v2327_v43 = vrot.slane %v18214_v50, 2 }
 0x32a   : > { %v18238_v48 = vadd.f32 %v2713_v20, %v2581_v60  ;;  %v4843_v42 = vrot.slane %v18224_v5, 1  ;;  %v6024_v18 = vmax.f32 %v5911_v4, 0.0  ;;  %v3927_v55 = vrot.slane %v18221_v27, 2 }
 0x32b   : > { %v4430_v25 = vadd.f32 %v4317_v39, %v4185_v6  ;;  %v5228_v59 = vmul.f32 %v17986_v53, %v873_v36  ;;  %v18245_v15 = vmul.f32 %v13966_v13, %v878_v2  ;;  %v1895_v38 = vadd.f32 %v18120_v19, %v18038_v21 }
 0x32c   : > { %v4844_v58 = vsel %vm1478_vm0, %v4841_v45, %v4843_v42  ;;  %v18250_v61 = vmul.f32 %v13969_v14, %v878_v2  ;;  %6139 = vst.msk [vmem:[#allocation2 + $0x241] sm:$0xff] %vm6066_vm2, %v6024_v18  ;;  %v18254_v54 = vsel %vm1478_vm0, %v3241_v57, %v3243_v16  ;;  %v21531_v36 = vrot.slane %v18102_v1, 2  ;;  %v6611_v56 = vld [vmem:[#allocation3 + $0x80] sm:$0xff] }
 0x32d   : > { %v5106_v37 = vadd.f32 %v4844_v58, %v4429_v32  ;;  %v5527_v60 = vrot.slane %v5228_v59, 2  ;;  %v21532_v45 = vrot.slane %v18041_v22, 2  ;;  %v6612_v29 = vld [vmem:[#allocation3 + $0x88] sm:$0xff]  ;;  %v1644_v21 = vrot.slane %v18245_v15, 1  ;;  %v6565_v6 = vld [vmem:[#allocation3 + $0x7f] sm:$0xff] }
 0x32e   : > { %v2714_v44 = vmul.f32 %v13999_v35, %v878_v2  ;;  %v18264_v49 = vmul.f32 %v14008_v40, %v878_v2  ;;  %v6632_v57 = vpack.c.bf16 %v6612_v29, %v6611_v56  ;;  %v6566_v32 = vld [vmem:[#allocation3 + $0x87] sm:$0xff]  ;;  %v3500_v22 = vadd.f32 %v18141_v9, %v18073_v63 }
 0x32f   : > { %v2324_v28 = vsel %vm2163_vm1, %v21532_v45, %v21531_v36  ;;  %v5528_v52 = vsel %vm2163_vm1, %v5525_v10, %v5527_v60  ;;  %v18270_v20 = vmul.f32 %v14011_v41, %v878_v2  ;;  %v6586_v5 = vpack.c.bf16 %v6566_v32, %v6565_v6  ;;  %v883_v45 = vpop.permute.xlu1 %882 }
 0x330   : > { %v2582_v19 = vadd.f32 %v2324_v28, %v1895_v38  ;;  %v5792_v4 = vadd.f32 %v5528_v52, %v5106_v37  ;;  %v18273_v39 = vmul.f32 %v13989_v31, %v878_v2  ;;  %v2329_v18 = vrot.slane %v18250_v61, 2  ;;  %12880 = vmatmul.mubr.msk.bf16.gmra.mrb[8].mxu1 %vm6066_vm2, %v6632_v57 }
 0x331   : > { %v18278_v59 = vsel %vm1478_vm0, %v1642_v51, %v1644_v21  ;;  %v3245_v10 = vrot.slane %v18264_v49, 1  ;;  %v21533_v58 = vrot.slane %v18111_v0, 2  ;;  %v21534_v63 = vrot.slane %v18058_v11, 2  ;;  %12912 = vmatmul.mubr.msk.bf16.gmra.mrb[12].mxu0 %vm6066_vm2, %v6586_v5 }
 0x332   : > { %v4318_v15 = vmul.f32 %v14017_v46, %v878_v2  ;;  %v5912_v38 = vadd.f32 %v18173_v30, %v5792_v4  ;;  %v4547_v36 = vmul.f32 %v14020_v47, %v878_v2  ;;  %v5229_v51 = vmul.f32 %v17986_v53, %v878_v2 }
 0x333   : > { %v3924_v9 = vsel %vm2163_vm1, %v21534_v63, %v21533_v58  ;;  %v18291_v28 = vadd.f32 %v2714_v44, %v2582_v19  ;;  %v3929_v56 = vrot.slane %v18270_v20, 2  ;;  %v1896_v11 = vadd.f32 %v18181_v17, %v18099_v23 }
 0x334   : > { %v4186_v37 = vadd.f32 %v3924_v9, %v3500_v22  ;;  %v3501_v29 = vadd.f32 %v18194_v7, %v18122_v12  ;;  %v6025_v49 = vmax.f32 %v5912_v38, 0.0  ;;  %v4845_v57 = vrot.slane %v4547_v36, 1  ;;  %v888_v38 = vpop.permute.xlu0 %887 }
 0x335   : > { %v5529_v6 = vrot.slane %v5229_v51, 2  ;;  %v21535_v32 = vrot.slane %v18138_v26, 2  ;;  %v21536_v52 = vrot.slane %v18102_v1, 2  ;;  %v18304_v19 = vsel %vm1478_vm0, %v3243_v16, %v3245_v10 }
 0x336   : > { %v4431_v44 = vadd.f32 %v4318_v15, %v4186_v37  ;;  %v1338_v5 = vmul.f32 %v13966_v13, %v883_v45  ;;  %6140 = vst.msk [vmem:[#allocation2 + $0x249] sm:$0xff] %vm6066_vm2, %v6025_v49  ;;  %v4846_v23 = vsel %vm1478_vm0, %v4843_v42, %v4845_v57  ;;  %v21537_v12 = vmov %v21533_v58 }
 0x337   : > { %v2326_v2 = vsel %vm2163_vm1, %v21536_v52, %v21535_v32  ;;  %v3926_v17 = vsel %vm2163_vm1, %v21537_v12, %v3925_v8  ;;  %v18315_v1 = vmul.f32 %v13989_v31, %v883_v45  ;;  %v18318_v7 = vmul.f32 %v13969_v14, %v883_v45 }
 0x338   : > { %v2583_v22 = vadd.f32 %v2326_v2, %v1896_v11  ;;  %v5107_v16 = vadd.f32 %v4846_v23, %v4430_v25  ;;  %v4187_v4 = vadd.f32 %v3926_v17, %v3501_v29  ;;  %v1646_v58 = vrot.slane %v1338_v5, 1 }
 0x339   : > { %v2944_v63 = vmul.f32 %v14008_v40, %v883_v45  ;;  %v5530_v9 = vsel %vm2163_vm1, %v5527_v60, %v5529_v6  ;;  %v2715_v42 = vmul.f32 %v13999_v35, %v883_v45  ;;  %v18324_v15 = vmul.f32 %v14011_v41, %v883_v45 }
 0x33a   : > { %v4548_v0 = vmul.f32 %v14020_v47, %v883_v45  ;;  %v5793_v37 = vadd.f32 %v5530_v9, %v5107_v16  ;;  %v18328_v36 = vsel %vm1478_vm0, %v1644_v21, %v1646_v58  ;;  %v2331_v25 = vrot.slane %v18318_v7, 2 }
 0x33b   : > { %v4319_v51 = vmul.f32 %v14017_v46, %v883_v45  ;;  %v18332_v11 = vadd.f32 %v2715_v42, %v2583_v22  ;;  %v3247_v29 = vrot.slane %v2944_v63, 1  ;;  %v5230_v49 = vmul.f32 %v17986_v53, %v883_v45 }
 0x33c   : > { %v4847_v60 = vrot.slane %v4548_v0, 1  ;;  %v5913_v32 = vadd.f32 %v18173_v30, %v5793_v37  ;;  %v3931_v52 = vrot.slane %v18324_v15, 2  ;;  %v1339_v5 = vmul.f32 %v13966_v13, %v888_v38 }
 0x33d   : > { %v4432_v2 = vadd.f32 %v4319_v51, %v4187_v4  ;;  %v5531_v23 = vrot.slane %v5230_v49, 2  ;;  %v1897_v12 = vadd.f32 %v18235_v62, %v18153_v3  ;;  %v18342_v22 = vmul.f32 %v13969_v14, %v888_v38 }
 0x33e   : > { %v4848_v21 = vsel %vm1478_vm0, %v4845_v57, %v4847_v60  ;;  %v6026_v17 = vmax.f32 %v5913_v32, 0.0  ;;  %v1648_v63 = vrot.slane %v1339_v5, 1  ;;  %v21538_v45 = vrot.slane %v18138_v26, 2 }
 0x33f   : > { %v5108_v16 = vadd.f32 %v4848_v21, %v4431_v44  ;;  %v18350_v9 = vsel %vm1478_vm0, %v3245_v10, %v3247_v29  ;;  %v5532_v57 = vsel %vm2163_vm1, %v5529_v6, %v5531_v23  ;;  %v2716_v3 = vmul.f32 %v13999_v35, %v888_v38 }
 0x340   : > { %v2328_v4 = vsel %vm2163_vm1, %v21538_v45, %v2327_v43  ;;  %6141 = vst.msk [vmem:[#allocation2 + $0x251] sm:$0xff] %vm6066_vm2, %v6026_v17  ;;  %v18356_v44 = vmul.f32 %v13989_v31, %v888_v38  ;;  %v18359_v0 = vmul.f32 %v14008_v40, %v888_v38  ;;  %v3502_v26 = vadd.f32 %v18254_v54, %v18183_v24  ;;  %v893_v17 = vpop.permute.xlu1 %892 }
 0x341   : > { %v2584_v42 = vadd.f32 %v2328_v4, %v1897_v12  ;;  %v5794_v62 = vadd.f32 %v5532_v57, %v5108_v16  ;;  %v18364_v10 = vsel %vm1478_vm0, %v1646_v58, %v1648_v63  ;;  %v2333_v6 = vrot.slane %v18342_v22, 2 }
 0x342   : > { %v18370_v51 = vmul.f32 %v14011_v41, %v888_v38  ;;  %v3249_v32 = vrot.slane %v18359_v0, 1  ;;  %v3928_v24 = vsel %vm2163_vm1, %v3925_v8, %v3927_v55  ;;  %v4549_v54 = vmul.f32 %v14020_v47, %v888_v38 }
 0x343   : > { %v18367_v37 = vadd.f32 %v2716_v3, %v2584_v42  ;;  %v5914_v49 = vadd.f32 %v18173_v30, %v5794_v62  ;;  %v4188_v58 = vadd.f32 %v3928_v24, %v3502_v26  ;;  %v4320_v5 = vmul.f32 %v14017_v46, %v888_v38 }
 0x344   : > { %v5231_v21 = vmul.f32 %v17986_v53, %v888_v38  ;;  %v1898_v12 = vadd.f32 %v18278_v59, %v18228_v34  ;;  %v3933_v45 = vrot.slane %v18370_v51, 2  ;;  %v4849_v4 = vrot.slane %v4549_v54, 1 }
 0x345   : > { %v6027_v16 = vmax.f32 %v5914_v49, 0.0  ;;  %v2330_v8 = vsel %vm2163_vm1, %v2327_v43, %v2329_v18  ;;  %v18391_v33 = vsel %vm1478_vm0, %v3247_v29, %v3249_v32  ;;  %v3503_v38 = vadd.f32 %v18304_v19, %v18238_v48 }
 0x346   : > { %v5533_v57 = vrot.slane %v5231_v21, 2  ;;  %v2585_v42 = vadd.f32 %v2330_v8, %v1898_v12  ;;  %v4850_v34 = vsel %vm1478_vm0, %v4847_v60, %v4849_v4  ;;  %v3930_v50 = vsel %vm2163_vm1, %v3927_v55, %v3929_v56 }
 0x347   : > { %6142 = vst.msk [vmem:[#allocation2 + $0x259] sm:$0xff] %vm6066_vm2, %v6027_v16  ;;  %v1340_v43 = vmul.f32 %v13966_v13, %v893_v17  ;;  %v18404_v59 = vmul.f32 %v13969_v14, %v893_v17  ;;  %v4433_v29 = vadd.f32 %v4320_v5, %v4188_v58  ;;  %v5109_v3 = vadd.f32 %v4850_v34, %v4432_v2  ;;  %v898_v2 = vpop.permute.xlu0 %897 }
 0x348   : > { %v5534_v62 = vsel %vm2163_vm1, %v5531_v23, %v5533_v57  ;;  %v4189_v48 = vadd.f32 %v3930_v50, %v3503_v38  ;;  %v2717_v0 = vmul.f32 %v13999_v35, %v893_v17  ;;  %v2946_v60 = vmul.f32 %v14008_v40, %v893_v17 }
 0x349   : > { %v1650_v19 = vrot.slane %v1340_v43, 1  ;;  %v18410_v26 = vmul.f32 %v14011_v41, %v893_v17  ;;  %v5795_v27 = vadd.f32 %v5534_v62, %v5109_v3  ;;  %v18413_v55 = vmul.f32 %v13989_v31, %v893_v17 }
 0x34a   : > { %v21320_v49 = vrot.slane %v18404_v59, 2  ;;  %v4550_v24 = vmul.f32 %v14020_v47, %v893_v17  ;;  %v18420_v54 = vadd.f32 %v2717_v0, %v2585_v42  ;;  %v4321_v58 = vmul.f32 %v14017_v46, %v893_v17 }
 0x34b   : > { %v18418_v23 = vsel %vm1478_vm0, %v1648_v63, %v1650_v19  ;;  %v5232_v5 = vmul.f32 %v17986_v53, %v893_v17  ;;  %v5915_v21 = vadd.f32 %v18173_v30, %v5795_v27  ;;  %v3251_v12 = vrot.slane %v2946_v60, 1 }
 0x34c   : > { %v21319_v16 = vrot.slane %v18410_v26, 2  ;;  %v4851_v8 = vrot.slane %v4550_v24, 1  ;;  %v4434_v38 = vadd.f32 %v4321_v58, %v4189_v48  ;;  %v1341_v50 = vmul.f32 %v13966_v13, %v898_v2 }
 0x34d   : > { %v5535_v34 = vrot.slane %v5232_v5, 2  ;;  %v1899_v63 = vadd.f32 %v18328_v36, %v18273_v39  ;;  %v6028_v43 = vmax.f32 %v5915_v21, 0.0  ;;  %v18431_v3 = vmul.f32 %v13989_v31, %v898_v2 }
 0x34e   : > { %v4852_v42 = vsel %vm1478_vm0, %v4849_v4, %v4851_v8  ;;  %v18434_v17 = vmul.f32 %v13969_v14, %v898_v2  ;;  %v1652_v60 = vrot.slane %v1341_v50, 1  ;;  %v2332_v48 = vsel %vm2163_vm1, %v2329_v18, %v2331_v25 }
 0x34f   : > { %v5110_v62 = vadd.f32 %v4852_v42, %v4433_v29  ;;  %v5536_v0 = vsel %vm2163_vm1, %v5533_v57, %v5535_v34  ;;  %6143 = vst.msk [vmem:[#allocation2 + $0x261] sm:$0xff] %vm6066_vm2, %v6028_v43  ;;  %v2586_v39 = vadd.f32 %v2332_v48, %v1899_v63  ;;  %v2718_v36 = vmul.f32 %v13999_v35, %v898_v2  ;;  %v903_v63 = vpop.permute.xlu1 %902 }
 0x350   : > { %v2947_v4 = vmul.f32 %v14008_v40, %v898_v2  ;;  %v3504_v27 = vadd.f32 %v18350_v9, %v18291_v28  ;;  %v18448_v29 = vsel %vm1478_vm0, %v3249_v32, %v3251_v12  ;;  %v18451_v24 = vmul.f32 %v14011_v41, %v898_v2 }
 0x351   : > { %v5796_v57 = vadd.f32 %v5536_v0, %v5110_v62  ;;  %v3932_v61 = vsel %vm2163_vm1, %v3929_v56, %v3931_v52  ;;  %v4322_v21 = vmul.f32 %v14017_v46, %v898_v2  ;;  %v18462_v9 = vsel %vm1478_vm0, %v1650_v19, %v1652_v60 }
 0x352   : > { %v3253_v58 = vrot.slane %v2947_v4, 1  ;;  %v4190_v5 = vadd.f32 %v3932_v61, %v3504_v27  ;;  %v4551_v32 = vmul.f32 %v14020_v47, %v898_v2  ;;  %v5233_v50 = vmul.f32 %v17986_v53, %v898_v2  ;;  %v908_v61 = vpop.permute.xlu0 %907 }
 0x353   : > { %v5916_v28 = vadd.f32 %v18173_v30, %v5796_v57  ;;  %v18466_v43 = vadd.f32 %v2718_v36, %v2586_v39  ;;  %v1900_v56 = vadd.f32 %v18364_v10, %v18315_v1  ;;  %v2334_v42 = vsel %vm2163_vm1, %v2331_v25, %v2333_v6 }
 0x354   : > { %v4853_v62 = vrot.slane %v4551_v32, 1  ;;  %v5537_v0 = vrot.slane %v5233_v50, 2  ;;  %v3505_v2 = vadd.f32 %v18391_v33, %v18332_v11  ;;  %v18479_v48 = vsel %vm1478_vm0, %v3251_v12, %v3253_v58 }
 0x355   : > { %v6029_v19 = vmax.f32 %v5916_v28, 0.0  ;;  %v4435_v39 = vadd.f32 %v4322_v21, %v4190_v5  ;;  %v2587_v36 = vadd.f32 %v2334_v42, %v1900_v56  ;;  %v1342_v4 = vmul.f32 %v13966_v13, %v903_v63 }
 0x356   : > { %v4854_v1 = vsel %vm1478_vm0, %v4851_v8, %v4853_v62  ;;  %v3934_v7 = vsel %vm2163_vm1, %v3931_v52, %v3933_v45  ;;  %v18490_v25 = vmul.f32 %v13989_v31, %v903_v63  ;;  %v18493_v11 = vmul.f32 %v13969_v14, %v903_v63 }
 0x357   : > { %6144 = vst.msk [vmem:[#allocation2 + $0x269] sm:$0xff] %vm6066_vm2, %v6029_v19  ;;  %v5111_v10 = vadd.f32 %v4854_v1, %v4434_v38  ;;  %v4191_v33 = vadd.f32 %v3934_v7, %v3505_v2  ;;  %v1654_v12 = vrot.slane %v1342_v4, 1  ;;  %v18496_v27 = vmul.f32 %v14008_v40, %v903_v63 }
 0x358   : > { %v5538_v8 = vsel %vm2163_vm1, %v5535_v34, %v5537_v0  ;;  %v2719_v57 = vmul.f32 %v13999_v35, %v903_v63  ;;  %v18501_v15 = vmul.f32 %v14011_v41, %v903_v63  ;;  %v18504_v52 = vmul.f32 %v14020_v47, %v903_v63 }
 0x359   : > { %v5797_v5 = vadd.f32 %v5538_v8, %v5111_v10  ;;  %v3255_v38 = vrot.slane %v18496_v27, 1  ;;  %v4323_v28 = vmul.f32 %v14017_v46, %v903_v63  ;;  %v18510_v32 = vsel %vm1478_vm0, %v1652_v60, %v1654_v12 }
 0x35a   : > { %v18512_v34 = vadd.f32 %v2719_v57, %v2587_v36  ;;  %v4855_v50 = vrot.slane %v18504_v52, 1  ;;  %v18516_v56 = vmul.f32 %v17986_v53, %v903_v63  ;;  %v18521_v4 = vmul.f32 %v13966_v13, %v908_v61 }
 0x35b   : > { %v5917_v42 = vadd.f32 %v18173_v30, %v5797_v5  ;;  %v4436_v2 = vadd.f32 %v4323_v28, %v4191_v33  ;;  %v1901_v36 = vadd.f32 %v18418_v23, %v18356_v44  ;;  %v18528_v7 = vmul.f32 %v13969_v14, %v908_v61  ;;  %v6271_v23 = vld [vmem:[#allocation2 + $0x1c0] ss:$2 sm:$0xff]  ;;  %v6385_v5 = vld [vmem:[#allocation2 + $0x1d1] ss:$2 sm:$0xff] }
 0x35c   : > { %v4856_v1 = vsel %vm1478_vm0, %v4853_v62, %v4855_v50  ;;  %v5539_v60 = vrot.slane %v18516_v56, 2  ;;  %v18531_v10 = vsel %vm1478_vm0, %v3253_v58, %v3255_v38  ;;  %v2336_v33 = vsel %vm2163_vm1, %v2333_v6, %v21320_v49  ;;  %v6273_v6 = vld [vmem:[#allocation2 + $0x1d0] ss:$2 sm:$0xff]  ;;  %v6389_v28 = vld [vmem:[#allocation2 + $0x1f1] ss:$2 sm:$0xff] }
 0x35d   : > { %v6030_v63 = vmax.f32 %v5917_v42, 0.0  ;;  %v5112_v27 = vadd.f32 %v4856_v1, %v4435_v39  ;;  %v1656_v8 = vrot.slane %v18521_v4, 1  ;;  %v2588_v57 = vadd.f32 %v2336_v33, %v1901_v36  ;;  %v6275_v36 = vld [vmem:[#allocation2 + $0x1e0] ss:$2 sm:$0xff] }
 0x35e   : > { %v5540_v62 = vsel %vm2163_vm1, %v5537_v0, %v5539_v60  ;;  %v2720_v44 = vmul.f32 %v13999_v35, %v908_v61  ;;  %v18543_v58 = vmul.f32 %v13989_v31, %v908_v61  ;;  %v18546_v39 = vmul.f32 %v14008_v40, %v908_v61  ;;  %v6383_v0 = vld [vmem:[#allocation2 + $0x1c1] ss:$2 sm:$0xff] }
 0x35f   : > { %6145 = vst.msk [vmem:[#allocation2 + $0x271] sm:$0xff] %vm6066_vm2, %v6030_v63  ;;  %v5798_v52 = vadd.f32 %v5540_v62, %v5112_v27  ;;  %v3506_v22 = vadd.f32 %v18448_v29, %v18367_v37  ;;  %v18552_v56 = vmul.f32 %v14011_v41, %v908_v61  ;;  %v3936_v42 = vsel %vm2163_vm1, %v3933_v45, %v21319_v16  ;;  %v6387_v63 = vld [vmem:[#allocation2 + $0x1e1] ss:$2 sm:$0xff]  ;;  %v6277_v62 = vld [vmem:[#allocation2 + $0x1f0] ss:$2 sm:$0xff] }
 0x360   : > { %v4324_v1 = vmul.f32 %v14017_v46, %v908_v61  ;;  %v4553_v33 = vmul.f32 %v14020_v47, %v908_v61  ;;  %v18566_v19 = vsel %vm1478_vm0, %v1654_v12, %v1656_v8  ;;  %v18568_v51 = vadd.f32 %v2720_v44, %v2588_v57  ;;  %v913_v12 = vpop.permute.xlu1 %912 }
 0x361   : > { %v5918_v37 = vadd.f32 %v18173_v30, %v5798_v52  ;;  %v4192_v27 = vadd.f32 %v3936_v42, %v3506_v22  ;;  %v3941_v45 = vrot.slane %v18552_v56, 2  ;;  %v18572_v21 = vmul.f32 %v17986_v53, %v908_v61 }
 0x362   : > { %v4857_v16 = vrot.slane %v4553_v33, 1  ;;  %v6466_v20 = vmax.f32 %v6271_v23, %v6383_v0  ;;  %v6467_v22 = vmax.f32 %v6273_v6, %v6385_v5  ;;  %v6468_v49 = vmax.f32 %v6275_v36, %v6387_v63  ;;  %v13461_v6 = vld [vmem:[%s21263_s3 + $0x20] sm:$0xff]  }
 0x363   : > { %v6031_v52 = vmax.f32 %v5918_v37, 0.0  ;;  %v5541_v42 = vrot.slane %v18572_v21, 2  ;;  %v6469_v18 = vmax.f32 %v6277_v62, %v6389_v28  ;;  %v1902_v29 = vadd.f32 %v18462_v9, %v18413_v55  ;;  %12927 = vmatprep.subr.bf16.mxu0 %v13461_v6 }
 0x364   : > { %v21539_v57 = vrot.slane %v18546_v39, 1  ;;  %v4437_v61 = vadd.f32 %v4324_v1, %v4192_v27  ;;  %v4858_v37 = vsel %vm1478_vm0, %v4855_v50, %v4857_v16  ;;  %v3507_v23 = vadd.f32 %v18479_v48, %v18420_v54  ;;  %12928 = vmatpush3.bf16.msra.mxu0 %v13461_v6 }
 0x365   : > { %6146 = vst.msk [vmem:[#allocation2 + $0x279] sm:$0xff] %vm6066_vm2, %v6031_v52  ;;  %v5113_v0 = vadd.f32 %v4858_v37, %v4436_v2  ;;  %v6523_v55 = vmax.f32 %v6466_v20, %v6468_v49  ;;  %v6524_v9 = vmax.f32 %v6467_v22, %v6469_v18  ;;  %v21540_v5 = vrot.slane %v18434_v17, 2  ;;  %v918_v22 = vpop.permute.xlu0 %917 }
 0x366   : > { %v18581_v44 = vsel %vm1478_vm0, %v3255_v38, %v21539_v57  ;;  %v21541_v28 = vrot.slane %v18404_v59, 2  ;;  %v5542_v50 = vsel %vm2163_vm1, %v5539_v60, %v5541_v42  ;;  %v21542_v54 = vrot.slane %v18451_v24, 2 }
 0x367   : > { %v21543_v48 = vrot.slane %v18410_v26, 2  ;;  %v1344_v49 = vmul.f32 %v13966_v13, %v913_v12  ;;  %v5799_v18 = vadd.f32 %v5542_v50, %v5113_v0  ;;  %6525 = vst.msk [vmem:[#allocation3 + $0x90] sm:$0xff] %vm6066_vm2, %v6523_v55  ;;  %v18606_v20 = vmul.f32 %v13969_v14, %v913_v12 }
 0x368   : > { %v2338_v38 = vsel %vm2163_vm1, %v21541_v28, %v21540_v5  ;;  %6526 = vst.msk [vmem:[#allocation3 + $0x98] sm:$0x3f] %vm6497_vm4, %v6524_v9  ;;  %v18609_v2 = vmul.f32 %v14008_v40, %v913_v12  ;;  %v2721_v26 = vmul.f32 %v13999_v35, %v913_v12  ;;  %v18613_v63 = vmul.f32 %v14011_v41, %v913_v12 }
 0x369   : > { %v2589_v1 = vadd.f32 %v2338_v38, %v1902_v29  ;;  %v3938_v36 = vsel %vm2163_vm1, %v21543_v48, %v21542_v54  ;;  %v1658_v60 = vrot.slane %v1344_v49, 1  ;;  %v18616_v29 = vmul.f32 %v14020_v47, %v913_v12 }
 0x36a   : > { %v4193_v59 = vadd.f32 %v3938_v36, %v3507_v23  ;;  %v5919_v27 = vadd.f32 %v18173_v30, %v5799_v18  ;;  %v18620_v33 = vmul.f32 %v13989_v31, %v913_v12  ;;  %v3259_v62 = vrot.slane %v18609_v2, 1 }
 0x36b   : > { %v4325_v52 = vmul.f32 %v14017_v46, %v913_v12  ;;  %v18627_v57 = vsel %vm1478_vm0, %v1656_v8, %v1658_v60  ;;  %v2343_v37 = vrot.slane %v18606_v20, 2  ;;  %v18630_v23 = vadd.f32 %v2721_v26, %v2589_v1 }
 0x36c   : > { %v4859_v6 = vrot.slane %v18616_v29, 1  ;;  %v6032_v0 = vmax.f32 %v5919_v27, 0.0  ;;  %v3943_v55 = vrot.slane %v18613_v63, 2  ;;  %v5236_v5 = vmul.f32 %v17986_v53, %v913_v12 }
 0x36d   : > { %v4438_v9 = vadd.f32 %v4325_v52, %v4193_v59  ;;  %v18637_v38 = vmul.f32 %v13966_v13, %v918_v22  ;;  %v1903_v4 = vadd.f32 %v18510_v32, %v18431_v3  ;;  %v18642_v8 = vmul.f32 %v13969_v14, %v918_v22 }
 0x36e   : > { %v4860_v28 = vsel %vm1478_vm0, %v4857_v16, %v4859_v6  ;;  %6147 = vst.msk [vmem:[#allocation2 + $0x281] sm:$0xff] %vm6066_vm2, %v6032_v0  ;;  %v21544_v50 = vrot.slane %v18546_v39, 1  ;;  %v5543_v53 = vrot.slane %v5236_v5, 2  ;;  %v21545_v16 = vrot.slane %v18493_v11, 2  ;;  %v6613_v36 = vld [vmem:[#allocation3 + $0x90] sm:$0xff] }
 0x36f   : > { %v5114_v54 = vadd.f32 %v4860_v28, %v4437_v61  ;;  %v21546_v12 = vrot.slane %v18434_v17, 2  ;;  %v6614_v3 = vld [vmem:[#allocation3 + $0x98] sm:$0xff]  ;;  %v1660_v32 = vrot.slane %v18637_v38, 1  ;;  %v2722_v18 = vmul.f32 %v13999_v35, %v918_v22  ;;  %v6567_v2 = vld [vmem:[#allocation3 + $0x8f] sm:$0xff] }
 0x370   : > { %v18648_v1 = vsel %vm1478_vm0, %v21544_v50, %v3259_v62  ;;  %v18658_v39 = vmul.f32 %v14008_v40, %v918_v22  ;;  %v6633_v59 = vpack.c.bf16 %v6614_v3, %v6613_v36  ;;  %v6568_v61 = vld [vmem:[#allocation3 + $0x97] sm:$0xff]  ;;  %v5544_v26 = vsel %vm2163_vm1, %v5541_v42, %v5543_v53 }
 0x371   : > { %v2340_v48 = vsel %vm2163_vm1, %v21546_v12, %v21545_v16  ;;  %v3508_v17 = vadd.f32 %v18531_v10, %v18466_v43  ;;  %v18666_v29 = vmul.f32 %v14011_v41, %v918_v22  ;;  %v6587_v27 = vpack.c.bf16 %v6568_v61, %v6567_v2  ;;  %v923_v12 = vpop.permute.xlu1 %922 }
 0x372   : > { %v2590_v49 = vadd.f32 %v2340_v48, %v1903_v4  ;;  %v5800_v52 = vadd.f32 %v5544_v26, %v5114_v54  ;;  %v18669_v0 = vmul.f32 %v13989_v31, %v918_v22  ;;  %v2345_v5 = vrot.slane %v18642_v8, 2  ;;  %12883 = vmatprep.mubr.msk.bf16.mxu1 %vm6066_vm2, %v6633_v59 }
 0x373   : > { %v18674_v28 = vsel %vm1478_vm0, %v1658_v60, %v1660_v32  ;;  %v3261_v21 = vrot.slane %v18658_v39, 1  ;;  %v21547_v42 = vrot.slane %v18501_v15, 2  ;;  %v21548_v43 = vrot.slane %v18451_v24, 2  ;;  %12915 = vmatprep.mubr.msk.bf16.mxu0 %vm6066_vm2, %v6587_v27  ;;  %v18689_v60 = vld [vmem:[%s21261_s1 + $0x8] ss:$0 sm:$0xff] }
 0x374   : > { %v4326_v38 = vmul.f32 %v14017_v46, %v918_v22  ;;  %v5920_v4 = vadd.f32 %v18173_v30, %v5800_v52  ;;  %v4555_v54 = vmul.f32 %v14020_v47, %v918_v22  ;;  %v5237_v16 = vmul.f32 %v18689_v60, %v918_v22 }
 0x375   : > { %v3940_v10 = vsel %vm2163_vm1, %v21548_v43, %v21547_v42  ;;  %v18692_v24 = vadd.f32 %v2722_v18, %v2590_v49  ;;  %v3945_v48 = vrot.slane %v18666_v29, 2  ;;  %v1904_v36 = vadd.f32 %v18566_v19, %v18490_v25 }
 0x376   : > { %v4194_v50 = vadd.f32 %v3940_v10, %v3508_v17  ;;  %v3509_v3 = vadd.f32 %v18581_v44, %v18512_v34  ;;  %v6033_v39 = vmax.f32 %v5920_v4, 0.0  ;;  %v4861_v59 = vrot.slane %v4555_v54, 1  ;;  %v928_v4 = vpop.permute.xlu0 %927 }
 0x377   : > { %v5545_v2 = vrot.slane %v5237_v16, 2  ;;  %v21549_v61 = vrot.slane %v18528_v7, 2  ;;  %v21550_v26 = vrot.slane %v18493_v11, 2  ;;  %v18705_v49 = vsel %vm1478_vm0, %v3259_v62, %v3261_v21 }
 0x378   : > { %v4439_v18 = vadd.f32 %v4326_v38, %v4194_v50  ;;  %v1346_v27 = vmul.f32 %v13966_v13, %v923_v12  ;;  %6148 = vst.msk [vmem:[#allocation2 + $0x289] sm:$0xff] %vm6066_vm2, %v6033_v39  ;;  %v4862_v25 = vsel %vm1478_vm0, %v4859_v6, %v4861_v59  ;;  %v21551_v34 = vmov %v21547_v42 }
 0x379   : > { %v2342_v22 = vsel %vm2163_vm1, %v21550_v26, %v21549_v61  ;;  %v3942_v19 = vsel %vm2163_vm1, %v21551_v34, %v3941_v45  ;;  %v18716_v11 = vmul.f32 %v13989_v31, %v923_v12  ;;  %v18719_v44 = vmul.f32 %v13969_v14, %v923_v12 }
 0x37a   : > { %v2591_v17 = vadd.f32 %v2342_v22, %v1904_v36  ;;  %v5115_v62 = vadd.f32 %v4862_v25, %v4438_v9  ;;  %v4195_v52 = vadd.f32 %v3942_v19, %v3509_v3  ;;  %v1662_v42 = vrot.slane %v1346_v27, 1 }
 0x37b   : > { %v2952_v43 = vmul.f32 %v14008_v40, %v923_v12  ;;  %v5546_v10 = vsel %vm2163_vm1, %v5543_v53, %v5545_v2  ;;  %v2723_v6 = vmul.f32 %v13999_v35, %v923_v12  ;;  %v18725_v38 = vmul.f32 %v14011_v41, %v923_v12 }
 0x37c   : > { %v4556_v15 = vmul.f32 %v14020_v47, %v923_v12  ;;  %v5801_v50 = vadd.f32 %v5546_v10, %v5115_v62  ;;  %v18729_v54 = vsel %vm1478_vm0, %v1660_v32, %v1662_v42  ;;  %v2347_v9 = vrot.slane %v18719_v44, 2 }
 0x37d   : > { %v4327_v16 = vmul.f32 %v14017_v46, %v923_v12  ;;  %v18733_v36 = vadd.f32 %v2723_v6, %v2591_v17  ;;  %v3263_v3 = vrot.slane %v2952_v43, 1  ;;  %v5238_v39 = vmul.f32 %v18689_v60, %v923_v12 }
 0x37e   : > { %v4863_v53 = vrot.slane %v4556_v15, 1  ;;  %v5921_v61 = vadd.f32 %v18173_v30, %v5801_v50  ;;  %v3947_v26 = vrot.slane %v18725_v38, 2  ;;  %v1347_v27 = vmul.f32 %v13966_v13, %v928_v4 }
 0x37f   : > { %v4440_v22 = vadd.f32 %v4327_v16, %v4195_v52  ;;  %v5547_v25 = vrot.slane %v5238_v39, 2  ;;  %v1905_v34 = vadd.f32 %v18627_v57, %v18543_v58  ;;  %v18743_v17 = vmul.f32 %v13969_v14, %v928_v4 }
 0x380   : > { %v4864_v32 = vsel %vm1478_vm0, %v4861_v59, %v4863_v53  ;;  %v6034_v19 = vmax.f32 %v5921_v61, 0.0  ;;  %v1664_v43 = vrot.slane %v1347_v27, 1  ;;  %v21552_v12 = vrot.slane %v18528_v7, 2 }
 0x381   : > { %v5116_v62 = vadd.f32 %v4864_v32, %v4439_v18  ;;  %v18751_v10 = vsel %vm1478_vm0, %v3261_v21, %v3263_v3  ;;  %v5548_v59 = vsel %vm2163_vm1, %v5545_v2, %v5547_v25  ;;  %v2724_v58 = vmul.f32 %v13999_v35, %v928_v4 }
 0x382   : > { %v2344_v52 = vsel %vm2163_vm1, %v21552_v12, %v2343_v37  ;;  %6149 = vst.msk [vmem:[#allocation2 + $0x291] sm:$0xff] %vm6066_vm2, %v6034_v19  ;;  %v18757_v18 = vmul.f32 %v13989_v31, %v928_v4  ;;  %v18760_v15 = vmul.f32 %v14008_v40, %v928_v4  ;;  %v3510_v7 = vadd.f32 %v18648_v1, %v18568_v51  ;;  %v933_v19 = vpop.permute.xlu1 %932 }
 0x383   : > { %v2592_v6 = vadd.f32 %v2344_v52, %v1905_v34  ;;  %v5802_v57 = vadd.f32 %v5548_v59, %v5116_v62  ;;  %v18765_v21 = vsel %vm1478_vm0, %v1662_v42, %v1664_v43  ;;  %v2349_v2 = vrot.slane %v18743_v17, 2 }
 0x384   : > { %v18771_v16 = vmul.f32 %v14011_v41, %v928_v4  ;;  %v3265_v61 = vrot.slane %v18760_v15, 1  ;;  %v3944_v51 = vsel %vm2163_vm1, %v3941_v45, %v3943_v55  ;;  %v4557_v1 = vmul.f32 %v14020_v47, %v928_v4 }
 0x385   : > { %v18768_v50 = vadd.f32 %v2724_v58, %v2592_v6  ;;  %v5922_v39 = vadd.f32 %v18173_v30, %v5802_v57  ;;  %v4196_v42 = vadd.f32 %v3944_v51, %v3510_v7  ;;  %v4328_v27 = vmul.f32 %v14017_v46, %v928_v4 }
 0x386   : > { %v5239_v32 = vmul.f32 %v18689_v60, %v928_v4  ;;  %v1906_v34 = vadd.f32 %v18674_v28, %v18620_v33  ;;  %v3949_v12 = vrot.slane %v18771_v16, 2  ;;  %v4865_v52 = vrot.slane %v4557_v1, 1 }
 0x387   : > { %v6035_v62 = vmax.f32 %v5922_v39, 0.0  ;;  %v2346_v56 = vsel %vm2163_vm1, %v2343_v37, %v2345_v5  ;;  %v18792_v45 = vsel %vm1478_vm0, %v3263_v3, %v3265_v61  ;;  %v3511_v4 = vadd.f32 %v18705_v49, %v18630_v23 }
 0x388   : > { %v5549_v59 = vrot.slane %v5239_v32, 2  ;;  %v2593_v6 = vadd.f32 %v2346_v56, %v1906_v34  ;;  %v4866_v33 = vsel %vm1478_vm0, %v4863_v53, %v4865_v52  ;;  %v3946_v20 = vsel %vm2163_vm1, %v3943_v55, %v3945_v48 }
 0x389   : > { %6150 = vst.msk [vmem:[#allocation2 + $0x299] sm:$0xff] %vm6066_vm2, %v6035_v62  ;;  %v1348_v37 = vmul.f32 %v13966_v13, %v933_v19  ;;  %v18805_v28 = vmul.f32 %v13969_v14, %v933_v19  ;;  %v4441_v3 = vadd.f32 %v4328_v27, %v4196_v42  ;;  %v5117_v58 = vadd.f32 %v4866_v33, %v4440_v22  ;;  %v938_v22 = vpop.permute.xlu0 %937 }
 0x38a   : > { %v5550_v57 = vsel %vm2163_vm1, %v5547_v25, %v5549_v59  ;;  %v4197_v23 = vadd.f32 %v3946_v20, %v3511_v4  ;;  %v2725_v15 = vmul.f32 %v13999_v35, %v933_v19  ;;  %v2954_v53 = vmul.f32 %v14008_v40, %v933_v19 }
 0x38b   : > { %v1666_v49 = vrot.slane %v1348_v37, 1  ;;  %v18811_v7 = vmul.f32 %v14011_v41, %v933_v19  ;;  %v5803_v63 = vadd.f32 %v5550_v57, %v5117_v58  ;;  %v18814_v55 = vmul.f32 %v13989_v31, %v933_v19 }
 0x38c   : > { %v21322_v39 = vrot.slane %v18805_v28, 2  ;;  %v4558_v51 = vmul.f32 %v14020_v47, %v933_v19  ;;  %v18821_v1 = vadd.f32 %v2725_v15, %v2593_v6  ;;  %v4329_v42 = vmul.f32 %v14017_v46, %v933_v19 }
 0x38d   : > { %v18819_v25 = vsel %vm1478_vm0, %v1664_v43, %v1666_v49  ;;  %v5240_v27 = vmul.f32 %v18689_v60, %v933_v19  ;;  %v5923_v32 = vadd.f32 %v18173_v30, %v5803_v63  ;;  %v3267_v34 = vrot.slane %v2954_v53, 1 }
 0x38e   : > { %v21321_v62 = vrot.slane %v18811_v7, 2  ;;  %v4867_v56 = vrot.slane %v4558_v51, 1  ;;  %v4442_v4 = vadd.f32 %v4329_v42, %v4197_v23  ;;  %v1349_v20 = vmul.f32 %v13966_v13, %v938_v22 }
 0x38f   : > { %v5551_v33 = vrot.slane %v5240_v27, 2  ;;  %v1907_v43 = vadd.f32 %v18729_v54, %v18669_v0  ;;  %v6036_v37 = vmax.f32 %v5923_v32, 0.0  ;;  %v18832_v58 = vmul.f32 %v13989_v31, %v938_v22 }
 0x390   : > { %v4868_v6 = vsel %vm1478_vm0, %v4865_v52, %v4867_v56  ;;  %v18835_v19 = vmul.f32 %v13969_v14, %v938_v22  ;;  %v1668_v53 = vrot.slane %v1349_v20, 1  ;;  %v2348_v23 = vsel %vm2163_vm1, %v2345_v5, %v2347_v9 }
 0x391   : > { %v5118_v57 = vadd.f32 %v4868_v6, %v4441_v3  ;;  %v5552_v15 = vsel %vm2163_vm1, %v5549_v59, %v5551_v33  ;;  %6151 = vst.msk [vmem:[#allocation2 + $0x2a1] sm:$0xff] %vm6066_vm2, %v6036_v37  ;;  %v2594_v0 = vadd.f32 %v2348_v23, %v1907_v43  ;;  %v2726_v54 = vmul.f32 %v13999_v35, %v938_v22  ;;  %v943_v43 = vpop.permute.xlu1 %942 }
 0x392   : > { %v2955_v52 = vmul.f32 %v14008_v40, %v938_v22  ;;  %v3512_v63 = vadd.f32 %v18751_v10, %v18692_v24  ;;  %v18849_v3 = vsel %vm1478_vm0, %v3265_v61, %v3267_v34  ;;  %v18852_v51 = vmul.f32 %v14011_v41, %v938_v22 }
 0x393   : > { %v5804_v59 = vadd.f32 %v5552_v15, %v5118_v57  ;;  %v3948_v8 = vsel %vm2163_vm1, %v3945_v48, %v3947_v26  ;;  %v4330_v32 = vmul.f32 %v14017_v46, %v938_v22  ;;  %v18863_v10 = vsel %vm1478_vm0, %v1666_v49, %v1668_v53 }
 0x394   : > { %v3269_v42 = vrot.slane %v2955_v52, 1  ;;  %v4198_v27 = vadd.f32 %v3948_v8, %v3512_v63  ;;  %v4559_v61 = vmul.f32 %v14020_v47, %v938_v22  ;;  %v5241_v20 = vmul.f32 %v18689_v60, %v938_v22 }
 0x395   : > { %v5924_v24 = vadd.f32 %v18173_v30, %v5804_v59  ;;  %v18867_v37 = vadd.f32 %v2726_v54, %v2594_v0  ;;  %v1908_v48 = vadd.f32 %v18765_v21, %v18716_v11  ;;  %v2350_v30 = vsel %vm2163_vm1, %v2347_v9, %v2349_v2  ;;  %v948_v59 = vpop.permute.xlu0 %947 }
 0x396   : > { %v4869_v6 = vrot.slane %v4559_v61, 1  ;;  %v5553_v57 = vrot.slane %v5241_v20, 2  ;;  %v3513_v22 = vadd.f32 %v18792_v45, %v18733_v36  ;;  %v18880_v15 = vsel %vm1478_vm0, %v3267_v34, %v3269_v42 }
 0x397   : > { %v6037_v49 = vmax.f32 %v5924_v24, 0.0  ;;  %v4443_v23 = vadd.f32 %v4330_v32, %v4198_v27  ;;  %v2595_v0 = vadd.f32 %v2350_v30, %v1908_v48  ;;  %v18883_v54 = vmul.f32 %v13966_v13, %v943_v43  ;;  %v18925_v48 = vld [vmem:[%s21262_s2] ss:$0 sm:$0xff] }
 0x398   : > { %v4870_v11 = vsel %vm1478_vm0, %v4867_v56, %v4869_v6  ;;  %v3950_v44 = vsel %vm2163_vm1, %v3947_v26, %v3949_v12  ;;  %v18893_v9 = vmul.f32 %v13989_v31, %v943_v43  ;;  %v18896_v36 = vmul.f32 %v13969_v14, %v943_v43 }
 0x399   : > { %6152 = vst.msk [vmem:[#allocation2 + $0x2a9] sm:$0xff] %vm6066_vm2, %v6037_v49  ;;  %v5119_v21 = vadd.f32 %v4870_v11, %v4442_v4  ;;  %v4199_v45 = vadd.f32 %v3950_v44, %v3513_v22  ;;  %v1670_v34 = vrot.slane %v18883_v54, 1  ;;  %v18900_v52 = vmul.f32 %v14008_v40, %v943_v43 }
 0x39a   : > { %v5554_v56 = vsel %vm2163_vm1, %v5551_v33, %v5553_v57  ;;  %v2727_v63 = vmul.f32 %v13999_v35, %v943_v43  ;;  %v18905_v38 = vmul.f32 %v14011_v41, %v943_v43  ;;  %v18908_v26 = vmul.f32 %v14020_v47, %v943_v43 }
 0x39b   : > { %v5805_v8 = vadd.f32 %v5554_v56, %v5119_v21  ;;  %v3271_v27 = vrot.slane %v18900_v52, 1  ;;  %v4331_v32 = vmul.f32 %v14017_v46, %v943_v43  ;;  %v18914_v24 = vsel %vm1478_vm0, %v1668_v53, %v1670_v34 }
 0x39c   : > { %v18916_v33 = vadd.f32 %v2727_v63, %v2595_v0  ;;  %v4871_v61 = vrot.slane %v18908_v26, 1  ;;  %v18920_v20 = vmul.f32 %v18689_v60, %v943_v43  ;;  %v18930_v53 = vmul.f32 %v13966_v13, %v948_v59 }
 0x39d   : > { %v5925_v30 = vadd.f32 %v18925_v48, %v5805_v8  ;;  %v4444_v22 = vadd.f32 %v4331_v32, %v4199_v45  ;;  %v1909_v43 = vadd.f32 %v18819_v25, %v18757_v18  ;;  %v18937_v11 = vmul.f32 %v13969_v14, %v948_v59  ;;  %v6279_v25 = vld [vmem:[#allocation2 + $0x200] ss:$2 sm:$0xff]  ;;  %v6393_v8 = vld [vmem:[#allocation2 + $0x211] ss:$2 sm:$0xff] }
 0x39e   : > { %v4872_v0 = vsel %vm1478_vm0, %v4869_v6, %v4871_v61  ;;  %v5555_v54 = vrot.slane %v18920_v20, 2  ;;  %v18940_v21 = vsel %vm1478_vm0, %v3269_v42, %v3271_v27  ;;  %v2352_v45 = vsel %vm2163_vm1, %v2349_v2, %v21322_v39  ;;  %v6281_v2 = vld [vmem:[#allocation2 + $0x210] ss:$2 sm:$0xff]  ;;  %v6397_v32 = vld [vmem:[#allocation2 + $0x231] ss:$2 sm:$0xff] }
 0x39f   : > { %v6038_v44 = vmax.f32 %v5925_v30, 0.0  ;;  %v5120_v52 = vadd.f32 %v4872_v0, %v4443_v23  ;;  %v1672_v56 = vrot.slane %v18930_v53, 1  ;;  %v2596_v63 = vadd.f32 %v2352_v45, %v1909_v43  ;;  %v6283_v43 = vld [vmem:[#allocation2 + $0x220] ss:$2 sm:$0xff] }
 0x3a0   : > { %v5556_v6 = vsel %vm2163_vm1, %v5553_v57, %v5555_v54  ;;  %v2728_v18 = vmul.f32 %v13999_v35, %v948_v59  ;;  %v18952_v42 = vmul.f32 %v13989_v31, %v948_v59  ;;  %v18955_v23 = vmul.f32 %v14008_v40, %v948_v59  ;;  %v6391_v57 = vld [vmem:[#allocation2 + $0x201] ss:$2 sm:$0xff] }
 0x3a1   : > { %6153 = vst.msk [vmem:[#allocation2 + $0x2b1] sm:$0xff] %vm6066_vm2, %v6038_v44  ;;  %v5806_v26 = vadd.f32 %v5556_v6, %v5120_v52  ;;  %v3514_v17 = vadd.f32 %v18849_v3, %v18768_v50  ;;  %v18961_v20 = vmul.f32 %v14011_v41, %v948_v59  ;;  %v3952_v30 = vsel %vm2163_vm1, %v3949_v12, %v21321_v62  ;;  %v6395_v44 = vld [vmem:[#allocation2 + $0x221] ss:$2 sm:$0xff]  ;;  %v6285_v6 = vld [vmem:[#allocation2 + $0x230] ss:$2 sm:$0xff] }
 0x3a2   : > { %v4332_v0 = vmul.f32 %v14017_v46, %v948_v59  ;;  %v3273_v3 = vrot.slane %v18955_v23, 1  ;;  %v4561_v45 = vmul.f32 %v14020_v47, %v948_v59  ;;  %v18975_v49 = vsel %vm1478_vm0, %v1670_v34, %v1672_v56  ;;  %v953_v34 = vpop.permute.xlu1 %952 }
 0x3a3   : > { %v5926_v50 = vadd.f32 %v18925_v48, %v5806_v26  ;;  %v4200_v52 = vadd.f32 %v3952_v30, %v3514_v17  ;;  %v18977_v16 = vadd.f32 %v2728_v18, %v2596_v63  ;;  %v3957_v12 = vrot.slane %v18961_v20, 2 }
 0x3a4   : > { %v18981_v4 = vmul.f32 %v18689_v60, %v948_v59  ;;  %v4873_v62 = vrot.slane %v4561_v45, 1  ;;  %v6470_v23 = vmax.f32 %v6279_v25, %v6391_v57  ;;  %v6471_v17 = vmax.f32 %v6281_v2, %v6393_v8 }
 0x3a5   : > { %v6039_v26 = vmax.f32 %v5926_v50, 0.0  ;;  %v6472_v29 = vmax.f32 %v6283_v43, %v6395_v44  ;;  %v6473_v39 = vmax.f32 %v6285_v6, %v6397_v32  ;;  %v1910_v5 = vadd.f32 %v18863_v10, %v18814_v55  ;;  %v958_v6 = vpop.permute.xlu0 %957 }
 0x3a6   : > { %v5557_v30 = vrot.slane %v18981_v4, 2  ;;  %v18988_v63 = vsel %vm1478_vm0, %v3271_v27, %v3273_v3  ;;  %v4445_v18 = vadd.f32 %v4332_v0, %v4200_v52  ;;  %v4874_v59 = vsel %vm1478_vm0, %v4871_v61, %v4873_v62 }
 0x3a7   : > { %6154 = vst.msk [vmem:[#allocation2 + $0x2b9] sm:$0xff] %vm6066_vm2, %v6039_v26  ;;  %v3515_v25 = vadd.f32 %v18880_v15, %v18821_v1  ;;  %v5121_v2 = vadd.f32 %v4874_v59, %v4444_v22  ;;  %v6527_v57 = vmax.f32 %v6470_v23, %v6472_v29  ;;  %v6528_v4 = vmax.f32 %v6471_v17, %v6473_v39 }
 0x3a8   : > { %v21553_v8 = vrot.slane %v18835_v19, 2  ;;  %v21554_v32 = vrot.slane %v18805_v28, 2  ;;  %v5558_v10 = vsel %vm2163_vm1, %v5555_v54, %v5557_v30  ;;  %v21555_v27 = vrot.slane %v18852_v51, 2 }
 0x3a9   : > { %v21556_v0 = vrot.slane %v18811_v7, 2  ;;  %v1352_v1 = vmul.f32 %v13966_v13, %v953_v34  ;;  %v5807_v15 = vadd.f32 %v5558_v10, %v5121_v2  ;;  %6529 = vst.msk [vmem:[#allocation3 + $0xa0] sm:$0xff] %vm6066_vm2, %v6527_v57  ;;  %v19008_v28 = vmul.f32 %v13969_v14, %v953_v34 }
 0x3aa   : > { %v2354_v55 = vsel %vm2163_vm1, %v21554_v32, %v21553_v8  ;;  %6530 = vst.msk [vmem:[#allocation3 + $0xa8] sm:$0x3f] %vm6497_vm4, %v6528_v4  ;;  %v19011_v29 = vmul.f32 %v14008_v40, %v953_v34  ;;  %v2729_v22 = vmul.f32 %v13999_v35, %v953_v34  ;;  %v19015_v7 = vmul.f32 %v14011_v41, %v953_v34 }
 0x3ab   : > { %v2597_v43 = vadd.f32 %v2354_v55, %v1910_v5  ;;  %v3954_v61 = vsel %vm2163_vm1, %v21556_v0, %v21555_v27  ;;  %v1674_v5 = vrot.slane %v1352_v1, 1  ;;  %v19018_v54 = vmul.f32 %v14020_v47, %v953_v34 }
 0x3ac   : > { %v4201_v39 = vadd.f32 %v3954_v61, %v3515_v25  ;;  %v5927_v44 = vadd.f32 %v18925_v48, %v5807_v15  ;;  %v19022_v50 = vmul.f32 %v13989_v31, %v953_v34  ;;  %v3275_v52 = vrot.slane %v19011_v29, 1 }
 0x3ad   : > { %v4333_v45 = vmul.f32 %v14017_v46, %v953_v34  ;;  %v19029_v26 = vsel %vm1478_vm0, %v1672_v56, %v1674_v5  ;;  %v2359_v23 = vrot.slane %v19008_v28, 2  ;;  %v19032_v17 = vadd.f32 %v2729_v22, %v2597_v43 }
 0x3ae   : > { %v4875_v59 = vrot.slane %v19018_v54, 1  ;;  %v6040_v25 = vmax.f32 %v5927_v44, 0.0  ;;  %v3959_v2 = vrot.slane %v19015_v7, 2  ;;  %v5244_v4 = vmul.f32 %v18689_v60, %v953_v34 }
 0x3af   : > { %v4446_v57 = vadd.f32 %v4333_v45, %v4201_v39  ;;  %v19039_v32 = vmul.f32 %v13966_v13, %v958_v6  ;;  %v1911_v53 = vadd.f32 %v18914_v24, %v18832_v58  ;;  %v19044_v56 = vmul.f32 %v13969_v14, %v958_v6 }
 0x3b0   : > { %v4876_v8 = vsel %vm1478_vm0, %v4873_v62, %v4875_v59  ;;  %6155 = vst.msk [vmem:[#allocation2 + $0x2c1] sm:$0xff] %vm6066_vm2, %v6040_v25  ;;  %v19048_v55 = vsel %vm1478_vm0, %v3273_v3, %v3275_v52  ;;  %v5559_v43 = vrot.slane %v5244_v4, 2  ;;  %v21557_v34 = vrot.slane %v18896_v36, 2  ;;  %v6615_v0 = vld [vmem:[#allocation3 + $0xa0] sm:$0xff] }
 0x3b1   : > { %v5122_v10 = vadd.f32 %v4876_v8, %v4445_v18  ;;  %v21558_v62 = vrot.slane %v18835_v19, 2  ;;  %v6616_v61 = vld [vmem:[#allocation3 + $0xa8] sm:$0xff]  ;;  %v1676_v58 = vrot.slane %v19039_v32, 1  ;;  %v2730_v1 = vmul.f32 %v13999_v35, %v958_v6  ;;  %v6569_v39 = vld [vmem:[#allocation3 + $0x9f] sm:$0xff] }
 0x3b2   : > { %v19058_v15 = vmul.f32 %v14008_v40, %v958_v6  ;;  %v6634_v3 = vpack.c.bf16 %v6616_v61, %v6615_v0  ;;  %v6570_v18 = vld [vmem:[#allocation3 + $0xa7] sm:$0xff]  ;;  %v5560_v29 = vsel %vm2163_vm1, %v5557_v30, %v5559_v43  ;;  %v3516_v19 = vadd.f32 %v18940_v21, %v18867_v37 }
 0x3b3   : > { %v2356_v27 = vsel %vm2163_vm1, %v21558_v62, %v21557_v34  ;;  %v19064_v22 = vmul.f32 %v14011_v41, %v958_v6  ;;  %v6588_v54 = vpack.c.bf16 %v6570_v18, %v6569_v39  ;;  %v5808_v44 = vadd.f32 %v5560_v29, %v5122_v10  ;;  %v963_v62 = vpop.permute.xlu1 %962 }
 0x3b4   : > { %v2598_v24 = vadd.f32 %v2356_v27, %v1911_v53  ;;  %v19067_v45 = vmul.f32 %v13989_v31, %v958_v6  ;;  %v2361_v25 = vrot.slane %v19044_v56, 2  ;;  %12884 = vmatmul.mubr.msk.bf16.gmra.mrb[12].mxu1 %vm6066_vm2, %v6634_v3  ;;  %v19072_v4 = vsel %vm1478_vm0, %v1674_v5, %v1676_v58 }
 0x3b5   : > { %v3277_v30 = vrot.slane %v19058_v15, 1  ;;  %v21559_v8 = vrot.slane %v18905_v38, 2  ;;  %v21560_v37 = vrot.slane %v18852_v51, 2  ;;  %v4334_v32 = vmul.f32 %v14017_v46, %v958_v6  ;;  %12916 = vmatmul.mubr.msk.bf16.gmra.mrb[16].mxu0 %vm6066_vm2, %v6588_v54 }
 0x3b6   : > { %v5928_v53 = vadd.f32 %v18925_v48, %v5808_v44  ;;  %v4563_v34 = vmul.f32 %v14020_v47, %v958_v6  ;;  %v5245_v5 = vmul.f32 %v18689_v60, %v958_v6  ;;  %v19085_v27 = vadd.f32 %v2730_v1, %v2598_v24 }
 0x3b7   : > { %v3956_v21 = vsel %vm2163_vm1, %v21560_v37, %v21559_v8  ;;  %v3961_v0 = vrot.slane %v19064_v22, 2  ;;  %v1912_v51 = vadd.f32 %v18975_v49, %v18893_v9  ;;  %v3517_v61 = vadd.f32 %v18988_v63, %v18916_v33 }
 0x3b8   : > { %v4202_v10 = vadd.f32 %v3956_v21, %v3516_v19  ;;  %v6041_v15 = vmax.f32 %v5928_v53, 0.0  ;;  %v4877_v3 = vrot.slane %v4563_v34, 1  ;;  %v5561_v39 = vrot.slane %v5245_v5, 2  ;;  %v968_v53 = vpop.permute.xlu0 %967 }
 0x3b9   : > { %v21561_v18 = vrot.slane %v18937_v11, 2  ;;  %v21562_v29 = vrot.slane %v18896_v36, 2  ;;  %v19098_v24 = vsel %vm1478_vm0, %v3275_v52, %v3277_v30  ;;  %v1354_v54 = vmul.f32 %v13966_v13, %v963_v62 }
 0x3ba   : > { %v4447_v1 = vadd.f32 %v4334_v32, %v4202_v10  ;;  %6156 = vst.msk [vmem:[#allocation2 + $0x2c9] sm:$0xff] %vm6066_vm2, %v6041_v15  ;;  %v4878_v9 = vsel %vm1478_vm0, %v4875_v59, %v4877_v3  ;;  %v21563_v33 = vmov %v21559_v8  ;;  %v19109_v36 = vmul.f32 %v13989_v31, %v963_v62 }
 0x3bb   : > { %v2358_v6 = vsel %vm2163_vm1, %v21562_v29, %v21561_v18  ;;  %v3958_v49 = vsel %vm2163_vm1, %v21563_v33, %v3957_v12  ;;  %v19112_v63 = vmul.f32 %v13969_v14, %v963_v62  ;;  %v5123_v52 = vadd.f32 %v4878_v9, %v4446_v57 }
 0x3bc   : > { %v2599_v19 = vadd.f32 %v2358_v6, %v1912_v51  ;;  %v4203_v44 = vadd.f32 %v3958_v49, %v3517_v61  ;;  %v1678_v8 = vrot.slane %v1354_v54, 1  ;;  %v2960_v37 = vmul.f32 %v14008_v40, %v963_v62 }
 0x3bd   : > { %v5562_v21 = vsel %vm2163_vm1, %v5559_v43, %v5561_v39  ;;  %v2731_v59 = vmul.f32 %v13999_v35, %v963_v62  ;;  %v19118_v32 = vmul.f32 %v14011_v41, %v963_v62  ;;  %v4564_v38 = vmul.f32 %v14020_v47, %v963_v62 }
 0x3be   : > { %v5809_v10 = vadd.f32 %v5562_v21, %v5123_v52  ;;  %v19122_v34 = vsel %vm1478_vm0, %v1676_v58, %v1678_v8  ;;  %v2363_v57 = vrot.slane %v19112_v63, 2  ;;  %v4335_v5 = vmul.f32 %v14017_v46, %v963_v62 }
 0x3bf   : > { %v19126_v51 = vadd.f32 %v2731_v59, %v2599_v19  ;;  %v3279_v61 = vrot.slane %v2960_v37, 1  ;;  %v4879_v43 = vrot.slane %v4564_v38, 1  ;;  %v5246_v15 = vmul.f32 %v18689_v60, %v963_v62 }
 0x3c0   : > { %v5929_v18 = vadd.f32 %v18925_v48, %v5809_v10  ;;  %v3963_v29 = vrot.slane %v19118_v32, 2  ;;  %v4448_v6 = vadd.f32 %v4335_v5, %v4203_v44  ;;  %v1355_v54 = vmul.f32 %v13966_v13, %v968_v53 }
 0x3c1   : > { %v4880_v58 = vsel %vm1478_vm0, %v4877_v3, %v4879_v43  ;;  %v5563_v9 = vrot.slane %v5246_v15, 2  ;;  %v1913_v33 = vadd.f32 %v19029_v26, %v18952_v42  ;;  %v19136_v19 = vmul.f32 %v13969_v14, %v968_v53 }
 0x3c2   : > { %v6042_v49 = vmax.f32 %v5929_v18, 0.0  ;;  %v5124_v52 = vadd.f32 %v4880_v58, %v4447_v1  ;;  %v1680_v37 = vrot.slane %v1355_v54, 1  ;;  %v21564_v62 = vrot.slane %v18937_v11, 2 }
 0x3c3   : > { %v19144_v21 = vsel %vm1478_vm0, %v3277_v30, %v3279_v61  ;;  %v5564_v3 = vsel %vm2163_vm1, %v5561_v39, %v5563_v9  ;;  %v2732_v42 = vmul.f32 %v13999_v35, %v968_v53  ;;  %v19150_v1 = vmul.f32 %v13989_v31, %v968_v53 }
 0x3c4   : > { %v2360_v44 = vsel %vm2163_vm1, %v21564_v62, %v2359_v23  ;;  %6157 = vst.msk [vmem:[#allocation2 + $0x2d1] sm:$0xff] %vm6066_vm2, %v6042_v49  ;;  %v5810_v26 = vadd.f32 %v5564_v3, %v5124_v52  ;;  %v19153_v38 = vmul.f32 %v14008_v40, %v968_v53  ;;  %v3518_v11 = vadd.f32 %v19048_v55, %v18977_v16  ;;  %v973_v49 = vpop.permute.xlu1 %972 }
 0x3c5   : > { %v2600_v59 = vadd.f32 %v2360_v44, %v1913_v33  ;;  %v19158_v30 = vsel %vm1478_vm0, %v1678_v8, %v1680_v37  ;;  %v2365_v39 = vrot.slane %v19136_v19, 2  ;;  %v19164_v5 = vmul.f32 %v14011_v41, %v968_v53 }
 0x3c6   : > { %v5930_v15 = vadd.f32 %v18925_v48, %v5810_v26  ;;  %v3281_v18 = vrot.slane %v19153_v38, 1  ;;  %v3960_v16 = vsel %vm2163_vm1, %v3957_v12, %v3959_v2  ;;  %v4565_v55 = vmul.f32 %v14020_v47, %v968_v53 }
 0x3c7   : > { %v19161_v10 = vadd.f32 %v2732_v42, %v2600_v59  ;;  %v4204_v8 = vadd.f32 %v3960_v16, %v3518_v11  ;;  %v4336_v54 = vmul.f32 %v14017_v46, %v968_v53  ;;  %v5247_v58 = vmul.f32 %v18689_v60, %v968_v53 }
 0x3c8   : > { %v1914_v33 = vadd.f32 %v19072_v4, %v19022_v50  ;;  %v6043_v52 = vmax.f32 %v5930_v15, 0.0  ;;  %v3965_v62 = vrot.slane %v19164_v5, 2  ;;  %v4881_v44 = vrot.slane %v4565_v55, 1 }
 0x3c9   : > { %v2362_v20 = vsel %vm2163_vm1, %v2359_v23, %v2361_v25  ;;  %v19187_v12 = vsel %vm1478_vm0, %v3279_v61, %v3281_v18  ;;  %v5565_v53 = vrot.slane %v5247_v58, 2  ;;  %v3519_v50 = vadd.f32 %v19098_v24, %v19032_v17 }
 0x3ca   : > { %v2601_v3 = vadd.f32 %v2362_v20, %v1914_v33  ;;  %6158 = vst.msk [vmem:[#allocation2 + $0x2d9] sm:$0xff] %vm6066_vm2, %v6043_v52  ;;  %v4882_v4 = vsel %vm1478_vm0, %v4879_v43, %v4881_v44  ;;  %v3962_v28 = vsel %vm2163_vm1, %v3959_v2, %v3961_v0  ;;  %v1356_v23 = vmul.f32 %v13966_v13, %v973_v49 }
 0x3cb   : > { %v19200_v61 = vmul.f32 %v13969_v14, %v973_v49  ;;  %v4449_v59 = vadd.f32 %v4336_v54, %v4204_v8  ;;  %v5125_v42 = vadd.f32 %v4882_v4, %v4448_v6  ;;  %v5566_v26 = vsel %vm2163_vm1, %v5563_v9, %v5565_v53  ;;  %v978_v6 = vpop.permute.xlu0 %977  ;;  %v13462_v4 = vld [vmem:[%s21263_s3 + $0x28] sm:$0xff]  }
 0x3cc   : > { %v4205_v17 = vadd.f32 %v3962_v28, %v3519_v50  ;;  %v1682_v24 = vrot.slane %v1356_v23, 1  ;;  %v2733_v11 = vmul.f32 %v13999_v35, %v973_v49  ;;  %v2962_v43 = vmul.f32 %v14008_v40, %v973_v49  ;;  %12929 = vmatprep.subr.bf16.mxu0 %v13462_v4 }
 0x3cd   : > { %v19206_v15 = vmul.f32 %v14011_v41, %v973_v49  ;;  %v5811_v7 = vadd.f32 %v5566_v26, %v5125_v42  ;;  %v19209_v2 = vmul.f32 %v13989_v31, %v973_v49  ;;  %v21324_v16 = vrot.slane %v19200_v61, 2  ;;  %12930 = vmatpush3.bf16.msra.mxu0 %v13462_v4 }
 0x3ce   : > { %v4566_v55 = vmul.f32 %v14020_v47, %v973_v49  ;;  %v19214_v9 = vsel %vm1478_vm0, %v1680_v37, %v1682_v24  ;;  %v19216_v8 = vadd.f32 %v2733_v11, %v2601_v3  ;;  %v4337_v54 = vmul.f32 %v14017_v46, %v973_v49 }
 0x3cf   : > { %v19220_v58 = vmul.f32 %v18689_v60, %v973_v49  ;;  %v5931_v33 = vadd.f32 %v18925_v48, %v5811_v7  ;;  %v3283_v52 = vrot.slane %v2962_v43, 1  ;;  %v21325_v20 = vrot.slane %v19206_v15, 2 }
 0x3d0   : > { %v4883_v50 = vrot.slane %v4566_v55, 1  ;;  %v4450_v28 = vadd.f32 %v4337_v54, %v4205_v17  ;;  %v19229_v3 = vmul.f32 %v13966_v13, %v978_v6  ;;  %v1915_v49 = vadd.f32 %v19122_v34, %v19067_v45 }
 0x3d1   : > { %v5567_v37 = vrot.slane %v19220_v58, 2  ;;  %v6044_v23 = vmax.f32 %v5931_v33, 0.0  ;;  %v19235_v26 = vmul.f32 %v13989_v31, %v978_v6  ;;  %v19238_v11 = vmul.f32 %v13969_v14, %v978_v6 }
 0x3d2   : > { %v4884_v42 = vsel %vm1478_vm0, %v4881_v44, %v4883_v50  ;;  %v1684_v7 = vrot.slane %v19229_v3, 1  ;;  %v2364_v45 = vsel %vm2163_vm1, %v2361_v25, %v2363_v57  ;;  %v2734_v44 = vmul.f32 %v13999_v35, %v978_v6 }
 0x3d3   : > { %v5126_v43 = vadd.f32 %v4884_v42, %v4449_v59  ;;  %v5568_v17 = vsel %vm2163_vm1, %v5565_v53, %v5567_v37  ;;  %6159 = vst.msk [vmem:[#allocation2 + $0x2e1] sm:$0xff] %vm6066_vm2, %v6044_v23  ;;  %v2602_v34 = vadd.f32 %v2364_v45, %v1915_v49  ;;  %v2963_v55 = vmul.f32 %v14008_v40, %v978_v6  ;;  %v983_v49 = vpop.permute.xlu1 %982 }
 0x3d4   : > { %v3520_v59 = vadd.f32 %v19144_v21, %v19085_v27  ;;  %v19255_v53 = vsel %vm1478_vm0, %v3281_v18, %v3283_v52  ;;  %v19258_v56 = vmul.f32 %v14011_v41, %v978_v6  ;;  %v3964_v25 = vsel %vm2163_vm1, %v3961_v0, %v3963_v29 }
 0x3d5   : > { %v5812_v54 = vadd.f32 %v5568_v17, %v5126_v43  ;;  %v3285_v33 = vrot.slane %v2963_v55, 1  ;;  %v4338_v27 = vmul.f32 %v14017_v46, %v978_v6  ;;  %v19269_v38 = vsel %vm1478_vm0, %v1682_v24, %v1684_v7 }
 0x3d6   : > { %v4206_v4 = vadd.f32 %v3964_v25, %v3520_v59  ;;  %v4567_v18 = vmul.f32 %v14020_v47, %v978_v6  ;;  %v5249_v3 = vmul.f32 %v18689_v60, %v978_v6  ;;  %v19273_v23 = vadd.f32 %v2734_v44, %v2602_v34 }
 0x3d7   : > { %v5932_v21 = vadd.f32 %v18925_v48, %v5812_v54  ;;  %v1916_v0 = vadd.f32 %v19158_v30, %v19109_v36  ;;  %v2366_v42 = vsel %vm2163_vm1, %v2363_v57, %v2365_v39  ;;  %v3521_v6 = vadd.f32 %v19187_v12, %v19126_v51  ;;  %v13463_v36 = vld [vmem:[%s21263_s3 + $0x30] sm:$0xff]  }
 0x3d8   : > { %v4885_v43 = vrot.slane %v4567_v18, 1  ;;  %v5569_v17 = vrot.slane %v5249_v3, 2  ;;  %v19286_v45 = vsel %vm1478_vm0, %v3283_v52, %v3285_v33  ;;  %v4451_v34 = vadd.f32 %v4338_v27, %v4206_v4  ;;  %12959 = vmatprep.subr.bf16.mxu0 %v13463_v36  ;;  %v988_v4 = vpop.permute.xlu0 %987 }
 0x3d9   : > { %v6045_v24 = vmax.f32 %v5932_v21, 0.0  ;;  %v2603_v44 = vadd.f32 %v2366_v42, %v1916_v0  ;;  %v19289_v55 = vmul.f32 %v13966_v13, %v983_v49  ;;  %v3966_v57 = vsel %vm2163_vm1, %v3963_v29, %v3965_v62 }
 0x3da   : > { %v4886_v63 = vsel %vm1478_vm0, %v4883_v50, %v4885_v43  ;;  %v19302_v51 = vmul.f32 %v13989_v31, %v983_v49  ;;  %v19305_v30 = vmul.f32 %v13969_v14, %v983_v49  ;;  %v4207_v52 = vadd.f32 %v3966_v57, %v3521_v6 }
 0x3db   : > { %6160 = vst.msk [vmem:[#allocation2 + $0x2e9] sm:$0xff] %vm6066_vm2, %v6045_v24  ;;  %v5127_v12 = vadd.f32 %v4886_v63, %v4450_v28  ;;  %v21323_v59 = vrot.slane %v19289_v55, 1  ;;  %v19309_v54 = vmul.f32 %v14008_v40, %v983_v49  ;;  %v5570_v50 = vsel %vm2163_vm1, %v5567_v37, %v5569_v17 }
 0x3dc   : > { %v2735_v32 = vmul.f32 %v13999_v35, %v983_v49  ;;  %v19314_v29 = vmul.f32 %v14011_v41, %v983_v49  ;;  %v4568_v25 = vmul.f32 %v14020_v47, %v983_v49  ;;  %v4339_v18 = vmul.f32 %v14017_v46, %v983_v49 }
 0x3dd   : > { %v5813_v27 = vadd.f32 %v5570_v50, %v5127_v12  ;;  %v3287_v21 = vrot.slane %v19309_v54, 1  ;;  %v19323_v3 = vsel %vm1478_vm0, %v1684_v7, %v21323_v59  ;;  %v5250_v42 = vmul.f32 %v18689_v60, %v983_v49  ;;  %v6293_v59 = vld [vmem:[#allocation2 + $0x270] ss:$2 sm:$0xff] }
 0x3de   : > { %v19325_v37 = vadd.f32 %v2735_v32, %v2603_v44  ;;  %v4887_v0 = vrot.slane %v4568_v25, 1  ;;  %v4452_v36 = vadd.f32 %v4339_v18, %v4207_v52  ;;  %v19331_v63 = vmul.f32 %v13966_v13, %v988_v4  ;;  %v6287_v25 = vld [vmem:[#allocation2 + $0x240] ss:$2 sm:$0xff]  ;;  %v6401_v18 = vld [vmem:[#allocation2 + $0x251] ss:$2 sm:$0xff] }
 0x3df   : > { %v5933_v24 = vadd.f32 %v18925_v48, %v5813_v27  ;;  %v5571_v12 = vrot.slane %v5250_v42, 2  ;;  %v1917_v7 = vadd.f32 %v19214_v9, %v19150_v1  ;;  %v19337_v44 = vmul.f32 %v13969_v14, %v988_v4  ;;  %v6399_v27 = vld [vmem:[#allocation2 + $0x241] ss:$2 sm:$0xff] }
 0x3e0   : > { %v4888_v57 = vsel %vm1478_vm0, %v4885_v43, %v4887_v0  ;;  %v19340_v49 = vsel %vm1478_vm0, %v3285_v33, %v3287_v21  ;;  %v2368_v52 = vsel %vm2163_vm1, %v2365_v39, %v21324_v16  ;;  %v19349_v32 = vmul.f32 %v13989_v31, %v988_v4 }
 0x3e1   : > { %v6046_v54 = vmax.f32 %v5933_v24, 0.0  ;;  %v5128_v50 = vadd.f32 %v4888_v57, %v4451_v34  ;;  %v5572_v43 = vsel %vm2163_vm1, %v5569_v17, %v5571_v12  ;;  %v2604_v1 = vadd.f32 %v2368_v52, %v1917_v7  ;;  %v6289_v17 = vld [vmem:[#allocation2 + $0x250] ss:$2 sm:$0xff]  ;;  %v6405_v24 = vld [vmem:[#allocation2 + $0x271] ss:$2 sm:$0xff] }
 0x3e2   : > { %v2736_v9 = vmul.f32 %v13999_v35, %v988_v4  ;;  %v19354_v34 = vmul.f32 %v14008_v40, %v988_v4  ;;  %v3522_v19 = vadd.f32 %v19255_v53, %v19161_v10  ;;  %v19359_v39 = vmul.f32 %v14011_v41, %v988_v4 }
 0x3e3   : > { %6161 = vst.msk [vmem:[#allocation2 + $0x2f1] sm:$0xff] %vm6066_vm2, %v6046_v54  ;;  %v5814_v33 = vadd.f32 %v5572_v43, %v5128_v50  ;;  %v4569_v7 = vmul.f32 %v14020_v47, %v988_v4  ;;  %v6291_v54 = vld [vmem:[#allocation2 + $0x260] ss:$2 sm:$0xff]  ;;  %v6403_v50 = vld [vmem:[#allocation2 + $0x261] ss:$2 sm:$0xff]  ;;  %v3968_v53 = vsel %vm2163_vm1, %v3965_v62, %v21325_v20  ;;  %v4340_v43 = vmul.f32 %v14017_v46, %v988_v4  ;;  %v993_v20 = vpop.permute.xlu1 %992 }
 0x3e4   : > { %v19363_v57 = vadd.f32 %v2736_v9, %v2604_v1  ;;  %v3289_v10 = vrot.slane %v19354_v34, 1  ;;  %v4208_v9 = vadd.f32 %v3968_v53, %v3522_v19  ;;  %v5251_v6 = vmul.f32 %v18689_v60, %v988_v4  ;;  %v998_v53 = vpop.permute.xlu0 %997 }
 0x3e5   : > { %v5934_v52 = vadd.f32 %v18925_v48, %v5814_v33  ;;  %v4889_v42 = vrot.slane %v4569_v7, 1  ;;  %v6474_v33 = vmax.f32 %v6287_v25, %v6399_v27  ;;  %v6475_v22 = vmax.f32 %v6289_v17, %v6401_v18 }
 0x3e6   : > { %v6476_v34 = vmax.f32 %v6291_v54, %v6403_v50  ;;  %v5573_v58 = vrot.slane %v5251_v6, 2  ;;  %v6477_v5 = vmax.f32 %v6293_v59, %v6405_v24  ;;  %v1918_v62 = vadd.f32 %v19269_v38, %v19209_v2 }
 0x3e7   : > { %v6047_v28 = vmax.f32 %v5934_v52, 0.0  ;;  %v4890_v16 = vsel %vm1478_vm0, %v4887_v0, %v4889_v42  ;;  %v19381_v1 = vsel %vm1478_vm0, %v3287_v21, %v3289_v10  ;;  %v3523_v60 = vadd.f32 %v19286_v45, %v19216_v8 }
 0x3e8   : > { %v5129_v19 = vadd.f32 %v4890_v16, %v4452_v36  ;;  %v6531_v7 = vmax.f32 %v6474_v33, %v6476_v34  ;;  %v4453_v4 = vadd.f32 %v4340_v43, %v4208_v9  ;;  %v5574_v25 = vsel %vm2163_vm1, %v5571_v12, %v5573_v58  ;;  %v19425_v34 = vld [vmem:[%s21261_s1 + $0x8] ss:$0 sm:$0xff] }
 0x3e9   : > { %6162 = vst.msk [vmem:[#allocation2 + $0x2f9] sm:$0xff] %vm6066_vm2, %v6047_v28  ;;  %v6532_v0 = vmax.f32 %v6475_v22, %v6477_v5  ;;  %v21565_v59 = vrot.slane %v19238_v11, 2  ;;  %v21566_v6 = vrot.slane %v19200_v61, 2  ;;  %v21567_v16 = vrot.slane %v19258_v56, 2 }
 0x3ea   : > { %v5815_v38 = vadd.f32 %v5574_v25, %v5129_v19  ;;  %6533 = vst.msk [vmem:[#allocation3 + $0xb0] sm:$0xff] %vm6066_vm2, %v6531_v7  ;;  %v21568_v21 = vrot.slane %v19206_v15, 2  ;;  %v19398_v45 = vmul.f32 %v13966_v13, %v993_v20  ;;  %v19402_v61 = vmul.f32 %v13969_v14, %v993_v20 }
 0x3eb   : > { %v2370_v2 = vsel %vm2163_vm1, %v21566_v6, %v21565_v59  ;;  %6534 = vst.msk [vmem:[#allocation3 + $0xb8] sm:$0x3f] %vm6497_vm4, %v6532_v0  ;;  %v2966_v36 = vmul.f32 %v14008_v40, %v993_v20  ;;  %v19406_v12 = vmul.f32 %v14011_v41, %v993_v20  ;;  %v19410_v15 = vmul.f32 %v13989_v31, %v993_v20 }
 0x3ec   : > { %v2605_v28 = vadd.f32 %v2370_v2, %v1918_v62  ;;  %v3970_v8 = vsel %vm2163_vm1, %v21568_v21, %v21567_v16  ;;  %v5935_v17 = vadd.f32 %v18925_v48, %v5815_v38  ;;  %v2737_v27 = vmul.f32 %v13999_v35, %v993_v20 }
 0x3ed   : > { %v4209_v22 = vadd.f32 %v3970_v8, %v3523_v60  ;;  %v19414_v18 = vmul.f32 %v14020_v47, %v993_v20  ;;  %v21327_v24 = vrot.slane %v19398_v45, 1  ;;  %v21326_v54 = vrot.slane %v19402_v61, 2 }
 0x3ee   : > { %v3291_v50 = vrot.slane %v2966_v36, 1  ;;  %v4341_v52 = vmul.f32 %v14017_v46, %v993_v20  ;;  %v6048_v43 = vmax.f32 %v5935_v17, 0.0  ;;  %v19419_v9 = vadd.f32 %v2737_v27, %v2605_v28 }
 0x3ef   : > { %v4891_v33 = vrot.slane %v19414_v18, 1  ;;  %v5252_v5 = vmul.f32 %v19425_v34, %v993_v20  ;;  %v3975_v19 = vrot.slane %v19406_v12, 2  ;;  %v1919_v60 = vadd.f32 %v19323_v3, %v19235_v26 }
 0x3f0   : > { %v3292_v62 = vsel %vm1478_vm0, %v3289_v10, %v3291_v50  ;;  %v4454_v7 = vadd.f32 %v4341_v52, %v4209_v22  ;;  %6163 = vst.msk [vmem:[#allocation2 + $0x301] sm:$0xff] %vm6066_vm2, %v6048_v43  ;;  %v19435_v59 = vmul.f32 %v13989_v31, %v998_v53  ;;  %v21569_v6 = vrot.slane %v19305_v30, 2 }
 0x3f1   : > { %v4892_v25 = vsel %vm1478_vm0, %v4889_v42, %v4891_v33  ;;  %v5575_v0 = vrot.slane %v5252_v5, 2  ;;  %v21570_v20 = vrot.slane %v19238_v11, 2  ;;  %v6617_v2 = vld [vmem:[#allocation3 + $0xb0] sm:$0xff]  ;;  %v19443_v28 = vmul.f32 %v13966_v13, %v998_v53 }
 0x3f2   : > { %v5130_v38 = vadd.f32 %v4892_v25, %v4453_v4  ;;  %v2738_v3 = vmul.f32 %v13999_v35, %v998_v53  ;;  %v6618_v16 = vld [vmem:[#allocation3 + $0xb8] sm:$0xff]  ;;  %v6571_v42 = vld [vmem:[#allocation3 + $0xaf] sm:$0xff]  ;;  %v19448_v22 = vmul.f32 %v13969_v14, %v998_v53  ;;  %v19451_v11 = vmul.f32 %v14008_v40, %v998_v53 }
 0x3f3   : > { %v2372_v10 = vsel %vm2163_vm1, %v21570_v20, %v21569_v6  ;;  %v6572_v21 = vld [vmem:[#allocation3 + $0xb7] sm:$0xff]  ;;  %v5576_v8 = vsel %vm2163_vm1, %v5573_v58, %v5575_v0  ;;  %v3524_v4 = vadd.f32 %v19340_v49, %v19273_v23  ;;  %v6635_v36 = vpack.c.bf16 %v6618_v16, %v6617_v2 }
 0x3f4   : > { %v2606_v26 = vadd.f32 %v2372_v10, %v1919_v60  ;;  %v6589_v17 = vpack.c.bf16 %v6572_v21, %v6571_v42  ;;  %v5816_v27 = vadd.f32 %v5576_v8, %v5130_v38  ;;  %v3293_v52 = vrot.slane %v19451_v11, 1  ;;  %v19472_v10 = vpop.permute.xlu1 %1002 }
 0x3f5   : > { %v19459_v43 = vmul.f32 %v14011_v41, %v998_v53  ;;  %v21571_v58 = vrot.slane %v19314_v29, 2  ;;  %v21572_v5 = vrot.slane %v19258_v56, 2  ;;  %v4342_v25 = vmul.f32 %v14017_v46, %v998_v53  ;;  %12887 = vmatprep.mubr.msk.bf16.mxu1 %vm6066_vm2, %v6635_v36 }
 0x3f6   : > { %v19455_v18 = vadd.f32 %v2738_v3, %v2606_v26  ;;  %12919 = vmatprep.mubr.msk.bf16.mxu0 %vm6066_vm2, %v6589_v17  ;;  %v5936_v23 = vadd.f32 %v18925_v48, %v5816_v27  ;;  %v4571_v20 = vmul.f32 %v14020_v47, %v998_v53  ;;  %v3294_v56 = vsel %vm1478_vm0, %v3291_v50, %v3293_v52 }
 0x3f7   : > { %v3972_v60 = vsel %vm2163_vm1, %v21572_v5, %v21571_v58  ;;  %v3977_v2 = vrot.slane %v19459_v43, 2  ;;  %v5253_v38 = vmul.f32 %v19425_v34, %v998_v53  ;;  %v3525_v26 = vadd.f32 %v19381_v1, %v19325_v37  ;;  %v19494_v37 = vpop.permute.xlu0 %1007 }
 0x3f8   : > { %v4210_v6 = vadd.f32 %v3972_v60, %v3524_v4  ;;  %v6049_v3 = vmax.f32 %v5936_v23, 0.0  ;;  %v4893_v42 = vrot.slane %v4571_v20, 1  ;;  %v21573_v21 = vrot.slane %v19359_v39, 2 }
 0x3f9   : > { %v21574_v8 = vmov %v21571_v58  ;;  %v5577_v36 = vrot.slane %v5253_v38, 2  ;;  %v19488_v50 = vmul.f32 %v13999_v35, %v19472_v10  ;;  %v19492_v53 = vmul.f32 %v14008_v40, %v19472_v10 }
 0x3fa   : > { %v4455_v16 = vadd.f32 %v4342_v25, %v4210_v6  ;;  %v3974_v4 = vsel %vm2163_vm1, %v21574_v8, %v21573_v21  ;;  %6164 = vst.msk [vmem:[#allocation2 + $0x309] sm:$0xff] %vm6066_vm2, %v6049_v3  ;;  %v4894_v1 = vsel %vm1478_vm0, %v4891_v33, %v4893_v42  ;;  %v19500_v29 = vmul.f32 %v14011_v41, %v19472_v10 }
 0x3fb   : > { %v4211_v17 = vadd.f32 %v3974_v4, %v3525_v26  ;;  %v4343_v27 = vmul.f32 %v14017_v46, %v19472_v10  ;;  %v4572_v58 = vmul.f32 %v14020_v47, %v19472_v10  ;;  %v5131_v5 = vadd.f32 %v4894_v1, %v4454_v7 }
 0x3fc   : > { %v5578_v60 = vsel %vm2163_vm1, %v5575_v0, %v5577_v36  ;;  %v3295_v25 = vrot.slane %v19492_v53, 1  ;;  %v5254_v23 = vmul.f32 %v19425_v34, %v19472_v10  ;;  %v19512_v20 = vmul.f32 %v14008_v40, %v19494_v37 }
 0x3fd   : > { %v4456_v6 = vadd.f32 %v4343_v27, %v4211_v17  ;;  %v4895_v33 = vrot.slane %v4572_v58, 1  ;;  %v3526_v38 = vadd.f32 %v3292_v62, %v19363_v57  ;;  %v5817_v26 = vadd.f32 %v5578_v60, %v5131_v5  ;;  %v19528_v62 = vpop.permute.xlu1 %1012 }
 0x3fe   : > { %v5579_v3 = vrot.slane %v5254_v23, 2  ;;  %v19517_v7 = vmul.f32 %v14011_v41, %v19494_v37  ;;  %v21575_v0 = vmov %v21573_v21  ;;  %v3297_v4 = vrot.slane %v19512_v20, 1  ;;  %v19542_v23 = vpop.permute.xlu0 %1017 }
 0x3ff   : > { %v3976_v21 = vsel %vm2163_vm1, %v21575_v0, %v3975_v19  ;;  %v4896_v8 = vsel %vm1478_vm0, %v4893_v42, %v4895_v33  ;;  %v4344_v57 = vmul.f32 %v14017_v46, %v19494_v37  ;;  %v5937_v53 = vadd.f32 %v18925_v48, %v5817_v26 }
 0x400   : > { %v4212_v17 = vadd.f32 %v3976_v21, %v3526_v38  ;;  %v5132_v1 = vadd.f32 %v4896_v8, %v4455_v16  ;;  %v5580_v27 = vsel %vm2163_vm1, %v5577_v36, %v5579_v3  ;;  %v4573_v39 = vmul.f32 %v14020_v47, %v19494_v37 }
 0x401   : > { %v5255_v42 = vmul.f32 %v19425_v34, %v19494_v37  ;;  %v3527_v5 = vadd.f32 %v3294_v56, %v19419_v9  ;;  %v3978_v60 = vsel %vm2163_vm1, %v3975_v19, %v3977_v2  ;;  %v6050_v16 = vmax.f32 %v5937_v53, 0.0 }
 0x402   : > { %v4457_v58 = vadd.f32 %v4344_v57, %v4212_v17  ;;  %v5818_v38 = vadd.f32 %v5580_v27, %v5132_v1  ;;  %v4897_v36 = vrot.slane %v4573_v39, 1  ;;  %v4345_v26 = vmul.f32 %v14017_v46, %v19528_v62 }
 0x403   : > { %v5581_v0 = vrot.slane %v5255_v42, 2  ;;  %v4213_v21 = vadd.f32 %v3978_v60, %v3527_v5  ;;  %v4574_v8 = vmul.f32 %v14020_v47, %v19528_v62  ;;  %v5256_v9 = vmul.f32 %v19425_v34, %v19528_v62  ;;  %6165 = vst.msk [vmem:[#allocation2 + $0x311] sm:$0xff] %vm6066_vm2, %v6050_v16 }
 0x404   : > { %v5938_v12 = vadd.f32 %v18925_v48, %v5818_v38  ;;  %v4898_v19 = vsel %vm1478_vm0, %v4895_v33, %v4897_v36  ;;  %v4346_v56 = vmul.f32 %v14017_v46, %v19542_v23  ;;  %v19557_v17 = vmul.f32 %v14020_v47, %v19542_v23 }
 0x405   : > { %v5133_v57 = vadd.f32 %v4898_v19, %v4456_v6  ;;  %v5582_v53 = vsel %vm2163_vm1, %v5579_v3, %v5581_v0  ;;  %v4458_v1 = vadd.f32 %v4345_v26, %v4213_v21  ;;  %v4899_v27 = vrot.slane %v4574_v8, 1  ;;  %v19576_v8 = vpop.f32.mrb[0].mxu1 }
 0x406   : > { %v6051_v39 = vmax.f32 %v5938_v12, 0.0  ;;  %v5583_v42 = vrot.slane %v5256_v9, 2  ;;  %v19562_v5 = vmul.f32 %v19425_v34, %v19542_v23  ;;  %v21576_v33 = vrot.slane %v19331_v63, 1  ;;  %v19586_v19 = vpop.f32.mrb[1].mxu1 }
 0x407   : > { %v21577_v60 = vrot.slane %v19289_v55, 1  ;;  %v5819_v38 = vadd.f32 %v5582_v53, %v5133_v57  ;;  %v4900_v49 = vsel %vm1478_vm0, %v4897_v36, %v4899_v27  ;;  %v21578_v3 = vrot.slane %v19337_v44, 2  ;;  %v1931_v36 = vpop.permute.xlu1 %1930 }
 0x408   : > { %v21579_v26 = vrot.slane %v19305_v30, 2  ;;  %6166 = vst.msk [vmem:[#allocation2 + $0x319] sm:$0xff] %vm6066_vm2, %v6051_v39  ;;  %v5134_v9 = vadd.f32 %v4900_v49, %v4457_v58  ;;  %v5584_v55 = vsel %vm2163_vm1, %v5581_v0, %v5583_v42  ;;  %v3296_v12 = vsel %vm1478_vm0, %v3293_v52, %v3295_v25  ;;  %v19591_v58 = vpop.f32.mrb[2].mxu1 }
 0x409   : > { %v1689_v16 = vsel %vm1478_vm0, %v21577_v60, %v21576_v33  ;;  %v5939_v30 = vadd.f32 %v18925_v48, %v5819_v38  ;;  %v3528_v53 = vadd.f32 %v3296_v12, %v19455_v18  ;;  %v3979_v49 = vrot.slane %v19500_v29, 2 }
 0x40a   : > { %v1920_v6 = vadd.f32 %v1689_v16, %v19302_v51  ;;  %v2374_v21 = vsel %vm2163_vm1, %v21579_v26, %v21578_v3  ;;  %v3298_v51 = vsel %vm1478_vm0, %v3295_v25, %v3297_v4  ;;  %v5820_v0 = vadd.f32 %v5584_v55, %v5134_v9  ;;  %v19596_v25 = vpop.f32.mrb[3].mxu1 }
 0x40b   : > { %v3981_v11 = vrot.slane %v19517_v7, 2  ;;  %v4901_v52 = vrot.slane %v19557_v17, 1  ;;  %v5585_v39 = vrot.slane %v19562_v5, 2  ;;  %21580 = vst [vmem:[#allocation18_spill] sm:$0xff] %v19596_v25  ;;  %v6052_v33 = vmax.f32 %v5939_v30, 0.0  ;;  %v2618_v30 = vpop.permute.xlu0 %2617 }
 0x40c   : > { %v2607_v57 = vadd.f32 %v2374_v21, %v1920_v6  ;;  %v3980_v18 = vsel %vm2163_vm1, %v3977_v2, %v3979_v49  ;;  %v19603_v29 = vmul.f32 %v13969_v14, %v1931_v36  ;;  %v5940_v38 = vadd.f32 %v18925_v48, %v5820_v0  ;;  %v6301_v21 = vld [vmem:[#allocation2 + $0x2b0] ss:$2 sm:$0xff] }
 0x40d   : > { %v4214_v6 = vadd.f32 %v3980_v18, %v3528_v53  ;;  %v4902_v17 = vsel %vm1478_vm0, %v4899_v27, %v4901_v52  ;;  %6167 = vst.msk [vmem:[#allocation2 + $0x321] sm:$0xff] %vm6066_vm2, %v6052_v33  ;;  %v5586_v2 = vsel %vm2163_vm1, %v5583_v42, %v5585_v39  ;;  %v19615_v9 = vmul.f32 %v14008_v40, %v1931_v36 }
 0x40e   : > { %v2852_v60 = vadd.f32 %v19488_v50, %v2607_v57  ;;  %v3982_v50 = vsel %vm2163_vm1, %v3979_v49, %v3981_v11  ;;  %v5135_v43 = vadd.f32 %v4902_v17, %v4458_v1  ;;  %v6053_v3 = vmax.f32 %v5940_v38, 0.0  ;;  %v19631_v57 = vld [vmem:[%s21262_s2] ss:$0 sm:$0xff]  ;;  %v6413_v1 = vld [vmem:[#allocation2 + $0x2b1] ss:$2 sm:$0xff] }
 0x40f   : > { %v4459_v26 = vadd.f32 %v4346_v56, %v4214_v6  ;;  %v19618_v27 = vmul.f32 %v13999_v35, %v1931_v36  ;;  %v4347_v12 = vmul.f32 %v14017_v46, %v1931_v36  ;;  %v19624_v42 = vmul.f32 %v14011_v41, %v1931_v36 }
 0x410   : > { %v3529_v5 = vadd.f32 %v3298_v51, %v2852_v60  ;;  %v5821_v55 = vadd.f32 %v5586_v2, %v5135_v43  ;;  %6168 = vst.msk [vmem:[#allocation2 + $0x329] sm:$0xff] %vm6066_vm2, %v6053_v3  ;;  %v4576_v56 = vmul.f32 %v14020_v47, %v1931_v36  ;;  %v5258_v51 = vmul.f32 %v19425_v34, %v1931_v36 }
 0x411   : > { %v2740_v0 = vmul.f32 %v13999_v35, %v19494_v37  ;;  %v21581_v33 = vrot.slane %v19331_v63, 1  ;;  %v21582_v6 = vrot.slane %v19337_v44, 2  ;;  %v19652_v43 = vmul.f32 %v14008_v40, %v2618_v30 }
 0x412   : > { %v4215_v48 = vadd.f32 %v3982_v50, %v3529_v5  ;;  %v5941_v53 = vadd.f32 %v19631_v57, %v5821_v55  ;;  %v4903_v18 = vrot.slane %v4576_v56, 1  ;;  %v5587_v36 = vrot.slane %v5258_v51, 2  ;;  %v6407_v55 = vld [vmem:[#allocation2 + $0x281] ss:$2 sm:$0xff] }
 0x413   : > { %v1691_v60 = vsel %vm1478_vm0, %v21581_v33, %v21327_v24  ;;  %v2376_v17 = vsel %vm2163_vm1, %v21582_v6, %v21326_v54  ;;  %v19649_v50 = vmul.f32 %v14008_v40, %v19528_v62  ;;  %v19656_v63 = vmul.f32 %v14011_v41, %v19528_v62  ;;  %v6299_v33 = vld [vmem:[#allocation2 + $0x2a0] ss:$2 sm:$0xff] }
 0x414   : > { %v4460_v49 = vadd.f32 %v4347_v12, %v4215_v48  ;;  %v1921_v38 = vadd.f32 %v1691_v60, %v19349_v32  ;;  %v6054_v5 = vmax.f32 %v5941_v53, 0.0  ;;  %v4904_v32 = vsel %vm1478_vm0, %v4901_v52, %v4903_v18  ;;  %v6295_v48 = vld [vmem:[#allocation2 + $0x280] ss:$2 sm:$0xff]  ;;  %v6411_v52 = vld [vmem:[#allocation2 + $0x2a1] ss:$2 sm:$0xff] }
 0x415   : > { %v19660_v3 = vmul.f32 %v13999_v35, %v2618_v30  ;;  %v19663_v44 = vmul.f32 %v14011_v41, %v2618_v30  ;;  %v5136_v12 = vadd.f32 %v4904_v32, %v4459_v26  ;;  %v5588_v56 = vsel %vm2163_vm1, %v5585_v39, %v5587_v36 }
 0x416   : > { %v2608_v2 = vadd.f32 %v2376_v17, %v1921_v38  ;;  %6169 = vst.msk [vmem:[#allocation2 + $0x331] sm:$0xff] %vm6066_vm2, %v6054_v5  ;;  %v3299_v51 = vrot.slane %v19649_v50, 1  ;;  %v3983_v53 = vrot.slane %v19656_v63, 2  ;;  %v4577_v17 = vmul.f32 %v14020_v47, %v2618_v30  ;;  %v6297_v50 = vld [vmem:[#allocation2 + $0x290] ss:$2 sm:$0xff] }
 0x417   : > { %v5822_v54 = vadd.f32 %v5588_v56, %v5136_v12  ;;  %v4348_v26 = vmul.f32 %v14017_v46, %v2618_v30  ;;  %v5259_v5 = vmul.f32 %v19425_v34, %v2618_v30  ;;  %v6409_v63 = vld [vmem:[#allocation2 + $0x291] ss:$2 sm:$0xff]  ;;  %v6478_v6 = vmax.f32 %v6295_v48, %v6407_v55 }
 0x418   : > { %v2853_v60 = vadd.f32 %v2740_v0, %v2608_v2  ;;  %v3300_v39 = vsel %vm1478_vm0, %v3297_v4, %v3299_v51  ;;  %v3984_v32 = vsel %vm2163_vm1, %v3981_v11, %v3983_v53  ;;  %v4905_v2 = vrot.slane %v4577_v17, 1 }
 0x419   : > { %v5942_v38 = vadd.f32 %v19631_v57, %v5822_v54  ;;  %v5589_v12 = vrot.slane %v5259_v5, 2  ;;  %v6480_v56 = vmax.f32 %v6299_v33, %v6411_v52  ;;  %v6481_v20 = vmax.f32 %v6301_v21, %v6413_v1  ;;  %v2623_v21 = vpop.permute.xlu1 %2622  ;;  %v2628_v5 = vpop.permute.xlu0 %2627 }
 0x41a   : > { %v3530_v0 = vadd.f32 %v3300_v39, %v2853_v60  ;;  %v4906_v4 = vsel %vm1478_vm0, %v4903_v18, %v4905_v2  ;;  %v6479_v24 = vmax.f32 %v6297_v50, %v6409_v63  ;;  %v21583_v30 = vrot.slane %v19443_v28, 1 }
 0x41b   : > { %v21584_v25 = vrot.slane %v19398_v45, 1  ;;  %v6055_v7 = vmax.f32 %v5942_v38, 0.0  ;;  %v5137_v39 = vadd.f32 %v4906_v4, %v4460_v49  ;;  %v6535_v11 = vmax.f32 %v6478_v6, %v6480_v56 }
 0x41c   : > { %v4216_v16 = vadd.f32 %v3984_v32, %v3530_v0  ;;  %v21585_v48 = vrot.slane %v19448_v22, 2  ;;  %v21586_v54 = vrot.slane %v19402_v61, 2  ;;  %v5590_v18 = vsel %vm2163_vm1, %v5587_v36, %v5589_v12 }
 0x41d   : > { %v1693_v60 = vsel %vm1478_vm0, %v21584_v25, %v21583_v30  ;;  %v6536_v33 = vmax.f32 %v6479_v24, %v6481_v20  ;;  %6170 = vst.msk [vmem:[#allocation2 + $0x339] sm:$0xff] %vm6066_vm2, %v6055_v7  ;;  %v5823_v45 = vadd.f32 %v5590_v18, %v5137_v39  ;;  %6537 = vst.msk [vmem:[#allocation3 + $0xc0] sm:$0xff] %vm6066_vm2, %v6535_v11  ;;  %v3540_v4 = vpop.permute.xlu1 %3539 }
 0x41e   : > { %v2378_v55 = vsel %vm2163_vm1, %v21586_v54, %v21585_v48  ;;  %v4461_v1 = vadd.f32 %v4348_v26, %v4216_v16  ;;  %v1922_v52 = vadd.f32 %v1693_v60, %v19410_v15  ;;  %v2741_v25 = vmul.f32 %v13999_v35, %v19528_v62 }
 0x41f   : > { %v19700_v61 = vmul.f32 %v14008_v40, %v19542_v23  ;;  %v19704_v16 = vmul.f32 %v14011_v41, %v19542_v23  ;;  %6538 = vst.msk [vmem:[#allocation3 + $0xc8] sm:$0x3f] %vm6497_vm4, %v6536_v33  ;;  %v19708_v15 = vmul.f32 %v13999_v35, %v2623_v21  ;;  %v19711_v49 = vmul.f32 %v14008_v40, %v2623_v21 }
 0x420   : > { %v2609_v24 = vadd.f32 %v2378_v55, %v1922_v52  ;;  %v19714_v36 = vmul.f32 %v14011_v41, %v2623_v21  ;;  %v5943_v38 = vadd.f32 %v19631_v57, %v5823_v45  ;;  %v4578_v26 = vmul.f32 %v14020_v47, %v2623_v21 }
 0x421   : > { %v3301_v6 = vrot.slane %v19700_v61, 1  ;;  %v3985_v17 = vrot.slane %v19704_v16, 2  ;;  %v3307_v63 = vrot.slane %v19711_v49, 1  ;;  %v4349_v0 = vmul.f32 %v14017_v46, %v2623_v21 }
 0x422   : > { %v2854_v50 = vadd.f32 %v2741_v25, %v2609_v24  ;;  %v5260_v32 = vmul.f32 %v19425_v34, %v2623_v21  ;;  %v6056_v56 = vmax.f32 %v5943_v38, 0.0  ;;  %v4907_v30 = vrot.slane %v4578_v26, 1 }
 0x423   : > { %v3302_v20 = vsel %vm1478_vm0, %v3299_v51, %v3301_v6  ;;  %v3986_v7 = vsel %vm2163_vm1, %v3983_v53, %v3985_v17  ;;  %v19731_v11 = vmul.f32 %v14008_v40, %v2628_v5  ;;  %v19736_v54 = vmul.f32 %v13999_v35, %v2628_v5 }
 0x424   : > { %v3531_v60 = vadd.f32 %v3302_v20, %v2854_v50  ;;  %v5591_v39 = vrot.slane %v5260_v32, 2  ;;  %6171 = vst.msk [vmem:[#allocation2 + $0x341] sm:$0xff] %vm6066_vm2, %v6056_v56  ;;  %v4908_v48 = vsel %vm1478_vm0, %v4905_v2, %v4907_v30  ;;  %v19739_v51 = vmul.f32 %v14011_v41, %v2628_v5  ;;  %v6619_v21 = vld [vmem:[#allocation3 + $0xc0] sm:$0xff] }
 0x425   : > { %v19742_v55 = vmul.f32 %v14020_v47, %v2628_v5  ;;  %v5138_v53 = vadd.f32 %v4908_v48, %v4461_v1  ;;  %v19746_v40 = vmul.f32 %v14017_v46, %v2628_v5  ;;  %v6573_v45 = vld [vmem:[#allocation3 + $0xbf] sm:$0xff]  ;;  %v19752_v26 = vmul.f32 %v19425_v34, %v2628_v5  ;;  %v19768_v5 = vpop.f32.mrb[4].mxu1 }
 0x426   : > { %v4217_v18 = vadd.f32 %v3986_v7, %v3531_v60  ;;  %v5592_v33 = vsel %vm2163_vm1, %v5589_v12, %v5591_v39  ;;  %v6620_v52 = vld [vmem:[#allocation3 + $0xc8] sm:$0xff]  ;;  %v1362_v60 = vmul.f32 %v13966_v13, %v19472_v10  ;;  %v19766_v7 = vmul.f32 %v13966_v13, %v19494_v37 }
 0x427   : > { %v6574_v2 = vld [vmem:[#allocation3 + $0xc7] sm:$0xff]  ;;  %v4909_v38 = vrot.slane %v19742_v55, 1  ;;  %v19754_v50 = vpack.c.bf16 %v6620_v52, %v6619_v21  ;;  %v5824_v32 = vadd.f32 %v5592_v33, %v5138_v53  ;;  %v5593_v20 = vrot.slane %v19752_v26, 2 }
 0x428   : > { %v19756_v1 = vpack.c.bf16 %v6574_v2, %v6573_v45  ;;  %v4462_v12 = vadd.f32 %v4349_v0, %v4217_v18  ;;  %v2045_v48 = vmul.f32 %v13969_v14, %v19472_v10  ;;  %v3987_v21 = vrot.slane %v19624_v42, 2  ;;  %v19778_v18 = vpop.f32.mrb[5].mxu1 }
 0x429   : > { %v4910_v56 = vsel %vm1478_vm0, %v4907_v30, %v4909_v38  ;;  %12888 = vmatmul.mubr.msk.bf16.gmra.mrb[16].mxu1 %vm6066_vm2, %v19754_v50  ;;  %v5944_v0 = vadd.f32 %v19631_v57, %v5824_v32  ;;  %v5594_v53 = vsel %vm2163_vm1, %v5591_v39, %v5593_v20  ;;  %v1694_v33 = vrot.slane %v1362_v60, 1  ;;  %v19784_v2 = vpop.f32.mrb[6].mxu1 }
 0x42a   : > { %12920 = vmatmul.mubr.msk.bf16.gmra.mrb[20].mxu0 %vm6066_vm2, %v19756_v1  ;;  %v5139_v30 = vadd.f32 %v4910_v56, %v4462_v12  ;;  %v1696_v52 = vrot.slane %v19766_v7, 1  ;;  %v2046_v45 = vmul.f32 %v13969_v14, %v19494_v37  ;;  %v1133_v12 = vmul.f32 %v13989_v31, %v19472_v10  ;;  %v19788_v24 = vpop.f32.mrb[7].mxu1 }
 0x42b   : > { %v6057_v26 = vmax.f32 %v5944_v0, 0.0  ;;  %v2379_v56 = vrot.slane %v2045_v48, 2  ;;  %v21587_v42 = vrot.slane %v19443_v28, 1  ;;  %v2742_v25 = vmul.f32 %v13999_v35, %v19542_v23 }
 0x42c   : > { %v5825_v32 = vadd.f32 %v5594_v53, %v5139_v30  ;;  %v1697_v60 = vsel %vm1478_vm0, %v1694_v33, %v1696_v52  ;;  %v2381_v7 = vrot.slane %v2046_v45, 2  ;;  %v21588_v48 = vrot.slane %v19615_v9, 1 }
 0x42d   : > { %v1695_v39 = vsel %vm1478_vm0, %v21587_v42, %v1694_v33  ;;  %6172 = vst.msk [vmem:[#allocation2 + $0x349] sm:$0xff] %vm6066_vm2, %v6057_v26  ;;  %v1924_v30 = vadd.f32 %v1697_v60, %v1133_v12  ;;  %v21589_v53 = vrot.slane %v19448_v22, 2  ;;  %v21590_v45 = vrot.slane %v19652_v43, 1 }
 0x42e   : > { %v5945_v0 = vadd.f32 %v19631_v57, %v5825_v32  ;;  %v1923_v10 = vadd.f32 %v1695_v39, %v19435_v59  ;;  %v3304_v28 = vsel %vm1478_vm0, %v3301_v6, %v21588_v48  ;;  %v2382_v35 = vsel %vm2163_vm1, %v2379_v56, %v2381_v7 }
 0x42f   : > { %v2380_v33 = vsel %vm2163_vm1, %v21589_v53, %v2379_v56  ;;  %v21591_v26 = vmov %v21588_v48  ;;  %v3988_v59 = vsel %vm2163_vm1, %v3985_v17, %v3987_v21  ;;  %v2611_v42 = vadd.f32 %v2382_v35, %v1924_v30  ;;  %v4226_v48 = vpop.permute.xlu0 %4225 }
 0x430   : > { %v3306_v32 = vsel %vm1478_vm0, %v21591_v26, %v21590_v45  ;;  %v6058_v12 = vmax.f32 %v5945_v0, 0.0  ;;  %v2610_v61 = vadd.f32 %v2380_v33, %v1923_v10  ;;  %v19817_v6 = vmul.f32 %v14011_v41, %v3540_v4 }
 0x431   : > { %v21592_v22 = vrot.slane %v19663_v44, 2  ;;  %v4351_v39 = vmul.f32 %v14017_v46, %v3540_v4  ;;  %v4580_v9 = vmul.f32 %v14020_v47, %v3540_v4  ;;  %v5262_v60 = vmul.f32 %v19425_v34, %v3540_v4 }
 0x432   : > { %6173 = vst.msk [vmem:[#allocation2 + $0x351] sm:$0xff] %vm6066_vm2, %v6058_v12  ;;  %v2855_v16 = vadd.f32 %v2742_v25, %v2610_v61  ;;  %v2856_v17 = vadd.f32 %v19618_v27, %v2611_v42  ;;  %v1134_v0 = vmul.f32 %v13989_v31, %v19494_v37  ;;  %v1364_v41 = vmul.f32 %v13966_v13, %v19528_v62 }
 0x433   : > { %v3990_v56 = vsel %vm2163_vm1, %v3987_v21, %v21592_v22  ;;  %v3995_v10 = vrot.slane %v19817_v6, 2  ;;  %v4911_v21 = vrot.slane %v4580_v9, 1  ;;  %v5595_v30 = vrot.slane %v5262_v60, 2  ;;  %v6421_v6 = vld [vmem:[#allocation2 + $0x2f1] ss:$2 sm:$0xff] }
 0x434   : > { %v2047_v53 = vmul.f32 %v13969_v14, %v19528_v62  ;;  %v3532_v4 = vadd.f32 %v3304_v28, %v2855_v16  ;;  %v3533_v33 = vadd.f32 %v3306_v32, %v2856_v17  ;;  %v1698_v35 = vrot.slane %v1364_v41, 1 }
 0x435   : > { %v21593_v27 = vmov %v21590_v45  ;;  %v4912_v25 = vsel %vm1478_vm0, %v4909_v38, %v4911_v21  ;;  %v5596_v45 = vsel %vm2163_vm1, %v5593_v20, %v5595_v30  ;;  %v21594_v12 = vrot.slane %v19714_v36, 2 }
 0x436   : > { %v3308_v37 = vsel %vm1478_vm0, %v21593_v27, %v3307_v63  ;;  %v2383_v26 = vrot.slane %v2047_v53, 2  ;;  %v21595_v61 = vmov %v21592_v22  ;;  %v4218_v32 = vadd.f32 %v3988_v59, %v3532_v4 }
 0x437   : > { %v3992_v28 = vsel %vm2163_vm1, %v21595_v61, %v21594_v12  ;;  %v4219_v42 = vadd.f32 %v3990_v56, %v3533_v33  ;;  %v1699_v22 = vsel %vm1478_vm0, %v1696_v52, %v1698_v35  ;;  %v4581_v43 = vmul.f32 %v14020_v47, %v4226_v48 }
 0x438   : > { %v1925_v9 = vadd.f32 %v1699_v22, %v1134_v0  ;;  %v2384_v55 = vsel %vm2163_vm1, %v2381_v7, %v2383_v26  ;;  %v4352_v38 = vmul.f32 %v14017_v46, %v4226_v48  ;;  %v5263_v20 = vmul.f32 %v19425_v34, %v4226_v48  ;;  %v4231_v7 = vpop.permute.xlu1 %4230 }
 0x439   : > { %v4463_v60 = vadd.f32 %v19746_v40, %v4218_v32  ;;  %v4913_v16 = vrot.slane %v4581_v43, 1  ;;  %v1135_v44 = vmul.f32 %v13989_v31, %v19528_v62  ;;  %v1365_v59 = vmul.f32 %v13966_v13, %v19542_v23 }
 0x43a   : > { %v4464_v56 = vadd.f32 %v4351_v39, %v4219_v42  ;;  %v2612_v52 = vadd.f32 %v2384_v55, %v1925_v9  ;;  %v5597_v17 = vrot.slane %v5263_v20, 2  ;;  %v2048_v0 = vmul.f32 %v13969_v14, %v19542_v23  ;;  %v4236_v9 = vpop.permute.xlu0 %4235 }
 0x43b   : > { %v5140_v41 = vadd.f32 %v4912_v25, %v4463_v60  ;;  %v4914_v53 = vsel %vm1478_vm0, %v4911_v21, %v4913_v16  ;;  %v1700_v48 = vrot.slane %v1365_v59, 1  ;;  %v21596_v40 = vrot.slane %v19731_v11, 1 }
 0x43c   : > { %v2857_v4 = vadd.f32 %v19660_v3, %v2612_v52  ;;  %v5141_v13 = vadd.f32 %v4914_v53, %v4464_v56  ;;  %v2385_v39 = vrot.slane %v2048_v0, 2  ;;  %v21597_v33 = vrot.slane %v19739_v51, 2  ;;  %v5148_v59 = vpop.permute.xlu1 %5147  ;;  %v6415_v0 = vld [vmem:[#allocation2 + $0x2c1] ss:$2 sm:$0xff] }
 0x43d   : > { %v3310_v62 = vsel %vm1478_vm0, %v3307_v63, %v21596_v40  ;;  %v21598_v27 = vmov %v21594_v12  ;;  %v5826_v25 = vadd.f32 %v5596_v45, %v5140_v41  ;;  %v5598_v21 = vsel %vm2163_vm1, %v5595_v30, %v5597_v17  ;;  %v6307_v40 = vld [vmem:[#allocation2 + $0x2e0] ss:$2 sm:$0xff] }
 0x43e   : > { %v3994_v14 = vsel %vm2163_vm1, %v21598_v27, %v21597_v33  ;;  %v1701_v12 = vsel %vm1478_vm0, %v1698_v35, %v1700_v48  ;;  %v4582_v61 = vmul.f32 %v14020_v47, %v4231_v7  ;;  %v3534_v49 = vadd.f32 %v3308_v37, %v2857_v4 }
 0x43f   : > { %v5827_v32 = vadd.f32 %v5598_v21, %v5141_v13  ;;  %v1926_v63 = vadd.f32 %v1701_v12, %v1135_v44  ;;  %v2386_v3 = vsel %vm2163_vm1, %v2383_v26, %v2385_v39  ;;  %v5946_v42 = vadd.f32 %v19631_v57, %v5826_v25  ;;  %v6311_v25 = vld [vmem:[#allocation2 + $0x300] ss:$2 sm:$0xff] }
 0x440   : > { %v4915_v22 = vrot.slane %v4582_v61, 1  ;;  %v19878_v43 = vmul.f32 %v19425_v34, %v4231_v7  ;;  %v1136_v36 = vmul.f32 %v13989_v31, %v19542_v23  ;;  %v4220_v45 = vadd.f32 %v3992_v28, %v3534_v49  ;;  %v6303_v28 = vld [vmem:[#allocation2 + $0x2c0] ss:$2 sm:$0xff] }
 0x441   : > { %v5947_v30 = vadd.f32 %v19631_v57, %v5827_v32  ;;  %v2613_v35 = vadd.f32 %v2386_v3, %v1926_v63  ;;  %v21599_v37 = vrot.slane %v19603_v29, 2  ;;  %v6059_v20 = vmax.f32 %v5946_v42, 0.0  ;;  %v6423_v32 = vld [vmem:[#allocation2 + $0x301] ss:$2 sm:$0xff] }
 0x442   : > { %v4916_v26 = vsel %vm1478_vm0, %v4913_v16, %v4915_v22  ;;  %v5599_v60 = vrot.slane %v19878_v43, 2  ;;  %v1927_v44 = vadd.f32 %v1700_v48, %v1136_v36  ;;  %v4465_v56 = vadd.f32 %v4352_v38, %v4220_v45  ;;  %v6305_v48 = vld [vmem:[#allocation2 + $0x2d0] ss:$2 sm:$0xff]  ;;  %v6315_v36 = vld [vmem:[#allocation2 + $0x320] ss:$2 sm:$0xff] }
 0x443   : > { %v2388_v55 = vsel %vm2163_vm1, %v2385_v39, %v21599_v37  ;;  %v6060_v52 = vmax.f32 %v5947_v30, 0.0  ;;  %v2858_v31 = vadd.f32 %v19708_v15, %v2613_v35  ;;  %v4353_v23 = vmul.f32 %v14017_v46, %v4231_v7  ;;  %6174 = vst.msk [vmem:[#allocation2 + $0x359] sm:$0xff] %vm6066_vm2, %v6059_v20  ;;  %v6417_v15 = vld [vmem:[#allocation2 + $0x2d1] ss:$2 sm:$0xff]  ;;  %v6309_v39 = vld [vmem:[#allocation2 + $0x2f0] ss:$2 sm:$0xff] }
 0x444   : > { %v5600_v29 = vsel %vm2163_vm1, %v5597_v17, %v5599_v60  ;;  %v2614_v41 = vadd.f32 %v2388_v55, %v1927_v44  ;;  %v21600_v16 = vmov %v21597_v33  ;;  %v4583_v38 = vmul.f32 %v14020_v47, %v4236_v9  ;;  %v6419_v33 = vld [vmem:[#allocation2 + $0x2e1] ss:$2 sm:$0xff] }
 0x445   : > { %v3996_v53 = vsel %vm2163_vm1, %v21600_v16, %v3995_v10  ;;  %6175 = vst.msk [vmem:[#allocation2 + $0x361] sm:$0xff] %vm6066_vm2, %v6060_v52  ;;  %v3535_v7 = vadd.f32 %v3310_v62, %v2858_v31  ;;  %v5142_v4 = vadd.f32 %v4916_v26, %v4465_v56  ;;  %v5265_v13 = vmul.f32 %v19425_v34, %v4236_v9  ;;  %v6313_v62 = vld [vmem:[#allocation2 + $0x310] ss:$2 sm:$0xff]  ;;  %v6427_v45 = vld [vmem:[#allocation2 + $0x321] ss:$2 sm:$0xff]  ;;  %v19907_v56 = vpop.f32.mrb[8].mxu1 }
 0x446   : > { %v5266_v17 = vmul.f32 %v19425_v34, %v5148_v59  ;;  %v2859_v51 = vadd.f32 %v19736_v54, %v2614_v41  ;;  %v4354_v10 = vmul.f32 %v14017_v46, %v4236_v9  ;;  %v4917_v27 = vrot.slane %v4583_v38, 1  ;;  %v6425_v54 = vld [vmem:[#allocation2 + $0x311] ss:$2 sm:$0xff] }
 0x447   : > { %v6482_v47 = vmax.f32 %v6303_v28, %v6415_v0  ;;  %v4221_v21 = vadd.f32 %v3994_v14, %v3535_v7  ;;  %v5828_v12 = vadd.f32 %v5600_v29, %v5142_v4  ;;  %v5601_v61 = vrot.slane %v5265_v13, 2  ;;  %v6317_v14 = vld [vmem:[#allocation2 + $0x330] ss:$2 sm:$0xff]  ;;  %v6429_v9 = vld [vmem:[#allocation2 + $0x331] ss:$2 sm:$0xff]  ;;  %v19912_v28 = vpop.f32.mrb[9].mxu1 }
 0x448   : > { %v6483_v49 = vmax.f32 %v6305_v48, %v6417_v15  ;;  %v21601_v63 = vrot.slane %v19731_v11, 1  ;;  %v4918_v34 = vsel %vm1478_vm0, %v4915_v22, %v4917_v27  ;;  %v6484_v42 = vmax.f32 %v6307_v40, %v6419_v33  ;;  %v19916_v16 = vpop.f32.mrb[10].mxu1  ;;  %v6319_v4 = vld [vmem:[#allocation2 + $0x340] ss:$2 sm:$0xff]  ;;  %v6431_v13 = vld [vmem:[#allocation2 + $0x341] ss:$2 sm:$0xff] }
 0x449   : > { %v6485_v43 = vmax.f32 %v6309_v39, %v6421_v6  ;;  %v4466_v46 = vadd.f32 %v4353_v23, %v4221_v21  ;;  %v5948_v30 = vadd.f32 %v19631_v57, %v5828_v12  ;;  %v5603_v35 = vrot.slane %v5266_v17, 2  ;;  %v19918_v48 = vpop.f32.mrb[11].mxu1 }
 0x44a   : > { %v3536_v3 = vadd.f32 %v21601_v63, %v2859_v51  ;;  %v6539_v55 = vmax.f32 %v6482_v47, %v6484_v42  ;;  %v6486_v11 = vmax.f32 %v6311_v25, %v6423_v32  ;;  %v6488_v59 = vmax.f32 %v6315_v36, %v6427_v45  ;;  %v6321_v36 = vld [vmem:[#allocation2 + $0x350] ss:$2 sm:$0xff] }
 0x44b   : > { %v6540_v20 = vmax.f32 %v6483_v49, %v6485_v43  ;;  %v6061_v26 = vmax.f32 %v5948_v30, 0.0  ;;  %v5143_v44 = vadd.f32 %v4918_v34, %v4466_v46  ;;  %v5602_v52 = vsel %vm2163_vm1, %v5599_v60, %v5601_v61  ;;  %v7043_v49 = vld [vmem:[#allocation3 + $0x19] sm:$0xff]  ;;  %v7045_v30 = vld [vmem:[#allocation3 + $0x29] sm:$0xff] }
 0x44c   : > { %v4222_v37 = vadd.f32 %v3996_v53, %v3536_v3  ;;  %6541 = vst.msk [vmem:[#allocation3 + $0xd0] sm:$0xff] %vm6066_vm2, %v6539_v55  ;;  %v6487_v31 = vmax.f32 %v6313_v62, %v6425_v54  ;;  %v6489_v23 = vmax.f32 %v6317_v14, %v6429_v9  ;;  %v5604_v29 = vsel %vm2163_vm1, %v5601_v61, %v5603_v35  ;;  %v7042_v61 = vld [vmem:[#allocation3 + $0x11] sm:$0xff]  ;;  %v7047_v14 = vld [vmem:[#allocation3 + $0x39] sm:$0xff] }
 0x44d   : > { %6542 = vst.msk [vmem:[#allocation3 + $0xd8] sm:$0x3f] %vm6497_vm4, %v6540_v20  ;;  %v5829_v0 = vadd.f32 %v5602_v52, %v5143_v44  ;;  %v6543_v41 = vmax.f32 %v6486_v11, %v6488_v59  ;;  %v6490_v21 = vmax.f32 %v6319_v4, %v6431_v13  ;;  %v7070_v43 = vpack.c.bf16 %v7043_v49, %v7042_v61  ;;  %v6433_v54 = vld [vmem:[#allocation2 + $0x351] ss:$2 sm:$0xff]  ;;  %v7049_v52 = vld [vmem:[#allocation3 + $0x49] sm:$0xff] }
 0x44e   : > { %v4467_v22 = vadd.f32 %v4354_v10, %v4222_v37  ;;  %6176 = vst.msk [vmem:[#allocation2 + $0x369] sm:$0xff] %vm6066_vm2, %v6061_v26  ;;  %v6544_v38 = vmax.f32 %v6487_v31, %v6489_v23  ;;  %v6491_v9 = vmax.f32 %v6321_v36, %v6433_v54  ;;  %v7044_v37 = vld [vmem:[#allocation3 + $0x21] sm:$0xff]  ;;  %v7046_v20 = vld [vmem:[#allocation3 + $0x31] sm:$0xff]  ;;  %v7051_v31 = vld [vmem:[#allocation3 + $0x59] sm:$0xff] }
 0x44f   : > { %v5949_v60 = vadd.f32 %v19631_v57, %v5829_v0  ;;  %6545 = vst.msk [vmem:[#allocation3 + $0xe0] sm:$0xff] %vm6066_vm2, %v6543_v41  ;;  %v19943_v55 = vpack.c.bf16 %v7045_v30, %v7044_v37  ;;  %v13464_v26 = vld [vmem:[%s21263_s3 + $0x38] sm:$0xff]   ;;  %v19948_v11 = vpack.c.bf16 %v7047_v14, %v7046_v20  ;;  %v13694_v59 = vld [vmem:[%s21263_s3 + $0x30] sm:$0xff]   ;;  %v7048_v23 = vld [vmem:[#allocation3 + $0x41] sm:$0xff] }
 0x450   : > { %v5144_v53 = vadd.f32 %v4917_v27, %v4467_v22  ;;  %6546 = vst.msk [vmem:[#allocation3 + $0xe8] sm:$0x3f] %vm6497_vm4, %v6544_v38  ;;  %v19961_v22 = vld [vmem:[%s21263_s3 + $0x40] sm:$0xff]   ;;  %v19963_v0 = vpack.c.bf16 %v7049_v52, %v7048_v23  ;;  %v7057_v4 = vld [vmem:[#allocation3 + $0x89] sm:$0xff]  ;;  %v7319_v20 = vld [vmem:[#allocation3 + $0x37] sm:$0xff] }
 0x451   : > { %v6062_v15 = vmax.f32 %v5949_v60, 0.0  ;;  %v7055_v38 = vld [vmem:[#allocation3 + $0x79] sm:$0xff]  ;;  %v7052_v60 = vld [vmem:[#allocation3 + $0x61] sm:$0xff] }
 0x452   : > { %v5830_v40 = vadd.f32 %v5604_v29, %v5144_v53  ;;  %v7050_v29 = vld [vmem:[#allocation3 + $0x51] sm:$0xff]  ;;  %v7053_v53 = vld [vmem:[#allocation3 + $0x69] sm:$0xff]  ;;  %v7059_v13 = vld [vmem:[#allocation3 + $0x99] sm:$0xff] }
 0x453   : > { %6177 = vst.msk [vmem:[#allocation2 + $0x371] sm:$0xff] %vm6066_vm2, %v6062_v15  ;;  %v6621_v17 = vld [vmem:[#allocation3 + $0xd0] sm:$0xff]  ;;  %v19966_v41 = vpack.c.bf16 %v7051_v31, %v7050_v29  ;;  %v7317_v36 = vld [vmem:[#allocation3 + $0x27] sm:$0xff]  ;;  %v7320_v52 = vld [vmem:[#allocation3 + $0x3f] sm:$0xff] }
 0x454   : > { %v5950_v7 = vadd.f32 %v19631_v57, %v5830_v40  ;;  %v6622_v39 = vld [vmem:[#allocation3 + $0xd8] sm:$0xff]  ;;  %v6575_v33 = vld [vmem:[#allocation3 + $0xcf] sm:$0xff]  ;;  %v19972_v40 = vpack.c.bf16 %v7053_v53, %v7052_v60 }
 0x455   : > { %v6323_v6 = vld [vmem:[#allocation2 + $0x360] ss:$2 sm:$0xff]  ;;  %v6435_v51 = vld [vmem:[#allocation2 + $0x361] ss:$2 sm:$0xff]  ;;  %v19925_v27 = vpack.c.bf16 %v6622_v39, %v6621_v17  ;;  %v6576_v47 = vld [vmem:[#allocation3 + $0xd7] sm:$0xff] }
 0x456   : > { %v6063_v10 = vmax.f32 %v5950_v7, 0.0  ;;  %v19927_v25 = vpack.c.bf16 %v6576_v47, %v6575_v33  ;;  %v6492_v12 = vmax.f32 %v6323_v6, %v6435_v51  ;;  %v6623_v57 = vld [vmem:[#allocation3 + $0xe0] sm:$0xff]  ;;  %v7054_v15 = vld [vmem:[#allocation3 + $0x71] sm:$0xff]  ;;  %v7061_v51 = vld [vmem:[#allocation3 + $0xa9] sm:$0xff] }
 0x457   : > { %12891 = vmatprep.mubr.msk.bf16.mxu1 %vm6066_vm2, %v19925_v27  ;;  %v6624_v62 = vld [vmem:[#allocation3 + $0xe8] sm:$0xff]  ;;  %v6577_v32 = vld [vmem:[#allocation3 + $0xdf] sm:$0xff]  ;;  %v19974_v7 = vpack.c.bf16 %v7055_v38, %v7054_v15  ;;  %v7058_v33 = vld [vmem:[#allocation3 + $0x91] sm:$0xff] }
 0x458   : > { %6179 = vst.msk [vmem:[#allocation2 + $0x379] sm:$0x7f] %vm6178_vm5, %v6063_v10  ;;  %12923 = vmatprep.mubr.msk.bf16.mxu0 %vm6066_vm2, %v19927_v25  ;;  %v6578_v63 = vld [vmem:[#allocation3 + $0xe7] sm:$0xff]  ;;  %v6547_v3 = vmax.f32 %v6490_v21, %v6492_v12  ;;  %v19933_v34 = vpack.c.bf16 %v6624_v62, %v6623_v57  ;;  %v19982_v6 = vpack.c.bf16 %v7059_v13, %v7058_v33  ;;  %v7063_v10 = vld [vmem:[#allocation3 + $0xb9] sm:$0xff]  ;;  %v7062_v12 = vld [vmem:[#allocation3 + $0xb1] sm:$0xff] }
 0x459   : > { %v19935_v42 = vpack.c.bf16 %v6578_v63, %v6577_v32  ;;  %v7056_v17 = vld [vmem:[#allocation3 + $0x81] sm:$0xff]  ;;  %v19990_v57 = vpack.c.bf16 %v7063_v10, %v7062_v12  ;;  %v7065_v61 = vld [vmem:[#allocation3 + $0xc9] sm:$0xff]  ;;  %v7067_v49 = vld [vmem:[#allocation3 + $0xd9] sm:$0xff] }
 0x45a   : > { %6549 = vst.msk [vmem:[#allocation3 + $0xf0] sm:$0xff] %vm6066_vm2, %v6547_v3  ;;  %12892 = vmatmul.mubr.msk.bf16.gmra.mrb[20].mxu1 %vm6066_vm2, %v19933_v34  ;;  %v19980_v39 = vpack.c.bf16 %v7057_v4, %v7056_v17  ;;  %v7060_v47 = vld [vmem:[#allocation3 + $0xa1] sm:$0xff]  ;;  %v7066_v63 = vld [vmem:[#allocation3 + $0xd1] sm:$0xff] }
 0x45b   : > { %12924 = vmatmul.mubr.msk.bf16.gmra.mrb[24].mxu0 %vm6066_vm2, %v19935_v42  ;;  %v19988_v21 = vpack.c.bf16 %v7061_v51, %v7060_v47  ;;  %v7064_v62 = vld [vmem:[#allocation3 + $0xc1] sm:$0xff]  ;;  %v19998_v3 = vpack.c.bf16 %v7067_v49, %v7066_v63  ;;  %v13467_v29 = vld [vmem:[%s21263_s3 + $0x50] sm:$0xff]  }
 0x45c   : > { %12931 = vmatprep.mubr.msk.bf16.mxu0 %vm6066_vm2, %v7070_v43  ;;  %v19996_v32 = vpack.c.bf16 %v7065_v61, %v7064_v62  ;;  %v13466_v31 = vld [vmem:[%s21263_s3 + $0x48] sm:$0xff]   ;;  %v7323_v53 = vld [vmem:[#allocation3 + $0x57] sm:$0xff]  ;;  %v7324_v4 = vld [vmem:[#allocation3 + $0x5f] sm:$0xff] }
 0x45d   : > { %v7325_v38 = vld [vmem:[#allocation3 + $0x67] sm:$0xff]  ;;  %v7322_v60 = vld [vmem:[#allocation3 + $0x4f] sm:$0xff]  ;;  %v7328_v10 = vld [vmem:[#allocation3 + $0x7f] sm:$0xff] }
 0x45e   : > { %v20032_v15 = vpack.c.bf16 %v7323_v53, %v7322_v60  ;;  %v20034_v13 = vpack.c.bf16 %v7325_v38, %v7324_v4  ;;  %v7329_v17 = vld [vmem:[#allocation3 + $0x87] sm:$0xff]  ;;  %v7326_v33 = vld [vmem:[#allocation3 + $0x6f] sm:$0xff]  ;;  %v7331_v12 = vld [vmem:[#allocation3 + $0x97] sm:$0xff] }
 0x45f   : > { %v6325_v45 = vld [vmem:[#allocation2 + $0x370] ss:$2 sm:$0xff]  ;;  %v6437_v46 = vld [vmem:[#allocation2 + $0x371] ss:$2 sm:$0xff]  ;;  %v20042_v47 = vpack.c.bf16 %v7329_v17, %v7328_v10  ;;  %v7333_v61 = vld [vmem:[#allocation3 + $0xa7] sm:$0xff] }
 0x460   : > { %v6493_v35 = vmax.f32 %v6325_v45, %v6437_v46  ;;  %v7068_v45 = vld [vmem:[#allocation3 + $0xe1] sm:$0xff]  ;;  %v7330_v49 = vld [vmem:[#allocation3 + $0x8f] sm:$0xff]  ;;  %v7593_v53 = vld [vmem:[#allocation3 + $0x38] sm:$0xff] }
 0x461   : > { %v7069_v43 = vld [vmem:[#allocation3 + $0xe9] sm:$0xff]  ;;  %v20048_v62 = vpack.c.bf16 %v7331_v12, %v7330_v49  ;;  %v7332_v63 = vld [vmem:[#allocation3 + $0x9f] sm:$0xff] }
 0x462   : > { %v6548_v44 = vmax.f32 %v6491_v9, %v6493_v35  ;;  %v20008_v30 = vpack.c.bf16 %v7069_v43, %v7068_v45  ;;  %v7316_v35 = vld [vmem:[#allocation3 + $0x1f] sm:$0xff]  ;;  %v20050_v43 = vpack.c.bf16 %v7333_v61, %v7332_v63  ;;  %v7334_v45 = vld [vmem:[#allocation3 + $0xaf] sm:$0xff] }
 0x463   : > { %12932 = vmatmul.mubr.msk.bf16.vlgmr.msra.gmra.mrb[0].mxu0 %vm6066_vm2, %v19943_v55  ;;  %v7344_v9 = vpack.c.bf16 %v7317_v36, %v7316_v35  ;;  %v7335_v36 = vld [vmem:[#allocation3 + $0xb7] sm:$0xff]  ;;  %v7594_v4 = vld [vmem:[#allocation3 + $0x40] sm:$0xff]  ;;  %v7599_v12 = vld [vmem:[#allocation3 + $0x68] sm:$0xff] }
 0x464   : > { %6550 = vst.msk [vmem:[#allocation3 + $0xf8] sm:$0x3f] %vm6497_vm4, %v6548_v44  ;;  %12960 = vmatpush3.bf16.msra.mxu0 %v13694_v59  ;;  %12935 = vmatprep.mubr.msk.bf16.mxu0 %vm6066_vm2, %v19948_v11  ;;  %v7318_v44 = vld [vmem:[#allocation3 + $0x2f] sm:$0xff]  ;;  %v20056_v35 = vpack.c.bf16 %v7335_v36, %v7334_v45  ;;  %v7597_v10 = vld [vmem:[#allocation3 + $0x58] sm:$0xff]  ;;  %v7598_v63 = vld [vmem:[#allocation3 + $0x60] sm:$0xff] }
 0x465   : > { %12961 = vmatprep.subr.bf16.mxu0 %v13464_v26  ;;  %v20017_v59 = vpack.c.bf16 %v7319_v20, %v7318_v44  ;;  %v7591_v20 = vld [vmem:[#allocation3 + $0x28] sm:$0xff]  ;;  %v7592_v38 = vld [vmem:[#allocation3 + $0x30] sm:$0xff]  ;;  %v20087_v36 = vpack.c.bf16 %v7599_v12, %v7598_v63 }
 0x466   : > { %v20071_v60 = vpack.c.bf16 %v7593_v53, %v7592_v38  ;;  %v7596_v61 = vld [vmem:[#allocation3 + $0x50] sm:$0xff]  ;;  %v7603_v45 = vld [vmem:[#allocation3 + $0x88] sm:$0xff] }
 0x467   : > { %v20085_v49 = vpack.c.bf16 %v7597_v10, %v7596_v61  ;;  %v7607_v53 = vld [vmem:[#allocation3 + $0xa8] sm:$0xff]  ;;  %v7609_v10 = vld [vmem:[#allocation3 + $0xb8] sm:$0xff]  ;;  %v7608_v12 = vld [vmem:[#allocation3 + $0xb0] sm:$0xff] }
 0x468   : > { %12962 = vmatpush3.bf16.msra.mxu0 %v13464_v26  ;;  %v7321_v26 = vld [vmem:[#allocation3 + $0x47] sm:$0xff]  ;;  %v20109_v61 = vpack.c.bf16 %v7609_v10, %v7608_v12 }
 0x469   : > { %12991 = vmatprep.subr.bf16.mxu0 %v19961_v22  ;;  %v20022_v23 = vpack.c.bf16 %v7321_v26, %v7320_v52  ;;  %v7342_v26 = vld [vmem:[#allocation3 + $0xef] sm:$0xff]  ;;  %v7590_v52 = vld [vmem:[#allocation3 + $0x20] sm:$0xff] }
 0x46b   : > { %12936 = vmatmul.mubr.msk.bf16.gmra.mrb[4].mxu0 %vm6066_vm2, %v19963_v0  ;;  %v7617_v63 = vld [vmem:[#allocation3 + $0xf8] sm:$0xff] }
 0x46c   : > { %12939 = vmatprep.mubr.msk.bf16.mxu0 %vm6066_vm2, %v19966_v41  ;;  %v7890_v12 = vld [vmem:[#allocation3 + $0xf1] sm:$0xff] }
 0x473   : > { %12940 = vmatmul.mubr.msk.bf16.gmra.mrb[8].mxu0 %vm6066_vm2, %v19972_v40 }
 0x474   : > { %12943 = vmatprep.mubr.msk.bf16.mxu0 %vm6066_vm2, %v19974_v7 }
 0x47b   : > { %12944 = vmatmul.mubr.msk.bf16.gmra.mrb[12].mxu0 %vm6066_vm2, %v19980_v39 }
 0x47c   : > { %12947 = vmatprep.mubr.msk.bf16.mxu0 %vm6066_vm2, %v19982_v6 }
 0x483   : > { %12948 = vmatmul.mubr.msk.bf16.gmra.mrb[16].mxu0 %vm6066_vm2, %v19988_v21 }
 0x484   : > { %12951 = vmatprep.mubr.msk.bf16.mxu0 %vm6066_vm2, %v19990_v57 }
 0x487   : > { %v20004_v54 = vpop.f32.mrb[12].mxu1 }
 0x488   : > { %v20006_v46 = vpop.f32.mrb[13].mxu1 }
 0x489   : > { %v20010_v14 = vpop.f32.mrb[14].mxu1 }
 0x48a   : > { %v20012_v37 = vpop.f32.mrb[15].mxu1 }
 0x48b   : > { %12952 = vmatmul.mubr.msk.bf16.gmra.mrb[20].mxu0 %vm6066_vm2, %v19996_v32 }
 0x48c   : > { %12955 = vmatprep.mubr.msk.bf16.mxu0 %vm6066_vm2, %v19998_v3 }
 0x493   : > { %12956 = vmatmul.mubr.msk.bf16.gmra.mrb[24].mxu0 %vm6066_vm2, %v20008_v30 }
 0x494   : > { %12963 = vmatprep.mubr.msk.bf16.mxu0 %vm6066_vm2, %v7344_v9  ;;  %v7343_v9 = vld [vmem:[#allocation3 + $0xf7] sm:$0xff] }
 0x495   : > { %v20066_v44 = vpack.c.bf16 %v7343_v9, %v7342_v26  ;;  %v7600_v9 = vld [vmem:[#allocation3 + $0x70] sm:$0xff]  ;;  %v7602_v26 = vld [vmem:[#allocation3 + $0x80] sm:$0xff] }
 0x49b   : > { %12964 = vmatmul.mubr.msk.bf16.vlgmr.msra.gmra.mrb[0].mxu0 %vm6066_vm2, %v20017_v59 }
 0x49c   : > { %12992 = vmatpush3.bf16.msra.mxu0 %v19961_v22  ;;  %12967 = vmatprep.mubr.msk.bf16.mxu0 %vm6066_vm2, %v20022_v23  ;;  %v7327_v22 = vld [vmem:[#allocation3 + $0x77] sm:$0xff] }
 0x49d   : > { %12993 = vmatprep.subr.bf16.mxu0 %v13466_v31  ;;  %v20040_v51 = vpack.c.bf16 %v7327_v22, %v7326_v33  ;;  %v13468_v22 = vld [vmem:[%s21263_s3 + $0x58] sm:$0xff]   ;;  %v13469_v33 = vld [vmem:[%s21263_s3 + $0x60] sm:$0xff]  }
 0x4a0   : > { %12994 = vmatpush3.bf16.msra.mxu0 %v13466_v31  ;;  %v7618_v31 = vpack.c.bf16 %v7591_v20, %v7590_v52  ;;  %v20095_v52 = vpack.c.bf16 %v7603_v45, %v7602_v26 }
 0x4a1   : > { %13023 = vmatprep.subr.bf16.mxu0 %v13467_v29 }
 0x4a3   : > { %12968 = vmatmul.mubr.msk.bf16.gmra.mrb[4].mxu0 %vm6066_vm2, %v20032_v15 }
 0x4a4   : > { %12971 = vmatprep.mubr.msk.bf16.mxu0 %vm6066_vm2, %v20034_v13 }
 0x4ab   : > { %12972 = vmatmul.mubr.msk.bf16.gmra.mrb[8].mxu0 %vm6066_vm2, %v20040_v51 }
 0x4ac   : > { %12975 = vmatprep.mubr.msk.bf16.mxu0 %vm6066_vm2, %v20042_v47 }
 0x4b3   : > { %12976 = vmatmul.mubr.msk.bf16.gmra.mrb[12].mxu0 %vm6066_vm2, %v20048_v62 }
 0x4b4   : > { %12979 = vmatprep.mubr.msk.bf16.mxu0 %vm6066_vm2, %v20050_v43 }
 0x4bb   : > { %12980 = vmatmul.mubr.msk.bf16.gmra.mrb[16].mxu0 %vm6066_vm2, %v20056_v35 }
 0x4bc   : > { %12983 = vmatprep.mubr.msk.bf16.mxu0 %vm6066_vm2, %v19756_v1  ;;  %v7595_v1 = vld [vmem:[#allocation3 + $0x48] sm:$0xff] }
 0x4bd   : > { %v20076_v17 = vpack.c.bf16 %v7595_v1, %v7594_v4  ;;  %v7604_v1 = vld [vmem:[#allocation3 + $0x90] sm:$0xff]  ;;  %v7606_v4 = vld [vmem:[#allocation3 + $0xa0] sm:$0xff] }
 0x4c3   : > { %12984 = vmatmul.mubr.msk.bf16.gmra.mrb[20].mxu0 %vm6066_vm2, %v19927_v25 }
 0x4c4   : > { %12987 = vmatprep.mubr.msk.bf16.mxu0 %vm6066_vm2, %v19935_v42 }
 0x4cb   : > { %12988 = vmatmul.mubr.msk.bf16.gmra.mrb[24].mxu0 %vm6066_vm2, %v20066_v44 }
 0x4cc   : > { %12995 = vmatprep.mubr.msk.bf16.mxu0 %vm6066_vm2, %v7618_v31  ;;  %v7605_v31 = vld [vmem:[#allocation3 + $0x98] sm:$0xff] }
 0x4cd   : > { %v20101_v38 = vpack.c.bf16 %v7605_v31, %v7604_v1  ;;  %v13471_v1 = vld [vmem:[%s21263_s3 + $0x70] sm:$0xff]  }
 0x4d3   : > { %12996 = vmatmul.mubr.msk.bf16.vlgmr.msra.gmra.mrb[0].mxu0 %vm6066_vm2, %v20071_v60 }
 0x4d4   : > { %13024 = vmatpush3.bf16.msra.mxu0 %v13467_v29  ;;  %12999 = vmatprep.mubr.msk.bf16.mxu0 %vm6066_vm2, %v20076_v17  ;;  %v7601_v29 = vld [vmem:[#allocation3 + $0x78] sm:$0xff] }
 0x4d5   : > { %13025 = vmatprep.subr.bf16.mxu0 %v13468_v22  ;;  %v20093_v20 = vpack.c.bf16 %v7601_v29, %v7600_v9  ;;  %v7616_v29 = vld [vmem:[#allocation3 + $0xf0] sm:$0xff] }
 0x4d6   : > { %v20121_v9 = vpack.c.bf16 %v7617_v63, %v7616_v29  ;;  %v7891_v63 = vld [vmem:[#allocation3 + $0xf9] sm:$0xff] }
 0x4d7   : > { %v20171_v29 = vpack.c.bf16 %v7891_v63, %v7890_v12  ;;  %v13473_v12 = vld [vmem:[%s21263_s3 + $0x80] sm:$0xff]  }
 0x4d8   : > { %13026 = vmatpush3.bf16.msra.mxu0 %v13468_v22  ;;  %v20103_v22 = vpack.c.bf16 %v7607_v53, %v7606_v4  ;;  %v13470_v53 = vld [vmem:[%s21263_s3 + $0x68] sm:$0xff]  }
 0x4d9   : > { %13055 = vmatprep.subr.bf16.mxu0 %v13469_v33 }
 0x4db   : > { %13000 = vmatmul.mubr.msk.bf16.gmra.mrb[4].mxu0 %vm6066_vm2, %v20085_v49 }
 0x4dc   : > { %13003 = vmatprep.mubr.msk.bf16.mxu0 %vm6066_vm2, %v20087_v36 }
 0x4e3   : > { %13004 = vmatmul.mubr.msk.bf16.gmra.mrb[8].mxu0 %vm6066_vm2, %v20093_v20 }
 0x4e4   : > { %13007 = vmatprep.mubr.msk.bf16.mxu0 %vm6066_vm2, %v20095_v52 }
 0x4eb   : > { %13008 = vmatmul.mubr.msk.bf16.gmra.mrb[12].mxu0 %vm6066_vm2, %v20101_v38 }
 0x4ec   : > { %13011 = vmatprep.mubr.msk.bf16.mxu0 %vm6066_vm2, %v20103_v22 }
 0x4f3   : > { %13012 = vmatmul.mubr.msk.bf16.gmra.mrb[16].mxu0 %vm6066_vm2, %v20109_v61 }
 0x4f4   : > { %13015 = vmatprep.mubr.msk.bf16.mxu0 %vm6066_vm2, %v19754_v50 }
 0x4fb   : > { %13016 = vmatmul.mubr.msk.bf16.gmra.mrb[20].mxu0 %vm6066_vm2, %v19925_v27 }
 0x4fc   : > { %13019 = vmatprep.mubr.msk.bf16.mxu0 %vm6066_vm2, %v19933_v34  ;;  %v20119_v45 = vpop.f32.mrb[16].mxu1 }
 0x4fd   : > { %v20123_v26 = vpop.f32.mrb[17].mxu1 }
 0x4fe   : > { %v20125_v31 = vpop.f32.mrb[18].mxu1 }
 0x4ff   : > { %v20129_v50 = vpop.f32.mrb[19].mxu1 }
 0x503   : > { %13020 = vmatmul.mubr.msk.bf16.gmra.mrb[24].mxu0 %vm6066_vm2, %v20121_v9 }
 0x504   : > { %13027 = vmatprep.mubr.msk.bf16.mxu0 %vm6066_vm2, %v19943_v55 }
 0x50b   : > { %13028 = vmatmul.mubr.msk.bf16.vlgmr.msra.gmra.mrb[0].mxu0 %vm6066_vm2, %v19948_v11 }
 0x50c   : > { %13056 = vmatpush3.bf16.msra.mxu0 %v13469_v33  ;;  %13031 = vmatprep.mubr.msk.bf16.mxu0 %vm6066_vm2, %v19963_v0 }
 0x50d   : > { %13057 = vmatprep.subr.bf16.mxu0 %v13470_v53 }
 0x510   : > { %13058 = vmatpush3.bf16.msra.mxu0 %v13470_v53  ;;  %v13472_v53 = vld [vmem:[%s21263_s3 + $0x78] sm:$0xff]  }
 0x511   : > { %13087 = vmatprep.subr.bf16.mxu0 %v13471_v1 }
 0x513   : > { %13032 = vmatmul.mubr.msk.bf16.gmra.mrb[4].mxu0 %vm6066_vm2, %v19966_v41 }
 0x514   : > { %13035 = vmatprep.mubr.msk.bf16.mxu0 %vm6066_vm2, %v19972_v40 }
 0x51b   : > { %13036 = vmatmul.mubr.msk.bf16.gmra.mrb[8].mxu0 %vm6066_vm2, %v19974_v7 }
 0x51c   : > { %13039 = vmatprep.mubr.msk.bf16.mxu0 %vm6066_vm2, %v19980_v39 }
 0x523   : > { %13040 = vmatmul.mubr.msk.bf16.gmra.mrb[12].mxu0 %vm6066_vm2, %v19982_v6 }
 0x524   : > { %13043 = vmatprep.mubr.msk.bf16.mxu0 %vm6066_vm2, %v19988_v21 }
 0x52b   : > { %13044 = vmatmul.mubr.msk.bf16.gmra.mrb[16].mxu0 %vm6066_vm2, %v19990_v57 }
 0x52c   : > { %13047 = vmatprep.mubr.msk.bf16.mxu0 %vm6066_vm2, %v19996_v32 }
 0x52d   : > { %v20159_v55 = vpop.f32.mrb[20].mxu1 }
 0x52e   : > { %v20161_v33 = vpop.f32.mrb[21].mxu1 }
 0x52f   : > { %v20163_v4 = vpop.f32.mrb[22].mxu1 }
 0x530   : > { %v20165_v10 = vpop.f32.mrb[23].mxu1 }
 0x533   : > { %13048 = vmatmul.mubr.msk.bf16.gmra.mrb[20].mxu0 %vm6066_vm2, %v19998_v3 }
 0x534   : > { %13051 = vmatprep.mubr.msk.bf16.mxu0 %vm6066_vm2, %v20008_v30 }
 0x53b   : > { %13052 = vmatmul.mubr.msk.bf16.gmra.mrb[24].mxu0 %vm6066_vm2, %v20171_v29 }
 0x53c   : > { %13059 = vmatprep.mubr.msk.bf16.mxu0 %vm6066_vm2, %v20017_v59  ;;  %v8157_v59 = vld [vmem:[#allocation3 + $0xc7] sm:$0xff] }
 0x543   : > { %13060 = vmatmul.mubr.msk.bf16.vlgmr.msra.gmra.mrb[0].mxu0 %vm6066_vm2, %v20022_v23  ;;  %v8156_v23 = vld [vmem:[#allocation3 + $0xbf] sm:$0xff] }
 0x544   : > { %13088 = vmatpush3.bf16.msra.mxu0 %v13471_v1  ;;  %13063 = vmatprep.mubr.msk.bf16.mxu0 %vm6066_vm2, %v20032_v15  ;;  %v8175_v15 = vpack.c.bf16 %v8157_v59, %v8156_v23  ;;  %v13761_v1 = vmov 1966171168  }
 0x545   : > { %13089 = vmatprep.subr.bf16.mxu0 %v13472_v53  ;;  %v9129_v63 = vunpack.c.l.s4 %v13761_v1 }
 0x548   : > { %13090 = vmatpush3.bf16.msra.mxu0 %v13472_v53 }
 0x549   : > { %13119 = vmatprep.subr.bf16.mxu0 %v13473_v12 }
 0x54b   : > { %13064 = vmatmul.mubr.msk.bf16.gmra.mrb[4].mxu0 %vm6066_vm2, %v20034_v13  ;;  %v8164_v13 = vld [vmem:[#allocation3 + $0xff] sm:$0xff] }
 0x54c   : > { %13067 = vmatprep.mubr.msk.bf16.mxu0 %vm6066_vm2, %v20040_v51  ;;  %v8165_v51 = vld [vmem:[#allocation3 + $0x107] sm:$0xff] }
 0x553   : > { %13068 = vmatmul.mubr.msk.bf16.gmra.mrb[8].mxu0 %vm6066_vm2, %v20042_v47  ;;  %v8179_v47 = vpack.c.bf16 %v8165_v51, %v8164_v13 }
 0x554   : > { %13071 = vmatprep.mubr.msk.bf16.mxu0 %vm6066_vm2, %v20048_v62  ;;  %v13474_v62 = vld [vmem:[%s21263_s3 + $0x88] sm:$0xff]  }
 0x55b   : > { %13072 = vmatmul.mubr.msk.bf16.gmra.mrb[12].mxu0 %vm6066_vm2, %v20050_v43 }
 0x55c   : > { %13075 = vmatprep.mubr.msk.bf16.mxu0 %vm6066_vm2, %v20056_v35  ;;  %v8438_v35 = vld [vmem:[#allocation3 + $0x100] sm:$0xff] }
 0x563   : > { %13076 = vmatmul.mubr.msk.bf16.gmra.mrb[16].mxu0 %vm6066_vm2, %v8175_v15 }
 0x564   : > { %13079 = vmatprep.mubr.msk.bf16.mxu0 %vm6066_vm2, %v19927_v25  ;;  %v8431_v25 = vld [vmem:[#allocation3 + $0xc8] sm:$0xff] }
 0x56b   : > { %13080 = vmatmul.mubr.msk.bf16.gmra.mrb[20].mxu0 %vm6066_vm2, %v19935_v42  ;;  %v8430_v42 = vld [vmem:[#allocation3 + $0xc0] sm:$0xff] }
 0x56c   : > { %13083 = vmatprep.mubr.msk.bf16.mxu0 %vm6066_vm2, %v20066_v44  ;;  %v8449_v43 = vpack.c.bf16 %v8431_v25, %v8430_v42  ;;  %v8439_v44 = vld [vmem:[#allocation3 + $0x108] sm:$0xff]  ;;  %v9130_v25 = vunpack.c.0.s8 %v9129_v63 }
 0x573   : > { %13084 = vmatmul.mubr.msk.bf16.gmra.mrb[24].mxu0 %vm6066_vm2, %v8179_v47  ;;  %v21602_v47 = vld [vmem:[#allocation18_spill] sm:$0xff] }
 0x574   : > { %13091 = vmatprep.mubr.msk.bf16.mxu0 %vm6066_vm2, %v20071_v60  ;;  %v8453_v60 = vpack.c.bf16 %v8439_v44, %v8438_v35 }
 0x57b   : > { %13092 = vmatmul.mubr.msk.bf16.vlgmr.msra.gmra.mrb[0].mxu0 %vm6066_vm2, %v20076_v17 }
 0x57c   : > { %13120 = vmatpush3.bf16.msra.mxu0 %v13473_v12  ;;  %13095 = vmatprep.mubr.msk.bf16.mxu0 %vm6066_vm2, %v20085_v49 }
 0x57d   : > { %13121 = vmatprep.subr.bf16.mxu0 %v13474_v62 }
 0x580   : > { %13122 = vmatpush3.bf16.msra.mxu0 %v13474_v62 }
 0x583   : > { %13096 = vmatmul.mubr.msk.bf16.gmra.mrb[4].mxu0 %vm6066_vm2, %v20087_v36 }
 0x584   : > { %13099 = vmatprep.mubr.msk.bf16.mxu0 %vm6066_vm2, %v20093_v20 }
 0x58b   : > { %13100 = vmatmul.mubr.msk.bf16.gmra.mrb[8].mxu0 %vm6066_vm2, %v20095_v52 }
 0x58c   : > { %13103 = vmatprep.mubr.msk.bf16.mxu0 %vm6066_vm2, %v20101_v38 }
 0x593   : > { %13104 = vmatmul.mubr.msk.bf16.gmra.mrb[12].mxu0 %vm6066_vm2, %v20103_v22 }
 0x594   : > { %13107 = vmatprep.mubr.msk.bf16.mxu0 %vm6066_vm2, %v20109_v61 }
 0x59b   : > { %13108 = vmatmul.mubr.msk.bf16.gmra.mrb[16].mxu0 %vm6066_vm2, %v8449_v43 }
 0x59c   : > { %13111 = vmatprep.mubr.msk.bf16.mxu0 %vm6066_vm2, %v19925_v27  ;;  %v8712_v27 = vld [vmem:[#allocation3 + $0x101] sm:$0xff] }
 0x5a3   : > { %13112 = vmatmul.mubr.msk.bf16.gmra.mrb[20].mxu0 %vm6066_vm2, %v19933_v34  ;;  %v8713_v34 = vld [vmem:[#allocation3 + $0x109] sm:$0xff] }
 0x5a4   : > { %13115 = vmatprep.mubr.msk.bf16.mxu0 %vm6066_vm2, %v20121_v9 }
 0x5ab   : > { %13116 = vmatmul.mubr.msk.bf16.gmra.mrb[24].mxu0 %vm6066_vm2, %v8453_v60 }
 0x5ac   : > { %13123 = vmatprep.mubr.msk.bf16.mxu0 %vm6066_vm2, %v19948_v11  ;;  %v8727_v11 = vpack.c.bf16 %v8713_v34, %v8712_v27 }
 0x5b3   : > { %13124 = vmatmul.mubr.msk.bf16.vlgmr.msra.gmra.mrb[0].mxu0 %vm6066_vm2, %v19963_v0  ;;  %v13475_v0 = vld [vmem:[%s21265_s5 + $0x40] sm:$0xff]  }
 0x5b4   : > { %13127 = vmatprep.mubr.msk.bf16.mxu0 %vm6066_vm2, %v19966_v41  ;;  %v13476_v41 = vld [vmem:[%s21265_s5] sm:$0xff]   ;;  %12585 = vmatprep.subr.bf16.mxu1 %v13475_v0 }
 0x5b5   : > { %12586 = vmatpush3.bf16.msra.mxu1 %v13476_v41 }
 0x5bb   : > { %13128 = vmatmul.mubr.msk.bf16.gmra.mrb[4].mxu0 %vm6066_vm2, %v19972_v40  ;;  %v13477_v40 = vld [vmem:[%s21265_s5 + $0x48] sm:$0xff]  }
 0x5bc   : > { %13131 = vmatprep.mubr.msk.bf16.mxu0 %vm6066_vm2, %v19974_v7  ;;  %v13478_v7 = vld [vmem:[%s21265_s5 + $0x8] sm:$0xff]   ;;  %12587 = vmatprep.subr.bf16.mxu1 %v13477_v40 }
 0x5bd   : > { %12588 = vmatpush3.bf16.msra.mxu1 %v13478_v7 }
 0x5c3   : > { %13132 = vmatmul.mubr.msk.bf16.gmra.mrb[8].mxu0 %vm6066_vm2, %v19980_v39  ;;  %v13479_v39 = vld [vmem:[%s21265_s5 + $0x50] sm:$0xff]  }
 0x5c4   : > { %13135 = vmatprep.mubr.msk.bf16.mxu0 %vm6066_vm2, %v19982_v6  ;;  %v13480_v6 = vld [vmem:[%s21265_s5 + $0x10] sm:$0xff]   ;;  %12589 = vmatprep.subr.bf16.mxu1 %v13479_v39 }
 0x5c5   : > { %12590 = vmatpush3.bf16.msra.mxu1 %v13480_v6  ;;  %v21603_v39 = vld [vmem:[#allocation9_spill] sm:$0xff] }
 0x5c6   : > { %v20311_v6 = vsub.s32 %v9130_v25, %v21603_v39 }
 0x5cb   : > { %13136 = vmatmul.mubr.msk.bf16.gmra.mrb[12].mxu0 %vm6066_vm2, %v19988_v21  ;;  %v20284_v21 = vld [vmem:[%s21264_s4] ss:$0 sm:$0xff] }
 0x5cc   : > { %13139 = vmatprep.mubr.msk.bf16.mxu0 %vm6066_vm2, %v19990_v57 }
 0x5d3   : > { %13140 = vmatmul.mubr.msk.bf16.gmra.mrb[16].mxu0 %vm6066_vm2, %v19996_v32 }
 0x5d4   : > { %13143 = vmatprep.mubr.msk.bf16.mxu0 %vm6066_vm2, %v19998_v3 }
 0x5db   : > { %13144 = vmatmul.mubr.msk.bf16.gmra.mrb[20].mxu0 %vm6066_vm2, %v20008_v30 }
 0x5dc   : > { %13147 = vmatprep.mubr.msk.bf16.mxu0 %vm6066_vm2, %v20171_v29 }
 0x5e3   : > { %13148 = vmatmul.mubr.msk.bf16.gmra.mrb[24].mxu0 %vm6066_vm2, %v8727_v11 }
 0x686   : > { %v13125_v57 = vpop.f32.mrb[0].mxu0 }
 0x687   : > { %v8969_v32 = vadd.f32 %v13125_v57, %v20284_v21  ;;  %v8821_v3 = vpop.f32.mrb[1].mxu0 }
 0x688   : > { %v8967_v30 = vadd.f32 %v20284_v21, %v8821_v3  ;;  %v13126_v17 = vpop.f32.mrb[2].mxu0  ;;  %v21604_v3 = vlaneseq }
 0x689   : > { %v8997_v49 = vmax.f32 %v8969_v32, 0.0  ;;  %v8970_v36 = vadd.f32 %v13126_v17, %v20284_v21  ;;  %v8824_v20 = vpop.f32.mrb[3].mxu0  ;;  %v13483_v17 = vld [vmem:[%s21265_s5 + $0x60] sm:$0xff]  }
 0x68a   : > { %v8995_v52 = vmax.f32 %v8967_v30, 0.0  ;;  %v8968_v38 = vadd.f32 %v20284_v21, %v8824_v20  ;;  %vm20316_vm7 = vcmp.lt.s32.totalorder %v21604_v3, 64  ;;  %vm9153_vm8 = vcmp.ge.s32.totalorder %v21604_v3, 64 }
 0x68b   : > { %9026 = vst.msk [vmem:[#allocation4 + $0x10] sm:$0xff] %vm9023_vm6, %v8997_v49  ;;  %v8998_v22 = vmax.f32 %v8970_v36, 0.0  ;;  %v13484_v49 = vld [vmem:[%s21265_s5 + $0x20] sm:$0xff]   ;;  %vm9154_vm9 = vcmp.lt.s32.totalorder %v21604_v3, 128 }
 0x68c   : > { %9024 = vst.msk [vmem:[#allocation4] sm:$0xff] %vm9023_vm6, %v8995_v52  ;;  %v8996_v61 = vmax.f32 %v8968_v38, 0.0  ;;  %vm20525_vm10 = vmand %vm9153_vm8, %vm9154_vm9 }
 0x68d   : > { %9027 = vst.msk [vmem:[#allocation4 + $0x18] sm:$0xff] %vm9023_vm6, %v8998_v22 }
 0x68e   : > { %9025 = vst.msk [vmem:[#allocation4 + $0x8] sm:$0xff] %vm9023_vm6, %v8996_v61  ;;  %v13129_v9 = vpop.f32.mrb[4].mxu0 }
 0x68f   : > { %v13187_v29 = vadd.f32 %v13129_v9, %v19576_v8  ;;  %v8837_v53 = vpop.f32.mrb[5].mxu0  ;;  %v13481_v8 = vld [vmem:[%s21265_s5 + $0x58] sm:$0xff]  }
 0x690   : > { %v13188_v12 = vadd.f32 %v8837_v53, %v19586_v19  ;;  %v13130_v59 = vpop.f32.mrb[6].mxu0  ;;  %v13482_v19 = vld [vmem:[%s21265_s5 + $0x18] sm:$0xff]   ;;  %12591 = vmatprep.subr.bf16.mxu1 %v13481_v8 }
 0x691   : > { %v8973_v23 = vadd.f32 %v13187_v29, %v20284_v21  ;;  %v13189_v15 = vadd.f32 %v13130_v59, %v19591_v58  ;;  %v8840_v13 = vpop.f32.mrb[7].mxu0  ;;  %12592 = vmatpush3.bf16.msra.mxu1 %v13482_v19 }
 0x692   : > { %v8971_v51 = vadd.f32 %v13188_v12, %v20284_v21  ;;  %v13190_v62 = vadd.f32 %v8840_v13, %v21602_v47  ;;  %12593 = vmatprep.subr.bf16.mxu1 %v13483_v17 }
 0x693   : > { %v9001_v42 = vmax.f32 %v8973_v23, 0.0  ;;  %v8974_v43 = vadd.f32 %v13189_v15, %v20284_v21 }
 0x694   : > { %v8999_v35 = vmax.f32 %v8971_v51, 0.0  ;;  %v8972_v58 = vadd.f32 %v13190_v62, %v20284_v21  ;;  %v9054_v44 = vld [vmem:[#allocation4 + $0x10] ss:$2 sm:$0xff]  ;;  %v9082_v60 = vld [vmem:[#allocation4 + $0x11] ss:$2 sm:$0xff] }
 0x695   : > { %9030 = vst.msk [vmem:[#allocation4 + $0x30] sm:$0xff] %vm9023_vm6, %v9001_v42  ;;  %v9002_v27 = vmax.f32 %v8974_v43, 0.0  ;;  %v9052_v34 = vld [vmem:[#allocation4] ss:$2 sm:$0xff]  ;;  %v9080_v11 = vld [vmem:[#allocation4 + $0x1] ss:$2 sm:$0xff]  ;;  %v9108_v0 = vmax.f32 %v9054_v44, %v9082_v60  ;;  %12594 = vmatpush3.bf16.msra.mxu1 %v13484_v49 }
 0x696   : > { %9028 = vst.msk [vmem:[#allocation4 + $0x20] sm:$0xff] %vm9023_vm6, %v8999_v35  ;;  %v9000_v41 = vmax.f32 %v8972_v58, 0.0  ;;  %v13133_v40 = vpop.f32.mrb[8].mxu0  ;;  %v9107_v7 = vmax.f32 %v9052_v34, %v9080_v11  ;;  %v13485_v60 = vld [vmem:[%s21265_s5 + $0x68] sm:$0xff]  }
 0x697   : > { %9031 = vst.msk [vmem:[#allocation4 + $0x38] sm:$0xff] %vm9023_vm6, %v9002_v27  ;;  %v13191_v57 = vadd.f32 %v13133_v40, %v19768_v5  ;;  %v8853_v32 = vpop.f32.mrb[9].mxu0  ;;  %12595 = vmatprep.subr.bf16.mxu1 %v13485_v60 }
 0x698   : > { %9029 = vst.msk [vmem:[#allocation4 + $0x28] sm:$0xff] %vm9023_vm6, %v9000_v41  ;;  %v13192_v36 = vadd.f32 %v8853_v32, %v19778_v18  ;;  %v13134_v20 = vpop.f32.mrb[10].mxu0  ;;  %v9121_v5 = vmax.f32 %v9107_v7, %v9108_v0 }
 0x699   : > { %v8977_v52 = vadd.f32 %v13191_v57, %v20284_v21  ;;  %v13193_v38 = vadd.f32 %v13134_v20, %v19784_v2  ;;  %v8856_v22 = vpop.f32.mrb[11].mxu0 }
 0x69a   : > { %v8975_v61 = vadd.f32 %v13192_v36, %v20284_v21  ;;  %v13194_v9 = vadd.f32 %v8856_v22, %v19788_v24  ;;  %v9134_v1 = vrot.slane %v9121_v5, %v20311_v6  ;;  %v9165_v63 = vcombine.high %v9121_v5, %v9121_v5  ;;  %9126 = vst.msk [vmem:[#allocation5] sm:$0x1] %vm20316_vm7, %v9121_v5  ;;  %v13488_v22 = vld [vmem:[%s21265_s5 + $0x30] sm:$0xff]  }
 0x69b   : > { %v9005_v18 = vmax.f32 %v8977_v52, 0.0  ;;  %v8978_v29 = vadd.f32 %v13193_v38, %v20284_v21  ;;  %v13487_v38 = vld [vmem:[%s21265_s5 + $0x70] sm:$0xff]  }
 0x69c   : > { %v9003_v53 = vmax.f32 %v8975_v61, 0.0  ;;  %v8976_v12 = vadd.f32 %v13194_v9, %v20284_v21  ;;  %v9135_v2 = vcombine.high %v9134_v1, %v9134_v1  ;;  %v9172_v59 = vrot.slane %v9165_v63, %v20311_v6 }
 0x69d   : > { %9034 = vst.msk [vmem:[#allocation4 + $0x50] sm:$0xff] %vm9023_vm6, %v9005_v18  ;;  %v9006_v23 = vmax.f32 %v8978_v29, 0.0  ;;  %v9142_v24 = vrot.slane %v9134_v1, %v20311_v6 }
 0x69e   : > { %9032 = vst.msk [vmem:[#allocation4 + $0x40] sm:$0xff] %vm9023_vm6, %v9003_v53  ;;  %v9004_v15 = vmax.f32 %v8976_v12, 0.0  ;;  %v13137_v13 = vpop.f32.mrb[12].mxu0  ;;  %v9149_v51 = vrot.slane %v9135_v2, %v20311_v6  ;;  %v9182_v47 = vcombine.high %v9172_v59, %v9172_v59  ;;  %v9058_v62 = vld [vmem:[#allocation4 + $0x30] ss:$2 sm:$0xff]  ;;  %v9179_v42 = vrot.slane %v9172_v59, %v20311_v6 }
 0x69f   : > { %v9086_v25 = vld [vmem:[#allocation4 + $0x31] ss:$2 sm:$0xff]  ;;  %9035 = vst.msk [vmem:[#allocation4 + $0x58] sm:$0xff] %vm9023_vm6, %v9006_v23  ;;  %v13195_v43 = vadd.f32 %v13137_v13, %v19907_v56  ;;  %v8869_v8 = vpop.f32.mrb[13].mxu0  ;;  %v9056_v19 = vld [vmem:[#allocation4 + $0x20] ss:$2 sm:$0xff]  ;;  %v9157_v44 = vcombine.high %v9142_v24, %v9142_v24 }
 0x6a0   : > { %v9084_v35 = vld [vmem:[#allocation4 + $0x21] ss:$2 sm:$0xff]  ;;  %v9110_v58 = vmax.f32 %v9058_v62, %v9086_v25  ;;  %9033 = vst.msk [vmem:[#allocation4 + $0x48] sm:$0xff] %vm9023_vm6, %v9004_v15  ;;  %v13196_v27 = vadd.f32 %v8869_v8, %v19912_v28  ;;  %9150 = vrot.lane.b32.xlu0 %v9149_v51, %s13762_s29  ;;  %v13138_v34 = vpop.f32.mrb[14].mxu0  ;;  %v9160_v11 = vcombine.high %v9149_v51, %v9149_v51  ;;  %v13486_v56 = vld [vmem:[%s21265_s5 + $0x28] sm:$0xff]  }
 0x6a1   : > { %v9109_v0 = vmax.f32 %v9056_v19, %v9084_v35  ;;  %9181 = vst.msk [vmem:[#allocation5 + $0x2] sm:$0x1] %vm20316_vm7, %v9179_v42  ;;  %v8981_v41 = vadd.f32 %v13195_v43, %v20284_v21  ;;  %v13197_v40 = vadd.f32 %v13138_v34, %v19916_v16  ;;  %v8872_v7 = vpop.f32.mrb[15].mxu0  ;;  %v9189_v28 = vrot.slane %v9182_v47, %v20311_v6 }
 0x6a2   : > { %9159 = vst.msk [vmem:[#allocation5 + $0x1] sm:$0x1] %vm20316_vm7, %v9157_v44  ;;  %v9194_v39 = vcombine.high %v9179_v42, %v9179_v42  ;;  %v8979_v57 = vadd.f32 %v13196_v27, %v20284_v21  ;;  %v13198_v32 = vadd.f32 %v8872_v7, %v19918_v48  ;;  %9161 = vrot.lane.b32.xlu1 %v9160_v11, %s13762_s29 }
 0x6a3   : > { %v9197_v17 = vmax.f32 %v9109_v0, %v9110_v58  ;;  %12596 = vmatpush3.bf16.msra.mxu1 %v13486_v56  ;;  %v9009_v49 = vmax.f32 %v8981_v41, 0.0  ;;  %v8982_v36 = vadd.f32 %v13197_v40, %v20284_v21  ;;  %v13489_v56 = vld [vmem:[%s21265_s5 + $0x78] sm:$0xff]  }
 0x6a4   : > { %9196 = vst.msk [vmem:[#allocation5 + $0x3] sm:$0x1] %vm20316_vm7, %v9194_v39  ;;  %v9007_v16 = vmax.f32 %v8979_v57, 0.0  ;;  %v8980_v20 = vadd.f32 %v13198_v32, %v20284_v21  ;;  %9190 = vrot.lane.b32.xlu0 %v9189_v28, %s13762_s29  ;;  %12597 = vmatprep.subr.bf16.mxu1 %v13487_v38  ;;  %v13490_v41 = vld [vmem:[%s21265_s5 + $0x38] sm:$0xff]  }
 0x6a5   : > { %v9205_v5 = vrot.slane %v9197_v17, %v20311_v6  ;;  %v9235_v52 = vcombine.high %v9197_v17, %v9197_v17  ;;  %9038 = vst.msk [vmem:[#allocation4 + $0x70] sm:$0xff] %vm9023_vm6, %v9009_v49  ;;  %v9010_v48 = vmax.f32 %v8982_v36, 0.0 }
 0x6a6   : > { %9036 = vst.msk [vmem:[#allocation4 + $0x60] sm:$0xff] %vm9023_vm6, %v9007_v16  ;;  %v9008_v61 = vmax.f32 %v8980_v20, 0.0  ;;  %v13141_v9 = vpop.f32.mrb[16].mxu0  ;;  %v9062_v18 = vld [vmem:[#allocation4 + $0x50] ss:$2 sm:$0xff] }
 0x6a7   : > { %v9212_v1 = vrot.slane %v9205_v5, %v20311_v6  ;;  %v9242_v63 = vrot.slane %v9235_v52, %v20311_v6  ;;  %v9090_v29 = vld [vmem:[#allocation4 + $0x51] ss:$2 sm:$0xff]  ;;  %v9217_v53 = vcombine.high %v9205_v5, %v9205_v5  ;;  %9039 = vst.msk [vmem:[#allocation4 + $0x78] sm:$0xff] %vm9023_vm6, %v9010_v48  ;;  %v13199_v12 = vadd.f32 %v13141_v9, %v20004_v54  ;;  %v8885_v2 = vpop.f32.mrb[17].mxu0  ;;  %v9060_v59 = vld [vmem:[#allocation4 + $0x40] ss:$2 sm:$0xff] }
 0x6a8   : > { %v9088_v23 = vld [vmem:[#allocation4 + $0x41] ss:$2 sm:$0xff]  ;;  %v9112_v24 = vmax.f32 %v9062_v18, %v9090_v29  ;;  %9037 = vst.msk [vmem:[#allocation4 + $0x68] sm:$0xff] %vm9023_vm6, %v9008_v61  ;;  %v13200_v15 = vadd.f32 %v8885_v2, %v20006_v46  ;;  %v13142_v13 = vpop.f32.mrb[18].mxu0  ;;  %12598 = vmatpush3.bf16.msra.mxu1 %v13488_v22 }
 0x6a9   : > { %9213 = vrot.lane.b32.xlu1 %v9212_v1, %s13762_s29  ;;  %v9227_v51 = vcombine.high %v9212_v1, %v9212_v1  ;;  %v9249_v47 = vrot.slane %v9242_v63, %v20311_v6  ;;  %v9111_v62 = vmax.f32 %v9060_v59, %v9088_v23  ;;  %v8985_v25 = vadd.f32 %v13199_v12, %v20284_v21  ;;  %v8888_v42 = vpop.f32.mrb[19].mxu0  ;;  %v13491_v2 = vld [vmem:[%s21265_s5 + $0xc0] sm:$0xff]  }
 0x6aa   : > { %v13201_v54 = vadd.f32 %v13142_v13, %v20010_v14  ;;  %v9224_v43 = vrot.slane %v9217_v53, %v20311_v6  ;;  %v9254_v8 = vcombine.high %v9242_v63, %v9242_v63  ;;  %v8983_v19 = vadd.f32 %v13200_v15, %v20284_v21  ;;  %12599 = vmatprep.subr.bf16.mxu1 %v13489_v56 }
 0x6ab   : > { %v13202_v46 = vadd.f32 %v8888_v42, %v20012_v37  ;;  %9228 = vrot.lane.b32.xlu0 %v9227_v51, %s13762_s29  ;;  %v9264_v35 = vcombine.high %v9249_v47, %v9249_v47  ;;  %v9269_v58 = vmax.f32 %v9111_v62, %v9112_v24  ;;  %v9013_v44 = vmax.f32 %v8985_v25, 0.0 }
 0x6ac   : > { %v8986_v60 = vadd.f32 %v13201_v54, %v20284_v21  ;;  %9226 = vst.msk [vmem:[#allocation5 + $0x4] sm:$0x1] %vm20316_vm7, %v9224_v43  ;;  %v9232_v14 = vcombine.high %v9224_v43, %v9224_v43  ;;  %v9261_v27 = vrot.slane %v9254_v8, %v20311_v6  ;;  %v9011_v34 = vmax.f32 %v8983_v19, 0.0  ;;  %12600 = vmatpush3.bf16.msra.mxu1 %v13490_v41 }
 0x6ad   : > { %v8984_v11 = vadd.f32 %v13202_v46, %v20284_v21  ;;  %9250 = vrot.lane.b32.xlu1 %v9249_v47, %s13762_s29  ;;  %v9278_v37 = vrot.slane %v9269_v58, %v20311_v6  ;;  %v9306_v0 = vcombine.high %v9269_v58, %v9269_v58  ;;  %9270 = vst.msk [vmem:[#allocation5 + $0x7] sm:$0x1] %vm20316_vm7, %v9269_v58 }
 0x6ae   : > { %9042 = vst.msk [vmem:[#allocation4 + $0x90] sm:$0xff] %vm9023_vm6, %v9013_v44  ;;  %v9014_v40 = vmax.f32 %v8986_v60, 0.0  ;;  %9040 = vst.msk [vmem:[#allocation4 + $0x80] sm:$0xff] %vm9023_vm6, %v9011_v34  ;;  %v13145_v28 = vpop.f32.mrb[20].mxu0  ;;  %v9066_v32 = vld [vmem:[#allocation4 + $0x70] ss:$2 sm:$0xff]  ;;  %12607 = vmatprep.subr.bf16.mxu1 %v13491_v2 }
 0x6af   : > { %9234 = vst.msk [vmem:[#allocation5 + $0x5] sm:$0x1] %vm20316_vm7, %v9232_v14  ;;  %9263 = vst.msk [vmem:[#allocation5 + $0x6] sm:$0x1] %vm20316_vm7, %v9261_v27  ;;  %v9012_v7 = vmax.f32 %v8984_v11, 0.0  ;;  %9265 = vrot.lane.b32.xlu0 %v9264_v35, %s13762_s29  ;;  %v9279_v39 = vcombine.high %v9278_v37, %v9278_v37  ;;  %v9313_v57 = vrot.slane %v9306_v0, %v20311_v6  ;;  %v8901_v16 = vpop.f32.mrb[21].mxu0 }
 0x6b0   : > { %v9094_v17 = vld [vmem:[#allocation4 + $0x71] ss:$2 sm:$0xff]  ;;  %v9286_v49 = vrot.slane %v9278_v37, %v20311_v6  ;;  %9043 = vst.msk [vmem:[#allocation4 + $0x98] sm:$0xff] %vm9023_vm6, %v9014_v40  ;;  %v13203_v36 = vadd.f32 %v13145_v28, %v20119_v45  ;;  %v9064_v20 = vld [vmem:[#allocation4 + $0x60] ss:$2 sm:$0xff]  ;;  %v13204_v48 = vadd.f32 %v8901_v16, %v20123_v26  ;;  %v13146_v38 = vpop.f32.mrb[22].mxu0 }
 0x6b1   : > { %v9092_v5 = vld [vmem:[#allocation4 + $0x61] ss:$2 sm:$0xff]  ;;  %v9114_v52 = vmax.f32 %v9066_v32, %v9094_v17  ;;  %9041 = vst.msk [vmem:[#allocation4 + $0x88] sm:$0xff] %vm9023_vm6, %v9012_v7  ;;  %v9293_v22 = vrot.slane %v9279_v39, %v20311_v6  ;;  %v9323_v61 = vcombine.high %v9313_v57, %v9313_v57  ;;  %v13205_v63 = vadd.f32 %v13146_v38, %v20125_v31  ;;  %v8904_v18 = vpop.f32.mrb[23].mxu0 }
 0x6b2   : > { %v9113_v9 = vmax.f32 %v9064_v20, %v9092_v5  ;;  %v8989_v1 = vadd.f32 %v13203_v36, %v20284_v21  ;;  %v9298_v45 = vcombine.high %v9286_v49, %v9286_v49  ;;  %v9320_v29 = vrot.slane %v9313_v57, %v20311_v6 }
 0x6b3   : > { %v8987_v53 = vadd.f32 %v13204_v48, %v20284_v21  ;;  %v13206_v12 = vadd.f32 %v8904_v18, %v20129_v50  ;;  %9294 = vrot.lane.b32.xlu1 %v9293_v22, %s13762_s29  ;;  %v9301_v26 = vcombine.high %v9293_v22, %v9293_v22  ;;  %v8990_v23 = vadd.f32 %v13205_v63, %v20284_v21 }
 0x6b4   : > { %v9017_v59 = vmax.f32 %v8989_v1, 0.0  ;;  %v9338_v24 = vmax.f32 %v9113_v9, %v9114_v52  ;;  %9300 = vst.msk [vmem:[#allocation5 + $0x8] sm:$0x1] %vm20316_vm7, %v9298_v45  ;;  %9322 = vst.msk [vmem:[#allocation5 + $0x9] sm:$0x1] %vm20316_vm7, %v9320_v29  ;;  %v9335_v31 = vcombine.high %v9320_v29, %v9320_v29  ;;  %v9330_v13 = vrot.slane %v9323_v61, %v20311_v6 }
 0x6b5   : > { %v9015_v15 = vmax.f32 %v8987_v53, 0.0  ;;  %v8988_v50 = vadd.f32 %v13206_v12, %v20284_v21  ;;  %9302 = vrot.lane.b32.xlu0 %v9301_v26, %s13762_s29  ;;  %v9018_v51 = vmax.f32 %v8990_v23, 0.0 }
 0x6b6   : > { %9046 = vst.msk [vmem:[#allocation4 + $0xb0] sm:$0xff] %vm9023_vm6, %v9017_v59  ;;  %v9346_v47 = vrot.slane %v9338_v24, %v20311_v6  ;;  %v9376_v62 = vcombine.high %v9338_v24, %v9338_v24  ;;  %v13149_v54 = vpop.f32.mrb[24].mxu0 }
 0x6b7   : > { %9337 = vst.msk [vmem:[#allocation5 + $0xa] sm:$0x1] %vm20316_vm7, %v9335_v31  ;;  %v9016_v25 = vmax.f32 %v8988_v50, 0.0  ;;  %9331 = vrot.lane.b32.xlu1 %v9330_v13, %s13762_s29  ;;  %v9070_v42 = vld [vmem:[#allocation4 + $0x90] ss:$2 sm:$0xff]  ;;  %v13207_v8 = vadd.f32 %v13149_v54, %v20159_v55  ;;  %v8917_v19 = vpop.f32.mrb[25].mxu0 }
 0x6b8   : > { %9044 = vst.msk [vmem:[#allocation4 + $0xa0] sm:$0xff] %vm9023_vm6, %v9015_v15  ;;  %v9098_v43 = vld [vmem:[#allocation4 + $0x91] ss:$2 sm:$0xff]  ;;  %9047 = vst.msk [vmem:[#allocation4 + $0xb8] sm:$0xff] %vm9023_vm6, %v9018_v51  ;;  %v9353_v46 = vrot.slane %v9346_v47, %v20311_v6  ;;  %v9383_v35 = vrot.slane %v9376_v62, %v20311_v6  ;;  %v9068_v58 = vld [vmem:[#allocation4 + $0x80] ss:$2 sm:$0xff]  ;;  %v13208_v14 = vadd.f32 %v8917_v19, %v20161_v33 }
 0x6b9   : > { %v9096_v44 = vld [vmem:[#allocation4 + $0x81] ss:$2 sm:$0xff]  ;;  %v9116_v60 = vmax.f32 %v9070_v42, %v9098_v43  ;;  %9045 = vst.msk [vmem:[#allocation4 + $0xa8] sm:$0xff] %vm9023_vm6, %v9016_v25  ;;  %v13150_v27 = vpop.f32.mrb[26].mxu0  ;;  %v9358_v11 = vcombine.high %v9346_v47, %v9346_v47  ;;  %v8993_v37 = vadd.f32 %v13207_v8, %v20284_v21 }
 0x6ba   : > { %v9115_v34 = vmax.f32 %v9068_v58, %v9096_v44  ;;  %9354 = vrot.lane.b32.xlu0 %v9353_v46, %s13762_s29  ;;  %v13209_v55 = vadd.f32 %v13150_v27, %v20163_v4  ;;  %v8920_v0 = vpop.f32.mrb[27].mxu0  ;;  %v9368_v56 = vcombine.high %v9353_v46, %v9353_v46  ;;  %v9390_v41 = vrot.slane %v9383_v35, %v20311_v6 }
 0x6bb   : > { %v8991_v40 = vadd.f32 %v13208_v14, %v20284_v21  ;;  %v13210_v7 = vadd.f32 %v8920_v0, %v20165_v10  ;;  %v9365_v33 = vrot.slane %v9358_v11, %v20311_v6  ;;  %v9021_v39 = vmax.f32 %v8993_v37, 0.0 }
 0x6bc   : > { %v9410_v28 = vmax.f32 %v9115_v34, %v9116_v60  ;;  %v8994_v57 = vadd.f32 %v13209_v55, %v20284_v21  ;;  %9369 = vrot.lane.b32.xlu1 %v9368_v56, %s13762_s29  ;;  %v9395_v32 = vcombine.high %v9383_v35, %v9383_v35  ;;  %v9405_v16 = vcombine.high %v9390_v41, %v9390_v41 }
 0x6bd   : > { %v9019_v17 = vmax.f32 %v8991_v40, 0.0  ;;  %v8992_v4 = vadd.f32 %v13210_v7, %v20284_v21  ;;  %9367 = vst.msk [vmem:[#allocation5 + $0xb] sm:$0x1] %vm20316_vm7, %v9365_v33  ;;  %v9373_v20 = vcombine.high %v9365_v33, %v9365_v33  ;;  %v13515_v33 = vld [vmem:[%s21265_s5 + $0x160] sm:$0xff]  }
 0x6be   : > { %v9419_v49 = vrot.slane %v9410_v28, %v20311_v6  ;;  %v9447_v36 = vcombine.high %v9410_v28, %v9410_v28  ;;  %9411 = vst.msk [vmem:[#allocation5 + $0xe] sm:$0x1] %vm20316_vm7, %v9410_v28  ;;  %v9022_v10 = vmax.f32 %v8994_v57, 0.0  ;;  %9391 = vrot.lane.b32.xlu0 %v9390_v41, %s13762_s29  ;;  %v9402_v5 = vrot.slane %v9395_v32, %v20311_v6 }
 0x6bf   : > { %9050 = vst.msk [vmem:[#allocation4 + $0xd0] sm:$0xff] %vm9023_vm6, %v9021_v39  ;;  %9048 = vst.msk [vmem:[#allocation4 + $0xc0] sm:$0xff] %vm9023_vm6, %v9019_v17  ;;  %v9020_v21 = vmax.f32 %v8992_v4, 0.0  ;;  %v9074_v38 = vld [vmem:[#allocation4 + $0xb0] ss:$2 sm:$0xff] }
 0x6c0   : > { %v9420_v52 = vcombine.high %v9419_v49, %v9419_v49  ;;  %v9454_v48 = vrot.slane %v9447_v36, %v20311_v6  ;;  %v9102_v22 = vld [vmem:[#allocation4 + $0xb1] ss:$2 sm:$0xff]  ;;  %v9427_v61 = vrot.slane %v9419_v49, %v20311_v6  ;;  %9051 = vst.msk [vmem:[#allocation4 + $0xd8] sm:$0xff] %vm9023_vm6, %v9022_v10  ;;  %9406 = vrot.lane.b32.xlu1 %v9405_v16, %s13762_s29  ;;  %v9072_v9 = vld [vmem:[#allocation4 + $0xa0] ss:$2 sm:$0xff] }
 0x6c1   : > { %v9100_v1 = vld [vmem:[#allocation4 + $0xa1] ss:$2 sm:$0xff]  ;;  %v9118_v63 = vmax.f32 %v9074_v38, %v9102_v22  ;;  %9375 = vst.msk [vmem:[#allocation5 + $0xc] sm:$0x1] %vm20316_vm7, %v9373_v20  ;;  %9404 = vst.msk [vmem:[#allocation5 + $0xd] sm:$0x1] %vm20316_vm7, %v9402_v5 }
 0x6c2   : > { %9049 = vst.msk [vmem:[#allocation4 + $0xc8] sm:$0xff] %vm9023_vm6, %v9020_v21  ;;  %v9434_v18 = vrot.slane %v9420_v52, %v20311_v6  ;;  %v9464_v45 = vcombine.high %v9454_v48, %v9454_v48  ;;  %v9117_v29 = vmax.f32 %v9072_v9, %v9100_v1  ;;  %v9439_v53 = vcombine.high %v9427_v61, %v9427_v61  ;;  %v21609_v5 = vld [vmem:[#allocation11_spill] sm:$0xff]  ;;  %v21610_v52 = vld [vmem:[#allocation10_spill] sm:$0xff]  ;;  %v21611_v38 = vld [vmem:[#allocation13_spill] sm:$0xff] }
 0x6c3   : > { %v9461_v12 = vrot.slane %v9454_v48, %v20311_v6 }
 0x6c4   : > { %9435 = vrot.lane.b32.xlu0 %v9434_v18, %s13762_s29  ;;  %v9442_v26 = vcombine.high %v9434_v18, %v9434_v18  ;;  %v9479_v2 = vmax.f32 %v9117_v29, %v9118_v63  ;;  %9441 = vst.msk [vmem:[#allocation5 + $0xf] sm:$0x1] %vm20316_vm7, %v9439_v53  ;;  %v9471_v23 = vrot.slane %v9464_v45, %v20311_v6  ;;  %v13492_v63 = vld [vmem:[%s21265_s5 + $0x80] sm:$0xff]   ;;  %v13493_v18 = vld [vmem:[%s21265_s5 + $0xc8] sm:$0xff]  }
 0x6c5   : > { %9463 = vst.msk [vmem:[#allocation5 + $0x10] sm:$0x1] %vm20316_vm7, %v9461_v12  ;;  %v9476_v59 = vcombine.high %v9461_v12, %v9461_v12  ;;  %v13494_v53 = vld [vmem:[%s21265_s5 + $0x88] sm:$0xff]  }
 0x6c6   : > { %9443 = vrot.lane.b32.xlu1 %v9442_v26, %s13762_s29  ;;  %v9487_v24 = vrot.slane %v9479_v2, %v20311_v6  ;;  %v9517_v31 = vcombine.high %v9479_v2, %v9479_v2  ;;  %v13495_v26 = vld [vmem:[%s21265_s5 + $0xd0] sm:$0xff]  }
 0x6c7   : > { %9478 = vst.msk [vmem:[#allocation5 + $0x11] sm:$0x1] %vm20316_vm7, %v9476_v59  ;;  %v9078_v13 = vld [vmem:[#allocation4 + $0xd0] ss:$2 sm:$0xff]  ;;  %v9106_v51 = vld [vmem:[#allocation4 + $0xd1] ss:$2 sm:$0xff] }
 0x6c8   : > { %9472 = vrot.lane.b32.xlu0 %v9471_v23, %s13762_s29  ;;  %v9494_v15 = vrot.slane %v9487_v24, %v20311_v6  ;;  %v9524_v50 = vrot.slane %v9517_v31, %v20311_v6  ;;  %v9499_v47 = vcombine.high %v9487_v24, %v9487_v24  ;;  %v9120_v54 = vmax.f32 %v9078_v13, %v9106_v51  ;;  %v13496_v59 = vld [vmem:[%s21265_s5 + $0x90] sm:$0xff]   ;;  %v13497_v24 = vld [vmem:[%s21265_s5 + $0xd8] sm:$0xff]   ;;  %v13499_v13 = vld [vmem:[%s21265_s5 + $0xe0] sm:$0xff]  }
 0x6c9   : > { %v9076_v62 = vld [vmem:[#allocation4 + $0xc0] ss:$2 sm:$0xff]  ;;  %v9104_v25 = vld [vmem:[#allocation4 + $0xc1] ss:$2 sm:$0xff] }
 0x6ca   : > { %9495 = vrot.lane.b32.xlu1 %v9494_v15, %s13762_s29  ;;  %v9509_v42 = vcombine.high %v9494_v15, %v9494_v15  ;;  %v9531_v43 = vrot.slane %v9524_v50, %v20311_v6  ;;  %v9119_v8 = vmax.f32 %v9076_v62, %v9104_v25  ;;  %v9506_v19 = vrot.slane %v9499_v47, %v20311_v6  ;;  %v13498_v15 = vld [vmem:[%s21265_s5 + $0x98] sm:$0xff]   ;;  %v13500_v47 = vld [vmem:[%s21265_s5 + $0xa0] sm:$0xff]   ;;  %v13501_v25 = vld [vmem:[%s21265_s5 + $0xe8] sm:$0xff]  }
 0x6cb   : > { %v9536_v46 = vcombine.high %v9524_v50, %v9524_v50 }
 0x6cc   : > { %9510 = vrot.lane.b32.xlu0 %v9509_v42, %s13762_s29  ;;  %v9551_v35 = vmax.f32 %v9119_v8, %v9120_v54  ;;  %9508 = vst.msk [vmem:[#allocation5 + $0x12] sm:$0x1] %vm20316_vm7, %v9506_v19  ;;  %v9514_v58 = vcombine.high %v9506_v19, %v9506_v19  ;;  %v9546_v60 = vcombine.high %v9531_v43, %v9531_v43  ;;  %v13502_v54 = vld [vmem:[%s21265_s5 + $0xa8] sm:$0xff]   ;;  %v13504_v19 = vld [vmem:[%s21265_s5 + $0xb0] sm:$0xff]  }
 0x6cd   : > { %v9543_v44 = vrot.slane %v9536_v46, %v20311_v6 }
 0x6ce   : > { %9532 = vrot.lane.b32.xlu1 %v9531_v43, %s13762_s29  ;;  %v9560_v14 = vrot.slane %v9551_v35, %v20311_v6  ;;  %v9588_v27 = vcombine.high %v9551_v35, %v9551_v35  ;;  %9552 = vst.msk [vmem:[#allocation5 + $0x15] sm:$0x1] %vm20316_vm7, %v9551_v35  ;;  %9516 = vst.msk [vmem:[#allocation5 + $0x13] sm:$0x1] %vm20316_vm7, %v9514_v58  ;;  %v13503_v43 = vld [vmem:[%s21265_s5 + $0xf0] sm:$0xff]   ;;  %v13505_v35 = vld [vmem:[%s21265_s5 + $0xf8] sm:$0xff]  }
 0x6cf   : > { %9545 = vst.msk [vmem:[#allocation5 + $0x14] sm:$0x1] %vm20316_vm7, %v9543_v44  ;;  %v13506_v58 = vld [vmem:[%s21265_s5 + $0xb8] sm:$0xff]   ;;  %v21612_v44 = vld [vmem:[#allocation12_spill] sm:$0xff] }
 0x6d0   : > { %9547 = vrot.lane.b32.xlu0 %v9546_v60, %s13762_s29  ;;  %v9561_v34 = vcombine.high %v9560_v14, %v9560_v14  ;;  %v9595_v11 = vrot.slane %v9588_v27, %v20311_v6  ;;  %v9568_v37 = vrot.slane %v9560_v14, %v20311_v6  ;;  %v13507_v14 = vld [vmem:[%s21265_s5 + $0x140] sm:$0xff]  }
 0x6d1   : > { %v21613_v27 = vld [vmem:[#allocation15_spill] sm:$0xff] }
 0x6d2   : > { %v9575_v55 = vrot.slane %v9561_v34, %v20311_v6  ;;  %v9605_v0 = vcombine.high %v9595_v11, %v9595_v11  ;;  %v9580_v56 = vcombine.high %v9568_v37, %v9568_v37  ;;  %v9602_v41 = vrot.slane %v9595_v11, %v20311_v6  ;;  %v13508_v11 = vld [vmem:[%s21265_s5 + $0x100] sm:$0xff]  }
 0x6d4   : > { %9576 = vrot.lane.b32.xlu1 %v9575_v55, %s13762_s29  ;;  %v9583_v40 = vcombine.high %v9575_v55, %v9575_v55  ;;  %9582 = vst.msk [vmem:[#allocation5 + $0x16] sm:$0x1] %vm20316_vm7, %v9580_v56  ;;  %9604 = vst.msk [vmem:[#allocation5 + $0x17] sm:$0x1] %vm20316_vm7, %v9602_v41  ;;  %v9617_v7 = vcombine.high %v9602_v41, %v9602_v41  ;;  %v9612_v28 = vrot.slane %v9605_v0, %v20311_v6  ;;  %v13509_v55 = vld [vmem:[%s21265_s5 + $0x148] sm:$0xff]   ;;  %v13511_v41 = vld [vmem:[%s21265_s5 + $0x150] sm:$0xff]  }
 0x6d5   : > { %v13510_v56 = vld [vmem:[%s21265_s5 + $0x108] sm:$0xff]  }
 0x6d6   : > { %9584 = vrot.lane.b32.xlu0 %v9583_v40, %s13762_s29  ;;  %9619 = vst.msk [vmem:[#allocation5 + $0x18] sm:$0x1] %vm20316_vm7, %v9617_v7  ;;  %v13512_v40 = vld [vmem:[%s21265_s5 + $0x110] sm:$0xff]   ;;  %v13513_v7 = vld [vmem:[%s21265_s5 + $0x158] sm:$0xff]  }
 0x6d8   : > { %9613 = vrot.lane.b32.xlu1 %v9612_v28, %s13762_s29  ;;  %v13514_v28 = vld [vmem:[%s21265_s5 + $0x118] sm:$0xff]   ;;  %s21218_s29 = scalar_lea.hbm %s21269_s9, %s12437_s26 }
 0x712   : > { %v9151_v39 = vpop.permute.xlu0 %9150 }
 0x713   : > { %9156 = vst.msk [vmem:[#allocation5] sm:$0x1] %vm20525_vm10, %v9151_v39  ;;  %v13516_v39 = vld [vmem:[%s21265_s5 + $0x120] sm:$0xff]  }
 0x714   : > { %v9162_v57 = vpop.permute.xlu1 %9161 }
 0x715   : > { %9164 = vst.msk [vmem:[#allocation5 + $0x1] sm:$0x1] %vm20525_vm10, %v9162_v57  ;;  %v13517_v57 = vld [vmem:[%s21265_s5 + $0x168] sm:$0xff]  }
 0x716   : > { %v9191_v6 = vpop.permute.xlu0 %9190 }
 0x717   : > { %9193 = vst.msk [vmem:[#allocation5 + $0x2] sm:$0x1] %vm20525_vm10, %v9191_v6  ;;  %v13518_v6 = vld [vmem:[%s21265_s5 + $0x128] sm:$0xff]  }
 0x71b   : > { %v9214_v30 = vpop.permute.xlu1 %9213 }
 0x71c   : > { %9216 = vst.msk [vmem:[#allocation5 + $0x3] sm:$0x1] %vm20525_vm10, %v9214_v30  ;;  %v13519_v30 = vld [vmem:[%s21265_s5 + $0x170] sm:$0xff]  }
 0x71d   : > { %v9229_v3 = vpop.permute.xlu0 %9228 }
 0x71e   : > { %9231 = vst.msk [vmem:[#allocation5 + $0x4] sm:$0x1] %vm20525_vm10, %v9229_v3  ;;  %v13520_v3 = vld [vmem:[%s21265_s5 + $0x130] sm:$0xff]  }
 0x71f   : > { %v9251_v32 = vpop.permute.xlu1 %9250 }
 0x720   : > { %9253 = vst.msk [vmem:[#allocation5 + $0x5] sm:$0x1] %vm20525_vm10, %v9251_v32  ;;  %v13521_v32 = vld [vmem:[%s21265_s5 + $0x178] sm:$0xff]  }
 0x721   : > { %v9266_v17 = vpop.permute.xlu0 %9265 }
 0x722   : > { %9268 = vst.msk [vmem:[#allocation5 + $0x6] sm:$0x1] %vm20525_vm10, %v9266_v17  ;;  %v13522_v17 = vld [vmem:[%s21265_s5 + $0x138] sm:$0xff]  }
 0x725   : > { %v9295_v4 = vpop.permute.xlu1 %9294 }
 0x726   : > { %9297 = vst.msk [vmem:[#allocation5 + $0x7] sm:$0x1] %vm20525_vm10, %v9295_v4  ;;  %v21614_v4 = vld [vmem:[#allocation14_spill] sm:$0xff] }
 0x727   : > { %v9303_v49 = vpop.permute.xlu0 %9302 }
 0x728   : > { %9305 = vst.msk [vmem:[#allocation5 + $0x8] sm:$0x1] %vm20525_vm10, %v9303_v49 }
 0x729   : > { %v9332_v36 = vpop.permute.xlu1 %9331 }
 0x72a   : > { %9334 = vst.msk [vmem:[#allocation5 + $0x9] sm:$0x1] %vm20525_vm10, %v9332_v36  ;;  %v13523_v36 = vld [vmem:[%s21265_s5 + $0x1c0] sm:$0xff]  }
 0x72c   : > { %v9355_v10 = vpop.permute.xlu0 %9354 }
 0x72d   : > { %9357 = vst.msk [vmem:[#allocation5 + $0xa] sm:$0x1] %vm20525_vm10, %v9355_v10  ;;  %v20551_v16 = vld [vmem:[#allocation5] sm:$0xff] }
 0x72e   : > { %v9370_v20 = vpop.permute.xlu1 %9369  ;;  %v9635_v21 = vrot.slane %v20551_v16, %v21609_v5  ;;  %v9631_v48 = vrot.slane %v20551_v16, %v21610_v52  ;;  %v9643_v22 = vrot.slane %v20551_v16, %v21611_v38  ;;  %v9639_v60 = vrot.slane %v20551_v16, %v21612_v44  ;;  %v21615_v10 = vld [vmem:[#allocation17_spill] sm:$0xff] }
 0x72f   : > { %9372 = vst.msk [vmem:[#allocation5 + $0xb] sm:$0x1] %vm20525_vm10, %v9370_v20  ;;  %v9651_v34 = vrot.slane %v20551_v16, %v21613_v27  ;;  %v9647_v49 = vrot.slane %v20551_v16, %v21614_v4  ;;  %v9659_v20 = vrot.slane %v20551_v16, %v21615_v10 }
 0x730   : > { %v9392_v61 = vpop.permute.xlu0 %9391  ;;  %v9754_v9 = vpack.c.bf16 %v9635_v21, %v9635_v21  ;;  %v9753_v1 = vpack.c.bf16 %v9631_v48, %v9631_v48  ;;  %v9756_v29 = vpack.c.bf16 %v9643_v22, %v9643_v22  ;;  %v9755_v37 = vpack.c.bf16 %v9639_v60, %v9639_v60  ;;  %v13524_v21 = vld [vmem:[%s21265_s5 + $0x180] sm:$0xff]   ;;  %v13525_v22 = vld [vmem:[%s21265_s5 + $0x1c8] sm:$0xff]  }
 0x731   : > { %9394 = vst.msk [vmem:[#allocation5 + $0xc] sm:$0x1] %vm20525_vm10, %v9392_v61  ;;  %v9758_v0 = vpack.c.bf16 %v9651_v34, %v9651_v34  ;;  %v9757_v48 = vpack.c.bf16 %v9647_v49, %v9647_v49  ;;  %v9760_v61 = vpack.c.bf16 %v9659_v20, %v9659_v20  ;;  %v13550_v60 = vld [vmem:[%s21265_s5 + $0x228] sm:$0xff]   ;;  %v13552_v34 = vld [vmem:[%s21265_s5 + $0x230] sm:$0xff]  }
 0x732   : > { %v9407_v45 = vpop.permute.xlu1 %9406  ;;  %11382 = vmatprep.mubr.bf16.mxu1 %v9754_v9  ;;  %v13526_v9 = vld [vmem:[%s21265_s5 + $0x188] sm:$0xff]   ;;  %v13568_v20 = vld [vmem:[%s21265_s5 + $0x2b0] sm:$0xff]  }
 0x733   : > { %9409 = vst.msk [vmem:[#allocation5 + $0xd] sm:$0x1] %vm20525_vm10, %v9407_v45  ;;  %11383 = vmatmul.mubr.bf16.vlgmr.msra.gmra.mrb[24].mxu1 %v9753_v1  ;;  %v13527_v1 = vld [vmem:[%s21265_s5 + $0x1d0] sm:$0xff]   ;;  %v13530_v45 = vld [vmem:[%s21265_s5 + $0x198] sm:$0xff]   ;;  %v13566_v49 = vld [vmem:[%s21265_s5 + $0x2a8] sm:$0xff]  }
 0x734   : > { %12608 = vmatpush3.bf16.msra.mxu1 %v13492_v63  ;;  %11422 = vmatprep.mubr.bf16.mxu1 %v9756_v29  ;;  %v13528_v63 = vld [vmem:[%s21265_s5 + $0x190] sm:$0xff]   ;;  %v13531_v29 = vld [vmem:[%s21265_s5 + $0x1e0] sm:$0xff]  }
 0x735   : > { %12609 = vmatprep.subr.bf16.mxu1 %v13493_v18  ;;  %v13529_v18 = vld [vmem:[%s21265_s5 + $0x1d8] sm:$0xff]  }
 0x736   : > { %v9436_v12 = vpop.permute.xlu0 %9435 }
 0x737   : > { %9438 = vst.msk [vmem:[#allocation5 + $0xe] sm:$0x1] %vm20525_vm10, %v9436_v12  ;;  %v13533_v12 = vld [vmem:[%s21265_s5 + $0x1e8] sm:$0xff]  }
 0x738   : > { %v9444_v2 = vpop.permute.xlu1 %9443  ;;  %12610 = vmatpush3.bf16.msra.mxu1 %v13494_v53  ;;  %v13532_v53 = vld [vmem:[%s21265_s5 + $0x1a0] sm:$0xff]  }
 0x739   : > { %9446 = vst.msk [vmem:[#allocation5 + $0xf] sm:$0x1] %vm20525_vm10, %v9444_v2  ;;  %12611 = vmatprep.subr.bf16.mxu1 %v13495_v26  ;;  %v13534_v26 = vld [vmem:[%s21265_s5 + $0x1a8] sm:$0xff]   ;;  %v13535_v2 = vld [vmem:[%s21265_s5 + $0x1f0] sm:$0xff]  }
 0x73a   : > { %v9473_v23 = vpop.permute.xlu0 %9472 }
 0x73b   : > { %9475 = vst.msk [vmem:[#allocation5 + $0x10] sm:$0x1] %vm20525_vm10, %v9473_v23  ;;  %v13537_v23 = vld [vmem:[%s21265_s5 + $0x1f8] sm:$0xff]  }
 0x73c   : > { %v9496_v31 = vpop.permute.xlu1 %9495  ;;  %12612 = vmatpush3.bf16.msra.mxu1 %v13496_v59  ;;  %v13536_v59 = vld [vmem:[%s21265_s5 + $0x1b0] sm:$0xff]  }
 0x73d   : > { %9498 = vst.msk [vmem:[#allocation5 + $0x11] sm:$0x1] %vm20525_vm10, %v9496_v31  ;;  %12613 = vmatprep.subr.bf16.mxu1 %v13497_v24  ;;  %v13538_v31 = vld [vmem:[%s21265_s5 + $0x1b8] sm:$0xff]  }
 0x73e   : > { %v9511_v50 = vpop.permute.xlu0 %9510 }
 0x73f   : > { %9513 = vst.msk [vmem:[#allocation5 + $0x12] sm:$0x1] %vm20525_vm10, %v9511_v50 }
 0x740   : > { %v9533_v51 = vpop.permute.xlu1 %9532  ;;  %12614 = vmatpush3.bf16.msra.mxu1 %v13498_v15  ;;  %v20731_v24 = vld [vmem:[#allocation5 + $0x8] sm:$0xff]  ;;  %v21616_v15 = vld [vmem:[#allocation16_spill] sm:$0xff] }
 0x741   : > { %9535 = vst.msk [vmem:[#allocation5 + $0x13] sm:$0x1] %vm20525_vm10, %v9533_v51  ;;  %12615 = vmatprep.subr.bf16.mxu1 %v13499_v13  ;;  %v9655_v50 = vrot.slane %v20551_v16, %v21616_v15  ;;  %v13539_v13 = vld [vmem:[%s21265_s5 + $0x240] sm:$0xff]   ;;  %v9667_v51 = vrot.slane %v20731_v24, %v21609_v5  ;;  %v13542_v16 = vld [vmem:[%s21265_s5 + $0x208] sm:$0xff]  }
 0x742   : > { %v9548_v62 = vpop.permute.xlu0 %9547 }
 0x743   : > { %9550 = vst.msk [vmem:[#allocation5 + $0x14] sm:$0x1] %vm20525_vm10, %v9548_v62  ;;  %v9759_v62 = vpack.c.bf16 %v9655_v50, %v9655_v50  ;;  %v13582_v50 = vld [vmem:[%s21265_s5 + $0x328] sm:$0xff]  }
 0x744   : > { %12616 = vmatpush3.bf16.msra.mxu1 %v13500_v47  ;;  %v13540_v47 = vld [vmem:[%s21265_s5 + $0x200] sm:$0xff]  }
 0x745   : > { %12617 = vmatprep.subr.bf16.mxu1 %v13501_v25  ;;  %v13541_v25 = vld [vmem:[%s21265_s5 + $0x248] sm:$0xff]  }
 0x746   : > { %v9577_v42 = vpop.permute.xlu1 %9576 }
 0x747   : > { %9579 = vst.msk [vmem:[#allocation5 + $0x15] sm:$0x1] %vm20525_vm10, %v9577_v42  ;;  %v13543_v42 = vld [vmem:[%s21265_s5 + $0x250] sm:$0xff]  }
 0x748   : > { %v9585_v8 = vpop.permute.xlu0 %9584  ;;  %12618 = vmatpush3.bf16.msra.mxu1 %v13502_v54  ;;  %v9762_v54 = vpack.c.bf16 %v9667_v51, %v9667_v51  ;;  %v13584_v51 = vld [vmem:[%s21265_s5 + $0x330] sm:$0xff]  }
 0x749   : > { %9587 = vst.msk [vmem:[#allocation5 + $0x16] sm:$0x1] %vm20525_vm10, %v9585_v8  ;;  %12619 = vmatprep.subr.bf16.mxu1 %v13503_v43  ;;  %v13544_v43 = vld [vmem:[%s21265_s5 + $0x210] sm:$0xff]   ;;  %v13545_v8 = vld [vmem:[%s21265_s5 + $0x258] sm:$0xff]  }
 0x74a   : > { %v9614_v46 = vpop.permute.xlu1 %9613 }
 0x74b   : > { %9616 = vst.msk [vmem:[#allocation5 + $0x17] sm:$0x1] %vm20525_vm10, %v9614_v46  ;;  %v13547_v46 = vld [vmem:[%s21265_s5 + $0x260] sm:$0xff]  }
 0x74c   : > { %12620 = vmatpush3.bf16.msra.mxu1 %v13504_v19  ;;  %v13546_v19 = vld [vmem:[%s21265_s5 + $0x218] sm:$0xff]  }
 0x74d   : > { %12621 = vmatprep.subr.bf16.mxu1 %v13505_v35  ;;  %v13548_v35 = vld [vmem:[%s21265_s5 + $0x220] sm:$0xff]  }
 0x750   : > { %12622 = vmatpush3.bf16.msra.mxu1 %v13506_v58  ;;  %v13549_v58 = vld [vmem:[%s21265_s5 + $0x268] sm:$0xff]  }
 0x751   : > { %12629 = vmatprep.subr.bf16.mxu1 %v13507_v14  ;;  %v13551_v14 = vld [vmem:[%s21265_s5 + $0x270] sm:$0xff]  }
 0x753   : > { %11423 = vmatmul.mubr.bf16.vlgmr.msra.gmra.mrb[28].mxu1 %v9755_v37  ;;  %v13554_v37 = vld [vmem:[%s21265_s5 + $0x238] sm:$0xff]  }
 0x754   : > { %12630 = vmatpush3.bf16.msra.mxu1 %v13508_v11  ;;  %11462 = vmatprep.mubr.bf16.mxu1 %v9758_v0  ;;  %v13553_v11 = vld [vmem:[%s21265_s5 + $0x278] sm:$0xff]   ;;  %v13555_v0 = vld [vmem:[%s21265_s5 + $0x2c0] sm:$0xff]  }
 0x755   : > { %12631 = vmatprep.subr.bf16.mxu1 %v13509_v55  ;;  %v9663_v55 = vrot.slane %v20731_v24, %v21610_v52 }
 0x758   : > { %12632 = vmatpush3.bf16.msra.mxu1 %v13510_v56  ;;  %v9675_v56 = vrot.slane %v20731_v24, %v21611_v38 }
 0x759   : > { %12633 = vmatprep.subr.bf16.mxu1 %v13511_v41  ;;  %v13556_v41 = vld [vmem:[%s21265_s5 + $0x280] sm:$0xff]  }
 0x75c   : > { %12634 = vmatpush3.bf16.msra.mxu1 %v13512_v40  ;;  %v9761_v40 = vpack.c.bf16 %v9663_v55, %v9663_v55  ;;  %v13598_v55 = vld [vmem:[%s21265_s5 + $0x3a8] sm:$0xff]  }
 0x75d   : > { %12635 = vmatprep.subr.bf16.mxu1 %v13513_v7  ;;  %v13557_v7 = vld [vmem:[%s21265_s5 + $0x2c8] sm:$0xff]  }
 0x760   : > { %12636 = vmatpush3.bf16.msra.mxu1 %v13514_v28  ;;  %v9764_v28 = vpack.c.bf16 %v9675_v56, %v9675_v56 }
 0x761   : > { %12637 = vmatprep.subr.bf16.mxu1 %v13515_v33  ;;  %v13558_v33 = vld [vmem:[%s21265_s5 + $0x288] sm:$0xff]  }
 0x764   : > { %12638 = vmatpush3.bf16.msra.mxu1 %v13516_v39  ;;  %v13559_v39 = vld [vmem:[%s21265_s5 + $0x2d0] sm:$0xff]  }
 0x765   : > { %12639 = vmatprep.subr.bf16.mxu1 %v13517_v57  ;;  %v13560_v57 = vld [vmem:[%s21265_s5 + $0x290] sm:$0xff]  }
 0x768   : > { %12640 = vmatpush3.bf16.msra.mxu1 %v13518_v6  ;;  %v13561_v6 = vld [vmem:[%s21265_s5 + $0x2d8] sm:$0xff]  }
 0x769   : > { %12641 = vmatprep.subr.bf16.mxu1 %v13519_v30  ;;  %v13562_v30 = vld [vmem:[%s21265_s5 + $0x298] sm:$0xff]  }
 0x76c   : > { %12642 = vmatpush3.bf16.msra.mxu1 %v13520_v3  ;;  %v13563_v3 = vld [vmem:[%s21265_s5 + $0x2e0] sm:$0xff]  }
 0x76d   : > { %12643 = vmatprep.subr.bf16.mxu1 %v13521_v32  ;;  %v13564_v32 = vld [vmem:[%s21265_s5 + $0x2a0] sm:$0xff]  }
 0x770   : > { %12644 = vmatpush3.bf16.msra.mxu1 %v13522_v17  ;;  %v13565_v17 = vld [vmem:[%s21265_s5 + $0x2e8] sm:$0xff]  }
 0x771   : > { %12651 = vmatprep.subr.bf16.mxu1 %v13523_v36  ;;  %v13567_v36 = vld [vmem:[%s21265_s5 + $0x2f0] sm:$0xff]  }
 0x773   : > { %11463 = vmatmul.mubr.bf16.vlgmr.msra.gmra.mrb[32].mxu1 %v9757_v48  ;;  %v13570_v48 = vld [vmem:[%s21265_s5 + $0x2b8] sm:$0xff]  }
 0x774   : > { %12652 = vmatpush3.bf16.msra.mxu1 %v13524_v21  ;;  %11502 = vmatprep.mubr.bf16.mxu1 %v9760_v61  ;;  %v13569_v21 = vld [vmem:[%s21265_s5 + $0x2f8] sm:$0xff]   ;;  %v13571_v61 = vld [vmem:[%s21265_s5 + $0x340] sm:$0xff]  }
 0x775   : > { %12653 = vmatprep.subr.bf16.mxu1 %v13525_v22  ;;  %v9671_v22 = vrot.slane %v20731_v24, %v21612_v44 }
 0x778   : > { %12654 = vmatpush3.bf16.msra.mxu1 %v13526_v9  ;;  %v9683_v9 = vrot.slane %v20731_v24, %v21613_v27 }
 0x779   : > { %12655 = vmatprep.subr.bf16.mxu1 %v13527_v1  ;;  %v13572_v1 = vld [vmem:[%s21265_s5 + $0x300] sm:$0xff]  }
 0x77c   : > { %12656 = vmatpush3.bf16.msra.mxu1 %v13528_v63  ;;  %v9763_v63 = vpack.c.bf16 %v9671_v22, %v9671_v22  ;;  %v13610_v22 = vld [vmem:[%s21265_s5 + $0x418] sm:$0xff]  }
 0x77d   : > { %12657 = vmatprep.subr.bf16.mxu1 %v13529_v18  ;;  %v13573_v18 = vld [vmem:[%s21265_s5 + $0x348] sm:$0xff]  }
 0x780   : > { %12658 = vmatpush3.bf16.msra.mxu1 %v13530_v45  ;;  %v9766_v45 = vpack.c.bf16 %v9683_v9, %v9683_v9  ;;  %v13612_v9 = vld [vmem:[%s21265_s5 + $0x420] sm:$0xff]  }
 0x781   : > { %12659 = vmatprep.subr.bf16.mxu1 %v13531_v29  ;;  %v13574_v29 = vld [vmem:[%s21265_s5 + $0x308] sm:$0xff]  }
 0x784   : > { %12660 = vmatpush3.bf16.msra.mxu1 %v13532_v53  ;;  %v13575_v53 = vld [vmem:[%s21265_s5 + $0x350] sm:$0xff]  }
 0x785   : > { %12661 = vmatprep.subr.bf16.mxu1 %v13533_v12  ;;  %v13576_v12 = vld [vmem:[%s21265_s5 + $0x310] sm:$0xff]  }
 0x788   : > { %12662 = vmatpush3.bf16.msra.mxu1 %v13534_v26  ;;  %v13577_v26 = vld [vmem:[%s21265_s5 + $0x358] sm:$0xff]  }
 0x789   : > { %12663 = vmatprep.subr.bf16.mxu1 %v13535_v2  ;;  %v13578_v2 = vld [vmem:[%s21265_s5 + $0x318] sm:$0xff]  }
 0x78c   : > { %12664 = vmatpush3.bf16.msra.mxu1 %v13536_v59  ;;  %v13579_v59 = vld [vmem:[%s21265_s5 + $0x360] sm:$0xff]  }
 0x78d   : > { %12665 = vmatprep.subr.bf16.mxu1 %v13537_v23  ;;  %v13580_v23 = vld [vmem:[%s21265_s5 + $0x320] sm:$0xff]  }
 0x790   : > { %12666 = vmatpush3.bf16.msra.mxu1 %v13538_v31  ;;  %v13581_v31 = vld [vmem:[%s21265_s5 + $0x368] sm:$0xff]  }
 0x791   : > { %12673 = vmatprep.subr.bf16.mxu1 %v13539_v13  ;;  %v13583_v13 = vld [vmem:[%s21265_s5 + $0x370] sm:$0xff]  }
 0x793   : > { %11503 = vmatmul.mubr.bf16.vlgmr.msra.gmra.mrb[36].mxu1 %v9759_v62  ;;  %v13586_v62 = vld [vmem:[%s21265_s5 + $0x338] sm:$0xff]  }
 0x794   : > { %12674 = vmatpush3.bf16.msra.mxu1 %v13540_v47  ;;  %11542 = vmatprep.mubr.bf16.mxu1 %v9762_v54  ;;  %v13585_v47 = vld [vmem:[%s21265_s5 + $0x378] sm:$0xff]   ;;  %v13587_v54 = vld [vmem:[%s21265_s5 + $0x3c0] sm:$0xff]  }
 0x795   : > { %12675 = vmatprep.subr.bf16.mxu1 %v13541_v25  ;;  %v9679_v25 = vrot.slane %v20731_v24, %v21614_v4 }
 0x798   : > { %12676 = vmatpush3.bf16.msra.mxu1 %v13542_v16  ;;  %v9691_v16 = vrot.slane %v20731_v24, %v21615_v10 }
 0x799   : > { %12677 = vmatprep.subr.bf16.mxu1 %v13543_v42  ;;  %v13588_v42 = vld [vmem:[%s21265_s5 + $0x380] sm:$0xff]  }
 0x79c   : > { %12678 = vmatpush3.bf16.msra.mxu1 %v13544_v43  ;;  %v9765_v43 = vpack.c.bf16 %v9679_v25, %v9679_v25  ;;  %v13620_v25 = vld [vmem:[%s21265_s5 + $0x480] sm:$0xff]  }
 0x79d   : > { %12679 = vmatprep.subr.bf16.mxu1 %v13545_v8  ;;  %v13589_v8 = vld [vmem:[%s21265_s5 + $0x3c8] sm:$0xff]  }
 0x7a0   : > { %12680 = vmatpush3.bf16.msra.mxu1 %v13546_v19  ;;  %v9768_v19 = vpack.c.bf16 %v9691_v16, %v9691_v16  ;;  %v13621_v16 = vld [vmem:[%s21265_s5 + $0x4c8] sm:$0xff]  }
 0x7a1   : > { %12681 = vmatprep.subr.bf16.mxu1 %v13547_v46  ;;  %v13590_v46 = vld [vmem:[%s21265_s5 + $0x388] sm:$0xff]  }
 0x7a4   : > { %12682 = vmatpush3.bf16.msra.mxu1 %v13548_v35  ;;  %v13591_v35 = vld [vmem:[%s21265_s5 + $0x3d0] sm:$0xff]  }
 0x7a5   : > { %12683 = vmatprep.subr.bf16.mxu1 %v13549_v58  ;;  %v13592_v58 = vld [vmem:[%s21265_s5 + $0x390] sm:$0xff]  }
 0x7a8   : > { %12684 = vmatpush3.bf16.msra.mxu1 %v13550_v60  ;;  %v13593_v60 = vld [vmem:[%s21265_s5 + $0x3d8] sm:$0xff]  }
 0x7a9   : > { %12685 = vmatprep.subr.bf16.mxu1 %v13551_v14  ;;  %v13594_v14 = vld [vmem:[%s21265_s5 + $0x398] sm:$0xff]  }
 0x7ac   : > { %12686 = vmatpush3.bf16.msra.mxu1 %v13552_v34  ;;  %v13595_v34 = vld [vmem:[%s21265_s5 + $0x3e0] sm:$0xff]  }
 0x7ad   : > { %12687 = vmatprep.subr.bf16.mxu1 %v13553_v11  ;;  %v13596_v11 = vld [vmem:[%s21265_s5 + $0x3a0] sm:$0xff]  }
 0x7b0   : > { %12688 = vmatpush3.bf16.msra.mxu1 %v13554_v37  ;;  %v13597_v37 = vld [vmem:[%s21265_s5 + $0x3e8] sm:$0xff]  }
 0x7b1   : > { %12695 = vmatprep.subr.bf16.mxu1 %v13555_v0  ;;  %v13599_v0 = vld [vmem:[%s21265_s5 + $0x3f0] sm:$0xff]  }
 0x7b3   : > { %11543 = vmatmul.mubr.bf16.vlgmr.msra.gmra.mrb[40].mxu1 %v9761_v40 }
 0x7b4   : > { %12696 = vmatpush3.bf16.msra.mxu1 %v13556_v41  ;;  %11582 = vmatprep.mubr.bf16.mxu1 %v9764_v28  ;;  %v13600_v28 = vld [vmem:[%s21265_s5 + $0x3b0] sm:$0xff]  }
 0x7b5   : > { %12697 = vmatprep.subr.bf16.mxu1 %v13557_v7 }
 0x7b8   : > { %12698 = vmatpush3.bf16.msra.mxu1 %v13558_v33 }
 0x7b9   : > { %12699 = vmatprep.subr.bf16.mxu1 %v13559_v39  ;;  %v13601_v39 = vld [vmem:[%s21265_s5 + $0x3f8] sm:$0xff]  }
 0x7bc   : > { %12700 = vmatpush3.bf16.msra.mxu1 %v13560_v57  ;;  %v20941_v57 = vld [vmem:[#allocation5 + $0x10] sm:$0xff] }
 0x7bd   : > { %12701 = vmatprep.subr.bf16.mxu1 %v13561_v6  ;;  %v13602_v6 = vld [vmem:[%s21265_s5 + $0x3b8] sm:$0xff]  }
 0x7c0   : > { %12702 = vmatpush3.bf16.msra.mxu1 %v13562_v30  ;;  %v9687_v30 = vrot.slane %v20731_v24, %v21616_v15  ;;  %v13606_v24 = vld [vmem:[%s21265_s5 + $0x408] sm:$0xff]  }
 0x7c1   : > { %12703 = vmatprep.subr.bf16.mxu1 %v13563_v3  ;;  %v13603_v3 = vld [vmem:[%s21265_s5 + $0x440] sm:$0xff]  }
 0x7c4   : > { %12704 = vmatpush3.bf16.msra.mxu1 %v13564_v32  ;;  %v9699_v32 = vrot.slane %v20941_v57, %v21609_v5  ;;  %v13607_v5 = vld [vmem:[%s21265_s5 + $0x450] sm:$0xff]  }
 0x7c5   : > { %12705 = vmatprep.subr.bf16.mxu1 %v13565_v17  ;;  %v13604_v17 = vld [vmem:[%s21265_s5 + $0x400] sm:$0xff]  }
 0x7c8   : > { %12706 = vmatpush3.bf16.msra.mxu1 %v13566_v49  ;;  %v9767_v49 = vpack.c.bf16 %v9687_v30, %v9687_v30 }
 0x7c9   : > { %12707 = vmatprep.subr.bf16.mxu1 %v13567_v36  ;;  %v13605_v36 = vld [vmem:[%s21265_s5 + $0x448] sm:$0xff]  }
 0x7cc   : > { %12708 = vmatpush3.bf16.msra.mxu1 %v13568_v20  ;;  %v9770_v20 = vpack.c.bf16 %v9699_v32, %v9699_v32 }
 0x7cd   : > { %12709 = vmatprep.subr.bf16.mxu1 %v13569_v21  ;;  %v13608_v21 = vld [vmem:[%s21265_s5 + $0x410] sm:$0xff]  }
 0x7d0   : > { %12710 = vmatpush3.bf16.msra.mxu1 %v13570_v48  ;;  %v13609_v48 = vld [vmem:[%s21265_s5 + $0x458] sm:$0xff]  }
 0x7d1   : > { %12717 = vmatprep.subr.bf16.mxu1 %v13571_v61  ;;  %v13611_v61 = vld [vmem:[%s21265_s5 + $0x460] sm:$0xff]  }
 0x7d3   : > { %11583 = vmatmul.mubr.bf16.vlgmr.msra.gmra.mrb[44].mxu1 %v9763_v63  ;;  %v13614_v63 = vld [vmem:[%s21265_s5 + $0x428] sm:$0xff]  }
 0x7d4   : > { %12718 = vmatpush3.bf16.msra.mxu1 %v13572_v1  ;;  %11622 = vmatprep.mubr.bf16.mxu1 %v9766_v45  ;;  %v13613_v1 = vld [vmem:[%s21265_s5 + $0x468] sm:$0xff]   ;;  %v13615_v45 = vld [vmem:[%s21265_s5 + $0x470] sm:$0xff]  }
 0x7d5   : > { %12719 = vmatprep.subr.bf16.mxu1 %v13573_v18  ;;  %v10170_v18 = vld [vmem:[%s21266_s6] sm:$0x1] }
 0x7d8   : > { %12720 = vmatpush3.bf16.msra.mxu1 %v13574_v29 }
 0x7d9   : > { %12721 = vmatprep.subr.bf16.mxu1 %v13575_v53 }
 0x7dc   : > { %12722 = vmatpush3.bf16.msra.mxu1 %v13576_v12 }
 0x7dd   : > { %12723 = vmatprep.subr.bf16.mxu1 %v13577_v26 }
 0x7e0   : > { %12724 = vmatpush3.bf16.msra.mxu1 %v13578_v2 }
 0x7e1   : > { %12725 = vmatprep.subr.bf16.mxu1 %v13579_v59  ;;  %v13616_v59 = vld [vmem:[%s21265_s5 + $0x430] sm:$0xff]  }
 0x7e4   : > { %12726 = vmatpush3.bf16.msra.mxu1 %v13580_v23 }
 0x7e5   : > { %12727 = vmatprep.subr.bf16.mxu1 %v13581_v31  ;;  %v13617_v31 = vld [vmem:[%s21265_s5 + $0x478] sm:$0xff]  }
 0x7e8   : > { %12728 = vmatpush3.bf16.msra.mxu1 %v13582_v50 }
 0x7e9   : > { %12729 = vmatprep.subr.bf16.mxu1 %v13583_v13  ;;  %v13618_v13 = vld [vmem:[%s21265_s5 + $0x438] sm:$0xff]  }
 0x7ec   : > { %12730 = vmatpush3.bf16.msra.mxu1 %v13584_v51  ;;  %v9695_v51 = vrot.slane %v20941_v57, %v21610_v52  ;;  %v13622_v52 = vld [vmem:[%s21265_s5 + $0x488] sm:$0xff]  }
 0x7ed   : > { %12731 = vmatprep.subr.bf16.mxu1 %v13585_v47  ;;  %v13619_v47 = vld [vmem:[%s21265_s5 + $0x4c0] sm:$0xff]  }
 0x7f0   : > { %12732 = vmatpush3.bf16.msra.mxu1 %v13586_v62  ;;  %v9707_v62 = vrot.slane %v20941_v57, %v21611_v38  ;;  %v13623_v38 = vld [vmem:[%s21265_s5 + $0x4d0] sm:$0xff]  }
 0x7f1   : > { %12739 = vmatprep.subr.bf16.mxu1 %v13587_v54  ;;  %v9769_v54 = vpack.c.bf16 %v9695_v51, %v9695_v51  ;;  %v13657_v51 = vld [vmem:[%s21265_s5 + $0x5d8] sm:$0xff]  }
 0x7f3   : > { %11623 = vmatmul.mubr.bf16.vlgmr.msra.gmra.mrb[48].mxu1 %v9765_v43  ;;  %v13624_v43 = vld [vmem:[%s21265_s5 + $0x490] sm:$0xff]  }
 0x7f4   : > { %12740 = vmatpush3.bf16.msra.mxu1 %v13588_v42  ;;  %11662 = vmatprep.mubr.bf16.mxu1 %v9768_v19  ;;  %v9772_v42 = vpack.c.bf16 %v9707_v62, %v9707_v62  ;;  %v13626_v19 = vld [vmem:[%s21265_s5 + $0x498] sm:$0xff]   ;;  %v13659_v62 = vld [vmem:[%s21265_s5 + $0x5e0] sm:$0xff]  }
 0x7f5   : > { %12741 = vmatprep.subr.bf16.mxu1 %v13589_v8  ;;  %v13625_v8 = vld [vmem:[%s21265_s5 + $0x4d8] sm:$0xff]  }
 0x7f8   : > { %12742 = vmatpush3.bf16.msra.mxu1 %v13590_v46  ;;  %v13627_v46 = vld [vmem:[%s21265_s5 + $0x4e0] sm:$0xff]  }
 0x7f9   : > { %12743 = vmatprep.subr.bf16.mxu1 %v13591_v35  ;;  %v13628_v35 = vld [vmem:[%s21265_s5 + $0x4a0] sm:$0xff]  }
 0x7fc   : > { %12744 = vmatpush3.bf16.msra.mxu1 %v13592_v58  ;;  %v13629_v58 = vld [vmem:[%s21265_s5 + $0x4e8] sm:$0xff]  }
 0x7fd   : > { %12745 = vmatprep.subr.bf16.mxu1 %v13593_v60  ;;  %v13630_v60 = vld [vmem:[%s21265_s5 + $0x4a8] sm:$0xff]  }
 0x800   : > { %12746 = vmatpush3.bf16.msra.mxu1 %v13594_v14  ;;  %v13631_v14 = vld [vmem:[%s21265_s5 + $0x4f0] sm:$0xff]  }
 0x801   : > { %12747 = vmatprep.subr.bf16.mxu1 %v13595_v34 }
 0x804   : > { %12748 = vmatpush3.bf16.msra.mxu1 %v13596_v11 }
 0x805   : > { %12749 = vmatprep.subr.bf16.mxu1 %v13597_v37 }
 0x806   : > { %v12601_v56 = vpop.f32.mrb[24].mxu1 }
 0x807   : > { %v12602_v41 = vpop.f32.mrb[25].mxu1 }
 0x808   : > { %v12603_v40 = vadd.f32 %v12602_v41, %v12601_v56  ;;  %12750 = vmatpush3.bf16.msra.mxu1 %v13598_v55  ;;  %v12604_v7 = vpop.f32.mrb[26].mxu1  ;;  %v13633_v41 = vld [vmem:[%s21265_s5 + $0x4f8] sm:$0xff]  }
 0x809   : > { %v12605_v33 = vpop.f32.mrb[27].mxu1  ;;  %12751 = vmatprep.subr.bf16.mxu1 %v13599_v0  ;;  %v13632_v0 = vld [vmem:[%s21265_s5 + $0x4b0] sm:$0xff]   ;;  %v13634_v7 = vld [vmem:[%s21265_s5 + $0x4b8] sm:$0xff]  }
 0x80a   : > { %v11385_v12 = vadd.f32 %v12603_v40, %v10170_v18  ;;  %v13635_v33 = vld [vmem:[%s21265_s5 + $0x540] sm:$0xff]  }
 0x80c   : > { %12752 = vmatpush3.bf16.msra.mxu1 %v13600_v28  ;;  %v9703_v28 = vrot.slane %v20941_v57, %v21612_v44  ;;  %v13638_v44 = vld [vmem:[%s21265_s5 + $0x508] sm:$0xff]  }
 0x80d   : > { %12753 = vmatprep.subr.bf16.mxu1 %v13601_v39  ;;  %v9715_v39 = vrot.slane %v20941_v57, %v21613_v27  ;;  %v13639_v27 = vld [vmem:[%s21265_s5 + $0x550] sm:$0xff]  }
 0x80e   : > { %v9771_v30 = vpack.c.bf16 %v9703_v28, %v9703_v28 }
 0x80f   : > { %v9774_v32 = vpack.c.bf16 %v9715_v39, %v9715_v39 }
 0x810   : > { %12754 = vmatpush3.bf16.msra.mxu1 %v13602_v6  ;;  %v13636_v6 = vld [vmem:[%s21265_s5 + $0x500] sm:$0xff]  }
 0x811   : > { %12761 = vmatprep.subr.bf16.mxu1 %v13603_v3  ;;  %v13637_v3 = vld [vmem:[%s21265_s5 + $0x548] sm:$0xff]  }
 0x813   : > { %11663 = vmatmul.mubr.bf16.vlgmr.msra.gmra.mrb[52].mxu1 %v9767_v49  ;;  %v13641_v49 = vld [vmem:[%s21265_s5 + $0x558] sm:$0xff]  }
 0x814   : > { %12762 = vmatpush3.bf16.msra.mxu1 %v13604_v17  ;;  %11702 = vmatprep.mubr.bf16.mxu1 %v9770_v20  ;;  %v13640_v17 = vld [vmem:[%s21265_s5 + $0x510] sm:$0xff]   ;;  %v13643_v20 = vld [vmem:[%s21265_s5 + $0x560] sm:$0xff]  }
 0x815   : > { %12763 = vmatprep.subr.bf16.mxu1 %v13605_v36  ;;  %v13642_v36 = vld [vmem:[%s21265_s5 + $0x518] sm:$0xff]  }
 0x818   : > { %12764 = vmatpush3.bf16.msra.mxu1 %v13606_v24  ;;  %v13644_v24 = vld [vmem:[%s21265_s5 + $0x520] sm:$0xff]  }
 0x819   : > { %12765 = vmatprep.subr.bf16.mxu1 %v13607_v5  ;;  %v13645_v5 = vld [vmem:[%s21265_s5 + $0x568] sm:$0xff]  }
 0x81c   : > { %12766 = vmatpush3.bf16.msra.mxu1 %v13608_v21  ;;  %v13646_v21 = vld [vmem:[%s21265_s5 + $0x528] sm:$0xff]  }
 0x81d   : > { %12767 = vmatprep.subr.bf16.mxu1 %v13609_v48  ;;  %v13647_v48 = vld [vmem:[%s21265_s5 + $0x570] sm:$0xff]  }
 0x820   : > { %12768 = vmatpush3.bf16.msra.mxu1 %v13610_v22 }
 0x821   : > { %12769 = vmatprep.subr.bf16.mxu1 %v13611_v61 }
 0x824   : > { %12770 = vmatpush3.bf16.msra.mxu1 %v13612_v9 }
 0x825   : > { %12771 = vmatprep.subr.bf16.mxu1 %v13613_v1 }
 0x826   : > { %v12623_v29 = vpop.f32.mrb[28].mxu1 }
 0x827   : > { %v12624_v53 = vpop.f32.mrb[29].mxu1 }
 0x828   : > { %v12625_v26 = vadd.f32 %v12624_v53, %v12623_v29  ;;  %v12626_v2 = vpop.f32.mrb[30].mxu1  ;;  %12772 = vmatpush3.bf16.msra.mxu1 %v13614_v63  ;;  %v13648_v63 = vld [vmem:[%s21265_s5 + $0x530] sm:$0xff]   ;;  %v13650_v53 = vld [vmem:[%s21265_s5 + $0x538] sm:$0xff]  }
 0x829   : > { %v12627_v23 = vpop.f32.mrb[31].mxu1  ;;  %12773 = vmatprep.subr.bf16.mxu1 %v13615_v45  ;;  %v13649_v45 = vld [vmem:[%s21265_s5 + $0x578] sm:$0xff]   ;;  %v9723_v2 = vrot.slane %v20941_v57, %v21615_v10  ;;  %v13655_v10 = vld [vmem:[%s21265_s5 + $0x5d0] sm:$0xff]  }
 0x82a   : > { %v11425_v50 = vadd.f32 %v12625_v26, %v11385_v12  ;;  %v9711_v12 = vrot.slane %v20941_v57, %v21614_v4  ;;  %v13651_v26 = vld [vmem:[%s21265_s5 + $0x5c0] sm:$0xff]   ;;  %v13654_v4 = vld [vmem:[%s21265_s5 + $0x588] sm:$0xff]  }
 0x82c   : > { %12774 = vmatpush3.bf16.msra.mxu1 %v13616_v59  ;;  %v13652_v59 = vld [vmem:[%s21265_s5 + $0x580] sm:$0xff]   ;;  %v9773_v23 = vpack.c.bf16 %v9711_v12, %v9711_v12 }
 0x82d   : > { %12775 = vmatprep.subr.bf16.mxu1 %v13617_v31  ;;  %v13653_v31 = vld [vmem:[%s21265_s5 + $0x5c8] sm:$0xff]  }
 0x830   : > { %12776 = vmatpush3.bf16.msra.mxu1 %v13618_v13  ;;  %v13656_v13 = vld [vmem:[%s21265_s5 + $0x590] sm:$0xff]  }
 0x831   : > { %12783 = vmatprep.subr.bf16.mxu1 %v13619_v47  ;;  %v13658_v47 = vld [vmem:[%s21265_s5 + $0x598] sm:$0xff]  }
 0x833   : > { %11703 = vmatmul.mubr.bf16.vlgmr.msra.gmra.mrb[56].mxu1 %v9769_v54  ;;  %v13661_v54 = vld [vmem:[%s21265_s5 + $0x5e8] sm:$0xff]  }
 0x834   : > { %12784 = vmatpush3.bf16.msra.mxu1 %v13620_v25  ;;  %11742 = vmatprep.mubr.bf16.mxu1 %v9772_v42  ;;  %v13660_v25 = vld [vmem:[%s21265_s5 + $0x5a0] sm:$0xff]   ;;  %v13663_v42 = vld [vmem:[%s21265_s5 + $0x5f0] sm:$0xff]  }
 0x835   : > { %12785 = vmatprep.subr.bf16.mxu1 %v13621_v16  ;;  %v13662_v16 = vld [vmem:[%s21265_s5 + $0x5a8] sm:$0xff]  }
 0x838   : > { %12786 = vmatpush3.bf16.msra.mxu1 %v13622_v52 }
 0x839   : > { %12787 = vmatprep.subr.bf16.mxu1 %v13623_v38 }
 0x83c   : > { %12788 = vmatpush3.bf16.msra.mxu1 %v13624_v43 }
 0x83d   : > { %12789 = vmatprep.subr.bf16.mxu1 %v13625_v8 }
 0x840   : > { %12790 = vmatpush3.bf16.msra.mxu1 %v13626_v19  ;;  %v13664_v19 = vld [vmem:[%s21265_s5 + $0x5b0] sm:$0xff]  }
 0x841   : > { %12791 = vmatprep.subr.bf16.mxu1 %v13627_v46 }
 0x844   : > { %12792 = vmatpush3.bf16.msra.mxu1 %v13628_v35  ;;  %v13665_v35 = vld [vmem:[%s21265_s5 + $0x5f8] sm:$0xff]  }
 0x845   : > { %12793 = vmatprep.subr.bf16.mxu1 %v13629_v58 }
 0x846   : > { %v12645_v34 = vpop.f32.mrb[32].mxu1 }
 0x847   : > { %v12646_v11 = vpop.f32.mrb[33].mxu1 }
 0x848   : > { %v12647_v37 = vadd.f32 %v12646_v11, %v12645_v34  ;;  %v12648_v55 = vpop.f32.mrb[34].mxu1  ;;  %12794 = vmatpush3.bf16.msra.mxu1 %v13630_v60  ;;  %v13666_v60 = vld [vmem:[%s21265_s5 + $0x5b8] sm:$0xff]   ;;  %v13667_v34 = vld [vmem:[%s21265_s5 + $0x600] sm:$0xff]  }
 0x849   : > { %v12649_v56 = vpop.f32.mrb[35].mxu1  ;;  %12795 = vmatprep.subr.bf16.mxu1 %v13631_v14  ;;  %v9719_v14 = vrot.slane %v20941_v57, %v21616_v15  ;;  %v13668_v55 = vld [vmem:[%s21265_s5 + $0x608] sm:$0xff]   ;;  %v13669_v15 = vld [vmem:[%s21265_s5 + $0x610] sm:$0xff]   ;;  %v13670_v57 = vld [vmem:[%s21265_s5 + $0x618] sm:$0xff]  }
 0x84a   : > { %v11465_v40 = vadd.f32 %v12647_v37, %v11425_v50  ;;  %v9776_v50 = vpack.c.bf16 %v9723_v2, %v9723_v2  ;;  %v21617_v37 = vmov 0.0  }
 0x84b   : > { %v9775_v11 = vpack.c.bf16 %v9719_v14, %v9719_v14 }
 0x84c   : > { %12796 = vmatpush3.bf16.msra.mxu1 %v13632_v0  ;;  %v12231_v0 = vld [vmem:[#allocation5 + $0x18] ss:$0 sm:$0xff] }
 0x84d   : > { %12797 = vmatprep.subr.bf16.mxu1 %v13633_v41  ;;  %v9777_v56 = vpack.c.bf16 %v12231_v0, %v12231_v0 }
 0x850   : > { %12798 = vmatpush3.bf16.msra.mxu1 %v13634_v7 }
 0x851   : > { %12805 = vmatprep.subr.bf16.mxu1 %v13635_v33 }
 0x853   : > { %11743 = vmatmul.mubr.bf16.vlgmr.msra.gmra.mrb[60].mxu1 %v9771_v30 }
 0x854   : > { %12806 = vmatpush3.bf16.msra.mxu1 %v13636_v6  ;;  %11782 = vmatprep.mubr.bf16.mxu1 %v9774_v32 }
 0x855   : > { %12807 = vmatprep.subr.bf16.mxu1 %v13637_v3 }
 0x858   : > { %12808 = vmatpush3.bf16.msra.mxu1 %v13638_v44 }
 0x859   : > { %12809 = vmatprep.subr.bf16.mxu1 %v13639_v27 }
 0x85c   : > { %12810 = vmatpush3.bf16.msra.mxu1 %v13640_v17  ;;  %v13671_v17 = vld [vmem:[%s21267_s7] sm:$0xff]  }
 0x85d   : > { %12811 = vmatprep.subr.bf16.mxu1 %v13641_v49  ;;  %v13672_v49 = vld [vmem:[%s21267_s7 + $0x8] sm:$0xff]  }
 0x860   : > { %12812 = vmatpush3.bf16.msra.mxu1 %v13642_v36 }
 0x861   : > { %12813 = vmatprep.subr.bf16.mxu1 %v13643_v20  ;;  %v13673_v20 = vld [vmem:[%s21267_s7 + $0x10] sm:$0xff]  }
 0x864   : > { %12814 = vmatpush3.bf16.msra.mxu1 %v13644_v24 }
 0x865   : > { %12815 = vmatprep.subr.bf16.mxu1 %v13645_v5 }
 0x866   : > { %v12667_v22 = vpop.f32.mrb[36].mxu1 }
 0x867   : > { %v12668_v61 = vpop.f32.mrb[37].mxu1 }
 0x868   : > { %v12669_v9 = vadd.f32 %v12668_v61, %v12667_v22  ;;  %v12670_v1 = vpop.f32.mrb[38].mxu1  ;;  %12816 = vmatpush3.bf16.msra.mxu1 %v13646_v21  ;;  %v13674_v22 = vld [vmem:[%s21267_s7 + $0x18] sm:$0xff]  }
 0x869   : > { %v12671_v18 = vpop.f32.mrb[39].mxu1  ;;  %12817 = vmatprep.subr.bf16.mxu1 %v13647_v48  ;;  %v13676_v1 = vld [vmem:[%s21267_s7 + $0x28] sm:$0xff]  }
 0x86a   : > { %v11505_v29 = vadd.f32 %v12669_v9, %v11465_v40  ;;  %v13675_v9 = vld [vmem:[%s21267_s7 + $0x20] sm:$0xff]   ;;  %v13678_v18 = vld [vmem:[%s21267_s7 + $0x38] sm:$0xff]  }
 0x86c   : > { %12818 = vmatpush3.bf16.msra.mxu1 %v13648_v63  ;;  %v13677_v63 = vld [vmem:[%s21267_s7 + $0x30] sm:$0xff]  }
 0x86d   : > { %12819 = vmatprep.subr.bf16.mxu1 %v13649_v45 }
 0x870   : > { %12820 = vmatpush3.bf16.msra.mxu1 %v13650_v53 }
 0x871   : > { %12827 = vmatprep.subr.bf16.mxu1 %v13651_v26 }
 0x873   : > { %11783 = vmatmul.mubr.bf16.vlgmr.msra.gmra.mrb[64].mxu1 %v9773_v23 }
 0x874   : > { %12828 = vmatpush3.bf16.msra.mxu1 %v13652_v59  ;;  %11822 = vmatprep.mubr.bf16.mxu1 %v9776_v50 }
 0x875   : > { %12829 = vmatprep.subr.bf16.mxu1 %v13653_v31 }
 0x878   : > { %12830 = vmatpush3.bf16.msra.mxu1 %v13654_v4 }
 0x879   : > { %12831 = vmatprep.subr.bf16.mxu1 %v13655_v10 }
 0x87c   : > { %12832 = vmatpush3.bf16.msra.mxu1 %v13656_v13 }
 0x87d   : > { %12833 = vmatprep.subr.bf16.mxu1 %v13657_v51 }
 0x880   : > { %12834 = vmatpush3.bf16.msra.mxu1 %v13658_v47 }
 0x881   : > { %12835 = vmatprep.subr.bf16.mxu1 %v13659_v62 }
 0x884   : > { %12836 = vmatpush3.bf16.msra.mxu1 %v13660_v25 }
 0x885   : > { %12837 = vmatprep.subr.bf16.mxu1 %v13661_v54 }
 0x886   : > { %v12689_v52 = vpop.f32.mrb[40].mxu1 }
 0x887   : > { %v12690_v38 = vpop.f32.mrb[41].mxu1 }
 0x888   : > { %v12691_v43 = vadd.f32 %v12690_v38, %v12689_v52  ;;  %v12692_v8 = vpop.f32.mrb[42].mxu1  ;;  %12838 = vmatpush3.bf16.msra.mxu1 %v13662_v16 }
 0x889   : > { %v12693_v46 = vpop.f32.mrb[43].mxu1  ;;  %12839 = vmatprep.subr.bf16.mxu1 %v13663_v42 }
 0x88a   : > { %v11545_v58 = vadd.f32 %v12691_v43, %v11505_v29 }
 0x88c   : > { %12840 = vmatpush3.bf16.msra.mxu1 %v13664_v19 }
 0x88d   : > { %12841 = vmatprep.subr.bf16.mxu1 %v13665_v35 }
 0x890   : > { %12842 = vmatpush3.bf16.msra.mxu1 %v13666_v60 }
 0x891   : > { %13151 = vmatprep.subr.bf16.mxu1 %v21617_v37 }
 0x893   : > { %11823 = vmatmul.mubr.bf16.vlgmr.msra.gmra.mrb[68].mxu1 %v9775_v11  ;;  %v11888_v11 = vld [vmem:[%s21268_s8] sm:$0x1] }
 0x894   : > { %13152 = vmatpush3.bf16.msra.mxu1 %v13667_v34  ;;  %13159 = vmatprep.mubr.msk.bf16.mxu1 %vm13763_vm11, %v21617_v37 }
 0x895   : > { %13153 = vmatprep.subr.bf16.mxu1 %v21617_v37 }
 0x898   : > { %13154 = vmatpush3.bf16.msra.mxu1 %v13668_v55 }
 0x899   : > { %13155 = vmatprep.subr.bf16.mxu1 %v21617_v37 }
 0x89c   : > { %13156 = vmatpush3.bf16.msra.mxu1 %v13669_v15 }
 0x89d   : > { %13157 = vmatprep.subr.bf16.mxu1 %v21617_v37 }
 0x8a0   : > { %13158 = vmatpush3.bf16.msra.mxu1 %v13670_v57 }
 0x8a1   : > { %13163 = vmatprep.subr.bf16.mxu1 %v21617_v37 }
 0x8a3   : > { %13160 = vmatmul.mubr.msk.bf16.vlgmr.msra.gmra.mrb[72].mxu1 %vm9023_vm6, %v9777_v56 }
 0x8a4   : > { %13179 = vmatprep.mubr.msk.bf16.mxu1 %vm13763_vm11, %v21617_v37  ;;  %13164 = vmatpush3.bf16.msra.mxu1 %v13671_v17 }
 0x8a5   : > { %13165 = vmatprep.subr.bf16.mxu1 %v21617_v37 }
 0x8a6   : > { %v12711_v41 = vpop.f32.mrb[44].mxu1 }
 0x8a7   : > { %v12712_v40 = vpop.f32.mrb[45].mxu1 }
 0x8a8   : > { %v12713_v7 = vadd.f32 %v12712_v40, %v12711_v41  ;;  %v12714_v28 = vpop.f32.mrb[46].mxu1  ;;  %13166 = vmatpush3.bf16.msra.mxu1 %v13672_v49 }
 0x8a9   : > { %v12715_v33 = vpop.f32.mrb[47].mxu1  ;;  %13167 = vmatprep.subr.bf16.mxu1 %v21617_v37 }
 0x8aa   : > { %v11585_v39 = vadd.f32 %v12713_v7, %v11545_v58 }
 0x8ac   : > { %13168 = vmatpush3.bf16.msra.mxu1 %v13673_v20 }
 0x8ad   : > { %13169 = vmatprep.subr.bf16.mxu1 %v21617_v37 }
 0x8b0   : > { %13170 = vmatpush3.bf16.msra.mxu1 %v13674_v22 }
 0x8b1   : > { %13171 = vmatprep.subr.bf16.mxu1 %v21617_v37 }
 0x8b4   : > { %13172 = vmatpush3.bf16.msra.mxu1 %v13675_v9 }
 0x8b5   : > { %13173 = vmatprep.subr.bf16.mxu1 %v21617_v37 }
 0x8b8   : > { %13174 = vmatpush3.bf16.msra.mxu1 %v13676_v1 }
 0x8b9   : > { %13175 = vmatprep.subr.bf16.mxu1 %v21617_v37 }
 0x8bc   : > { %13176 = vmatpush3.bf16.msra.mxu1 %v13677_v63 }
 0x8bd   : > { %13177 = vmatprep.subr.bf16.mxu1 %v21617_v37 }
 0x8c0   : > { %13178 = vmatpush3.bf16.msra.mxu1 %v13678_v18 }
 0x8c6   : > { %v12733_v6 = vpop.f32.mrb[48].mxu1 }
 0x8c7   : > { %v12734_v30 = vpop.f32.mrb[49].mxu1 }
 0x8c8   : > { %v12735_v3 = vadd.f32 %v12734_v30, %v12733_v6  ;;  %v12736_v32 = vpop.f32.mrb[50].mxu1 }
 0x8c9   : > { %v12737_v44 = vpop.f32.mrb[51].mxu1 }
 0x8ca   : > { %v11625_v27 = vadd.f32 %v12735_v3, %v11585_v39 }
 0x8e6   : > { %v12755_v36 = vpop.f32.mrb[52].mxu1 }
 0x8e7   : > { %v12756_v24 = vpop.f32.mrb[53].mxu1 }
 0x8e8   : > { %v12757_v5 = vadd.f32 %v12756_v24, %v12755_v36  ;;  %v12758_v21 = vpop.f32.mrb[54].mxu1 }
 0x8e9   : > { %v12759_v48 = vpop.f32.mrb[55].mxu1 }
 0x8ea   : > { %v11665_v61 = vadd.f32 %v12757_v5, %v11625_v27 }
 0x906   : > { %v12777_v45 = vpop.f32.mrb[56].mxu1 }
 0x907   : > { %v12778_v29 = vpop.f32.mrb[57].mxu1 }
 0x908   : > { %v12779_v53 = vadd.f32 %v12778_v29, %v12777_v45  ;;  %v12780_v12 = vpop.f32.mrb[58].mxu1 }
 0x909   : > { %v12781_v26 = vpop.f32.mrb[59].mxu1 }
 0x90a   : > { %v11705_v2 = vadd.f32 %v12779_v53, %v11665_v61 }
 0x926   : > { %v12799_v59 = vpop.f32.mrb[60].mxu1 }
 0x927   : > { %v12800_v23 = vpop.f32.mrb[61].mxu1 }
 0x928   : > { %v12801_v31 = vadd.f32 %v12800_v23, %v12799_v59  ;;  %v12802_v50 = vpop.f32.mrb[62].mxu1 }
 0x929   : > { %v12803_v4 = vpop.f32.mrb[63].mxu1 }
 0x92a   : > { %v11745_v10 = vadd.f32 %v12801_v31, %v11705_v2 }
 0x946   : > { %v12821_v13 = vpop.f32.mrb[64].mxu1 }
 0x947   : > { %v12822_v51 = vpop.f32.mrb[65].mxu1 }
 0x948   : > { %v12823_v47 = vadd.f32 %v12822_v51, %v12821_v13  ;;  %v12824_v62 = vpop.f32.mrb[66].mxu1 }
 0x949   : > { %v12825_v25 = vpop.f32.mrb[67].mxu1 }
 0x94a   : > { %v11785_v54 = vadd.f32 %v12823_v47, %v11745_v10 }
 0x966   : > { %v12843_v16 = vpop.f32.mrb[68].mxu1 }
 0x967   : > { %v12844_v42 = vpop.f32.mrb[69].mxu1 }
 0x968   : > { %v12845_v52 = vadd.f32 %v12844_v42, %v12843_v16  ;;  %v12846_v38 = vpop.f32.mrb[70].mxu1 }
 0x969   : > { %v12847_v43 = vpop.f32.mrb[71].mxu1 }
 0x96a   : > { %v11825_v8 = vadd.f32 %v12845_v52, %v11785_v54 }
 0x976   : > { %v11864_v19 = vpop.f32.mrb[72].mxu1 }
 0x977   : > { %v11865_v46 = vadd.f32 %v11864_v19, %v11825_v8  ;;  %v13161_v35 = vpop.f32.mrb[73].mxu1 }
 0x978   : > { %v11867_v58 = vpop.f32.mrb[74].mxu1 }
 0x979   : > { %v11870_v60 = vmax.f32 %v11865_v46, 0.0  ;;  %v13162_v14 = vpop.f32.mrb[75].mxu1 }
 0x97b   : > { %v11871_v34 = vpack.c.bf16 %v11870_v60, %v11870_v60 }
 0x97d   : > { %13180 = vmatmul.mubr.bf16.vlgmr.msra.gmra.mrb[76].mxu1 %v11871_v34 }
 0xa50   : > { %v11971_v37 = vpop.f32.mrb[76].mxu1 }
 0xa51   : > { %v11972_v55 = vadd.f32 %v11971_v37, %v11888_v11  ;;  %v13181_v15 = vpop.f32.mrb[77].mxu1 }
 0xa52   : > { %v11974_v57 = vpop.f32.mrb[78].mxu1 }
 0xa53   : > { %11977 = vst [vmem:[%s324_s27] sm:$0x1] %v11972_v55  ;;  %v13182_v0 = vpop.f32.mrb[79].mxu1 }
 0xa54   : > { %13708 = shalt.err (!%p13705_p3)
}
 0xa55   : > { %s13709_s22 = scalar_lea.hbm %s21218_s29, 16  ;;  %s13713_s27 = scalar_lea.hbm %s21269_s9, 32 }
 0xa56   : > { %p13710_p4 = scmp.ne.s32.totalorder %s21218_s29, %s13709_s22  ;;  %p13714_p9 = scmp.lt.u32.totalorder %s21218_s29, %s21269_s9 }
 0xa57   : > { %p13715_p10 = scmp.lt.u32.totalorder %s13713_s27, %s13709_s22  ;;  %p13717_p12 = scmp.lt.u32.totalorder %s13709_s22, %s21218_s29 }
 0xa58   : > { %p13711_p7 = pnand %p13710_p4, %p13853_p5 }
 0xa59   : > { %p13716_p11 = por %p13715_p10, %p13714_p9 }
 0xa5a   : > { %p13712_p8 = pneg %p13711_p7 }
 0xa5b   : > { %p13718_p13 = por %p13717_p12, %p13716_p11 }
 0xa5d   : > { %p13719_p0 = pnand %p13718_p13, %p13712_p8 }
 0xa5f   : > { %13722 = shalt.err (!%p13719_p0)
}
 0xa60   : > { %13411 = dma.vmem_to_hbm [thread:$0]  (%p13853_p5), %s21220_s25, 16, %s21218_s29, %s11979_s16  }
 0xa61 PF: > { %p13417_p1 = scmp.ge.s32.totalorder %s13757_s12, 2  ;;  %s12003_s13 = sand.u32 1, %s13745_s30  }
 0xa62   : > { %s12004_s17 = scalar_lea.sflag [#allocation7], %s12003_s13 }
 0xa63   : > { %p13414_p2 = pnand %p13417_p1, %p13857_p6 }
 0xa65   : > { %13740 = dma.done.wait (!%p13414_p2), %s12004_s17, 16  }
 0xa66   : > { %13742 = vsyncadd (!%p13414_p2), %s12004_s17, 4294967280  ;;  %p19_p3 = scmp.ge.s32.totalorder %s13840_s15, 4   ;;  %s21618_s30 = smov %s13749_s10 }
 0xa67   : > { %s21619_s10 = smov %s13753_s11  ;;  %s21620_s11 = smov %s13851_s18 }
 0xa68   : > { %s21621_s12 = smov %s13840_s15  ;;  %21 = sbr.rel (!%p19_p3) target bundleno = 3 (0x3), region = 237 }
 0xa6f   :  { %12008 = vsyncpa [#allocation7], 1 }
 0xa70   :  { %12010 = vsyncpa [#allocation7 + $0x1], 1 }

</bundles_post_ra>
